<compile_context>
chip_gen: v7x
topology: tpu7x:2x2x1
jax: 0.10.0
libtpu: 0.0.40
codegen_flags: <defaults>
</compile_context>

<pallas_src>
import functools

import jax
import jax.numpy as jnp
from jax.experimental import pallas as pl
from jax.experimental.pallas import tpu as pltpu


# ------------------------------------------------------------ GATv2 block ---
def _gatv2_attn(ep, xl, xr, att, mask_bias, *, H, C, concat):
    """Dense GATv2 attention on VMEM-resident values.

    ep        : [N, N, H*C]  edge-attr projection (self-loops included)
    xl, xr    : [N, H*C]     source / target node projections (bias included)
    att       : [1, H*C]     attention vector, head-major
    mask_bias : [N, N]       0 where edge exists, -1e30 otherwise
    """
    N = xl.shape[0]
    s = ep + xl[None, :, :] + xr[:, None, :]            # [N, N, H*C]
    s = jnp.maximum(s, 0.2 * s)                          # leaky_relu(0.2)

    outs = []
    for head in range(H):                                # static unroll (H=4 / H=1)
        sl = slice(head * C, (head + 1) * C)
        logits = jnp.sum(s[:, :, sl] * att[:, sl].reshape(1, 1, C), axis=-1)
        logits = logits + mask_bias                      # additive mask: non-edges -> -1e30
        m = jnp.max(logits, axis=-1, keepdims=True)
        p = jnp.exp(logits - m)                          # masked entries underflow to 0
        denom = jnp.sum(p, axis=-1, keepdims=True)       # self-loops ensure denom >= 1
        alpha = p * pl.reciprocal(denom)                 # softmax over source nodes j
        outs.append(jnp.dot(alpha, xl[:, sl], preferred_element_type=jnp.float32))

    if concat:
        return outs[0] if H == 1 else jnp.concatenate(outs, axis=-1)   # [N, H*C]
    out = outs[0]
    for o in outs[1:]:
        out = out + o
    return out * (1.0 / H) if H > 1 else out                            # head mean


# --------------------------------------------------------- fused forward ----
def _fused_forward_kernel(
    x_ref, maskb_ref, ea_ref,
    w_in_ref, b_in_ref, we_ref,
    g1_w_ref, g1_b_ref, g1_att_ref, bn1_s_ref, bn1_t_ref,
    g2_w_ref, g2_b_ref, g2_att_ref, bn2_s_ref, bn2_t_ref,
    w_out_ref, b_out_ref,
    o_ref,
    *, h1, c1, h2, c2,
):
    N = x_ref.shape[0]
    hc1, hc2 = h1 * c1, h2 * c2
    maskb = maskb_ref[...]

    # Edge-attr projections for BOTH layers in one MXU pass over the big tensor.
    ep_all = jnp.dot(ea_ref[...], we_ref[...], preferred_element_type=jnp.float32)
    ep1 = ep_all[:, :hc1].reshape(N, N, hc1)
    ep2 = ep_all[:, hc1:].reshape(N, N, hc2)

    # lin_in + ReLU (dropout p=0.3 is identity in eval mode)
    h = jnp.dot(x_ref[...], w_in_ref[...], preferred_element_type=jnp.float32) + b_in_ref[...]
    h = jnp.maximum(h, 0.0)

    # ---- block 1: GATv2(h1 heads, concat) + residual + folded BN + ReLU ----
    p1 = jnp.dot(h, g1_w_ref[...], preferred_element_type=jnp.float32) + g1_b_ref[...]
    xl1, xr1, r1 = p1[:, :hc1], p1[:, hc1:2 * hc1], p1[:, 2 * hc1:]
    a1 = _gatv2_attn(ep1, xl1, xr1, g1_att_ref[...], maskb, H=h1, C=c1, concat=True)
    h = jnp.maximum((a1 + r1) * bn1_s_ref[...] + bn1_t_ref[...], 0.0)

    # ---- block 2: GATv2(h2 heads, mean) + residual + folded BN + ReLU ----
    p2 = jnp.dot(h, g2_w_ref[...], preferred_element_type=jnp.float32) + g2_b_ref[...]
    xl2, xr2, r2 = p2[:, :hc2], p2[:, hc2:2 * hc2], p2[:, 2 * hc2:]
    a2 = _gatv2_attn(ep2, xl2, xr2, g2_att_ref[...], maskb, H=h2, C=c2, concat=False)
    h = jnp.maximum((a2 + r2) * bn2_s_ref[...] + bn2_t_ref[...], 0.0)

    # lin_out (fused; the [N, out_ch] store is the only narrow output)
    o_ref[...] = (jnp.dot(h, w_out_ref[...], preferred_element_type=jnp.float32)
                  + b_out_ref[...]).astype(o_ref.dtype)


def gat_improved_forward(x, mask, dense_ea, params, *, heads=4, hidden=32):
    """Single fused pallas_call: all weights & activations stay VMEM-resident."""
    N = x.shape[0]
    E = dense_ea.shape[-1]
    out_ch = params["out_w"].shape[1]
    f32 = jnp.float32
    row = lambda v: jnp.asarray(v, f32).reshape(1, -1)

    def fold_bn(bn, extra_bias):  # eval-mode BN + (gat bias) -> single scale/shift FMA
        scale = jnp.asarray(bn["gamma"], f32) * jax.lax.rsqrt(jnp.asarray(bn["var"], f32) + 1e-5)
        shift = (jnp.asarray(bn["beta"], f32)
                 + (jnp.asarray(extra_bias, f32) - jnp.asarray(bn["mean"], f32)) * scale)
        return row(scale), row(shift)

    g1, g2 = params["gat1"], params["gat2"]
    # merged node-side projections: one matmul per block, [wl | wr | res_w]
    g1_w = jnp.concatenate([jnp.asarray(g1["wl"], f32), jnp.asarray(g1["wr"], f32),
                            jnp.asarray(params["res1_w"], f32)], axis=1)
    g1_b = row(jnp.concatenate([g1["bl"], g1["br"], params["res1_b"]], axis=0))
    g2_w = jnp.concatenate([jnp.asarray(g2["wl"], f32), jnp.asarray(g2["wr"], f32),
                            jnp.asarray(params["res2_w"], f32)], axis=1)
    g2_b = row(jnp.concatenate([g2["bl"], g2["br"], params["res2_b"]], axis=0))
    # both layers' edge projections share one matmul over the big [N*N, E] tensor
    we_cat = jnp.concatenate([jnp.asarray(g1["we"], f32), jnp.asarray(g2["we"], f32)], axis=1)
    bn1_s, bn1_t = fold_bn(params["bn1"], g1["bias"])
    bn2_s, bn2_t = fold_bn(params["bn2"], g2["bias"])
    # additive mask: 0 on edges, -1e30 elsewhere (single add instead of cmp+select)
    mask_bias = (jnp.asarray(mask, f32) - 1.0) * 1e30

    args = [jnp.asarray(x, f32), mask_bias,
            jnp.asarray(dense_ea, f32).reshape(N * N, E),
            jnp.asarray(params["lin_in_w"], f32), row(params["lin_in_b"]),
            we_cat,
            g1_w, g1_b, row(jnp.asarray(g1["att"], f32).reshape(-1)), bn1_s, bn1_t,
            g2_w, g2_b, row(jnp.asarray(g2["att"], f32).reshape(-1)), bn2_s, bn2_t,
            jnp.asarray(params["out_w"], f32), row(params["out_b"])]

    vmem = pl.BlockSpec(memory_space=pltpu.MemorySpace.VMEM)
    kernel = functools.partial(_fused_forward_kernel,
                               h1=heads, c1=hidden, h2=1, c2=hidden)
    # TODO(synk): for large N, tile the N x N attention with an online-softmax
    # loop over the source axis sized to per-chip scoped VMEM instead of
    # keeping the whole dense graph resident.
    return pl.pallas_call(
        kernel,
        out_shape=jax.ShapeDtypeStruct((N, out_ch), f32),
        in_specs=[vmem] * len(args),
        out_specs=vmem,
    )(*args)


# ------------------------------------------------------------- graph glue ---
def densify_graph(edge_index, edge_attr, num_nodes):
    """Dense mask + edge-attr with GATv2 self-loops (fill_value='mean')."""
    src, dst = edge_index[0], edge_index[1]
    N, E_dim = num_nodes, edge_attr.shape[-1]
    mask = jnp.zeros((N, N), jnp.float32).at[dst, src].set(1.0)
    dea = jnp.zeros((N, N, E_dim), jnp.float32).at[dst, src].set(edge_attr)
    deg = mask.sum(axis=1, keepdims=True)                       # incoming degree
    loop_attr = dea.sum(axis=1) / jnp.maximum(deg, 1.0)         # mean of incoming
    idx = jnp.arange(N)
    mask = mask.at[idx, idx].set(1.0)
    dea = dea.at[idx, idx].set(loop_attr)
    return mask, dea


# ----------------------------------------------------------- pure-JAX ref ---
def _ref_gat(x, mask, dea, p, H, C, concat):
    N = x.shape[0]
    xl = (x @ p["wl"] + p["bl"]).reshape(N, H, C)
    xr = (x @ p["wr"] + p["br"]).reshape(N, H, C)
    ep = (dea.reshape(N * N, -1) @ p["we"]).reshape(N, N, H, C)
    s = ep + xl[None, :, :, :] + xr[:, None, :, :]
    s = jnp.where(s > 0, s, 0.2 * s)
    logits = jnp.einsum("ijhc,hc->ijh", s, p["att"])
    logits = jnp.where(mask[:, :, None] > 0, logits, -1e30)
    m = logits.max(axis=1, keepdims=True)
    pe = jnp.exp(logits - m) * mask[:, :, None]
    alpha = pe / pe.sum(axis=1, keepdims=True)
    out = jnp.einsum("ijh,jhc->ihc", alpha, xl)
    out = out.reshape(N, H * C) if concat else out.mean(axis=1)
    return out + p["bias"]


def _ref_forward(x, mask, dea, P):
    lin = lambda x, w, b: x @ w + b
    bn = lambda x, s: (x - s["mean"]) * jax.lax.rsqrt(s["var"] + 1e-5) * s["gamma"] + s["beta"]
    h = jnp.maximum(lin(x, P["lin_in_w"], P["lin_in_b"]), 0.0)
    x1 = _ref_gat(h, mask, dea, P["gat1"], 4, 32, True)
    h = jnp.maximum(bn(x1 + lin(h, P["res1_w"], P["res1_b"]), P["bn1"]), 0.0)
    x2 = _ref_gat(h, mask, dea, P["gat2"], 1, 32, False)
    h = jnp.maximum(bn(x2 + lin(h, P["res2_w"], P["res2_b"]), P["bn2"]), 0.0)
    return lin(h, P["out_w"], P["out_b"])


# --------------------------------------------------------------- main -------
if __name__ == "__main__":
    N, IN_CH, EDGE_DIM, HID, HEADS, OUT_CH = 16, 8, 4, 32, 4, 1

    key = jax.random.PRNGKey(0)
    keys = iter(jax.random.split(key, 64))

    def glorot(shape):
        lim = (6.0 / (shape[0] + shape[1])) ** 0.5
        return jax.random.uniform(next(keys), shape, jnp.float32, -lim, lim)

    def bvec(F):  # small non-zero biases so the host-side folding is exercised
        return 0.05 * jax.random.normal(next(keys), (F,), jnp.float32)

    def bn_params(F):  # BatchNorm1d in eval mode with non-trivial running stats
        return {"gamma": jax.random.uniform(next(keys), (F,), jnp.float32, 0.5, 1.5),
                "beta": 0.1 * jax.random.normal(next(keys), (F,), jnp.float32),
                "mean": 0.1 * jax.random.normal(next(keys), (F,), jnp.float32),
                "var": jax.random.uniform(next(keys), (F,), jnp.float32, 0.5, 1.5)}

    def gat_params(in_ch, out_ch, heads):
        hc = heads * out_ch
        return {"wl": glorot((in_ch, hc)), "bl": bvec(hc),
                "wr": glorot((in_ch, hc)), "br": bvec(hc),
                "we": glorot((EDGE_DIM, hc)),
                "att": glorot((heads, out_ch)),
                "bias": bvec(hc if heads > 1 else out_ch)}

    params = {
        "lin_in_w": glorot((IN_CH, HID)), "lin_in_b": bvec(HID),
        "gat1": gat_params(HID, HID, HEADS),
        "res1_w": glorot((HID, HID * HEADS)), "res1_b": bvec(HID * HEADS),
        "bn1": bn_params(HID * HEADS),
        "gat2": gat_params(HID * HEADS, HID, 1),
        "res2_w": glorot((HID * HEADS, HID)), "res2_b": bvec(HID),
        "bn2": bn_params(HID),
        "out_w": glorot((HID, OUT_CH)), "out_b": bvec(OUT_CH),
    }

    # deterministic small graph: ring edges i->i+1 plus chords i->i+3 (no self loops)
    ar = jnp.arange(N)
    edge_index = jnp.stack([jnp.concatenate([ar, ar]),
                            jnp.concatenate([(ar + 1) % N, (ar + 3) % N])])       # [2, 32]
    edge_attr = jax.random.normal(next(keys), (edge_index.shape[1], EDGE_DIM), jnp.float32)
    x = jax.random.normal(next(keys), (N, IN_CH), jnp.float32)

    mask, dense_ea = densify_graph(edge_index, edge_attr, N)

    out = gat_improved_forward(x, mask, dense_ea, params, heads=HEADS, hidden=HID)
    out = jax.block_until_ready(out)
    assert out.shape == (N, OUT_CH)

    ref = _ref_forward(x, mask, dense_ea, params)
    assert jnp.allclose(out, ref, rtol=1e-4, atol=1e-4), (out, ref)

    # TODO(synk): dropout (p=0.3) and the BatchNorm batch-statistics branch only
    # apply in training mode; this implements the eval-mode forward pass.
    print("KERNEL_OK")
</pallas_src>

<mosaic_0001>
module attributes {stable_mosaic.version = 11 : i64} {
  func.func @_fused_forward_kernel(%arg0: memref<16x8xf32, #tpu.memory_space<vmem>>, %arg1: memref<16x16xf32, #tpu.memory_space<vmem>>, %arg2: memref<256x4xf32, #tpu.memory_space<vmem>>, %arg3: memref<8x32xf32, #tpu.memory_space<vmem>>, %arg4: memref<1x32xf32, #tpu.memory_space<vmem>>, %arg5: memref<4x160xf32, #tpu.memory_space<vmem>>, %arg6: memref<32x384xf32, #tpu.memory_space<vmem>>, %arg7: memref<1x384xf32, #tpu.memory_space<vmem>>, %arg8: memref<1x128xf32, #tpu.memory_space<vmem>>, %arg9: memref<1x128xf32, #tpu.memory_space<vmem>>, %arg10: memref<1x128xf32, #tpu.memory_space<vmem>>, %arg11: memref<128x96xf32, #tpu.memory_space<vmem>>, %arg12: memref<1x96xf32, #tpu.memory_space<vmem>>, %arg13: memref<1x32xf32, #tpu.memory_space<vmem>>, %arg14: memref<1x32xf32, #tpu.memory_space<vmem>>, %arg15: memref<1x32xf32, #tpu.memory_space<vmem>>, %arg16: memref<32x1xf32, #tpu.memory_space<vmem>>, %arg17: memref<1x1xf32, #tpu.memory_space<vmem>>, %arg18: memref<16x1xf32, #tpu.memory_space<vmem>>) attributes {dimension_semantics = [], scalar_prefetch = 0 : i64, scratch_operands = 0 : i64, tpu.core_type = #tpu.core_type<tc>} {
    %c0 = arith.constant 0 : index
    %c0_0 = arith.constant 0 : index
    %0 = vector.load %arg1[%c0, %c0_0] : memref<16x16xf32, #tpu.memory_space<vmem>>, vector<16x16xf32>
    %c0_1 = arith.constant 0 : index
    %c0_2 = arith.constant 0 : index
    %1 = vector.load %arg2[%c0_1, %c0_2] : memref<256x4xf32, #tpu.memory_space<vmem>>, vector<256x4xf32>
    %c0_3 = arith.constant 0 : index
    %c0_4 = arith.constant 0 : index
    %2 = vector.load %arg5[%c0_3, %c0_4] : memref<4x160xf32, #tpu.memory_space<vmem>>, vector<4x160xf32>
    %cst = arith.constant dense<0.000000e+00> : vector<256x160xf32>
    %3 = tpu.matmul %1, %2, %cst {dimension_numbers = #tpu.dot_dimension_numbers<[1], [0], [0], [1], [0, 0, 1, 1], [], []>} : vector<256x4xf32>, vector<4x160xf32>, vector<256x160xf32> -> vector<256x160xf32>
    %4 = vector.extract_strided_slice %3 {offsets = [0, 0], sizes = [256, 128], strides = [1, 1]} : vector<256x160xf32> to vector<256x128xf32>
    %5 = vector.shape_cast %4 : vector<256x128xf32> to vector<16x16x128xf32>
    %6 = vector.extract_strided_slice %3 {offsets = [0, 128], sizes = [256, 32], strides = [1, 1]} : vector<256x160xf32> to vector<256x32xf32>
    %7 = vector.shape_cast %6 : vector<256x32xf32> to vector<16x16x32xf32>
    %c0_5 = arith.constant 0 : index
    %c0_6 = arith.constant 0 : index
    %8 = vector.load %arg0[%c0_5, %c0_6] : memref<16x8xf32, #tpu.memory_space<vmem>>, vector<16x8xf32>
    %c0_7 = arith.constant 0 : index
    %c0_8 = arith.constant 0 : index
    %9 = vector.load %arg3[%c0_7, %c0_8] : memref<8x32xf32, #tpu.memory_space<vmem>>, vector<8x32xf32>
    %cst_9 = arith.constant dense<0.000000e+00> : vector<16x32xf32>
    %10 = tpu.matmul %8, %9, %cst_9 {dimension_numbers = #tpu.dot_dimension_numbers<[1], [0], [0], [1], [0, 0, 1, 1], [], []>} : vector<16x8xf32>, vector<8x32xf32>, vector<16x32xf32> -> vector<16x32xf32>
    %c0_10 = arith.constant 0 : index
    %c0_11 = arith.constant 0 : index
    %11 = vector.load %arg4[%c0_10, %c0_11] : memref<1x32xf32, #tpu.memory_space<vmem>>, vector<1x32xf32>
    %12 = vector.broadcast %11 : vector<1x32xf32> to vector<16x32xf32>
    %13 = arith.addf %10, %12 : vector<16x32xf32>
    %cst_12 = arith.constant 0.000000e+00 : f32
    %14 = vector.broadcast %cst_12 : f32 to vector<16x32xf32>
    %15 = arith.maximumf %13, %14 : vector<16x32xf32>
    %c0_13 = arith.constant 0 : index
    %c0_14 = arith.constant 0 : index
    %16 = vector.load %arg6[%c0_13, %c0_14] : memref<32x384xf32, #tpu.memory_space<vmem>>, vector<32x384xf32>
    %cst_15 = arith.constant dense<0.000000e+00> : vector<16x384xf32>
    %17 = tpu.matmul %15, %16, %cst_15 {dimension_numbers = #tpu.dot_dimension_numbers<[1], [0], [0], [1], [0, 0, 1, 1], [], []>} : vector<16x32xf32>, vector<32x384xf32>, vector<16x384xf32> -> vector<16x384xf32>
    %c0_16 = arith.constant 0 : index
    %c0_17 = arith.constant 0 : index
    %18 = vector.load %arg7[%c0_16, %c0_17] : memref<1x384xf32, #tpu.memory_space<vmem>>, vector<1x384xf32>
    %19 = vector.broadcast %18 : vector<1x384xf32> to vector<16x384xf32>
    %20 = arith.addf %17, %19 : vector<16x384xf32>
    %21 = vector.extract_strided_slice %20 {offsets = [0, 0], sizes = [16, 128], strides = [1, 1]} : vector<16x384xf32> to vector<16x128xf32>
    %22 = vector.extract_strided_slice %20 {offsets = [0, 128], sizes = [16, 128], strides = [1, 1]} : vector<16x384xf32> to vector<16x128xf32>
    %23 = vector.extract_strided_slice %20 {offsets = [0, 256], sizes = [16, 128], strides = [1, 1]} : vector<16x384xf32> to vector<16x128xf32>
    %c0_18 = arith.constant 0 : index
    %c0_19 = arith.constant 0 : index
    %24 = vector.load %arg8[%c0_18, %c0_19] : memref<1x128xf32, #tpu.memory_space<vmem>>, vector<1x128xf32>
    %25 = vector.shape_cast %21 : vector<16x128xf32> to vector<1x16x128xf32>
    %26 = vector.broadcast %25 : vector<1x16x128xf32> to vector<16x16x128xf32>
    %27 = arith.addf %5, %26 : vector<16x16x128xf32>
    %28 = vector.shape_cast %22 : vector<16x128xf32> to vector<16x1x128xf32>
    %29 = vector.broadcast %28 : vector<16x1x128xf32> to vector<16x16x128xf32>
    %30 = arith.addf %27, %29 : vector<16x16x128xf32>
    %cst_20 = arith.constant 2.000000e-01 : f32
    %31 = vector.broadcast %cst_20 : f32 to vector<16x16x128xf32>
    %32 = arith.mulf %31, %30 : vector<16x16x128xf32>
    %33 = arith.maximumf %30, %32 : vector<16x16x128xf32>
    %34 = vector.extract_strided_slice %33 {offsets = [0, 0, 0], sizes = [16, 16, 32], strides = [1, 1, 1]} : vector<16x16x128xf32> to vector<16x16x32xf32>
    %35 = vector.extract_strided_slice %24 {offsets = [0, 0], sizes = [1, 32], strides = [1, 1]} : vector<1x128xf32> to vector<1x32xf32>
    %36 = vector.shape_cast %35 : vector<1x32xf32> to vector<1x1x32xf32>
    %37 = vector.broadcast %36 : vector<1x1x32xf32> to vector<16x16x32xf32>
    %38 = arith.mulf %34, %37 : vector<16x16x32xf32>
    %cst_21 = arith.constant dense<0.000000e+00> : vector<16x16xf32>
    %39 = vector.multi_reduction <add>, %38, %cst_21 [2] : vector<16x16x32xf32> to vector<16x16xf32>
    %40 = arith.addf %39, %0 : vector<16x16xf32>
    %cst_22 = arith.constant dense<0xFF800000> : vector<16xf32>
    %41 = vector.multi_reduction <maximumf>, %40, %cst_22 [1] : vector<16x16xf32> to vector<16xf32>
    %42 = vector.shape_cast %41 : vector<16xf32> to vector<16x1xf32>
    %43 = vector.broadcast %42 : vector<16x1xf32> to vector<16x16xf32>
    %44 = arith.subf %40, %43 : vector<16x16xf32>
    %45 = math.exp %44 : vector<16x16xf32>
    %cst_23 = arith.constant dense<0.000000e+00> : vector<16xf32>
    %46 = vector.multi_reduction <add>, %45, %cst_23 [1] : vector<16x16xf32> to vector<16xf32>
    %47 = vector.shape_cast %46 : vector<16xf32> to vector<16x1xf32>
    %48 = tpu.reciprocal %47 : vector<16x1xf32> -> vector<16x1xf32>
    %49 = vector.broadcast %48 : vector<16x1xf32> to vector<16x16xf32>
    %50 = arith.mulf %45, %49 : vector<16x16xf32>
    %51 = vector.extract_strided_slice %21 {offsets = [0, 0], sizes = [16, 32], strides = [1, 1]} : vector<16x128xf32> to vector<16x32xf32>
    %cst_24 = arith.constant dense<0.000000e+00> : vector<16x32xf32>
    %52 = tpu.matmul %50, %51, %cst_24 {dimension_numbers = #tpu.dot_dimension_numbers<[1], [0], [0], [1], [0, 0, 1, 1], [], []>} : vector<16x16xf32>, vector<16x32xf32>, vector<16x32xf32> -> vector<16x32xf32>
    %53 = vector.extract_strided_slice %33 {offsets = [0, 0, 32], sizes = [16, 16, 32], strides = [1, 1, 1]} : vector<16x16x128xf32> to vector<16x16x32xf32>
    %54 = vector.extract_strided_slice %24 {offsets = [0, 32], sizes = [1, 32], strides = [1, 1]} : vector<1x128xf32> to vector<1x32xf32>
    %55 = vector.shape_cast %54 : vector<1x32xf32> to vector<1x1x32xf32>
    %56 = vector.broadcast %55 : vector<1x1x32xf32> to vector<16x16x32xf32>
    %57 = arith.mulf %53, %56 : vector<16x16x32xf32>
    %cst_25 = arith.constant dense<0.000000e+00> : vector<16x16xf32>
    %58 = vector.multi_reduction <add>, %57, %cst_25 [2] : vector<16x16x32xf32> to vector<16x16xf32>
    %59 = arith.addf %58, %0 : vector<16x16xf32>
    %cst_26 = arith.constant dense<0xFF800000> : vector<16xf32>
    %60 = vector.multi_reduction <maximumf>, %59, %cst_26 [1] : vector<16x16xf32> to vector<16xf32>
    %61 = vector.shape_cast %60 : vector<16xf32> to vector<16x1xf32>
    %62 = vector.broadcast %61 : vector<16x1xf32> to vector<16x16xf32>
    %63 = arith.subf %59, %62 : vector<16x16xf32>
    %64 = math.exp %63 : vector<16x16xf32>
    %cst_27 = arith.constant dense<0.000000e+00> : vector<16xf32>
    %65 = vector.multi_reduction <add>, %64, %cst_27 [1] : vector<16x16xf32> to vector<16xf32>
    %66 = vector.shape_cast %65 : vector<16xf32> to vector<16x1xf32>
    %67 = tpu.reciprocal %66 : vector<16x1xf32> -> vector<16x1xf32>
    %68 = vector.broadcast %67 : vector<16x1xf32> to vector<16x16xf32>
    %69 = arith.mulf %64, %68 : vector<16x16xf32>
    %70 = vector.extract_strided_slice %21 {offsets = [0, 32], sizes = [16, 32], strides = [1, 1]} : vector<16x128xf32> to vector<16x32xf32>
    %cst_28 = arith.constant dense<0.000000e+00> : vector<16x32xf32>
    %71 = tpu.matmul %69, %70, %cst_28 {dimension_numbers = #tpu.dot_dimension_numbers<[1], [0], [0], [1], [0, 0, 1, 1], [], []>} : vector<16x16xf32>, vector<16x32xf32>, vector<16x32xf32> -> vector<16x32xf32>
    %72 = vector.extract_strided_slice %33 {offsets = [0, 0, 64], sizes = [16, 16, 32], strides = [1, 1, 1]} : vector<16x16x128xf32> to vector<16x16x32xf32>
    %73 = vector.extract_strided_slice %24 {offsets = [0, 64], sizes = [1, 32], strides = [1, 1]} : vector<1x128xf32> to vector<1x32xf32>
    %74 = vector.shape_cast %73 : vector<1x32xf32> to vector<1x1x32xf32>
    %75 = vector.broadcast %74 : vector<1x1x32xf32> to vector<16x16x32xf32>
    %76 = arith.mulf %72, %75 : vector<16x16x32xf32>
    %cst_29 = arith.constant dense<0.000000e+00> : vector<16x16xf32>
    %77 = vector.multi_reduction <add>, %76, %cst_29 [2] : vector<16x16x32xf32> to vector<16x16xf32>
    %78 = arith.addf %77, %0 : vector<16x16xf32>
    %cst_30 = arith.constant dense<0xFF800000> : vector<16xf32>
    %79 = vector.multi_reduction <maximumf>, %78, %cst_30 [1] : vector<16x16xf32> to vector<16xf32>
    %80 = vector.shape_cast %79 : vector<16xf32> to vector<16x1xf32>
    %81 = vector.broadcast %80 : vector<16x1xf32> to vector<16x16xf32>
    %82 = arith.subf %78, %81 : vector<16x16xf32>
    %83 = math.exp %82 : vector<16x16xf32>
    %cst_31 = arith.constant dense<0.000000e+00> : vector<16xf32>
    %84 = vector.multi_reduction <add>, %83, %cst_31 [1] : vector<16x16xf32> to vector<16xf32>
    %85 = vector.shape_cast %84 : vector<16xf32> to vector<16x1xf32>
    %86 = tpu.reciprocal %85 : vector<16x1xf32> -> vector<16x1xf32>
    %87 = vector.broadcast %86 : vector<16x1xf32> to vector<16x16xf32>
    %88 = arith.mulf %83, %87 : vector<16x16xf32>
    %89 = vector.extract_strided_slice %21 {offsets = [0, 64], sizes = [16, 32], strides = [1, 1]} : vector<16x128xf32> to vector<16x32xf32>
    %cst_32 = arith.constant dense<0.000000e+00> : vector<16x32xf32>
    %90 = tpu.matmul %88, %89, %cst_32 {dimension_numbers = #tpu.dot_dimension_numbers<[1], [0], [0], [1], [0, 0, 1, 1], [], []>} : vector<16x16xf32>, vector<16x32xf32>, vector<16x32xf32> -> vector<16x32xf32>
    %91 = vector.extract_strided_slice %33 {offsets = [0, 0, 96], sizes = [16, 16, 32], strides = [1, 1, 1]} : vector<16x16x128xf32> to vector<16x16x32xf32>
    %92 = vector.extract_strided_slice %24 {offsets = [0, 96], sizes = [1, 32], strides = [1, 1]} : vector<1x128xf32> to vector<1x32xf32>
    %93 = vector.shape_cast %92 : vector<1x32xf32> to vector<1x1x32xf32>
    %94 = vector.broadcast %93 : vector<1x1x32xf32> to vector<16x16x32xf32>
    %95 = arith.mulf %91, %94 : vector<16x16x32xf32>
    %cst_33 = arith.constant dense<0.000000e+00> : vector<16x16xf32>
    %96 = vector.multi_reduction <add>, %95, %cst_33 [2] : vector<16x16x32xf32> to vector<16x16xf32>
    %97 = arith.addf %96, %0 : vector<16x16xf32>
    %cst_34 = arith.constant dense<0xFF800000> : vector<16xf32>
    %98 = vector.multi_reduction <maximumf>, %97, %cst_34 [1] : vector<16x16xf32> to vector<16xf32>
    %99 = vector.shape_cast %98 : vector<16xf32> to vector<16x1xf32>
    %100 = vector.broadcast %99 : vector<16x1xf32> to vector<16x16xf32>
    %101 = arith.subf %97, %100 : vector<16x16xf32>
    %102 = math.exp %101 : vector<16x16xf32>
    %cst_35 = arith.constant dense<0.000000e+00> : vector<16xf32>
    %103 = vector.multi_reduction <add>, %102, %cst_35 [1] : vector<16x16xf32> to vector<16xf32>
    %104 = vector.shape_cast %103 : vector<16xf32> to vector<16x1xf32>
    %105 = tpu.reciprocal %104 : vector<16x1xf32> -> vector<16x1xf32>
    %106 = vector.broadcast %105 : vector<16x1xf32> to vector<16x16xf32>
    %107 = arith.mulf %102, %106 : vector<16x16xf32>
    %108 = vector.extract_strided_slice %21 {offsets = [0, 96], sizes = [16, 32], strides = [1, 1]} : vector<16x128xf32> to vector<16x32xf32>
    %cst_36 = arith.constant dense<0.000000e+00> : vector<16x32xf32>
    %109 = tpu.matmul %107, %108, %cst_36 {dimension_numbers = #tpu.dot_dimension_numbers<[1], [0], [0], [1], [0, 0, 1, 1], [], []>} : vector<16x16xf32>, vector<16x32xf32>, vector<16x32xf32> -> vector<16x32xf32>
    %110 = tpu.concatenate %52, %71, %90, %109 in 1 : vector<16x32xf32>, vector<16x32xf32>, vector<16x32xf32>, vector<16x32xf32> -> vector<16x128xf32>
    %111 = arith.addf %110, %23 : vector<16x128xf32>
    %c0_37 = arith.constant 0 : index
    %c0_38 = arith.constant 0 : index
    %112 = vector.load %arg9[%c0_37, %c0_38] : memref<1x128xf32, #tpu.memory_space<vmem>>, vector<1x128xf32>
    %113 = vector.broadcast %112 : vector<1x128xf32> to vector<16x128xf32>
    %114 = arith.mulf %111, %113 : vector<16x128xf32>
    %c0_39 = arith.constant 0 : index
    %c0_40 = arith.constant 0 : index
    %115 = vector.load %arg10[%c0_39, %c0_40] : memref<1x128xf32, #tpu.memory_space<vmem>>, vector<1x128xf32>
    %116 = vector.broadcast %115 : vector<1x128xf32> to vector<16x128xf32>
    %117 = arith.addf %114, %116 : vector<16x128xf32>
    %cst_41 = arith.constant 0.000000e+00 : f32
    %118 = vector.broadcast %cst_41 : f32 to vector<16x128xf32>
    %119 = arith.maximumf %117, %118 : vector<16x128xf32>
    %c0_42 = arith.constant 0 : index
    %c0_43 = arith.constant 0 : index
    %120 = vector.load %arg11[%c0_42, %c0_43] : memref<128x96xf32, #tpu.memory_space<vmem>>, vector<128x96xf32>
    %cst_44 = arith.constant dense<0.000000e+00> : vector<16x96xf32>
    %121 = tpu.matmul %119, %120, %cst_44 {dimension_numbers = #tpu.dot_dimension_numbers<[1], [0], [0], [1], [0, 0, 1, 1], [], []>} : vector<16x128xf32>, vector<128x96xf32>, vector<16x96xf32> -> vector<16x96xf32>
    %c0_45 = arith.constant 0 : index
    %c0_46 = arith.constant 0 : index
    %122 = vector.load %arg12[%c0_45, %c0_46] : memref<1x96xf32, #tpu.memory_space<vmem>>, vector<1x96xf32>
    %123 = vector.broadcast %122 : vector<1x96xf32> to vector<16x96xf32>
    %124 = arith.addf %121, %123 : vector<16x96xf32>
    %125 = vector.extract_strided_slice %124 {offsets = [0, 0], sizes = [16, 32], strides = [1, 1]} : vector<16x96xf32> to vector<16x32xf32>
    %126 = vector.extract_strided_slice %124 {offsets = [0, 32], sizes = [16, 32], strides = [1, 1]} : vector<16x96xf32> to vector<16x32xf32>
    %127 = vector.extract_strided_slice %124 {offsets = [0, 64], sizes = [16, 32], strides = [1, 1]} : vector<16x96xf32> to vector<16x32xf32>
    %c0_47 = arith.constant 0 : index
    %c0_48 = arith.constant 0 : index
    %128 = vector.load %arg13[%c0_47, %c0_48] : memref<1x32xf32, #tpu.memory_space<vmem>>, vector<1x32xf32>
    %129 = vector.shape_cast %125 : vector<16x32xf32> to vector<1x16x32xf32>
    %130 = vector.broadcast %129 : vector<1x16x32xf32> to vector<16x16x32xf32>
    %131 = arith.addf %7, %130 : vector<16x16x32xf32>
    %132 = vector.shape_cast %126 : vector<16x32xf32> to vector<16x1x32xf32>
    %133 = vector.broadcast %132 : vector<16x1x32xf32> to vector<16x16x32xf32>
    %134 = arith.addf %131, %133 : vector<16x16x32xf32>
    %cst_49 = arith.constant 2.000000e-01 : f32
    %135 = vector.broadcast %cst_49 : f32 to vector<16x16x32xf32>
    %136 = arith.mulf %135, %134 : vector<16x16x32xf32>
    %137 = arith.maximumf %134, %136 : vector<16x16x32xf32>
    %138 = vector.shape_cast %128 : vector<1x32xf32> to vector<1x1x32xf32>
    %139 = vector.broadcast %138 : vector<1x1x32xf32> to vector<16x16x32xf32>
    %140 = arith.mulf %137, %139 : vector<16x16x32xf32>
    %cst_50 = arith.constant dense<0.000000e+00> : vector<16x16xf32>
    %141 = vector.multi_reduction <add>, %140, %cst_50 [2] : vector<16x16x32xf32> to vector<16x16xf32>
    %142 = arith.addf %141, %0 : vector<16x16xf32>
    %cst_51 = arith.constant dense<0xFF800000> : vector<16xf32>
    %143 = vector.multi_reduction <maximumf>, %142, %cst_51 [1] : vector<16x16xf32> to vector<16xf32>
    %144 = vector.shape_cast %143 : vector<16xf32> to vector<16x1xf32>
    %145 = vector.broadcast %144 : vector<16x1xf32> to vector<16x16xf32>
    %146 = arith.subf %142, %145 : vector<16x16xf32>
    %147 = math.exp %146 : vector<16x16xf32>
    %cst_52 = arith.constant dense<0.000000e+00> : vector<16xf32>
    %148 = vector.multi_reduction <add>, %147, %cst_52 [1] : vector<16x16xf32> to vector<16xf32>
    %149 = vector.shape_cast %148 : vector<16xf32> to vector<16x1xf32>
    %150 = tpu.reciprocal %149 : vector<16x1xf32> -> vector<16x1xf32>
    %151 = vector.broadcast %150 : vector<16x1xf32> to vector<16x16xf32>
    %152 = arith.mulf %147, %151 : vector<16x16xf32>
    %cst_53 = arith.constant dense<0.000000e+00> : vector<16x32xf32>
    %153 = tpu.matmul %152, %125, %cst_53 {dimension_numbers = #tpu.dot_dimension_numbers<[1], [0], [0], [1], [0, 0, 1, 1], [], []>} : vector<16x16xf32>, vector<16x32xf32>, vector<16x32xf32> -> vector<16x32xf32>
    %154 = arith.addf %153, %127 : vector<16x32xf32>
    %c0_54 = arith.constant 0 : index
    %c0_55 = arith.constant 0 : index
    %155 = vector.load %arg14[%c0_54, %c0_55] : memref<1x32xf32, #tpu.memory_space<vmem>>, vector<1x32xf32>
    %156 = vector.broadcast %155 : vector<1x32xf32> to vector<16x32xf32>
    %157 = arith.mulf %154, %156 : vector<16x32xf32>
    %c0_56 = arith.constant 0 : index
    %c0_57 = arith.constant 0 : index
    %158 = vector.load %arg15[%c0_56, %c0_57] : memref<1x32xf32, #tpu.memory_space<vmem>>, vector<1x32xf32>
    %159 = vector.broadcast %158 : vector<1x32xf32> to vector<16x32xf32>
    %160 = arith.addf %157, %159 : vector<16x32xf32>
    %cst_58 = arith.constant 0.000000e+00 : f32
    %161 = vector.broadcast %cst_58 : f32 to vector<16x32xf32>
    %162 = arith.maximumf %160, %161 : vector<16x32xf32>
    %c0_59 = arith.constant 0 : index
    %c0_60 = arith.constant 0 : index
    %163 = vector.load %arg16[%c0_59, %c0_60] : memref<32x1xf32, #tpu.memory_space<vmem>>, vector<32x1xf32>
    %cst_61 = arith.constant dense<0.000000e+00> : vector<16x1xf32>
    %164 = tpu.matmul %162, %163, %cst_61 {dimension_numbers = #tpu.dot_dimension_numbers<[1], [0], [0], [1], [0, 0, 1, 1], [], []>} : vector<16x32xf32>, vector<32x1xf32>, vector<16x1xf32> -> vector<16x1xf32>
    %c0_62 = arith.constant 0 : index
    %c0_63 = arith.constant 0 : index
    %165 = vector.load %arg17[%c0_62, %c0_63] : memref<1x1xf32, #tpu.memory_space<vmem>>, vector<1x1xf32>
    %166 = vector.broadcast %165 : vector<1x1xf32> to vector<16x1xf32>
    %167 = arith.addf %164, %166 : vector<16x1xf32>
    %c0_64 = arith.constant 0 : index
    %c0_65 = arith.constant 0 : index
    %168 = vector.load %arg18[%c0_64, %c0_65] : memref<16x1xf32, #tpu.memory_space<vmem>>, vector<16x1xf32>
    tpu.vector_store %arg18[%c0_64, %c0_65], %167 {strides = array<i32>} : memref<16x1xf32, #tpu.memory_space<vmem>>, vector<16x1xf32>,
    return
  }
}

</mosaic_0001>

<bundles_post_ra>
// kernel: tpu_custom_call.1
= control target key start
LH: loop header
LB: loop body
LE: loop exit
PB: predicated region body
PF: predicated region fallthrough
CT: control target
= control target key end

     0   :  { %vm195_vm0 = vcmask 1043456   ;;  %v9833_v1 = vmov 0.0   ;;  %vm98_vm1 = vcmask 31744   ;;  %vm467_vm2 = vcmask 64512   ;;  %s9836_s28 = smov 64   ;;  %s15727_s5 = inlined_call_operand.vmem [shape: f32[4,160], index: 5, kind: input, shape index: {}]   ;;  %s15728_s2 = inlined_call_operand.vmem [shape: f32[256,4], index: 2, kind: input, shape index: {}]   ;;  %s15729_s3 = inlined_call_operand.vmem [shape: f32[8,32], index: 3, kind: input, shape index: {}]   ;;  %s15730_s0 = inlined_call_operand.vmem [shape: f32[16,8], index: 0, kind: input, shape index: {}]   ;;  %s15731_s6 = inlined_call_operand.vmem [shape: f32[32,384], index: 6, kind: input, shape index: {}]   ;;  %s15732_s1 = inlined_call_operand.vmem [shape: f32[16,16], index: 1, kind: input, shape index: {}]   ;;  %s15733_s4 = inlined_call_operand.vmem [shape: f32[1,32], index: 4, kind: input, shape index: {}]   ;;  %s15734_s7 = inlined_call_operand.vmem [shape: f32[1,384], index: 7, kind: input, shape index: {}]   ;;  %s15735_s8 = inlined_call_operand.vmem [shape: f32[1,128], index: 8, kind: input, shape index: {}]   ;;  %s15736_s11 = inlined_call_operand.vmem [shape: f32[128,96], index: 11, kind: input, shape index: {}]   ;;  %s15737_s9 = inlined_call_operand.vmem [shape: f32[1,128], index: 9, kind: input, shape index: {}]   ;;  %s15738_s10 = inlined_call_operand.vmem [shape: f32[1,128], index: 10, kind: input, shape index: {}]   ;;  %s15739_s12 = inlined_call_operand.vmem [shape: f32[1,96], index: 12, kind: input, shape index: {}]   ;;  %s15740_s13 = inlined_call_operand.vmem [shape: f32[1,32], index: 13, kind: input, shape index: {}]   ;;  %s15741_s16 = inlined_call_operand.vmem [shape: f32[32,1], index: 16, kind: input, shape index: {}]   ;;  %s15742_s17 = inlined_call_operand.<no memory space> [shape: f32[1,1], index: 17, kind: input, shape index: {}]   ;;  %s15743_s14 = inlined_call_operand.vmem [shape: f32[1,32], index: 14, kind: input, shape index: {}]   ;;  %s15744_s15 = inlined_call_operand.vmem [shape: f32[1,32], index: 15, kind: input, shape index: {}]   ;;  %s15745_s18 = inlined_call_operand.vmem [shape: f32[16,1], index: 18, kind: output, shape index: {}]  }
   0x1   :  { %16123 = sst [smem:[#allocation238_spill]] %s15727_s5  ;;  %420 = vmatprep.mubr.f32.mxu1 %v9833_v1  ;;  %264 = vmatprep.mubr.f32.mxu0 %v9833_v1  ;;  %v457_v15 = vld [vmem:[%s15730_s0] sm:$0xff]  ;;  %v458_v17 = vld [vmem:[%s15730_s0 + $0x8] sm:$0xff]  ;;  %v554_v38 = vld [vmem:[%s15731_s6 + $0x18] sm:$0xff]  ;;  %v15747_v53 = vlaneseq  ;;  %vm580_vm3 = vcmask 261120   ;;  %vm1563_vm4 = vcmask 130112  }
   0x2   :  { %16124 = sst [smem:[#allocation239_spill]] %s15728_s2  ;;  %s16126_s29 = sld [smem:[#allocation238_spill]]  ;;  %v552_v34 = vld [vmem:[%s15731_s6 + $0x8] sm:$0xff]  ;;  %v555_v35 = vld [vmem:[%s15731_s6 + $0x20] sm:$0xff]  ;;  %v558_v41 = vld [vmem:[%s15731_s6 + $0x38] sm:$0xff]  ;;  %vm1700_vm5 = vcmask 1041409  }
   0x3   :  { %16125 = sst [smem:[#allocation240_spill]] %s15729_s3  ;;  %s16127_s19 = sld [smem:[#allocation239_spill]]  ;;  %v9390_v36 = vpack.c.bf16 %v555_v35, %v552_v34  ;;  %v551_v37 = vld [vmem:[%s15731_s6] sm:$0xff]  ;;  %v561_v42 = vld [vmem:[%s15731_s6 + $0x50] sm:$0xff]  ;;  %v560_v45 = vld [vmem:[%s15731_s6 + $0x48] sm:$0xff]  ;;  %v10141_v54 = vshrl.u32 %v15747_v53, 7 }
   0x4   :  { %s16128_s21 = sld [smem:[#allocation240_spill]]  ;;  %v9392_v39 = vpack.c.bf16 %v554_v38, %v551_v37  ;;  %v9394_v43 = vpack.c.bf16 %v561_v42, %v558_v41  ;;  %v557_v44 = vld [vmem:[%s15731_s6 + $0x30] sm:$0xff]  ;;  %v556_v49 = vld [vmem:[%s15731_s6 + $0x28] sm:$0xff]  ;;  %v61_v55 = vld [vmem:[%s15732_s1] sm:$0xff]  ;;  %vm1702_vm6 = vcmask 1042434   ;;  %vm1704_vm7 = vcmask 1043459  }
   0x5   :  { %v9396_v46 = vpack.c.bf16 %v560_v45, %v557_v44  ;;  %v553_v48 = vld [vmem:[%s15731_s6 + $0x10] sm:$0xff]  ;;  %16129 = vst [vmem:[#allocation3_spill] sm:$0xff] %v10141_v54  ;;  %v10147_v56 = vsub.s32 0, %v10141_v54  ;;  %v10150_v57 = vsub.s32 1, %v10141_v54  ;;  %v10153_v58 = vsub.s32 2, %v10141_v54  ;;  %v559_v41 = vld [vmem:[%s15731_s6 + $0x40] sm:$0xff] }
   0x6   :  { %v10127_v50 = vpack.c.bf16 %v556_v49, %v553_v48  ;;  %v10159_v62 = vsub.s32 3, %v10141_v54  ;;  %v9213_v37 = vld [vmem:[%s15733_s4] ss:$0 sm:$0xff]  ;;  %v562_v42 = vld [vmem:[%s15731_s6 + $0x58] sm:$0xff]  ;;  %vm1706_vm8 = vcmask 1044484   ;;  %vm1708_vm9 = vcmask 1045509  }
   0x7   :  { %16130 = vst [vmem:[#allocation4_spill] sm:$0xff] %v10147_v56  ;;  %16131 = vst [vmem:[#allocation5_spill] sm:$0xff] %v10150_v57  ;;  %v1187_v59 = vrot.slane %v61_v55, %v10147_v56  ;;  %v1198_v60 = vrot.slane %v61_v55, %v10150_v57  ;;  %v1209_v61 = vrot.slane %v61_v55, %v10153_v58  ;;  %vm1710_vm10 = vcmask 1046534  }
   0x8   :  { %v95_v0 = vld [vmem:[%s16126_s29] sm:$0xff]  ;;  %16132 = vst [vmem:[#allocation6_spill] sm:$0xff] %v10153_v58  ;;  %16133 = vst [vmem:[#allocation7_spill] sm:$0xff] %v10159_v62  ;;  %v1220_v63 = vrot.slane %v61_v55, %v10159_v62  ;;  %v9402_v48 = vpack.c.bf16 %v562_v42, %v559_v41  ;;  %s9837_s29 = smov 32   ;;  %vm1712_vm11 = vcmask 1047559   ;;  %vm1723_vm12 = vcmask 130048  }
   0x9   :  { %v97_v2 = vcombine.high %v95_v0, %v95_v0  ;;  %v89_v3 = vld [vmem:[%s16127_s19 + $0xd0] sm:$0xff]  ;;  %v63_v5 = vld [vmem:[%s16127_s19] sm:$0xff]  ;;  %v90_v6 = vld [vmem:[%s16127_s19 + $0xd8] sm:$0xff]  ;;  %1193 = vbcast.lane.b32.xlu1 %v1187_v59, 264  ;;  %1189 = vbcast.lane.b32.xlu0 %v1187_v59, 256  ;;  %vm7174_vm13 = vcmask 523264  }
   0xa   :  { %v459_v4 = vld [vmem:[%s16128_s21] sm:$0xff]  ;;  %v64_v7 = vld [vmem:[%s16127_s19 + $0x8] sm:$0xff]  ;;  %v65_v9 = vld [vmem:[%s16127_s19 + $0x10] sm:$0xff]  ;;  %vm7177_vm14 = vcmask 785408   ;;  %vm9172_vm15 = vcmask 7168  }
   0xb   :  { %9466 = vmatprep.subr.msk.mxu1 %vm195_vm0, %v97_v2  ;;  %9179 = vmatprep.subr.msk.mxu0 %vm195_vm0, %v97_v2  ;;  %v91_v8 = vld [vmem:[%s16127_s19 + $0xe0] sm:$0xff]  ;;  %v92_v10 = vld [vmem:[%s16127_s19 + $0xe8] sm:$0xff]  ;;  %v66_v11 = vld [vmem:[%s16127_s19 + $0x18] sm:$0xff] }
   0xc   :  { %9467 = vmatpush1.msk.msra.mxu1 %vm195_vm0, %v95_v0  ;;  %9180 = vmatpush1.msk.msra.mxu0 %vm195_vm0, %v95_v0  ;;  %v93_v12 = vld [vmem:[%s16127_s19 + $0xf0] sm:$0xff]  ;;  %v67_v13 = vld [vmem:[%s16127_s19 + $0x20] sm:$0xff]  ;;  %v94_v14 = vld [vmem:[%s16127_s19 + $0xf8] sm:$0xff]  ;;  %v10163_v0 = vsub.s32 4, %v10141_v54 }
   0xd   :  { %9207 = vmatmul.mubr.msk.f32.vlgmr.msra.gmra.mrb[0].mxu1 %vm98_vm1, %v89_v3  ;;  %9293 = vmatprep.subr.mxu1 %v459_v4  ;;  %v68_v16 = vld [vmem:[%s16127_s19 + $0x28] sm:$0xff]  ;;  %v69_v18 = vld [vmem:[%s16127_s19 + $0x30] sm:$0xff]  ;;  %v70_v19 = vld [vmem:[%s16127_s19 + $0x38] sm:$0xff]  ;;  %v10167_v3 = vsub.s32 5, %v10141_v54 }
   0xe   :  { %9294 = vmatpush3.msra.mxu1 %v459_v4  ;;  %426 = vmatprep.mubr.f32.mxu1 %v9833_v1  ;;  %v71_v20 = vld [vmem:[%s16127_s19 + $0x40] sm:$0xff]  ;;  %v72_v21 = vld [vmem:[%s16127_s19 + $0x48] sm:$0xff]  ;;  %v73_v22 = vld [vmem:[%s16127_s19 + $0x50] sm:$0xff]  ;;  %16134 = vst [vmem:[#allocation8_spill] sm:$0xff] %v10163_v0  ;;  %v1231_v2 = vrot.slane %v61_v55, %v10163_v0 }
   0xf   :  { %9181 = vmatmul.mubr.msk.f32.vlgmr.msra.gmra.mrb[0].mxu0 %vm98_vm1, %v63_v5  ;;  %v74_v23 = vld [vmem:[%s16127_s19 + $0x58] sm:$0xff]  ;;  %v75_v24 = vld [vmem:[%s16127_s19 + $0x60] sm:$0xff]  ;;  %v76_v25 = vld [vmem:[%s16127_s19 + $0x68] sm:$0xff]  ;;  %9391 = vmatprep.subr.bf16.mxu1 %v9390_v36  ;;  %16135 = vst [vmem:[#allocation9_spill] sm:$0xff] %v10167_v3  ;;  %v1242_v4 = vrot.slane %v61_v55, %v10167_v3  ;;  %v10171_v5 = vsub.s32 6, %v10141_v54 }
  0x10   :  { %270 = vmatprep.mubr.f32.mxu0 %v9833_v1  ;;  %v77_v26 = vld [vmem:[%s16127_s19 + $0x70] sm:$0xff]  ;;  %v78_v27 = vld [vmem:[%s16127_s19 + $0x78] sm:$0xff]  ;;  %v79_v28 = vld [vmem:[%s16127_s19 + $0x80] sm:$0xff]  ;;  %1200 = vbcast.lane.b32.xlu1 %v1198_v60, 256 }
  0x11   :  { %9208 = vmatmul.mubr.msk.f32.gmra.mrb[2].mxu1 %vm98_vm1, %v90_v6  ;;  %v80_v29 = vld [vmem:[%s16127_s19 + $0x88] sm:$0xff]  ;;  %v81_v30 = vld [vmem:[%s16127_s19 + $0x90] sm:$0xff]  ;;  %v82_v31 = vld [vmem:[%s16127_s19 + $0x98] sm:$0xff]  ;;  %1211 = vbcast.lane.b32.xlu0 %v1209_v61, 256  ;;  %16136 = vst [vmem:[#allocation10_spill] sm:$0xff] %v10171_v5  ;;  %v1253_v6 = vrot.slane %v61_v55, %v10171_v5 }
  0x12   :  { %432 = vmatprep.mubr.f32.mxu1 %v9833_v1  ;;  %v83_v32 = vld [vmem:[%s16127_s19 + $0xa0] sm:$0xff]  ;;  %v84_v33 = vld [vmem:[%s16127_s19 + $0xa8] sm:$0xff]  ;;  %v85_v40 = vld [vmem:[%s16127_s19 + $0xb0] sm:$0xff] }
  0x13   :  { %9182 = vmatmul.mubr.msk.f32.gmra.mrb[2].mxu0 %vm98_vm1, %v64_v7  ;;  %v86_v47 = vld [vmem:[%s16127_s19 + $0xb8] sm:$0xff]  ;;  %v87_v51 = vld [vmem:[%s16127_s19 + $0xc0] sm:$0xff]  ;;  %v88_v52 = vld [vmem:[%s16127_s19 + $0xc8] sm:$0xff]  ;;  %v10175_v7 = vsub.s32 7, %v10141_v54 }
  0x14   :  { %276 = vmatprep.mubr.f32.mxu0 %v9833_v1  ;;  %1204 = vbcast.lane.b32.xlu1 %v1198_v60, 264 }
  0x15   :  { %9209 = vmatmul.mubr.msk.f32.gmra.mrb[4].mxu1 %vm98_vm1, %v91_v8  ;;  %1222 = vbcast.lane.b32.xlu0 %v1220_v63, 256  ;;  %16137 = vst [vmem:[#allocation11_spill] sm:$0xff] %v10175_v7  ;;  %v1264_v8 = vrot.slane %v61_v55, %v10175_v7 }
  0x16   :  { %438 = vmatprep.mubr.f32.mxu1 %v9833_v1 }
  0x17   :  { %9183 = vmatmul.mubr.msk.f32.gmra.mrb[4].mxu0 %vm98_vm1, %v65_v9  ;;  %v10181_v9 = vld [vmem:[%s15732_s1 + $0x8] sm:$0xff] }
  0x18   :  { %282 = vmatprep.mubr.f32.mxu0 %v9833_v1  ;;  %1215 = vbcast.lane.b32.xlu1 %v1209_v61, 264 }
  0x19   :  { %9210 = vmatmul.mubr.msk.f32.gmra.mrb[6].mxu1 %vm98_vm1, %v92_v10  ;;  %1233 = vbcast.lane.b32.xlu0 %v1231_v2, 256  ;;  %v1275_v10 = vrot.slane %v10181_v9, %v10147_v56 }
  0x1a   :  { %444 = vmatprep.mubr.f32.mxu1 %v9833_v1 }
  0x1b   :  { %9184 = vmatmul.mubr.msk.f32.gmra.mrb[6].mxu0 %vm98_vm1, %v66_v11  ;;  %v1286_v11 = vrot.slane %v10181_v9, %v10150_v57 }
  0x1c   :  { %288 = vmatprep.mubr.f32.mxu0 %v9833_v1  ;;  %1226 = vbcast.lane.b32.xlu1 %v1220_v63, 264 }
  0x1d   :  { %9211 = vmatmul.mubr.msk.f32.gmra.mrb[8].mxu1 %vm98_vm1, %v93_v12  ;;  %1244 = vbcast.lane.b32.xlu0 %v1242_v4, 256  ;;  %v1297_v12 = vrot.slane %v10181_v9, %v10153_v58 }
  0x1e   :  { %450 = vmatprep.mubr.f32.mxu1 %v9833_v1 }
  0x1f   :  { %9185 = vmatmul.mubr.msk.f32.gmra.mrb[8].mxu0 %vm98_vm1, %v67_v13  ;;  %v1308_v13 = vrot.slane %v10181_v9, %v10159_v62 }
  0x20   :  { %294 = vmatprep.mubr.f32.mxu0 %v9833_v1  ;;  %1237 = vbcast.lane.b32.xlu1 %v1231_v2, 264 }
  0x21   :  { %9212 = vmatmul.mubr.msk.f32.gmra.mrb[10].mxu1 %vm98_vm1, %v94_v14  ;;  %1255 = vbcast.lane.b32.xlu0 %v1253_v6, 256 }
  0x22   :  { %9295 = vmatprep.mubr.msk.f32.mxu1 %vm467_vm2, %v457_v15 }
  0x23   :  { %9186 = vmatmul.mubr.msk.f32.gmra.mrb[10].mxu0 %vm98_vm1, %v68_v16 }
  0x24   :  { %300 = vmatprep.mubr.f32.mxu0 %v9833_v1  ;;  %1248 = vbcast.lane.b32.xlu1 %v1242_v4, 264 }
  0x25   :  { %9296 = vmatmul.mubr.msk.f32.vlgmr.msra.gmra.mrb[12].mxu1 %vm467_vm2, %v458_v17  ;;  %1266 = vbcast.lane.b32.xlu0 %v1264_v8, 256 }
  0x26   :  { %651 = vmatprep.mubr.f32.mxu1 %v9833_v1  ;;  %9393 = vmatpush1.bf16.msra.mxu1 %v9392_v39 }
  0x27   :  { %9187 = vmatmul.mubr.msk.f32.gmra.mrb[12].mxu0 %vm98_vm1, %v69_v18  ;;  %9395 = vmatprep.subr.bf16.mxu1 %v9394_v43 }
  0x28   :  { %306 = vmatprep.mubr.f32.mxu0 %v9833_v1  ;;  %1259 = vbcast.lane.b32.xlu1 %v1253_v6, 264 }
  0x29   :  { %1277 = vbcast.lane.b32.xlu0 %v1275_v10, 256 }
  0x2a   :  { %9397 = vmatpush1.bf16.msra.mxu1 %v9396_v46 }
  0x2b   :  { %9188 = vmatmul.mubr.msk.f32.gmra.mrb[14].mxu0 %vm98_vm1, %v70_v19  ;;  %9399 = vmatprep.subr.bf16.mxu1 %v10127_v50 }
  0x2c   :  { %312 = vmatprep.mubr.f32.mxu0 %v9833_v1  ;;  %1270 = vbcast.lane.b32.xlu1 %v1264_v8, 264 }
  0x2d   :  { %1288 = vbcast.lane.b32.xlu0 %v1286_v11, 256 }
  0x2f   :  { %9189 = vmatmul.mubr.msk.f32.gmra.mrb[16].mxu0 %vm98_vm1, %v71_v20 }
  0x30   :  { %318 = vmatprep.mubr.f32.mxu0 %v9833_v1  ;;  %1281 = vbcast.lane.b32.xlu1 %v1275_v10, 264 }
  0x31   :  { %1299 = vbcast.lane.b32.xlu0 %v1297_v12, 256 }
  0x33   :  { %9190 = vmatmul.mubr.msk.f32.gmra.mrb[18].mxu0 %vm98_vm1, %v72_v21 }
  0x34   :  { %324 = vmatprep.mubr.f32.mxu0 %v9833_v1  ;;  %1292 = vbcast.lane.b32.xlu1 %v1286_v11, 264 }
  0x35   :  { %1310 = vbcast.lane.b32.xlu0 %v1308_v13, 256 }
  0x37   :  { %9191 = vmatmul.mubr.msk.f32.gmra.mrb[20].mxu0 %vm98_vm1, %v73_v22 }
  0x38   :  { %330 = vmatprep.mubr.f32.mxu0 %v9833_v1  ;;  %1303 = vbcast.lane.b32.xlu1 %v1297_v12, 264 }
  0x3b   :  { %9192 = vmatmul.mubr.msk.f32.gmra.mrb[22].mxu0 %vm98_vm1, %v74_v23 }
  0x3c   :  { %336 = vmatprep.mubr.f32.mxu0 %v9833_v1  ;;  %1314 = vbcast.lane.b32.xlu1 %v1308_v13, 264 }
  0x3f   :  { %9193 = vmatmul.mubr.msk.f32.gmra.mrb[24].mxu0 %vm98_vm1, %v75_v24 }
  0x40   :  { %342 = vmatprep.mubr.f32.mxu0 %v9833_v1 }
  0x43   :  { %9194 = vmatmul.mubr.msk.f32.gmra.mrb[26].mxu0 %vm98_vm1, %v76_v25 }
  0x44   :  { %348 = vmatprep.mubr.f32.mxu0 %v9833_v1 }
  0x47   :  { %9195 = vmatmul.mubr.msk.f32.gmra.mrb[28].mxu0 %vm98_vm1, %v77_v26 }
  0x48   :  { %354 = vmatprep.mubr.f32.mxu0 %v9833_v1 }
  0x4b   :  { %9196 = vmatmul.mubr.msk.f32.gmra.mrb[30].mxu0 %vm98_vm1, %v78_v27 }
  0x4c   :  { %360 = vmatprep.mubr.f32.mxu0 %v9833_v1 }
  0x4f   :  { %9197 = vmatmul.mubr.msk.f32.gmra.mrb[32].mxu0 %vm98_vm1, %v79_v28 }
  0x50   :  { %366 = vmatprep.mubr.f32.mxu0 %v9833_v1 }
  0x53   :  { %9198 = vmatmul.mubr.msk.f32.gmra.mrb[34].mxu0 %vm98_vm1, %v80_v29 }
  0x54   :  { %372 = vmatprep.mubr.f32.mxu0 %v9833_v1 }
  0x57   :  { %9199 = vmatmul.mubr.msk.f32.gmra.mrb[36].mxu0 %vm98_vm1, %v81_v30 }
  0x58   :  { %378 = vmatprep.mubr.f32.mxu0 %v9833_v1 }
  0x5b   :  { %9200 = vmatmul.mubr.msk.f32.gmra.mrb[38].mxu0 %vm98_vm1, %v82_v31 }
  0x5c   :  { %384 = vmatprep.mubr.f32.mxu0 %v9833_v1 }
  0x5f   :  { %9201 = vmatmul.mubr.msk.f32.gmra.mrb[40].mxu0 %vm98_vm1, %v83_v32 }
  0x60   :  { %390 = vmatprep.mubr.f32.mxu0 %v9833_v1 }
  0x63   :  { %9202 = vmatmul.mubr.msk.f32.gmra.mrb[42].mxu0 %vm98_vm1, %v84_v33 }
  0x64   :  { %396 = vmatprep.mubr.f32.mxu0 %v9833_v1 }
  0x67   :  { %9203 = vmatmul.mubr.msk.f32.gmra.mrb[44].mxu0 %vm98_vm1, %v85_v40 }
  0x68   :  { %402 = vmatprep.mubr.f32.mxu0 %v9833_v1 }
  0x6b   :  { %9204 = vmatmul.mubr.msk.f32.gmra.mrb[46].mxu0 %vm98_vm1, %v86_v47 }
  0x6c   :  { %408 = vmatprep.mubr.f32.mxu0 %v9833_v1 }
  0x6f   :  { %9205 = vmatmul.mubr.msk.f32.gmra.mrb[48].mxu0 %vm98_vm1, %v87_v51 }
  0x70   :  { %414 = vmatprep.mubr.f32.mxu0 %v9833_v1 }
  0x73   :  { %9206 = vmatmul.mubr.msk.f32.gmra.mrb[50].mxu0 %vm98_vm1, %v88_v52 }
  0xe0   :  { %v10191_v14 = vpop.f32.mrb[0].mxu1 }
  0xe1   :  { %v10193_v15 = vpop.f32.mrb[1].mxu1 }
  0xe2   :  { %16138 = vst [vmem:[#allocation12_spill] sm:$0xff] %v10193_v15  ;;  %v10195_v16 = vpop.f32.mrb[0].mxu0  ;;  %v1330_v15 = vrot.slane %v10181_v9, %v10167_v3 }
  0xe3   :  { %v10197_v17 = vpop.f32.mrb[1].mxu0 }
  0xe4   :  { %16139 = vst [vmem:[#allocation13_spill] sm:$0xff] %v10197_v17  ;;  %v10199_v18 = vpop.f32.mrb[2].mxu1 }
  0xe5   :  { %v10201_v19 = vpop.f32.mrb[3].mxu1 }
  0xe6   :  { %16140 = vst [vmem:[#allocation14_spill] sm:$0xff] %v10201_v19  ;;  %v10203_v20 = vpop.f32.mrb[2].mxu0  ;;  %v563_v19 = vld [vmem:[%s15734_s7] sm:$0x7] }
  0xe7   :  { %v10205_v21 = vpop.f32.mrb[3].mxu0 }
  0xe8   :  { %16141 = vst [vmem:[#allocation15_spill] sm:$0xff] %v10205_v21  ;;  %v10207_v22 = vpop.f32.mrb[4].mxu1 }
  0xe9   :  { %v10209_v23 = vpop.f32.mrb[5].mxu1 }
  0xea   :  { %16142 = vst [vmem:[#allocation16_spill] sm:$0xff] %v10209_v23  ;;  %v10211_v24 = vpop.f32.mrb[4].mxu0 }
  0xeb   :  { %v10213_v25 = vpop.f32.mrb[5].mxu0 }
  0xec   :  { %16143 = vst [vmem:[#allocation17_spill] sm:$0xff] %v10213_v25  ;;  %v10215_v26 = vpop.f32.mrb[6].mxu1 }
  0xed   :  { %v10217_v27 = vpop.f32.mrb[7].mxu1 }
  0xee   :  { %16144 = vst [vmem:[#allocation18_spill] sm:$0xff] %v10217_v27  ;;  %v10219_v28 = vpop.f32.mrb[6].mxu0  ;;  %v1341_v27 = vrot.slane %v10181_v9, %v10171_v5 }
  0xef   :  { %v10221_v29 = vpop.f32.mrb[7].mxu0 }
  0xf0   :  { %16145 = vst [vmem:[#allocation19_spill] sm:$0xff] %v10221_v29  ;;  %v10223_v30 = vpop.f32.mrb[8].mxu1 }
  0xf1   :  { %v10225_v31 = vpop.f32.mrb[9].mxu1 }
  0xf2   :  { %16146 = vst [vmem:[#allocation20_spill] sm:$0xff] %v10225_v31  ;;  %v10227_v32 = vpop.f32.mrb[8].mxu0 }
  0xf3   :  { %v10229_v33 = vpop.f32.mrb[9].mxu0 }
  0xf4   :  { %16147 = vst [vmem:[#allocation21_spill] sm:$0xff] %v10229_v33  ;;  %v10231_v34 = vpop.f32.mrb[10].mxu1 }
  0xf5   :  { %v10233_v35 = vpop.f32.mrb[11].mxu1 }
  0xf6   :  { %16148 = vst [vmem:[#allocation22_spill] sm:$0xff] %v10233_v35  ;;  %v10235_v36 = vpop.f32.mrb[10].mxu0 }
  0xf7   :  { %v10240_v38 = vpop.f32.mrb[11].mxu0 }
  0xf8   :  { %16149 = vst [vmem:[#allocation23_spill] sm:$0xff] %v10240_v38  ;;  %v9297_v39 = vpop.f32.mrb[12].mxu1 }
  0xf9   :  { %v540_v40 = vpop.f32.mrb[13].mxu1  ;;  %v546_v46 = vadd.f32 %v9297_v39, %v9213_v37 }
  0xfa   :  { %v541_v43 = vadd.f32 %v9213_v37, %v540_v40  ;;  %v10248_v44 = vpop.f32.mrb[12].mxu0 }
  0xfb   :  { %v10250_v45 = vpop.f32.mrb[13].mxu0  ;;  %v550_v52 = vmax.f32 %v546_v46, 0.0 }
  0xfc   :  { %16150 = vst [vmem:[#allocation24_spill] sm:$0xff] %v10250_v45  ;;  %v549_v47 = vmax.f32 %v541_v43, 0.0  ;;  %v1319_v45 = vrot.slane %v10181_v9, %v10163_v0 }
  0xfe   :  { %9216 = vmatmul.mubr.msk.f32.vlgmr.msra.gmra.mrb[14].mxu1 %vm580_vm3, %v549_v47  ;;  %v10253_v49 = vpop.f32.mrb[14].mxu0  ;;  %1325 = vbcast.lane.b32.xlu1 %v1319_v45, 264 }
  0xff   :  { %9401 = vmatpush3.bf16.msra.mxu1 %v10127_v50  ;;  %657 = vmatprep.mubr.f32.mxu1 %v9833_v1  ;;  %v10257_v51 = vpop.f32.mrb[15].mxu0 }
 0x100   :  { %16151 = vst [vmem:[#allocation25_spill] sm:$0xff] %v10257_v51  ;;  %9403 = vmatprep.subr.bf16.mxu1 %v9402_v48  ;;  %1321 = vbcast.lane.b32.xlu0 %v1319_v45, 256 }
 0x102   :  { %9217 = vmatmul.mubr.msk.f32.gmra.mrb[16].mxu1 %vm580_vm3, %v550_v52  ;;  %v10260_v55 = vpop.f32.mrb[16].mxu0  ;;  %1336 = vbcast.lane.b32.xlu1 %v1330_v15, 264 }
 0x103   :  { %9405 = vmatpush3.bf16.msra.mxu1 %v9402_v48  ;;  %9306 = vmatprep.mubr.msk.f32.mxu1 %vm580_vm3, %v549_v47  ;;  %v10263_v59 = vpop.f32.mrb[17].mxu0 }
 0x104   :  { %16152 = vst [vmem:[#allocation26_spill] sm:$0xff] %v10263_v59  ;;  %1332 = vbcast.lane.b32.xlu0 %v1330_v15, 256  ;;  %v572_v15 = vrot.slane %v563_v19, %v10150_v57 }
 0x106   :  { %9307 = vmatmul.mubr.msk.f32.vlgmr.msra.gmra.mrb[18].mxu1 %vm580_vm3, %v550_v52  ;;  %v10266_v60 = vpop.f32.mrb[18].mxu0  ;;  %1347 = vbcast.lane.b32.xlu1 %v1341_v27, 264 }
 0x107   :  { %v10268_v50 = vpop.f32.mrb[19].mxu0 }
 0x108   :  { %16153 = vst [vmem:[#allocation27_spill] sm:$0xff] %v10268_v50  ;;  %1343 = vbcast.lane.b32.xlu0 %v1341_v27, 256 }
 0x10a   :  { %v10270_v1 = vpop.f32.mrb[20].mxu0 }
 0x10b   :  { %v10272_v61 = vpop.f32.mrb[21].mxu0 }
 0x10c   :  { %16154 = vst [vmem:[#allocation28_spill] sm:$0xff] %v10272_v61 }
 0x10e   :  { %v10274_v63 = vpop.f32.mrb[22].mxu0 }
 0x10f   :  { %v10276_v2 = vpop.f32.mrb[23].mxu0 }
 0x110   :  { %16155 = vst [vmem:[#allocation29_spill] sm:$0xff] %v10276_v2 }
 0x112   :  { %v10278_v4 = vpop.f32.mrb[24].mxu0 }
 0x113   :  { %v10280_v6 = vpop.f32.mrb[25].mxu0 }
 0x114   :  { %16156 = vst [vmem:[#allocation30_spill] sm:$0xff] %v10280_v6 }
 0x116   :  { %v10282_v8 = vpop.f32.mrb[26].mxu0 }
 0x117   :  { %v10284_v10 = vpop.f32.mrb[27].mxu0 }
 0x118   :  { %16157 = vst [vmem:[#allocation31_spill] sm:$0xff] %v10284_v10 }
 0x11a   :  { %v10286_v11 = vpop.f32.mrb[28].mxu0 }
 0x11b   :  { %v10288_v12 = vpop.f32.mrb[29].mxu0 }
 0x11c   :  { %16158 = vst [vmem:[#allocation32_spill] sm:$0xff] %v10288_v12  ;;  %v1352_v12 = vrot.slane %v10181_v9, %v10175_v7 }
 0x11e   :  { %v10290_v13 = vpop.f32.mrb[30].mxu0  ;;  %1358 = vbcast.lane.b32.xlu1 %v1352_v12, 264  ;;  %1354 = vbcast.lane.b32.xlu0 %v1352_v12, 256 }
 0x11f   :  { %v10292_v37 = vpop.f32.mrb[31].mxu0 }
 0x120   :  { %16159 = vst [vmem:[#allocation33_spill] sm:$0xff] %v10292_v37 }
 0x122   :  { %v362_v39 = vpop.f32.mrb[32].mxu0 }
 0x123   :  { %v10294_v40 = vpop.f32.mrb[33].mxu0 }
 0x124   :  { %16160 = vst [vmem:[#allocation34_spill] sm:$0xff] %v10294_v40 }
 0x126   :  { %v368_v41 = vpop.f32.mrb[34].mxu0 }
 0x127   :  { %v10296_v42 = vpop.f32.mrb[35].mxu0 }
 0x128   :  { %16161 = vst [vmem:[#allocation35_spill] sm:$0xff] %v10296_v42 }
 0x12a   :  { %v374_v43 = vpop.f32.mrb[36].mxu0 }
 0x12b   :  { %v10298_v46 = vpop.f32.mrb[37].mxu0 }
 0x12c   :  { %16162 = vst [vmem:[#allocation36_spill] sm:$0xff] %v10298_v46 }
 0x12e   :  { %v380_v47 = vpop.f32.mrb[38].mxu0 }
 0x12f   :  { %v10300_v48 = vpop.f32.mrb[39].mxu0 }
 0x130   :  { %16163 = vst [vmem:[#allocation37_spill] sm:$0xff] %v10300_v48 }
 0x132   :  { %v386_v52 = vpop.f32.mrb[40].mxu0 }
 0x133   :  { %v10302_v53 = vpop.f32.mrb[41].mxu0 }
 0x134   :  { %16164 = vst [vmem:[#allocation38_spill] sm:$0xff] %v10302_v53 }
 0x136   :  { %v392_v31 = vpop.f32.mrb[42].mxu0 }
 0x137   :  { %v10304_v6 = vpop.f32.mrb[43].mxu0 }
 0x138   :  { %16165 = vst [vmem:[#allocation39_spill] sm:$0xff] %v10304_v6 }
 0x13a   :  { %v10306_v35 = vpop.f32.mrb[44].mxu0 }
 0x13b   :  { %v10308_v37 = vpop.f32.mrb[45].mxu0 }
 0x13c   :  { %16166 = vst [vmem:[#allocation40_spill] sm:$0xff] %v10308_v37  ;;  %v9834_v37 = vmov 1966171168  }
 0x13d   :  { %v776_v45 = vunpack.c.l.s4 %v9834_v37 }
 0x13e   :  { %v10310_v61 = vpop.f32.mrb[46].mxu0 }
 0x13f   :  { %v10312_v10 = vpop.f32.mrb[47].mxu0  ;;  %v777_v59 = vunpack.c.0.s8 %v776_v45 }
 0x140   :  { %16167 = vst [vmem:[#allocation41_spill] sm:$0xff] %v10312_v10  ;;  %v568_v10 = vrot.slane %v563_v19, %v10147_v56 }
 0x141   :  { %v10330_v38 = vsub.s32 %v777_v59, %v10141_v54 }
 0x142   :  { %v410_v23 = vpop.f32.mrb[48].mxu0 }
 0x143   :  { %v10316_v2 = vpop.f32.mrb[49].mxu0  ;;  %16169 = vst [vmem:[#allocation43_spill] sm:$0xff] %v10330_v38 }
 0x144   :  { %16168 = vst [vmem:[#allocation42_spill] sm:$0xff] %v10316_v2 }
 0x146   :  { %v416_v51 = vpop.f32.mrb[50].mxu0 }
 0x1d1   :  { %v653_v33 = vpop.f32.mrb[14].mxu1 }
 0x1d2   :  { %v10332_v27 = vadd.f32 %v653_v33, %v568_v10  ;;  %v655_v9 = vpop.f32.mrb[15].mxu1 }
 0x1d3   :  { %v656_v50 = vadd.f32 %v655_v9, %v572_v15 }
 0x1d4   :  { %v740_v12 = vadd.f32 %v10332_v27, %v10195_v16  ;;  %v742_v37 = vadd.f32 %v10332_v27, %v10211_v24  ;;  %v744_v45 = vadd.f32 %v10332_v27, %v10227_v32  ;;  %v748_v19 = vadd.f32 %v10332_v27, %v10260_v55 }
 0x1d5   :  { %v774_v29 = vcombine.high %v656_v50, %v656_v50  ;;  %v781_v59 = vrot.slane %v656_v50, %v10330_v38  ;;  %v764_v33 = vadd.f32 %v10332_v27, %v410_v23  ;;  %v659_v2 = vpop.f32.mrb[16].mxu1  ;;  %v756_v9 = vadd.f32 %v10332_v27, %v362_v39 }
 0x1d6   :  { %v10345_v25 = vadd.f32 %v659_v2, %v568_v10  ;;  %v661_v16 = vpop.f32.mrb[17].mxu1  ;;  %v758_v53 = vadd.f32 %v10332_v27, %v374_v43  ;;  %v760_v24 = vadd.f32 %v10332_v27, %v386_v52  ;;  %v10351_v32 = vadd.f32 %v10332_v27, %v10248_v44 }
 0x1d7   :  { %v788_v55 = vrot.slane %v774_v29, %v10330_v38  ;;  %v789_v6 = vcombine.high %v781_v59, %v781_v59  ;;  %v797_v50 = vrot.slane %v781_v59, %v10330_v38  ;;  %v662_v23 = vadd.f32 %v661_v16, %v572_v15 }
 0x1d8   :  { %v757_v46 = vadd.f32 %v10345_v25, %v368_v41  ;;  %v759_v2 = vadd.f32 %v10345_v25, %v380_v47  ;;  %v761_v10 = vadd.f32 %v10345_v25, %v392_v31  ;;  %v765_v39 = vadd.f32 %v10345_v25, %v416_v51 }
 0x1d9   :  { %v804_v43 = vrot.slane %v788_v55, %v10330_v38  ;;  %v811_v52 = vrot.slane %v789_v6, %v10330_v38  ;;  %v819_v44 = vcombine.high %v797_v50, %v797_v50  ;;  %v10361_v48 = vpop.f32.mrb[18].mxu1  ;;  %v875_v29 = vrot.slane %v797_v50, %v10147_v56 }
 0x1da   :  { %16170 = vst [vmem:[#allocation44_spill] sm:$0xff] %v10361_v48  ;;  %v823_v17 = vcombine.high %v662_v23, %v662_v23  ;;  %v10364_v59 = vpop.f32.mrb[19].mxu1  ;;  %v830_v47 = vrot.slane %v662_v23, %v10330_v38  ;;  %v790_v16 = vcombine.high %v788_v55, %v788_v55 }
 0x1db   :  { %16171 = vst [vmem:[#allocation45_spill] sm:$0xff] %v10364_v59  ;;  %v879_v41 = vrot.slane %v811_v52, %v10147_v56  ;;  %v10369_v31 = vrot.slane %v819_v44, %v10147_v56  ;;  %v10372_v51 = vrot.slane %v804_v43, %v10147_v56  ;;  %v952_v15 = vadd.f32 %v875_v29, %v740_v12 }
 0x1dc   :  { %v837_v6 = vrot.slane %v823_v17, %v10330_v38  ;;  %v838_v23 = vcombine.high %v830_v47, %v830_v47  ;;  %v846_v44 = vrot.slane %v830_v47, %v10330_v38  ;;  %v9406_v12 = vpack.c.bf16 %v10345_v25, %v10332_v27 }
 0x1dd   :  { %v10375_v21 = vadd.f32 %v879_v41, %v742_v37  ;;  %v10378_v50 = vadd.f32 %v10369_v31, %v744_v45  ;;  %v10381_v42 = vadd.f32 %v10372_v51, %v748_v19  ;;  %v984_v40 = vmul.f32 0.2, %v952_v15 }
 0x1de   :  { %v10385_v59 = vrot.slane %v837_v6, %v10330_v38  ;;  %v741_v17 = vadd.f32 %v10345_v25, %v10203_v20  ;;  %v818_v37 = vrot.slane %v790_v16, %v10330_v38  ;;  %v10393_v45 = vrot.slane %v838_v23, %v10330_v38  ;;  %9407 = vmatprep.subr.bf16.mxu1 %v9406_v12  ;;  %v10406_v23 = vld [vmem:[%s15735_s8] ss:$0 sm:$0xff]  ;;  %s9835_s8 = smov 96  }
 0x1df   :  { %v868_v19 = vcombine.high %v846_v44, %v846_v44  ;;  %v907_v55 = vrot.slane %v846_v44, %v10147_v56  ;;  %9409 = vmatpush3.bf16.msra.mxu1 %v9406_v12  ;;  %v1016_v20 = vmax.f32 %v952_v15, %v984_v40  ;;  %v821_v3 = vcombine.high %v811_v52, %v811_v52 }
 0x1e0   :  { %v953_v48 = vadd.f32 %v875_v29, %v741_v17  ;;  %v911_v47 = vrot.slane %v10393_v45, %v10147_v56  ;;  %v923_v5 = vrot.slane %v10385_v59, %v10147_v56  ;;  %v820_v29 = vcombine.high %v804_v43, %v804_v43 }
 0x1e1   :  { %v915_v7 = vrot.slane %v868_v19, %v10147_v56  ;;  %v968_v16 = vadd.f32 %v907_v55, %v756_v9  ;;  %v10401_v0 = vadd.f32 %v907_v55, %v757_v46  ;;  %v822_v44 = vcombine.high %v818_v37, %v818_v37 }
 0x1e2   :  { %v10408_v17 = vadd.f32 %v911_v47, %v758_v53  ;;  %v10410_v62 = vadd.f32 %v911_v47, %v759_v2  ;;  %v839_v19 = vcombine.high %v837_v6, %v837_v6  ;;  %v10416_v40 = vadd.f32 %v923_v5, %v764_v33 }
 0x1e3   :  { %v10412_v58 = vadd.f32 %v915_v7, %v760_v24  ;;  %v10414_v12 = vadd.f32 %v915_v7, %v761_v10  ;;  %v977_v46 = vadd.f32 %v923_v5, %v765_v39  ;;  %v985_v9 = vmul.f32 0.2, %v953_v48 }
 0x1e4   :  { %v10419_v52 = vmul.f32 %v10406_v23, %v1016_v20  ;;  %v10422_v15 = vrot.slane %v821_v3, %v10147_v56  ;;  %v10425_v53 = vrot.slane %v818_v37, %v10147_v56  ;;  %v986_v2 = vmul.f32 0.2, %v10375_v21 }
 0x1e5   :  { %v743_v24 = vadd.f32 %v10345_v25, %v10219_v28  ;;  %v10431_v7 = vrot.slane %v820_v29, %v10147_v56  ;;  %v10434_v5 = vrot.slane %v822_v44, %v10147_v56  ;;  %v1009_v33 = vmul.f32 0.2, %v977_v46 }
 0x1e6   :  { %v1017_v10 = vmax.f32 %v953_v48, %v985_v9  ;;  %2715 = vrot.lane.b32.xlu1 %v10419_v52, %s9835_s8  ;;  %v10439_v3 = vrot.slane %v839_v19, %v10330_v38  ;;  %v988_v28 = vmul.f32 0.2, %v10378_v50  ;;  %v1000_v6 = vmul.f32 0.2, %v968_v16 }
 0x1e7   :  { %v955_v43 = vadd.f32 %v879_v41, %v743_v24  ;;  %v1041_v37 = vmax.f32 %v977_v46, %v1009_v33  ;;  %v745_v48 = vadd.f32 %v10345_v25, %v10235_v36  ;;  %v1001_v47 = vmul.f32 0.2, %v10401_v0 }
 0x1e8   :  { %v10445_v55 = vmul.f32 %v10406_v23, %v1017_v10  ;;  %v1018_v20 = vmax.f32 %v10375_v21, %v986_v2  ;;  %v10452_v29 = vmul.f32 0.2, %v10381_v42  ;;  %v10455_v19 = vmul.f32 0.2, %v10416_v40 }
 0x1e9   :  { %v987_v44 = vmul.f32 0.2, %v955_v43  ;;  %v10458_v41 = vmul.f32 %v10406_v23, %v1041_v37  ;;  %v957_v36 = vadd.f32 %v10369_v31, %v745_v48  ;;  %v749_v21 = vadd.f32 %v10345_v25, %v10266_v60 }
 0x1ea   :  { %2717 = vrot.lane.b32.xlu0 %v10445_v55, %s9835_s8  ;;  %4194 = vrot.lane.b32.xlu1 %v10419_v52, %s9836_s28  ;;  %v1020_v46 = vmax.f32 %v10378_v50, %v988_v28  ;;  %v958_v2 = vadd.f32 %v10422_v15, %v10351_v32  ;;  %v750_v24 = vadd.f32 %v10332_v27, %v10270_v1 }
 0x1eb   :  { %v1019_v9 = vmax.f32 %v955_v43, %v987_v44  ;;  %v989_v33 = vmul.f32 0.2, %v957_v36  ;;  %v961_v10 = vadd.f32 %v10372_v51, %v749_v21  ;;  %v752_v37 = vadd.f32 %v10332_v27, %v10278_v4 }
 0x1ec   :  { %v1032_v39 = vmax.f32 %v968_v16, %v1000_v6  ;;  %v1024_v31 = vmax.f32 %v10381_v42, %v10452_v29  ;;  %v990_v50 = vmul.f32 0.2, %v958_v2  ;;  %v962_v28 = vadd.f32 %v10425_v53, %v750_v24 }
 0x1ed   :  { %v10478_v60 = vmul.f32 %v10406_v23, %v1019_v9  ;;  %v1021_v1 = vmax.f32 %v957_v36, %v989_v33  ;;  %v993_v32 = vmul.f32 0.2, %v961_v10  ;;  %v964_v4 = vadd.f32 %v10431_v7, %v752_v37 }
 0x1ee   :  { %4196 = vrot.lane.b32.xlu0 %v10445_v55, %s9836_s28  ;;  %5671 = vrot.lane.b32.xlu1 %v10419_v52, %s9837_s29  ;;  %v10487_v51 = vmul.f32 %v10406_v23, %v1032_v39  ;;  %v1040_v42 = vmax.f32 %v10416_v40, %v10455_v19  ;;  %v10492_v16 = vmul.f32 %v10406_v23, %v1018_v20  ;;  %v994_v6 = vmul.f32 0.2, %v962_v28 }
 0x1ef   :  { %v1022_v43 = vmax.f32 %v958_v2, %v990_v50  ;;  %v10495_v48 = vmul.f32 %v10406_v23, %v1021_v1  ;;  %v1025_v29 = vmax.f32 %v961_v10, %v993_v32  ;;  %v996_v44 = vmul.f32 0.2, %v964_v4 }
 0x1f0   :  { %v747_v36 = vadd.f32 %v10345_v25, %v10253_v49  ;;  %v1026_v39 = vmax.f32 %v962_v28, %v994_v6  ;;  %v751_v40 = vadd.f32 %v10345_v25, %v10274_v63  ;;  %v753_v20 = vadd.f32 %v10345_v25, %v10282_v8 }
 0x1f1   :  { %v10500_v21 = vmul.f32 %v10406_v23, %v1022_v43  ;;  %v10511_v19 = vmul.f32 %v10406_v23, %v1025_v29  ;;  %v1028_v49 = vmax.f32 %v964_v4, %v996_v44  ;;  %v1033_v8 = vmax.f32 %v10401_v0, %v1001_v47 }
 0x1f2   :  { %5673 = vrot.lane.b32.xlu0 %v10445_v55, %s9837_s29  ;;  %2719 = vrot.lane.b32.xlu1 %v10492_v16, %s9835_s8  ;;  %v959_v9 = vadd.f32 %v10422_v15, %v747_v36  ;;  %v10515_v2 = vmul.f32 %v10406_v23, %v1026_v39  ;;  %v963_v63 = vadd.f32 %v10425_v53, %v751_v40  ;;  %v1002_v53 = vmul.f32 0.2, %v10408_v17 }
 0x1f3   :  { %v965_v24 = vadd.f32 %v10431_v7, %v753_v20  ;;  %v10521_v33 = vmul.f32 %v10406_v23, %v1020_v46  ;;  %v10524_v10 = vmul.f32 %v10406_v23, %v1028_v49  ;;  %v754_v50 = vadd.f32 %v10332_v27, %v10286_v11 }
 0x1f4   :  { %v991_v37 = vmul.f32 0.2, %v959_v9  ;;  %v995_v15 = vmul.f32 0.2, %v963_v63  ;;  %v10529_v1 = vmul.f32 %v10406_v23, %v1033_v8  ;;  %v870_v0 = vcombine.high %v10393_v45, %v10393_v45 }
 0x1f5   :  { %v997_v28 = vmul.f32 0.2, %v965_v24  ;;  %v966_v47 = vadd.f32 %v10434_v5, %v754_v50  ;;  %v1004_v46 = vmul.f32 0.2, %v10412_v58  ;;  %v10539_v11 = vmul.f32 %v10406_v23, %v1024_v31 }
 0x1f6   :  { %2723 = vrot.lane.b32.xlu1 %v10521_v33, %s9835_s8  ;;  %v1023_v7 = vmax.f32 %v959_v9, %v991_v37  ;;  %v1027_v32 = vmax.f32 %v963_v63, %v995_v15  ;;  %v1034_v43 = vmax.f32 %v10408_v17, %v1002_v53  ;;  %v10547_v44 = vmul.f32 %v10406_v23, %v1040_v42 }
 0x1f7   :  { %v1029_v4 = vmax.f32 %v965_v24, %v997_v28  ;;  %v998_v29 = vmul.f32 0.2, %v966_v47  ;;  %v1036_v45 = vmax.f32 %v10412_v58, %v1004_v46  ;;  %v919_v58 = vrot.slane %v870_v0, %v10147_v56 }
 0x1f8   :  { %v10543_v6 = vmul.f32 %v10406_v23, %v1023_v7  ;;  %v10550_v36 = vmul.f32 %v10406_v23, %v1027_v32  ;;  %v10556_v31 = vmul.f32 %v10406_v23, %v1034_v43  ;;  %v927_v42 = vrot.slane %v10439_v3, %v10147_v56 }
 0x1f9   :  { %v10553_v39 = vmul.f32 %v10406_v23, %v1029_v4  ;;  %v1030_v17 = vmax.f32 %v966_v47, %v998_v29  ;;  %v10561_v40 = vmul.f32 %v10406_v23, %v1036_v45  ;;  %v16172_v20 = vcombine.high %v10385_v59, %v10385_v59 }
 0x1fa   :  { %2731 = vrot.lane.b32.xlu1 %v10539_v11, %s9835_s8  ;;  %v755_v9 = vadd.f32 %v10345_v25, %v10290_v13  ;;  %v1003_v24 = vmul.f32 0.2, %v10410_v62  ;;  %v1005_v8 = vmul.f32 0.2, %v10414_v12  ;;  %v762_v50 = vadd.f32 %v10332_v27, %v10306_v35 }
 0x1fb   :  { %v931_v49 = vrot.slane %v16172_v20, %v10147_v56  ;;  %v10573_v63 = vmul.f32 %v10406_v23, %v1030_v17  ;;  %v766_v15 = vadd.f32 %v10332_v27, %v10191_v14  ;;  %v768_v59 = vadd.f32 %v10332_v27, %v10207_v22 }
 0x1fc   :  { %v967_v37 = vadd.f32 %v10434_v5, %v755_v9  ;;  %v871_v13 = vcombine.high %v10439_v3, %v10439_v3  ;;  %v1035_v28 = vmax.f32 %v10410_v62, %v1003_v24  ;;  %v1037_v53 = vmax.f32 %v10414_v12, %v1005_v8 }
 0x1fd   :  { %v974_v0 = vadd.f32 %v919_v58, %v762_v50  ;;  %v978_v7 = vadd.f32 %v927_v42, %v766_v15  ;;  %v980_v35 = vadd.f32 %v931_v49, %v768_v59  ;;  %v763_v62 = vadd.f32 %v10345_v25, %v10310_v61 }
 0x1fe   :  { %4198 = vrot.lane.b32.xlu1 %v10492_v16, %s9836_s28  ;;  %v999_v5 = vmul.f32 0.2, %v967_v37  ;;  %v10591_v47 = vmul.f32 %v10406_v23, %v1035_v28  ;;  %v10594_v14 = vmul.f32 %v10406_v23, %v1037_v53  ;;  %v935_v4 = vrot.slane %v871_v13, %v10147_v56 }
 0x1ff   :  { %v1006_v46 = vmul.f32 0.2, %v974_v0  ;;  %v1010_v3 = vmul.f32 0.2, %v978_v7  ;;  %v1012_v32 = vmul.f32 0.2, %v980_v35  ;;  %v767_v12 = vadd.f32 %v10345_v25, %v10199_v18 }
 0x200   :  { %v1031_v22 = vmax.f32 %v967_v37, %v999_v5  ;;  %v975_v20 = vadd.f32 %v919_v58, %v763_v62  ;;  %v769_v24 = vadd.f32 %v10345_v25, %v10215_v26  ;;  %v770_v8 = vadd.f32 %v10332_v27, %v10223_v30 }
 0x201   :  { %v1038_v29 = vmax.f32 %v974_v0, %v1006_v46  ;;  %v1042_v45 = vmax.f32 %v978_v7, %v1010_v3  ;;  %v1044_v17 = vmax.f32 %v980_v35, %v1012_v32  ;;  %v979_v9 = vadd.f32 %v927_v42, %v767_v12 }
 0x202   :  { %4202 = vrot.lane.b32.xlu1 %v10521_v33, %s9836_s28  ;;  %v10604_v43 = vmul.f32 %v10406_v23, %v1031_v22  ;;  %v1007_v58 = vmul.f32 0.2, %v975_v20  ;;  %v981_v50 = vadd.f32 %v931_v49, %v769_v24  ;;  %v982_v15 = vadd.f32 %v935_v4, %v770_v8 }
 0x203   :  { %v10611_v37 = vmul.f32 %v10406_v23, %v1038_v29  ;;  %v10614_v61 = vmul.f32 %v10406_v23, %v1042_v45  ;;  %v10617_v18 = vmul.f32 %v10406_v23, %v1044_v17  ;;  %v1011_v42 = vmul.f32 0.2, %v979_v9 }
 0x204   :  { %v771_v26 = vadd.f32 %v10345_v25, %v10231_v34  ;;  %v1039_v30 = vmax.f32 %v975_v20, %v1007_v58  ;;  %v1013_v13 = vmul.f32 0.2, %v981_v50  ;;  %v1014_v28 = vmul.f32 0.2, %v982_v15  ;;  %v10750_v58 = vpop.permute.xlu0 %1189 }
 0x205   :  { %v1043_v59 = vmax.f32 %v979_v9, %v1011_v42  ;;  %v10625_v5 = vpack.i.bf16 %v10345_v25, %v10332_v27  ;;  %v1086_v3 = vsel %vm580_vm3, %v10419_v52, 0.0  ;;  %v1089_v32 = vsel %vm580_vm3, %v10445_v55, 0.0  ;;  %16185 = vst [vmem:[#allocation58_spill] sm:$0xff] %v10750_v58 }
 0x206   :  { %4210 = vrot.lane.b32.xlu1 %v10539_v11, %s9836_s28  ;;  %v983_v53 = vadd.f32 %v935_v4, %v771_v26  ;;  %v10630_v0 = vmul.f32 %v10406_v23, %v1039_v30  ;;  %v1045_v7 = vmax.f32 %v981_v50, %v1013_v13  ;;  %v1046_v34 = vmax.f32 %v982_v15, %v1014_v28  ;;  %v10700_v4 = vpop.f32.mrb[51].mxu0 }
 0x207   :  { %16173 = vst [vmem:[#allocation46_spill] sm:$0xff] %v10625_v5  ;;  %v10633_v49 = vmul.f32 %v10406_v23, %v1043_v59  ;;  %v1095_v52 = vsel %vm580_vm3, %v10478_v60, 0.0  ;;  %v1101_v55 = vsel %vm580_vm3, %v10495_v48, 0.0  ;;  %16175 = vst [vmem:[#allocation48_spill] sm:$0xff] %v10700_v4  ;;  %v1107_v9 = vsel %vm580_vm3, %v10543_v6, 0.0 }
 0x208   :  { %v1015_v35 = vmul.f32 0.2, %v983_v53  ;;  %v10636_v22 = vmul.f32 %v10406_v23, %v1045_v7  ;;  %v10639_v46 = vmul.f32 %v10406_v23, %v1046_v34  ;;  %v1119_v8 = vsel %vm580_vm3, %v10550_v36, 0.0  ;;  %v10760_v15 = vpop.permute.xlu0 %1211 }
 0x209   :  { %v1125_v50 = vsel %vm580_vm3, %v10553_v39, 0.0  ;;  %16187 = vst [vmem:[#allocation60_spill] sm:$0xff] %v10760_v15  ;;  %v1137_v26 = vsel %vm580_vm3, %v10529_v1, 0.0  ;;  %v1131_v56 = vsel %vm580_vm3, %v10604_v43, 0.0 }
 0x20a   :  { %5675 = vrot.lane.b32.xlu1 %v10492_v16, %s9837_s29  ;;  %v1047_v25 = vmax.f32 %v983_v53, %v1015_v35  ;;  %v1104_v35 = vsel %vm580_vm3, %v10500_v21, 0.0 }
 0x20c   :  { %v10644_v27 = vmul.f32 %v10406_v23, %v1047_v25  ;;  %v1092_v23 = vsel %vm580_vm3, %v10492_v16, 0.0  ;;  %v1113_v16 = vsel %vm580_vm3, %v10511_v19, 0.0 }
 0x20e   :  { %5679 = vrot.lane.b32.xlu1 %v10521_v33, %s9837_s29 }
 0x211   :  { %1087 = vadd.xlane.f32.xlu0 %v1086_v3  ;;  %v1116_v3 = vsel %vm580_vm3, %v10515_v2, 0.0 }
 0x212   :  { %5687 = vrot.lane.b32.xlu1 %v10539_v11, %s9837_s29 }
 0x215   :  { %1090 = vadd.xlane.f32.xlu0 %v1089_v32 }
 0x22b   :  { %2721 = vrot.lane.b32.xlu0 %v10478_v60, %s9835_s8 }
 0x22f   :  { %2725 = vrot.lane.b32.xlu0 %v10495_v48, %s9835_s8 }
 0x233   :  { %2733 = vrot.lane.b32.xlu0 %v10511_v19, %s9835_s8 }
 0x236   :  { %1093 = vadd.xlane.f32.xlu1 %v1092_v23  ;;  %v1122_v23 = vsel %vm580_vm3, %v10524_v10, 0.0 }
 0x237   :  { %4200 = vrot.lane.b32.xlu0 %v10478_v60, %s9836_s28 }
 0x23a   :  { %1096 = vadd.xlane.f32.xlu1 %v1095_v52 }
 0x23b   :  { %4204 = vrot.lane.b32.xlu0 %v10495_v48, %s9836_s28 }
 0x23e   :  { %1102 = vadd.xlane.f32.xlu1 %v1101_v55 }
 0x23f   :  { %4212 = vrot.lane.b32.xlu0 %v10511_v19, %s9836_s28 }
 0x242   :  { %1114 = vadd.xlane.f32.xlu1 %v1113_v16 }
 0x243   :  { %5677 = vrot.lane.b32.xlu0 %v10478_v60, %s9837_s29  ;;  %v1098_v60 = vsel %vm580_vm3, %v10521_v33, 0.0 }
 0x247   :  { %5681 = vrot.lane.b32.xlu0 %v10495_v48, %s9837_s29  ;;  %v10694_v48 = vpop.permute.xlu1 %1193 }
 0x248   :  { %16174 = vst [vmem:[#allocation47_spill] sm:$0xff] %v10694_v48 }
 0x24b   :  { %5689 = vrot.lane.b32.xlu0 %v10511_v19, %s9837_s29  ;;  %v1110_v19 = vsel %vm580_vm3, %v10539_v11, 0.0  ;;  %v10702_v62 = vpop.permute.xlu1 %1200 }
 0x24c   :  { %16176 = vst [vmem:[#allocation49_spill] sm:$0xff] %v10702_v62  ;;  %v1170_v62 = vsel %vm580_vm3, %v10617_v18, 0.0 }
 0x24f   :  { %v10708_v33 = vpop.permute.xlu1 %1204 }
 0x250   :  { %16177 = vst [vmem:[#allocation50_spill] sm:$0xff] %v10708_v33 }
 0x253   :  { %2727 = vrot.lane.b32.xlu1 %v10500_v21, %s9835_s8  ;;  %v10712_v11 = vpop.permute.xlu1 %1215 }
 0x254   :  { %16178 = vst [vmem:[#allocation51_spill] sm:$0xff] %v10712_v11 }
 0x257   :  { %2735 = vrot.lane.b32.xlu1 %v10515_v2, %s9835_s8  ;;  %v10718_v12 = vpop.permute.xlu1 %1226 }
 0x258   :  { %16179 = vst [vmem:[#allocation52_spill] sm:$0xff] %v10718_v12 }
 0x25b   :  { %2739 = vrot.lane.b32.xlu1 %v10524_v10, %s9835_s8  ;;  %v10722_v29 = vpop.permute.xlu1 %1237 }
 0x25c   :  { %16180 = vst [vmem:[#allocation53_spill] sm:$0xff] %v10722_v29  ;;  %v1140_v29 = vsel %vm580_vm3, %v10556_v31, 0.0 }
 0x25f   :  { %2747 = vrot.lane.b32.xlu1 %v10487_v51, %s9835_s8  ;;  %v10728_v45 = vpop.permute.xlu1 %1248 }
 0x260   :  { %16181 = vst [vmem:[#allocation54_spill] sm:$0xff] %v10728_v45 }
 0x263   :  { %4226 = vrot.lane.b32.xlu1 %v10487_v51, %s9836_s28  ;;  %v10732_v17 = vpop.permute.xlu1 %1259 }
 0x264   :  { %16182 = vst [vmem:[#allocation55_spill] sm:$0xff] %v10732_v17  ;;  %v1128_v17 = vsel %vm580_vm3, %v10573_v63, 0.0 }
 0x267   :  { %4206 = vrot.lane.b32.xlu1 %v10500_v21, %s9836_s28  ;;  %v10738_v20 = vpop.permute.xlu1 %1270 }
 0x268   :  { %16183 = vst [vmem:[#allocation56_spill] sm:$0xff] %v10738_v20 }
 0x26a   :  { %1099 = vadd.xlane.f32.xlu0 %v1098_v60 }
 0x26b   :  { %4214 = vrot.lane.b32.xlu1 %v10515_v2, %s9836_s28  ;;  %v10744_v24 = vpop.permute.xlu1 %1281 }
 0x26c   :  { %16184 = vst [vmem:[#allocation57_spill] sm:$0xff] %v10744_v24 }
 0x26e   :  { %1111 = vadd.xlane.f32.xlu0 %v1110_v19 }
 0x26f   :  { %4218 = vrot.lane.b32.xlu1 %v10524_v10, %s9836_s28  ;;  %v10754_v42 = vpop.permute.xlu1 %1292 }
 0x270   :  { %16186 = vst [vmem:[#allocation59_spill] sm:$0xff] %v10754_v42 }
 0x273   :  { %5703 = vrot.lane.b32.xlu1 %v10487_v51, %s9837_s29  ;;  %v10764_v30 = vpop.permute.xlu1 %1303 }
 0x274   :  { %16188 = vst [vmem:[#allocation61_spill] sm:$0xff] %v10764_v30 }
 0x277   :  { %5683 = vrot.lane.b32.xlu1 %v10500_v21, %s9837_s29  ;;  %v10770_v59 = vpop.permute.xlu1 %1314 }
 0x278   :  { %16190 = vst [vmem:[#allocation63_spill] sm:$0xff] %v10770_v59 }
 0x27b   :  { %5691 = vrot.lane.b32.xlu1 %v10515_v2, %s9837_s29  ;;  %v10774_v28 = vpop.permute.xlu1 %1325  ;;  %v1134_v2 = vsel %vm580_vm3, %v10487_v51, 0.0 }
 0x27c   :  { %16192 = vst [vmem:[#allocation65_spill] sm:$0xff] %v10774_v28  ;;  %v1149_v28 = vsel %vm580_vm3, %v10594_v14, 0.0 }
 0x27f   :  { %5695 = vrot.lane.b32.xlu1 %v10524_v10, %s9837_s29 }
 0x284   :  { %2729 = vrot.lane.b32.xlu0 %v10543_v6, %s9835_s8 }
 0x288   :  { %2737 = vrot.lane.b32.xlu0 %v10550_v36, %s9835_s8 }
 0x28c   :  { %2741 = vrot.lane.b32.xlu0 %v10553_v39, %s9835_s8 }
 0x290   :  { %2749 = vrot.lane.b32.xlu0 %v10529_v1, %s9835_s8 }
 0x294   :  { %4228 = vrot.lane.b32.xlu0 %v10529_v1, %s9836_s28 }
 0x298   :  { %4208 = vrot.lane.b32.xlu0 %v10543_v6, %s9836_s28 }
 0x29c   :  { %4216 = vrot.lane.b32.xlu0 %v10550_v36, %s9836_s28 }
 0x2a0   :  { %4220 = vrot.lane.b32.xlu0 %v10553_v39, %s9836_s28 }
 0x2a3   :  { %1108 = vadd.xlane.f32.xlu1 %v1107_v9 }
 0x2a4   :  { %5705 = vrot.lane.b32.xlu0 %v10529_v1, %s9837_s29  ;;  %v10780_v1 = vpop.permute.xlu1 %1336 }
 0x2a5   :  { %16194 = vst [vmem:[#allocation67_spill] sm:$0xff] %v10780_v1 }
 0x2a7   :  { %1120 = vadd.xlane.f32.xlu1 %v1119_v8 }
 0x2a8   :  { %5685 = vrot.lane.b32.xlu0 %v10543_v6, %s9837_s29  ;;  %v10768_v6 = vpop.permute.xlu0 %1222 }
 0x2a9   :  { %16189 = vst [vmem:[#allocation62_spill] sm:$0xff] %v10768_v6  ;;  %v1152_v6 = vsel %vm580_vm3, %v10611_v37, 0.0 }
 0x2ab   :  { %1126 = vadd.xlane.f32.xlu1 %v1125_v50 }
 0x2ac   :  { %5693 = vrot.lane.b32.xlu0 %v10550_v36, %s9837_s29  ;;  %v10772_v13 = vpop.permute.xlu0 %1233 }
 0x2ad   :  { %16191 = vst [vmem:[#allocation64_spill] sm:$0xff] %v10772_v13 }
 0x2af   :  { %1138 = vadd.xlane.f32.xlu1 %v1137_v26 }
 0x2b0   :  { %5697 = vrot.lane.b32.xlu0 %v10553_v39, %s9837_s29  ;;  %v10776_v36 = vpop.permute.xlu0 %1244  ;;  %v10786_v39 = vpop.permute.xlu1 %1347 }
 0x2b1   :  { %16193 = vst [vmem:[#allocation66_spill] sm:$0xff] %v10776_v36  ;;  %16196 = vst [vmem:[#allocation69_spill] sm:$0xff] %v10786_v39 }
 0x2b4   :  { %v10784_v53 = vpop.permute.xlu0 %1255  ;;  %v10794_v34 = vpop.permute.xlu1 %1358 }
 0x2b5   :  { %16195 = vst [vmem:[#allocation68_spill] sm:$0xff] %v10784_v53  ;;  %16198 = vst [vmem:[#allocation71_spill] sm:$0xff] %v10794_v34  ;;  %v1143_v34 = vsel %vm580_vm3, %v10591_v47, 0.0 }
 0x2b8   :  { %v10790_v7 = vpop.permute.xlu0 %1266  ;;  %v10804_v32 = vpop.permute.xlu1 %2715 }
 0x2b9   :  { %16197 = vst [vmem:[#allocation70_spill] sm:$0xff] %v10790_v7 }
 0x2bc   :  { %v10800_v25 = vpop.permute.xlu0 %1277  ;;  %v10814_v21 = vpop.permute.xlu1 %4194 }
 0x2bd   :  { %16199 = vst [vmem:[#allocation72_spill] sm:$0xff] %v10800_v25  ;;  %v1173_v25 = vsel %vm580_vm3, %v10636_v22, 0.0 }
 0x2c0   :  { %2743 = vrot.lane.b32.xlu1 %v10573_v63, %s9835_s8  ;;  %v10810_v52 = vpop.permute.xlu0 %1288  ;;  %v10822_v16 = vpop.permute.xlu1 %5671 }
 0x2c1   :  { %16200 = vst [vmem:[#allocation73_spill] sm:$0xff] %v10810_v52 }
 0x2c4   :  { %2751 = vrot.lane.b32.xlu1 %v10556_v31, %s9835_s8  ;;  %v10820_v55 = vpop.permute.xlu0 %1299  ;;  %v10830_v60 = vpop.permute.xlu1 %2719 }
 0x2c5   :  { %16201 = vst [vmem:[#allocation74_spill] sm:$0xff] %v10820_v55  ;;  %v1167_v55 = vsel %vm580_vm3, %v10633_v49, 0.0 }
 0x2c8   :  { %2755 = vrot.lane.b32.xlu1 %v10561_v40, %s9835_s8  ;;  %v10826_v10 = vpop.permute.xlu0 %1310  ;;  %v10836_v19 = vpop.permute.xlu1 %2723 }
 0x2c9   :  { %16202 = vst [vmem:[#allocation75_spill] sm:$0xff] %v10826_v10 }
 0x2cc   :  { %2763 = vrot.lane.b32.xlu1 %v10547_v44, %s9835_s8  ;;  %v10834_v51 = vpop.permute.xlu0 %1321  ;;  %v10842_v8 = vpop.permute.xlu1 %2731 }
 0x2cd   :  { %16203 = vst [vmem:[#allocation76_spill] sm:$0xff] %v10834_v51  ;;  %v1155_v51 = vsel %vm580_vm3, %v10630_v0, 0.0 }
 0x2cf   :  { %1105 = vadd.xlane.f32.xlu0 %v1104_v35 }
 0x2d0   :  { %4230 = vrot.lane.b32.xlu1 %v10556_v31, %s9836_s28  ;;  %v10840_v9 = vpop.permute.xlu0 %1332  ;;  %v10850_v26 = vpop.permute.xlu1 %4198 }
 0x2d1   :  { %16204 = vst [vmem:[#allocation77_spill] sm:$0xff] %v10840_v9 }
 0x2d3   :  { %1117 = vadd.xlane.f32.xlu0 %v1116_v3 }
 0x2d4   :  { %4234 = vrot.lane.b32.xlu1 %v10561_v40, %s9836_s28  ;;  %v10846_v50 = vpop.permute.xlu0 %1343  ;;  %v10856_v3 = vpop.permute.xlu1 %4202 }
 0x2d5   :  { %16205 = vst [vmem:[#allocation78_spill] sm:$0xff] %v10846_v50 }
 0x2d7   :  { %1123 = vadd.xlane.f32.xlu0 %v1122_v23 }
 0x2d8   :  { %4242 = vrot.lane.b32.xlu1 %v10547_v44, %s9836_s28  ;;  %v10854_v35 = vpop.permute.xlu0 %1354 }
 0x2d9   :  { %16206 = vst [vmem:[#allocation79_spill] sm:$0xff] %v10854_v35 }
 0x2db   :  { %1135 = vadd.xlane.f32.xlu0 %v1134_v2  ;;  %v10864_v2 = vpop.permute.xlu1 %4210 }
 0x2dc   :  { %5707 = vrot.lane.b32.xlu1 %v10556_v31, %s9837_s29  ;;  %v10860_v23 = vpop.permute.xlu0 %2717  ;;  %v1158_v31 = vsel %vm580_vm3, %v10547_v44, 0.0 }
 0x2df   :  { %v10870_v38 = vpop.permute.xlu1 %5675 }
 0x2e0   :  { %4222 = vrot.lane.b32.xlu1 %v10573_v63, %s9836_s28  ;;  %v10868_v4 = vpop.permute.xlu0 %4196 }
 0x2e3   :  { %v10878_v57 = vpop.permute.xlu1 %5679 }
 0x2e4   :  { %5711 = vrot.lane.b32.xlu1 %v10561_v40, %s9837_s29  ;;  %v10874_v5 = vpop.permute.xlu0 %5673 }
 0x2e7   :  { %v10888_v39 = vpop.permute.xlu1 %5687 }
 0x2e8   :  { %5719 = vrot.lane.b32.xlu1 %v10547_v44, %s9837_s29  ;;  %v10882_v54 = vpop.xlane.xlu0 %1087 }
 0x2e9   :  { %16207 = vst [vmem:[#allocation80_spill] sm:$0xff] %v10882_v54 }
 0x2ec   :  { %5699 = vrot.lane.b32.xlu1 %v10573_v63, %s9837_s29  ;;  %v10892_v1 = vpop.xlane.xlu0 %1090  ;;  %v1146_v63 = vsel %vm580_vm3, %v10561_v40, 0.0 }
 0x2ed   :  { %16208 = vst [vmem:[#allocation81_spill] sm:$0xff] %v10892_v1 }
 0x2f1   :  { %2745 = vrot.lane.b32.xlu0 %v10604_v43, %s9835_s8 }
 0x2f5   :  { %2753 = vrot.lane.b32.xlu0 %v10591_v47, %s9835_s8 }
 0x2f9   :  { %2757 = vrot.lane.b32.xlu0 %v10594_v14, %s9835_s8 }
 0x2fd   :  { %2765 = vrot.lane.b32.xlu0 %v10458_v41, %s9835_s8 }
 0x301   :  { %4232 = vrot.lane.b32.xlu0 %v10591_v47, %s9836_s28 }
 0x305   :  { %4236 = vrot.lane.b32.xlu0 %v10594_v14, %s9836_s28 }
 0x309   :  { %4244 = vrot.lane.b32.xlu0 %v10458_v41, %s9836_s28 }
 0x30d   :  { %5709 = vrot.lane.b32.xlu0 %v10591_v47, %s9837_s29  ;;  %v1161_v47 = vsel %vm580_vm3, %v10458_v41, 0.0 }
 0x310   :  { %1132 = vadd.xlane.f32.xlu1 %v1131_v56  ;;  %v10896_v56 = vpop.xlane.xlu1 %1093 }
 0x311   :  { %4224 = vrot.lane.b32.xlu0 %v10604_v43, %s9836_s28  ;;  %16209 = vst [vmem:[#allocation82_spill] sm:$0xff] %v10896_v56 }
 0x314   :  { %1144 = vadd.xlane.f32.xlu1 %v1143_v34  ;;  %v10902_v34 = vpop.permute.xlu0 %2721  ;;  %v10906_v59 = vpop.xlane.xlu1 %1096 }
 0x315   :  { %5713 = vrot.lane.b32.xlu0 %v10594_v14, %s9837_s29  ;;  %16210 = vst [vmem:[#allocation83_spill] sm:$0xff] %v10906_v59 }
 0x318   :  { %1150 = vadd.xlane.f32.xlu1 %v1149_v28  ;;  %v10908_v30 = vpop.permute.xlu0 %2725  ;;  %v10910_v14 = vpop.xlane.xlu1 %1102 }
 0x319   :  { %5721 = vrot.lane.b32.xlu0 %v10458_v41, %s9837_s29  ;;  %16211 = vst [vmem:[#allocation84_spill] sm:$0xff] %v10910_v14 }
 0x31c   :  { %1162 = vadd.xlane.f32.xlu1 %v1161_v47  ;;  %v10912_v28 = vpop.permute.xlu0 %2733  ;;  %v10914_v42 = vpop.xlane.xlu1 %1114 }
 0x31d   :  { %5701 = vrot.lane.b32.xlu0 %v10604_v43, %s9837_s29  ;;  %16212 = vst [vmem:[#allocation85_spill] sm:$0xff] %v10914_v42 }
 0x320   :  { %v10918_v41 = vpop.permute.xlu0 %4200  ;;  %v10920_v47 = vpop.permute.xlu1 %2727 }
 0x324   :  { %v10924_v43 = vpop.permute.xlu0 %4204  ;;  %v10928_v24 = vpop.permute.xlu1 %2735 }
 0x328   :  { %v10932_v20 = vpop.permute.xlu0 %4212  ;;  %v10936_v45 = vpop.permute.xlu1 %2739 }
 0x32c   :  { %v10942_v42 = vpop.permute.xlu0 %5677  ;;  %v10946_v12 = vpop.permute.xlu1 %2747 }
 0x32d   :  { %2759 = vrot.lane.b32.xlu1 %v10611_v37, %s9835_s8 }
 0x331   :  { %2767 = vrot.lane.b32.xlu1 %v10614_v61, %s9835_s8 }
 0x335   :  { %2771 = vrot.lane.b32.xlu1 %v10617_v18, %s9835_s8 }
 0x339   :  { %4238 = vrot.lane.b32.xlu1 %v10611_v37, %s9836_s28 }
 0x33c   :  { %1129 = vadd.xlane.f32.xlu0 %v1128_v17  ;;  %v10952_v17 = vpop.permute.xlu0 %5681 }
 0x33d   :  { %4246 = vrot.lane.b32.xlu1 %v10614_v61, %s9836_s28 }
 0x340   :  { %1141 = vadd.xlane.f32.xlu0 %v1140_v29  ;;  %v10956_v29 = vpop.permute.xlu1 %4226  ;;  %v10960_v11 = vpop.permute.xlu0 %5689 }
 0x341   :  { %4250 = vrot.lane.b32.xlu1 %v10617_v18, %s9836_s28 }
 0x344   :  { %1147 = vadd.xlane.f32.xlu0 %v1146_v63  ;;  %v10964_v40 = vpop.permute.xlu1 %4206  ;;  %v10966_v63 = vpop.xlane.xlu0 %1099 }
 0x345   :  { %5715 = vrot.lane.b32.xlu1 %v10611_v37, %s9837_s29  ;;  %16213 = vst [vmem:[#allocation86_spill] sm:$0xff] %v10966_v63 }
 0x348   :  { %1159 = vadd.xlane.f32.xlu0 %v1158_v31  ;;  %v10968_v14 = vpop.permute.xlu1 %4214  ;;  %v10970_v33 = vpop.xlane.xlu0 %1111 }
 0x349   :  { %5723 = vrot.lane.b32.xlu1 %v10614_v61, %s9837_s29  ;;  %16214 = vst [vmem:[#allocation87_spill] sm:$0xff] %v10970_v33  ;;  %v1164_v33 = vsel %vm580_vm3, %v10614_v61, 0.0 }
 0x34c   :  { %v10972_v44 = vpop.permute.xlu1 %4218  ;;  %v10974_v31 = vpop.permute.xlu0 %2729 }
 0x34d   :  { %5727 = vrot.lane.b32.xlu1 %v10617_v18, %s9837_s29  ;;  %v2811_v18 = vsel %vm580_vm3, %v10804_v32, 0.0  ;;  %v5767_v32 = vsel %vm580_vm3, %v10822_v16, 0.0  ;;  %v4302_v16 = vsel %vm580_vm3, %v10856_v3, 0.0  ;;  %v5779_v3 = vsel %vm580_vm3, %v10878_v57, 0.0 }
 0x350   :  { %v10978_v59 = vpop.permute.xlu1 %5703  ;;  %v10982_v54 = vpop.permute.xlu0 %2737 }
 0x354   :  { %v10986_v58 = vpop.permute.xlu1 %5683  ;;  %v10988_v35 = vpop.permute.xlu0 %2741 }
 0x358   :  { %v10992_v50 = vpop.permute.xlu1 %5691  ;;  %v10996_v9 = vpop.permute.xlu0 %2749 }
 0x35c   :  { %v11002_v10 = vpop.permute.xlu1 %5695  ;;  %v11006_v52 = vpop.permute.xlu0 %4228 }
 0x35e   :  { %2761 = vrot.lane.b32.xlu0 %v10630_v0, %s9835_s8 }
 0x360   :  { %v11010_v7 = vpop.xlane.xlu1 %1108 }
 0x361   :  { %16215 = vst [vmem:[#allocation88_spill] sm:$0xff] %v11010_v7 }
 0x362   :  { %2769 = vrot.lane.b32.xlu0 %v10633_v49, %s9835_s8 }
 0x364   :  { %v11018_v53 = vpop.xlane.xlu1 %1120 }
 0x365   :  { %16216 = vst [vmem:[#allocation89_spill] sm:$0xff] %v11018_v53 }
 0x366   :  { %2773 = vrot.lane.b32.xlu0 %v10636_v22, %s9835_s8 }
 0x368   :  { %v11024_v36 = vpop.xlane.xlu1 %1126 }
 0x369   :  { %16217 = vst [vmem:[#allocation90_spill] sm:$0xff] %v11024_v36 }
 0x36a   :  { %4240 = vrot.lane.b32.xlu0 %v10630_v0, %s9836_s28 }
 0x36c   :  { %v11028_v7 = vpop.xlane.xlu1 %1138 }
 0x36d   :  { %16218 = vst [vmem:[#allocation91_spill] sm:$0xff] %v11028_v7 }
 0x36e   :  { %4248 = vrot.lane.b32.xlu0 %v10633_v49, %s9836_s28 }
 0x371   :  { %1156 = vadd.xlane.f32.xlu1 %v1155_v51  ;;  %v11016_v51 = vpop.permute.xlu0 %4208 }
 0x372   :  { %4252 = vrot.lane.b32.xlu0 %v10636_v22, %s9836_s28 }
 0x375   :  { %1168 = vadd.xlane.f32.xlu1 %v1167_v55  ;;  %v11022_v55 = vpop.permute.xlu0 %4216 }
 0x376   :  { %5717 = vrot.lane.b32.xlu0 %v10630_v0, %s9837_s29 }
 0x379   :  { %1174 = vadd.xlane.f32.xlu1 %v1173_v25  ;;  %v11026_v0 = vpop.permute.xlu0 %4220 }
 0x37a   :  { %5725 = vrot.lane.b32.xlu0 %v10633_v49, %s9837_s29  ;;  %v11036_v49 = vpop.permute.xlu1 %2743 }
 0x37d   :  { %v11032_v25 = vpop.permute.xlu0 %5705 }
 0x37e   :  { %5729 = vrot.lane.b32.xlu0 %v10636_v22, %s9837_s29  ;;  %v11042_v36 = vpop.permute.xlu1 %2751 }
 0x381   :  { %v11040_v22 = vpop.permute.xlu0 %5685 }
 0x382   :  { %v11046_v7 = vpop.permute.xlu1 %2755 }
 0x385   :  { %v11044_v53 = vpop.permute.xlu0 %5693 }
 0x386   :  { %v11054_v15 = vpop.permute.xlu1 %2763 }
 0x389   :  { %v11050_v13 = vpop.permute.xlu0 %5697 }
 0x38a   :  { %2775 = vrot.lane.b32.xlu1 %v10639_v46, %s9835_s8  ;;  %v11060_v56 = vpop.permute.xlu1 %4230 }
 0x38d   :  { %v11056_v63 = vpop.xlane.xlu0 %1105 }
 0x38e   :  { %4254 = vrot.lane.b32.xlu1 %v10639_v46, %s9836_s28  ;;  %16219 = vst [vmem:[#allocation92_spill] sm:$0xff] %v11056_v63  ;;  %v11064_v37 = vpop.permute.xlu1 %4234 }
 0x391   :  { %v11062_v48 = vpop.xlane.xlu0 %1117 }
 0x392   :  { %5731 = vrot.lane.b32.xlu1 %v10639_v46, %s9837_s29  ;;  %16220 = vst [vmem:[#allocation93_spill] sm:$0xff] %v11062_v48  ;;  %v11068_v1 = vpop.permute.xlu1 %4242  ;;  %v2835_v48 = vsel %vm580_vm3, %v10842_v8, 0.0 }
 0x396   :  { %v11074_v63 = vpop.permute.xlu1 %5707 }
 0x39d   :  { %1153 = vadd.xlane.f32.xlu0 %v1152_v6  ;;  %v11066_v6 = vpop.xlane.xlu0 %1123 }
 0x39e   :  { %16221 = vst [vmem:[#allocation94_spill] sm:$0xff] %v11066_v6  ;;  %v4290_v6 = vsel %vm580_vm3, %v10814_v21, 0.0  ;;  %v2823_v21 = vsel %vm580_vm3, %v10836_v19, 0.0  ;;  %v4314_v19 = vsel %vm580_vm3, %v10864_v2, 0.0  ;;  %v5791_v2 = vsel %vm580_vm3, %v10888_v39, 0.0 }
 0x39f   :  { %v2841_v39 = vsel %vm580_vm3, %v10928_v24, 0.0  ;;  %v2859_v24 = vsel %vm580_vm3, %v10946_v12, 0.0  ;;  %v4308_v12 = vsel %vm580_vm3, %v10964_v40, 0.0  ;;  %v4326_v40 = vsel %vm580_vm3, %v10972_v44, 0.0 }
 0x3a0   :  { %v4299_v44 = vsel %vm580_vm3, %v10918_v41, 0.0  ;;  %v4317_v41 = vsel %vm580_vm3, %v10932_v20, 0.0  ;;  %v5782_v20 = vsel %vm580_vm3, %v10952_v17, 0.0  ;;  %v2832_v17 = vsel %vm580_vm3, %v10974_v31, 0.0 }
 0x3a1   :  { %1165 = vadd.xlane.f32.xlu0 %v1164_v33  ;;  %v11070_v61 = vpop.xlane.xlu0 %1135  ;;  %v1179_v33 = vsel %vm580_vm3, %v10644_v27, 0.0  ;;  %v2850_v31 = vsel %vm580_vm3, %v10988_v35, 0.0  ;;  %v4341_v35 = vsel %vm580_vm3, %v11006_v52, 0.0  ;;  %v4323_v52 = vsel %vm580_vm3, %v11022_v55, 0.0 }
 0x3a2   :  { %16222 = vst [vmem:[#allocation95_spill] sm:$0xff] %v11070_v61  ;;  %v11084_v61 = vpop.permute.xlu1 %4222  ;;  %v5818_v55 = vsel %vm580_vm3, %v11032_v25, 0.0  ;;  %v5800_v25 = vsel %vm580_vm3, %v11044_v53, 0.0 }
 0x3a5   :  { %1171 = vadd.xlane.f32.xlu0 %v1170_v62  ;;  %v11078_v62 = vpop.permute.xlu0 %2745 }
 0x3a6   :  { %16223 = vst [vmem:[#allocation96_spill] sm:$0xff] %v11078_v62 }
 0x3b6   :  { %1180 = vadd.xlane.f32.xlu1 %v1179_v33  ;;  %v11088_v33 = vpop.permute.xlu0 %2753 }
 0x3b7   :  { %16224 = vst [vmem:[#allocation97_spill] sm:$0xff] %v11088_v33 }
 0x3ba   :  { %2812 = vadd.xlane.f32.xlu1 %v2811_v18  ;;  %v11094_v18 = vpop.permute.xlu1 %5711 }
 0x3bb   :  { %2777 = vrot.lane.b32.xlu0 %v10644_v27, %s9835_s8 }
 0x3be   :  { %4291 = vadd.xlane.f32.xlu1 %v4290_v6  ;;  %v11098_v6 = vpop.permute.xlu0 %2757  ;;  %v11102_v33 = vpop.permute.xlu1 %5719 }
 0x3bf   :  { %4256 = vrot.lane.b32.xlu0 %v10644_v27, %s9836_s28 }
 0x3c2   :  { %5768 = vadd.xlane.f32.xlu1 %v5767_v32  ;;  %v11104_v62 = vpop.permute.xlu0 %2765 }
 0x3c3   :  { %5733 = vrot.lane.b32.xlu0 %v10644_v27, %s9837_s29  ;;  %v11108_v27 = vpop.permute.xlu1 %5699 }
 0x3c6   :  { %2824 = vadd.xlane.f32.xlu1 %v2823_v21  ;;  %v11112_v32 = vpop.permute.xlu0 %4232 }
 0x3c7   :  { %16225 = vst [vmem:[#allocation98_spill] sm:$0xff] %v11112_v32  ;;  %v11114_v21 = vpop.xlane.xlu1 %1132 }
 0x3ca   :  { %2836 = vadd.xlane.f32.xlu1 %v2835_v48  ;;  %v5773_v48 = vsel %vm580_vm3, %v10870_v38, 0.0  ;;  %v11118_v8 = vpop.permute.xlu0 %4236  ;;  %v1176_v38 = vsel %vm580_vm3, %v10639_v46, 0.0  ;;  %v4293_v46 = vsel %vm580_vm3, %v10868_v4, 0.0  ;;  %v2817_v4 = vsel %vm580_vm3, %v10830_v60, 0.0 }
 0x3cb   :  { %v2826_v60 = vsel %vm580_vm3, %v10908_v30, 0.0  ;;  %v4296_v30 = vsel %vm580_vm3, %v10850_v26, 0.0  ;;  %v5797_v26 = vsel %vm580_vm3, %v10992_v50, 0.0  ;;  %v2853_v50 = vsel %vm580_vm3, %v11036_v49, 0.0 }
 0x3cc   :  { %v2871_v49 = vsel %vm580_vm3, %v11046_v7, 0.0  ;;  %v4344_v7 = vsel %vm580_vm3, %v11060_v56, 0.0  ;;  %v4362_v56 = vsel %vm580_vm3, %v11068_v1, 0.0  ;;  %v4332_v1 = vsel %vm580_vm3, %v11084_v61, 0.0 }
 0x3cd   :  { %v5839_v61 = vsel %vm580_vm3, %v11102_v33, 0.0 }
 0x3ce   :  { %4303 = vadd.xlane.f32.xlu1 %v4302_v16  ;;  %v11122_v16 = vpop.xlane.xlu1 %1144 }
 0x3d2   :  { %4315 = vadd.xlane.f32.xlu1 %v4314_v19  ;;  %v11126_v19 = vpop.permute.xlu0 %4244  ;;  %v11128_v32 = vpop.xlane.xlu1 %1150 }
 0x3d6   :  { %5774 = vadd.xlane.f32.xlu1 %v5773_v48  ;;  %v2829_v48 = vsel %vm580_vm3, %v10920_v47, 0.0  ;;  %v11134_v57 = vpop.permute.xlu0 %5709  ;;  %v2847_v47 = vsel %vm580_vm3, %v10936_v45, 0.0  ;;  %v4338_v45 = vsel %vm580_vm3, %v10956_v29, 0.0  ;;  %v4320_v29 = vsel %vm580_vm3, %v10968_v14, 0.0 }
 0x3d7   :  { %v5815_v14 = vsel %vm580_vm3, %v10978_v59, 0.0  ;;  %v4305_v59 = vsel %vm580_vm3, %v10924_v43, 0.0  ;;  %v5776_v43 = vsel %vm580_vm3, %v10942_v42, 0.0  ;;  %v5794_v42 = vsel %vm580_vm3, %v10960_v11, 0.0 }
 0x3d8   :  { %v2844_v11 = vsel %vm580_vm3, %v10982_v54, 0.0  ;;  %v2862_v54 = vsel %vm580_vm3, %v10996_v9, 0.0  ;;  %v4311_v9 = vsel %vm580_vm3, %v11016_v51, 0.0  ;;  %v4329_v51 = vsel %vm580_vm3, %v11026_v0, 0.0 }
 0x3d9   :  { %v5788_v0 = vsel %vm580_vm3, %v11040_v22, 0.0 }
 0x3da   :  { %5780 = vadd.xlane.f32.xlu1 %v5779_v3  ;;  %v2814_v3 = vsel %vm580_vm3, %v10860_v23, 0.0  ;;  %v5770_v23 = vsel %vm580_vm3, %v10874_v5, 0.0  ;;  %v2820_v5 = vsel %vm580_vm3, %v10902_v34, 0.0  ;;  %v2838_v34 = vsel %vm580_vm3, %v10912_v28, 0.0 }
 0x3de   :  { %5792 = vadd.xlane.f32.xlu1 %v5791_v2  ;;  %v11140_v2 = vpop.xlane.xlu1 %1162 }
 0x3e2   :  { %1177 = vadd.xlane.f32.xlu0 %v1176_v38  ;;  %2830 = vadd.xlane.f32.xlu1 %v2829_v48  ;;  %v11146_v38 = vpop.permute.xlu0 %4224  ;;  %v11148_v48 = vpop.permute.xlu1 %2759 }
 0x3e3   :  { %v2877_v33 = vsel %vm580_vm3, %v11148_v48, 0.0  ;;  %v5806_v48 = vsel %vm580_vm3, %v11050_v13, 0.0  ;;  %v16228_v13 = vld [vmem:[#allocation97_spill] sm:$0xff] }
 0x3e6   :  { %2815 = vadd.xlane.f32.xlu0 %v2814_v3  ;;  %2842 = vadd.xlane.f32.xlu1 %v2841_v39  ;;  %v11154_v3 = vpop.permute.xlu0 %5713  ;;  %v11160_v39 = vpop.permute.xlu1 %2767 }
 0x3ea   :  { %4294 = vadd.xlane.f32.xlu0 %v4293_v46  ;;  %2848 = vadd.xlane.f32.xlu1 %v2847_v47  ;;  %v11166_v46 = vpop.permute.xlu0 %5721  ;;  %v11168_v47 = vpop.permute.xlu1 %2771 }
 0x3ee   :  { %5771 = vadd.xlane.f32.xlu0 %v5770_v23  ;;  %2860 = vadd.xlane.f32.xlu1 %v2859_v24  ;;  %v11174_v23 = vpop.permute.xlu0 %5701  ;;  %v11180_v24 = vpop.permute.xlu1 %4238 }
 0x3f2   :  { %2818 = vadd.xlane.f32.xlu0 %v2817_v4  ;;  %4339 = vadd.xlane.f32.xlu1 %v4338_v45  ;;  %v11182_v4 = vpop.xlane.xlu0 %1129  ;;  %v9838_v45 = vmov 0   ;;  %v11188_v28 = vpop.permute.xlu1 %4246 }
 0x3f3   :  { %9474 = vset.pattern.permute.xlu1 %v9838_v45  ;;  %9475 = vset.pattern.permute.xlu0 %v9838_v45 }
 0x3f6   :  { %2821 = vadd.xlane.f32.xlu0 %v2820_v5  ;;  %4309 = vadd.xlane.f32.xlu1 %v4308_v12  ;;  %v5785_v5 = vsel %vm580_vm3, %v10986_v58, 0.0  ;;  %v11194_v12 = vpop.xlane.xlu0 %1141  ;;  %v5803_v58 = vsel %vm580_vm3, %v11002_v10, 0.0  ;;  %v2865_v10 = vsel %vm580_vm3, %v11042_v36, 0.0  ;;  %v2883_v36 = vsel %vm580_vm3, %v11054_v15, 0.0 }
 0x3f7   :  { %v4350_v15 = vsel %vm580_vm3, %v11064_v37, 0.0  ;;  %v5821_v37 = vsel %vm580_vm3, %v11074_v63, 0.0  ;;  %v5827_v63 = vsel %vm580_vm3, %v11094_v18, 0.0  ;;  %v5809_v18 = vsel %vm580_vm3, %v11108_v27, 0.0 }
 0x3f8   :  { %v2889_v27 = vsel %vm580_vm3, %v11160_v39, 0.0 }
 0x3fa   :  { %2827 = vadd.xlane.f32.xlu0 %v2826_v60  ;;  %4321 = vadd.xlane.f32.xlu1 %v4320_v29  ;;  %v11200_v60 = vpop.permute.xlu1 %4250  ;;  %v11202_v29 = vpop.xlane.xlu0 %1147 }
 0x3fe   :  { %2839 = vadd.xlane.f32.xlu0 %v2838_v34  ;;  %4327 = vadd.xlane.f32.xlu1 %v4326_v40  ;;  %v11208_v34 = vpop.permute.xlu1 %5715  ;;  %v11214_v40 = vpop.xlane.xlu0 %1159 }
 0x402   :  { %4297 = vadd.xlane.f32.xlu0 %v4296_v30  ;;  %5816 = vadd.xlane.f32.xlu1 %v5815_v14  ;;  %v11220_v30 = vpop.permute.xlu1 %5723  ;;  %v11222_v14 = vpop.permute.xlu0 %2761 }
 0x406   :  { %4300 = vadd.xlane.f32.xlu0 %v4299_v44  ;;  %5786 = vadd.xlane.f32.xlu1 %v5785_v5  ;;  %v11228_v45 = vpop.permute.xlu1 %5727  ;;  %v11234_v44 = vpop.permute.xlu0 %2769 }
 0x40a   :  { %4306 = vadd.xlane.f32.xlu0 %v4305_v59  ;;  %5798 = vadd.xlane.f32.xlu1 %v5797_v26  ;;  %v11236_v5 = vpop.xlane.xlu1 %1156  ;;  %v11242_v59 = vpop.permute.xlu0 %2773 }
 0x40e   :  { %4318 = vadd.xlane.f32.xlu0 %v4317_v41  ;;  %5804 = vadd.xlane.f32.xlu1 %v5803_v58  ;;  %v11248_v26 = vpop.xlane.xlu1 %1168  ;;  %v11254_v41 = vpop.permute.xlu0 %4240 }
 0x412   :  { %5777 = vadd.xlane.f32.xlu0 %v5776_v43  ;;  %2854 = vadd.xlane.f32.xlu1 %v2853_v50  ;;  %v11256_v58 = vpop.xlane.xlu1 %1174  ;;  %v11262_v43 = vpop.permute.xlu0 %4248 }
 0x416   :  { %5783 = vadd.xlane.f32.xlu0 %v5782_v20  ;;  %2866 = vadd.xlane.f32.xlu1 %v2865_v10  ;;  %v11268_v50 = vpop.permute.xlu1 %2775  ;;  %v11274_v20 = vpop.permute.xlu0 %4252 }
 0x41a   :  { %5795 = vadd.xlane.f32.xlu0 %v5794_v42  ;;  %2872 = vadd.xlane.f32.xlu1 %v2871_v49  ;;  %v11276_v10 = vpop.permute.xlu1 %4254  ;;  %v11282_v42 = vpop.permute.xlu0 %5717 }
 0x41e   :  { %2833 = vadd.xlane.f32.xlu0 %v2832_v17  ;;  %2884 = vadd.xlane.f32.xlu1 %v2883_v36  ;;  %v11288_v49 = vpop.permute.xlu1 %5731  ;;  %v11294_v17 = vpop.permute.xlu0 %5725 }
 0x422   :  { %2845 = vadd.xlane.f32.xlu0 %v2844_v11  ;;  %4345 = vadd.xlane.f32.xlu1 %v4344_v7  ;;  %v11304_v22 = vpop.permute.xlu0 %5729  ;;  %v2895_v7 = vsel %vm580_vm3, %v11168_v47, 0.0  ;;  %v4368_v47 = vsel %vm580_vm3, %v11188_v28, 0.0  ;;  %v2886_v28 = vsel %vm580_vm3, %v11104_v62, 0.0  ;;  %v4353_v62 = vsel %vm580_vm3, %v11118_v8, 0.0 }
 0x423   :  { %v5824_v8 = vsel %vm580_vm3, %v11134_v57, 0.0 }
 0x426   :  { %2851 = vadd.xlane.f32.xlu0 %v2850_v31  ;;  %4351 = vadd.xlane.f32.xlu1 %v4350_v15  ;;  %v16226_v15 = vld [vmem:[#allocation96_spill] sm:$0xff] }
 0x427   :  { %v2856_v39 = vsel %vm580_vm3, %v16226_v15, 0.0 }
 0x42a   :  { %2863 = vadd.xlane.f32.xlu0 %v2862_v54  ;;  %4363 = vadd.xlane.f32.xlu1 %v4362_v56  ;;  %v11312_v53 = vpop.xlane.xlu0 %1153  ;;  %v4356_v54 = vsel %vm580_vm3, %v11180_v24, 0.0  ;;  %v4374_v24 = vsel %vm580_vm3, %v11200_v60, 0.0  ;;  %v5845_v60 = vsel %vm580_vm3, %v11220_v30, 0.0  ;;  %v4365_v30 = vsel %vm580_vm3, %v11126_v19, 0.0 }
 0x42b   :  { %v4335_v19 = vsel %vm580_vm3, %v11146_v38, 0.0  ;;  %v5842_v38 = vsel %vm580_vm3, %v11166_v46, 0.0  ;;  %v2880_v46 = vsel %vm580_vm3, %v11222_v14, 0.0  ;;  %v16242_v14 = vld [vmem:[#allocation86_spill] sm:$0xff] }
 0x42e   :  { %4342 = vadd.xlane.f32.xlu0 %v4341_v35  ;;  %5822 = vadd.xlane.f32.xlu1 %v5821_v37  ;;  %v2868_v35 = vsel %vm580_vm3, %v16228_v13, 0.0  ;;  %v11324_v37 = vpop.xlane.xlu0 %1165 }
 0x432   :  { %4312 = vadd.xlane.f32.xlu0 %v4311_v9  ;;  %4333 = vadd.xlane.f32.xlu1 %v4332_v1  ;;  %v2874_v1 = vsel %vm580_vm3, %v11098_v6, 0.0  ;;  %v16229_v6 = vld [vmem:[#allocation98_spill] sm:$0xff] }
 0x436   :  { %4324 = vadd.xlane.f32.xlu0 %v4323_v52  ;;  %5828 = vadd.xlane.f32.xlu1 %v5827_v63  ;;  %v11334_v63 = vpop.xlane.xlu0 %1171 }
 0x43a   :  { %4330 = vadd.xlane.f32.xlu0 %v4329_v51  ;;  %5840 = vadd.xlane.f32.xlu1 %v5839_v61  ;;  %v5833_v51 = vsel %vm580_vm3, %v11208_v34, 0.0  ;;  %v5851_v34 = vsel %vm580_vm3, %v11228_v45, 0.0  ;;  %v4380_v45 = vsel %vm580_vm3, %v11276_v10, 0.0  ;;  %v5830_v10 = vsel %vm580_vm3, %v11154_v3, 0.0 }
 0x43e   :  { %5819 = vadd.xlane.f32.xlu0 %v5818_v55  ;;  %5810 = vadd.xlane.f32.xlu1 %v5809_v18  ;;  %v4347_v55 = vsel %vm580_vm3, %v16229_v6, 0.0  ;;  %v11346_v18 = vpop.permute.xlu0 %2777 }
 0x442   :  { %5789 = vadd.xlane.f32.xlu0 %v5788_v0  ;;  %2878 = vadd.xlane.f32.xlu1 %v2877_v33 }
 0x443   :  { %v11296_v36 = vpop.xlane.xlu1 %1180 }
 0x446   :  { %5801 = vadd.xlane.f32.xlu0 %v5800_v25  ;;  %2890 = vadd.xlane.f32.xlu1 %v2889_v27  ;;  %v11356_v25 = vpop.permute.xlu0 %4256  ;;  %v2901_v27 = vsel %vm580_vm3, %v11268_v50, 0.0  ;;  %v5857_v50 = vsel %vm580_vm3, %v11288_v49, 0.0 }
 0x447   :  { %v11302_v11 = vpop.xlane.xlu1 %2812 }
 0x44a   :  { %5807 = vadd.xlane.f32.xlu0 %v5806_v48  ;;  %2896 = vadd.xlane.f32.xlu1 %v2895_v7  ;;  %v11368_v7 = vpop.permute.xlu0 %5733 }
 0x44b   :  { %v11310_v31 = vpop.xlane.xlu1 %4291 }
 0x44e   :  { %2857 = vadd.xlane.f32.xlu0 %v2856_v39  ;;  %4357 = vadd.xlane.f32.xlu1 %v4356_v54 }
 0x44f   :  { %v11318_v56 = vpop.xlane.xlu1 %5768 }
 0x450   :  { %16227 = vst [vmem:[#allocation96_spill] sm:$0xff] %v11318_v56 }
 0x452   :  { %2869 = vadd.xlane.f32.xlu0 %v2868_v35  ;;  %4369 = vadd.xlane.f32.xlu1 %v4368_v47  ;;  %v5812_v47 = vsel %vm580_vm3, %v11174_v23, 0.0  ;;  %v16239_v23 = vld [vmem:[#allocation82_spill] sm:$0xff] }
 0x453   :  { %v11326_v9 = vpop.xlane.xlu1 %2824 }
 0x456   :  { %2875 = vadd.xlane.f32.xlu0 %v2874_v1  ;;  %4375 = vadd.xlane.f32.xlu1 %v4374_v24  ;;  %v16236_v24 = vld [vmem:[#allocation81_spill] sm:$0xff] }
 0x457   :  { %v11332_v52 = vpop.xlane.xlu1 %2836 }
 0x45a   :  { %2887 = vadd.xlane.f32.xlu0 %v2886_v28  ;;  %5834 = vadd.xlane.f32.xlu1 %v5833_v51  ;;  %v16237_v28 = vld [vmem:[#allocation47_spill] sm:$0xff] }
 0x45b   :  { %v11340_v61 = vpop.xlane.xlu1 %4303  ;;  %v11400_v51 = vadd.f32 %v16237_v28, %v16236_v24  ;;  %v4359_v24 = vsel %vm580_vm3, %v11254_v41, 0.0  ;;  %v16254_v41 = vld [vmem:[#allocation93_spill] sm:$0xff] }
 0x45d   :  { %16238 = vst [vmem:[#allocation81_spill] sm:$0xff] %v11400_v51 }
 0x45e   :  { %4348 = vadd.xlane.f32.xlu0 %v4347_v55  ;;  %5846 = vadd.xlane.f32.xlu1 %v5845_v60  ;;  %v16240_v60 = vld [vmem:[#allocation49_spill] sm:$0xff] }
 0x45f   :  { %v11348_v0 = vpop.xlane.xlu1 %4315 }
 0x460   :  { %16230 = vst [vmem:[#allocation97_spill] sm:$0xff] %v11348_v0 }
 0x462   :  { %4354 = vadd.xlane.f32.xlu0 %v4353_v62  ;;  %5852 = vadd.xlane.f32.xlu1 %v5851_v34  ;;  %v11411_v62 = vadd.f32 %v16240_v60, %v16239_v23  ;;  %v2892_v34 = vsel %vm580_vm3, %v11234_v44, 0.0  ;;  %v16246_v44 = vld [vmem:[#allocation87_spill] sm:$0xff] }
 0x463   :  { %v11354_v33 = vpop.xlane.xlu1 %5774 }
 0x464   :  { %16231 = vst [vmem:[#allocation98_spill] sm:$0xff] %v11354_v33  ;;  %16241 = vst [vmem:[#allocation82_spill] sm:$0xff] %v11411_v62 }
 0x466   :  { %4366 = vadd.xlane.f32.xlu0 %v4365_v30  ;;  %2902 = vadd.xlane.f32.xlu1 %v2901_v27 }
 0x467   :  { %v11362_v48 = vpop.xlane.xlu1 %5780 }
 0x468   :  { %16232 = vst [vmem:[#allocation99_spill] sm:$0xff] %v11362_v48 }
 0x46a   :  { %5825 = vadd.xlane.f32.xlu0 %v5824_v8  ;;  %4381 = vadd.xlane.f32.xlu1 %v4380_v45  ;;  %v16243_v8 = vld [vmem:[#allocation60_spill] sm:$0xff] }
 0x46b   :  { %v11370_v15 = vpop.xlane.xlu1 %5792  ;;  %v11422_v45 = vadd.f32 %v16243_v8, %v16242_v14 }
 0x46c   :  { %16233 = vst [vmem:[#allocation100_spill] sm:$0xff] %v11370_v15 }
 0x46d   :  { %16244 = vst [vmem:[#allocation86_spill] sm:$0xff] %v11422_v45 }
 0x46e   :  { %4336 = vadd.xlane.f32.xlu0 %v4335_v19  ;;  %5858 = vadd.xlane.f32.xlu1 %v5857_v50  ;;  %v2898_v19 = vsel %vm580_vm3, %v11242_v59, 0.0  ;;  %v16250_v59 = vld [vmem:[#allocation92_spill] sm:$0xff] }
 0x46f   :  { %v11376_v39 = vpop.xlane.xlu0 %1177  ;;  %v11378_v57 = vpop.xlane.xlu1 %2830 }
 0x472   :  { %5831 = vadd.xlane.f32.xlu0 %v5830_v10 }
 0x473   :  { %v11382_v54 = vpop.xlane.xlu0 %2815  ;;  %v11384_v13 = vpop.xlane.xlu1 %2842 }
 0x476   :  { %5843 = vadd.xlane.f32.xlu0 %v5842_v38  ;;  %v16247_v38 = vld [vmem:[#allocation64_spill] sm:$0xff] }
 0x477   :  { %v11388_v35 = vpop.xlane.xlu0 %4294  ;;  %v11390_v49 = vpop.xlane.xlu1 %2848 }
 0x478   :  { %16234 = vst [vmem:[#allocation101_spill] sm:$0xff] %v11388_v35 }
 0x47a   :  { %5813 = vadd.xlane.f32.xlu0 %v5812_v47  ;;  %v11433_v47 = vadd.f32 %v16247_v38, %v16246_v44 }
 0x47b   :  { %v11394_v1 = vpop.xlane.xlu0 %5771  ;;  %v11396_v3 = vpop.xlane.xlu1 %2860 }
 0x47c   :  { %16235 = vst [vmem:[#allocation102_spill] sm:$0xff] %v11394_v1  ;;  %16248 = vst [vmem:[#allocation87_spill] sm:$0xff] %v11433_v47 }
 0x47e   :  { %2881 = vadd.xlane.f32.xlu0 %v2880_v46 }
 0x47f   :  { %v11404_v6 = vpop.xlane.xlu0 %2818  ;;  %v11406_v55 = vpop.xlane.xlu1 %4339  ;;  %1460 = vperm.xlu1 %9474, %v11400_v51  }
 0x482   :  { %2893 = vadd.xlane.f32.xlu0 %v2892_v34  ;;  %v16251_v34 = vld [vmem:[#allocation62_spill] sm:$0xff] }
 0x483   :  { %v11415_v30 = vpop.xlane.xlu0 %2821  ;;  %v11417_v27 = vpop.xlane.xlu1 %4309  ;;  %1463 = vperm.xlu1 %9474, %v11411_v62   ;;  %v11444_v14 = vadd.f32 %v16251_v34, %v16250_v59 }
 0x485   :  { %16252 = vst [vmem:[#allocation92_spill] sm:$0xff] %v11444_v14 }
 0x486   :  { %2899 = vadd.xlane.f32.xlu0 %v2898_v19  ;;  %v4371_v19 = vsel %vm580_vm3, %v11262_v43, 0.0  ;;  %v16258_v43 = vld [vmem:[#allocation94_spill] sm:$0xff] }
 0x487   :  { %v11426_v50 = vpop.xlane.xlu0 %2827  ;;  %v11428_v10 = vpop.xlane.xlu1 %4321  ;;  %1469 = vperm.xlu1 %9474, %v11422_v45  }
 0x488   :  { %16245 = vst [vmem:[#allocation103_spill] sm:$0xff] %v11428_v10 }
 0x48a   :  { %4360 = vadd.xlane.f32.xlu0 %v4359_v24  ;;  %v16255_v24 = vld [vmem:[#allocation66_spill] sm:$0xff] }
 0x48b   :  { %v11437_v46 = vpop.xlane.xlu0 %2839  ;;  %v11439_v23 = vpop.xlane.xlu1 %4327  ;;  %1481 = vperm.xlu1 %9474, %v11433_v47   ;;  %v11455_v48 = vadd.f32 %v16255_v24, %v16254_v41 }
 0x48c   :  { %16249 = vst [vmem:[#allocation104_spill] sm:$0xff] %v11439_v23  ;;  %v4377_v23 = vsel %vm580_vm3, %v11274_v20, 0.0  ;;  %v16263_v20 = vld [vmem:[#allocation95_spill] sm:$0xff] }
 0x48d   :  { %16256 = vst [vmem:[#allocation93_spill] sm:$0xff] %v11455_v48 }
 0x48e   :  { %4372 = vadd.xlane.f32.xlu0 %v4371_v19  ;;  %v16259_v19 = vld [vmem:[#allocation68_spill] sm:$0xff] }
 0x48f   :  { %v11448_v44 = vpop.xlane.xlu0 %4297  ;;  %v11450_v15 = vpop.xlane.xlu1 %5816  ;;  %1475 = vperm.xlu1 %9474, %v11444_v14   ;;  %v11466_v56 = vadd.f32 %v16259_v19, %v16258_v43 }
 0x490   :  { %16253 = vst [vmem:[#allocation105_spill] sm:$0xff] %v11450_v15  ;;  %v5836_v15 = vsel %vm580_vm3, %v11282_v42, 0.0  ;;  %v16268_v42 = vld [vmem:[#allocation70_spill] sm:$0xff] }
 0x491   :  { %16260 = vst [vmem:[#allocation94_spill] sm:$0xff] %v11466_v56 }
 0x492   :  { %4378 = vadd.xlane.f32.xlu0 %v4377_v23  ;;  %v16264_v23 = vld [vmem:[#allocation72_spill] sm:$0xff] }
 0x493   :  { %v11459_v59 = vpop.xlane.xlu0 %4300  ;;  %v11461_v33 = vpop.xlane.xlu1 %5786  ;;  %1487 = vperm.xlu1 %9474, %v11455_v48   ;;  %v11477_v10 = vadd.f32 %v16264_v23, %v16263_v20 }
 0x494   :  { %16257 = vst [vmem:[#allocation106_spill] sm:$0xff] %v11461_v33  ;;  %v5848_v33 = vsel %vm580_vm3, %v11294_v17, 0.0  ;;  %v16271_v17 = vld [vmem:[#allocation73_spill] sm:$0xff] }
 0x495   :  { %16265 = vst [vmem:[#allocation95_spill] sm:$0xff] %v11477_v10 }
 0x496   :  { %5837 = vadd.xlane.f32.xlu0 %v5836_v15  ;;  %v11488_v15 = vadd.f32 %v16268_v42, %v11182_v4 }
 0x497   :  { %v11470_v41 = vpop.xlane.xlu0 %4306  ;;  %v11472_v1 = vpop.xlane.xlu1 %5798  ;;  %1493 = vperm.xlu1 %9474, %v11466_v56  }
 0x498   :  { %16261 = vst [vmem:[#allocation107_spill] sm:$0xff] %v11470_v41  ;;  %16262 = vst [vmem:[#allocation108_spill] sm:$0xff] %v11472_v1  ;;  %v5854_v1 = vsel %vm580_vm3, %v11304_v22, 0.0  ;;  %v16274_v22 = vld [vmem:[#allocation74_spill] sm:$0xff] }
 0x499   :  { %16269 = vst [vmem:[#allocation111_spill] sm:$0xff] %v11488_v15 }
 0x49a   :  { %5849 = vadd.xlane.f32.xlu0 %v5848_v33  ;;  %v11499_v33 = vadd.f32 %v16271_v17, %v11194_v12 }
 0x49b   :  { %v11481_v43 = vpop.xlane.xlu0 %4318  ;;  %v11483_v48 = vpop.xlane.xlu1 %5804  ;;  %1505 = vperm.xlu1 %9474, %v11477_v10  }
 0x49c   :  { %16266 = vst [vmem:[#allocation109_spill] sm:$0xff] %v11481_v43  ;;  %16267 = vst [vmem:[#allocation110_spill] sm:$0xff] %v11483_v48  ;;  %v2904_v48 = vsel %vm580_vm3, %v11346_v18, 0.0  ;;  %v16277_v18 = vld [vmem:[#allocation75_spill] sm:$0xff]  ;;  %v16292_v43 = vld [vmem:[#allocation80_spill] sm:$0xff] }
 0x49d   :  { %16272 = vst [vmem:[#allocation113_spill] sm:$0xff] %v11499_v33 }
 0x49e   :  { %5855 = vadd.xlane.f32.xlu0 %v5854_v1  ;;  %v11510_v1 = vadd.f32 %v16274_v22, %v11202_v29 }
 0x49f   :  { %v11492_v20 = vpop.xlane.xlu0 %5777  ;;  %v11494_v56 = vpop.xlane.xlu1 %2854  ;;  %1499 = vperm.xlu1 %9474, %v11488_v15  }
 0x4a0   :  { %16270 = vst [vmem:[#allocation112_spill] sm:$0xff] %v11492_v20  ;;  %16275 = vst [vmem:[#allocation115_spill] sm:$0xff] %v11510_v1  ;;  %v4383_v20 = vsel %vm580_vm3, %v11356_v25, 0.0  ;;  %v16279_v25 = vld [vmem:[#allocation76_spill] sm:$0xff] }
 0x4a2   :  { %2905 = vadd.xlane.f32.xlu0 %v2904_v48  ;;  %v11521_v48 = vadd.f32 %v16277_v18, %v11312_v53  ;;  %v16281_v53 = vld [vmem:[#allocation77_spill] sm:$0xff] }
 0x4a3   :  { %v11503_v4 = vpop.xlane.xlu0 %5783  ;;  %v11505_v10 = vpop.xlane.xlu1 %2866  ;;  %1511 = vperm.xlu1 %9474, %v11499_v33  }
 0x4a4   :  { %16273 = vst [vmem:[#allocation114_spill] sm:$0xff] %v11503_v4  ;;  %16278 = vst [vmem:[#allocation117_spill] sm:$0xff] %v11521_v48  ;;  %v5860_v4 = vsel %vm580_vm3, %v11368_v7, 0.0  ;;  %v11541_v7 = vadd.f32 %v16281_v53, %v11324_v37 }
 0x4a6   :  { %4384 = vadd.xlane.f32.xlu0 %v4383_v20  ;;  %v11532_v20 = vadd.f32 %v16279_v25, %v11214_v40  ;;  %16282 = vst [vmem:[#allocation119_spill] sm:$0xff] %v11541_v7 }
 0x4a7   :  { %v11514_v12 = vpop.xlane.xlu0 %5795  ;;  %v11516_v15 = vpop.xlane.xlu1 %2872  ;;  %1517 = vperm.xlu1 %9474, %v11510_v1  }
 0x4a8   :  { %16276 = vst [vmem:[#allocation116_spill] sm:$0xff] %v11514_v12  ;;  %16280 = vst [vmem:[#allocation118_spill] sm:$0xff] %v11532_v20 }
 0x4aa   :  { %5861 = vadd.xlane.f32.xlu0 %v5860_v4 }
 0x4ab   :  { %v11525_v29 = vpop.xlane.xlu0 %2833  ;;  %v11527_v33 = vpop.xlane.xlu1 %2884  ;;  %1523 = vperm.xlu1 %9474, %v11521_v48   ;;  %v16283_v48 = vld [vmem:[#allocation78_spill] sm:$0xff] }
 0x4ac   :  { %v11550_v40 = vadd.f32 %v16283_v48, %v11334_v63 }
 0x4ae   :  { %16284 = vst [vmem:[#allocation120_spill] sm:$0xff] %v11550_v40 }
 0x4af   :  { %v11534_v12 = vpop.xlane.xlu0 %2845  ;;  %v11536_v1 = vpop.xlane.xlu1 %4345  ;;  %1529 = vperm.xlu1 %9474, %v11532_v20   ;;  %v16286_v20 = vld [vmem:[#allocation79_spill] sm:$0xff] }
 0x4b0   :  { %v11559_v37 = vadd.f32 %v16286_v20, %v11376_v39  ;;  %v11582_v39 = vadd.f32 %v11404_v6, %v16240_v60 }
 0x4b2   :  { %16287 = vst [vmem:[#allocation122_spill] sm:$0xff] %v11559_v37  ;;  %16296 = vst [vmem:[#allocation128_spill] sm:$0xff] %v11582_v39 }
 0x4b3   :  { %v11543_v4 = vpop.xlane.xlu0 %2851  ;;  %v11545_v47 = vpop.xlane.xlu1 %4351  ;;  %1535 = vperm.xlu1 %9474, %v11541_v7   ;;  %v16290_v7 = vld [vmem:[#allocation58_spill] sm:$0xff] }
 0x4b4   :  { %v11568_v63 = vadd.f32 %v11302_v11, %v16290_v7  ;;  %v11572_v41 = vadd.f32 %v16290_v7, %v16292_v43 }
 0x4b6   :  { %16291 = vst [vmem:[#allocation125_spill] sm:$0xff] %v11568_v63  ;;  %16293 = vst [vmem:[#allocation80_spill] sm:$0xff] %v11572_v41 }
 0x4b7   :  { %v11552_v14 = vpop.xlane.xlu0 %2863  ;;  %v11554_v45 = vpop.xlane.xlu1 %4363  ;;  %1541 = vperm.xlu1 %9474, %v11550_v40  }
 0x4b8   :  { %16285 = vst [vmem:[#allocation121_spill] sm:$0xff] %v11554_v45 }
 0x4bb   :  { %v11561_v62 = vpop.xlane.xlu0 %4342  ;;  %v11563_v51 = vpop.xlane.xlu1 %5822  ;;  %1547 = vperm.xlu1 %9474, %v11559_v37   ;;  %v16298_v37 = vld [vmem:[#allocation50_spill] sm:$0xff] }
 0x4bc   :  { %16288 = vst [vmem:[#allocation123_spill] sm:$0xff] %v11561_v62  ;;  %16289 = vst [vmem:[#allocation124_spill] sm:$0xff] %v11563_v51  ;;  %v16297_v51 = vld [vmem:[#allocation83_spill] sm:$0xff] }
 0x4bd   :  { %v11586_v11 = vadd.f32 %v16298_v37, %v16297_v51 }
 0x4bf   :  { %v11574_v45 = vpop.xlane.xlu0 %4312  ;;  %v11576_v40 = vpop.xlane.xlu1 %4333  ;;  %2972 = vperm.xlu1 %9474, %v11568_v63   ;;  %16299 = vst [vmem:[#allocation83_spill] sm:$0xff] %v11586_v11  ;;  %v16303_v63 = vld [vmem:[#allocation84_spill] sm:$0xff] }
 0x4c0   :  { %16294 = vst [vmem:[#allocation126_spill] sm:$0xff] %v11574_v45  ;;  %16295 = vst [vmem:[#allocation127_spill] sm:$0xff] %v11576_v40  ;;  %1457 = vperm.xlu0 %9475, %v11572_v41   ;;  %v11596_v40 = vadd.f32 %v11415_v30, %v16298_v37  ;;  %v16304_v41 = vld [vmem:[#allocation51_spill] sm:$0xff] }
 0x4c1   :  { %v11600_v6 = vadd.f32 %v16304_v41, %v16303_v63 }
 0x4c2   :  { %16302 = vst [vmem:[#allocation131_spill] sm:$0xff] %v11596_v40 }
 0x4c3   :  { %v11588_v62 = vpop.xlane.xlu0 %4324  ;;  %v11590_v43 = vpop.xlane.xlu1 %5828  ;;  %2978 = vperm.xlu1 %9474, %v11582_v39   ;;  %16305 = vst [vmem:[#allocation84_spill] sm:$0xff] %v11600_v6  ;;  %v16309_v39 = vld [vmem:[#allocation88_spill] sm:$0xff] }
 0x4c4   :  { %16300 = vst [vmem:[#allocation129_spill] sm:$0xff] %v11588_v62  ;;  %16301 = vst [vmem:[#allocation130_spill] sm:$0xff] %v11590_v43  ;;  %1466 = vperm.xlu0 %9475, %v11586_v11   ;;  %v11610_v43 = vadd.f32 %v11326_v9, %v16243_v8  ;;  %v16310_v62 = vld [vmem:[#allocation52_spill] sm:$0xff] }
 0x4c5   :  { %v11614_v30 = vadd.f32 %v16310_v62, %v16309_v39 }
 0x4c6   :  { %16308 = vst [vmem:[#allocation134_spill] sm:$0xff] %v11610_v43 }
 0x4c7   :  { %v11602_v45 = vpop.xlane.xlu0 %4330  ;;  %v11604_v51 = vpop.xlane.xlu1 %5840  ;;  %2981 = vperm.xlu1 %9474, %v11596_v40   ;;  %16311 = vst [vmem:[#allocation88_spill] sm:$0xff] %v11614_v30  ;;  %v16316_v40 = vld [vmem:[#allocation53_spill] sm:$0xff] }
 0x4c8   :  { %16306 = vst [vmem:[#allocation132_spill] sm:$0xff] %v11602_v45  ;;  %16307 = vst [vmem:[#allocation133_spill] sm:$0xff] %v11604_v51  ;;  %1472 = vperm.xlu0 %9475, %v11600_v6   ;;  %v11624_v51 = vadd.f32 %v11332_v52, %v16247_v38  ;;  %v16315_v45 = vld [vmem:[#allocation85_spill] sm:$0xff] }
 0x4c9   :  { %v11628_v9 = vadd.f32 %v16316_v40, %v16315_v45  ;;  %v11648_v45 = vadd.f32 %v11384_v13, %v16255_v24 }
 0x4ca   :  { %16314 = vst [vmem:[#allocation137_spill] sm:$0xff] %v11624_v51 }
 0x4cb   :  { %v11616_v11 = vpop.xlane.xlu0 %5819  ;;  %v11618_v63 = vpop.xlane.xlu1 %5810  ;;  %2984 = vperm.xlu1 %9474, %v11610_v43   ;;  %16317 = vst [vmem:[#allocation85_spill] sm:$0xff] %v11628_v9  ;;  %v16321_v43 = vld [vmem:[#allocation54_spill] sm:$0xff]  ;;  %16323 = vst [vmem:[#allocation140_spill] sm:$0xff] %v11648_v45 }
 0x4cc   :  { %16312 = vst [vmem:[#allocation135_spill] sm:$0xff] %v11616_v11  ;;  %16313 = vst [vmem:[#allocation136_spill] sm:$0xff] %v11618_v63  ;;  %1478 = vperm.xlu0 %9475, %v11614_v30   ;;  %v11636_v63 = vadd.f32 %v11378_v57, %v16251_v34  ;;  %v16320_v11 = vld [vmem:[#allocation89_spill] sm:$0xff] }
 0x4cd   :  { %v11640_v30 = vadd.f32 %v16321_v43, %v16320_v11  ;;  %v11660_v11 = vadd.f32 %v11390_v49, %v16259_v19 }
 0x4ce   :  { %16319 = vst [vmem:[#allocation139_spill] sm:$0xff] %v11636_v63 }
 0x4cf   :  { %v11630_v6 = vpop.xlane.xlu0 %5789  ;;  %v2879_v39 = vpop.xlane.xlu1 %2878  ;;  %2996 = vperm.xlu1 %9474, %v11624_v51   ;;  %v16325_v51 = vld [vmem:[#allocation55_spill] sm:$0xff]  ;;  %16327 = vst [vmem:[#allocation141_spill] sm:$0xff] %v11660_v11 }
 0x4d0   :  { %16318 = vst [vmem:[#allocation138_spill] sm:$0xff] %v11630_v6  ;;  %1484 = vperm.xlu0 %9475, %v11628_v9   ;;  %v16324_v6 = vld [vmem:[#allocation90_spill] sm:$0xff] }
 0x4d1   :  { %v11652_v9 = vadd.f32 %v16325_v51, %v16324_v6  ;;  %v11674_v6 = vadd.f32 %v11396_v3, %v16264_v23 }
 0x4d3   :  { %v11642_v52 = vpop.xlane.xlu0 %5801  ;;  %v2891_v35 = vpop.xlane.xlu1 %2890  ;;  %2990 = vperm.xlu1 %9474, %v11636_v63   ;;  %16331 = vst [vmem:[#allocation144_spill] sm:$0xff] %v11674_v6 }
 0x4d4   :  { %16322 = vst [vmem:[#allocation89_spill] sm:$0xff] %v11642_v52  ;;  %1490 = vperm.xlu0 %9475, %v11640_v30   ;;  %v16328_v52 = vld [vmem:[#allocation56_spill] sm:$0xff] }
 0x4d5   :  { %v11664_v63 = vadd.f32 %v16328_v52, %v11114_v21 }
 0x4d7   :  { %v11654_v57 = vpop.xlane.xlu0 %5807  ;;  %v2897_v0 = vpop.xlane.xlu1 %2896  ;;  %3002 = vperm.xlu1 %9474, %v11648_v45   ;;  %16329 = vst [vmem:[#allocation142_spill] sm:$0xff] %v11664_v63  ;;  %v16333_v45 = vld [vmem:[#allocation57_spill] sm:$0xff] }
 0x4d8   :  { %16326 = vst [vmem:[#allocation90_spill] sm:$0xff] %v11654_v57  ;;  %1496 = vperm.xlu0 %9475, %v11652_v9   ;;  %v16332_v57 = vld [vmem:[#allocation91_spill] sm:$0xff] }
 0x4d9   :  { %v11678_v49 = vadd.f32 %v16333_v45, %v16332_v57 }
 0x4db   :  { %v11666_v13 = vpop.xlane.xlu0 %2857  ;;  %v11668_v24 = vpop.xlane.xlu1 %4357  ;;  %3008 = vperm.xlu1 %9474, %v11660_v11   ;;  %v11688_v11 = vadd.f32 %v11494_v56, %v16268_v42 }
 0x4dc   :  { %16330 = vst [vmem:[#allocation143_spill] sm:$0xff] %v11668_v24  ;;  %1502 = vperm.xlu0 %9475, %v11664_v63   ;;  %v16336_v24 = vld [vmem:[#allocation59_spill] sm:$0xff] }
 0x4dd   :  { %16335 = vst [vmem:[#allocation145_spill] sm:$0xff] %v11688_v11  ;;  %v11692_v3 = vadd.f32 %v16336_v24, %v11122_v16 }
 0x4df   :  { %v11680_v19 = vpop.xlane.xlu0 %2869  ;;  %v11682_v21 = vpop.xlane.xlu1 %4369  ;;  %3020 = vperm.xlu1 %9474, %v11674_v6   ;;  %16337 = vst [vmem:[#allocation146_spill] sm:$0xff] %v11692_v3  ;;  %v11702_v6 = vadd.f32 %v11505_v10, %v16271_v17 }
 0x4e0   :  { %16334 = vst [vmem:[#allocation91_spill] sm:$0xff] %v11682_v21  ;;  %1508 = vperm.xlu0 %9475, %v11678_v49   ;;  %v16340_v21 = vld [vmem:[#allocation61_spill] sm:$0xff] }
 0x4e1   :  { %16339 = vst [vmem:[#allocation148_spill] sm:$0xff] %v11702_v6  ;;  %v11706_v56 = vadd.f32 %v16340_v21, %v11128_v32 }
 0x4e3   :  { %v11694_v63 = vpop.xlane.xlu0 %2875  ;;  %v11696_v57 = vpop.xlane.xlu1 %4375  ;;  %3014 = vperm.xlu1 %9474, %v11688_v11   ;;  %16341 = vst [vmem:[#allocation149_spill] sm:$0xff] %v11706_v56  ;;  %v16344_v11 = vld [vmem:[#allocation63_spill] sm:$0xff] }
 0x4e4   :  { %16338 = vst [vmem:[#allocation147_spill] sm:$0xff] %v11696_v57  ;;  %1514 = vperm.xlu0 %9475, %v11692_v3   ;;  %v11716_v57 = vadd.f32 %v11516_v15, %v16274_v22  ;;  %v11720_v10 = vadd.f32 %v16344_v11, %v11236_v5 }
 0x4e6   :  { %16343 = vst [vmem:[#allocation151_spill] sm:$0xff] %v11716_v57  ;;  %16345 = vst [vmem:[#allocation152_spill] sm:$0xff] %v11720_v10 }
 0x4e7   :  { %v11708_v42 = vpop.xlane.xlu0 %2887  ;;  %v11710_v16 = vpop.xlane.xlu1 %5834  ;;  %3026 = vperm.xlu1 %9474, %v11702_v6   ;;  %v16348_v6 = vld [vmem:[#allocation65_spill] sm:$0xff] }
 0x4e8   :  { %16342 = vst [vmem:[#allocation150_spill] sm:$0xff] %v11710_v16  ;;  %1520 = vperm.xlu0 %9475, %v11706_v56   ;;  %v11730_v16 = vadd.f32 %v11527_v33, %v16279_v25  ;;  %v11734_v15 = vadd.f32 %v16348_v6, %v11140_v2  ;;  %v11754_v2 = vadd.f32 %v2891_v35, %v16281_v53 }
 0x4ea   :  { %16347 = vst [vmem:[#allocation154_spill] sm:$0xff] %v11730_v16  ;;  %16353 = vst [vmem:[#allocation158_spill] sm:$0xff] %v11754_v2 }
 0x4eb   :  { %v11722_v3 = vpop.xlane.xlu0 %4348  ;;  %v11724_v32 = vpop.xlane.xlu1 %5846  ;;  %3032 = vperm.xlu1 %9474, %v11716_v57   ;;  %v16351_v57 = vld [vmem:[#allocation67_spill] sm:$0xff] }
 0x4ec   :  { %16346 = vst [vmem:[#allocation153_spill] sm:$0xff] %v11724_v32  ;;  %1526 = vperm.xlu0 %9475, %v11720_v10   ;;  %v11743_v32 = vadd.f32 %v2879_v39, %v16277_v18  ;;  %v11747_v10 = vadd.f32 %v16351_v57, %v11248_v26  ;;  %v11767_v26 = vadd.f32 %v2897_v0, %v16283_v48 }
 0x4ed   :  { %v11815_v48 = vadd.f32 %v11534_v12, %v16321_v43 }
 0x4ee   :  { %16350 = vst [vmem:[#allocation156_spill] sm:$0xff] %v11743_v32  ;;  %16357 = vst [vmem:[#allocation161_spill] sm:$0xff] %v11767_v26 }
 0x4ef   :  { %v11736_v56 = vpop.xlane.xlu0 %4354  ;;  %v11738_v5 = vpop.xlane.xlu1 %5852  ;;  %3044 = vperm.xlu1 %9474, %v11730_v16   ;;  %16370 = vst [vmem:[#allocation173_spill] sm:$0xff] %v11815_v48 }
 0x4f0   :  { %16349 = vst [vmem:[#allocation155_spill] sm:$0xff] %v11738_v5  ;;  %1532 = vperm.xlu0 %9475, %v11734_v15   ;;  %v16354_v5 = vld [vmem:[#allocation69_spill] sm:$0xff] }
 0x4f1   :  { %v11758_v16 = vadd.f32 %v16354_v5, %v11256_v58 }
 0x4f3   :  { %v11749_v33 = vpop.xlane.xlu0 %4366  ;;  %v2903_v25 = vpop.xlane.xlu1 %2902  ;;  %3038 = vperm.xlu1 %9474, %v11743_v32   ;;  %v16358_v32 = vld [vmem:[#allocation71_spill] sm:$0xff] }
 0x4f4   :  { %16352 = vst [vmem:[#allocation157_spill] sm:$0xff] %v11749_v33  ;;  %1538 = vperm.xlu0 %9475, %v11747_v10   ;;  %v11771_v33 = vadd.f32 %v16358_v32, %v11296_v36  ;;  %v11792_v36 = vadd.f32 %v11426_v50, %v16304_v41  ;;  %v11810_v50 = vadd.f32 %v11525_v29, %v16310_v62 }
 0x4f5   :  { %v11829_v29 = vadd.f32 %v11552_v14, %v16333_v45 }
 0x4f6   :  { %16359 = vst [vmem:[#allocation162_spill] sm:$0xff] %v11771_v33  ;;  %16365 = vst [vmem:[#allocation168_spill] sm:$0xff] %v11792_v36 }
 0x4f7   :  { %v11760_v39 = vpop.xlane.xlu0 %5825  ;;  %v11762_v18 = vpop.xlane.xlu1 %4381  ;;  %3050 = vperm.xlu1 %9474, %v11754_v2   ;;  %16369 = vst [vmem:[#allocation172_spill] sm:$0xff] %v11810_v50  ;;  %16372 = vst [vmem:[#allocation175_spill] sm:$0xff] %v11829_v29  ;;  %v11836_v2 = vadd.f32 %v11666_v13, %v16328_v52  ;;  %v11854_v13 = vadd.f32 %v11694_v63, %v16340_v21 }
 0x4f8   :  { %16355 = vst [vmem:[#allocation159_spill] sm:$0xff] %v11760_v39  ;;  %16356 = vst [vmem:[#allocation160_spill] sm:$0xff] %v11762_v18  ;;  %1544 = vperm.xlu0 %9475, %v11758_v16   ;;  %v11780_v18 = vadd.f32 %v2903_v25, %v16286_v20  ;;  %v11784_v39 = vadd.f32 %v11382_v54, %v16237_v28  ;;  %v11801_v54 = vadd.f32 %v11437_v46, %v16316_v40 }
 0x4f9   :  { %16374 = vst [vmem:[#allocation177_spill] sm:$0xff] %v11836_v2  ;;  %16378 = vst [vmem:[#allocation181_spill] sm:$0xff] %v11854_v13 }
 0x4fa   :  { %16362 = vst [vmem:[#allocation165_spill] sm:$0xff] %v11780_v18  ;;  %16363 = vst [vmem:[#allocation166_spill] sm:$0xff] %v11784_v39 }
 0x4fb   :  { %v11773_v35 = vpop.xlane.xlu0 %4336  ;;  %3056 = vperm.xlu1 %9474, %v11767_v26   ;;  %v11777_v58 = vpop.xlane.xlu1 %5858  ;;  %16367 = vst [vmem:[#allocation170_spill] sm:$0xff] %v11801_v54 }
 0x4fc   :  { %16360 = vst [vmem:[#allocation163_spill] sm:$0xff] %v11773_v35  ;;  %1550 = vperm.xlu0 %9475, %v11771_v33   ;;  %16361 = vst [vmem:[#allocation164_spill] sm:$0xff] %v11777_v58 }
 0x4ff   :  { %v11786_v0 = vpop.xlane.xlu0 %5831  ;;  %3062 = vperm.xlu1 %9474, %v11780_v18   ;;  %v11794_v26 = vpop.permute.xlu1 %1460 }
 0x500   :  { %16364 = vst [vmem:[#allocation167_spill] sm:$0xff] %v11786_v0  ;;  %2975 = vperm.xlu0 %9475, %v11784_v39  }
 0x503   :  { %v11796_v58 = vpop.xlane.xlu0 %5843  ;;  %v11805_v20 = vpop.permute.xlu1 %1463 }
 0x504   :  { %16366 = vst [vmem:[#allocation169_spill] sm:$0xff] %v11796_v58  ;;  %2987 = vperm.xlu0 %9475, %v11792_v36  }
 0x507   :  { %v11803_v25 = vpop.xlane.xlu0 %5813  ;;  %v11817_v58 = vpop.permute.xlu1 %1469 }
 0x508   :  { %16368 = vst [vmem:[#allocation171_spill] sm:$0xff] %v11803_v25  ;;  %2999 = vperm.xlu0 %9475, %v11801_v54   ;;  %v11822_v25 = vadd.f32 %v11543_v4, %v16325_v51 }
 0x50a   :  { %16371 = vst [vmem:[#allocation174_spill] sm:$0xff] %v11822_v25 }
 0x50b   :  { %v2882_v18 = vpop.xlane.xlu0 %2881  ;;  %v11824_v35 = vpop.permute.xlu1 %1481 }
 0x50c   :  { %2993 = vperm.xlu0 %9475, %v11810_v50   ;;  %v16390_v50 = vld [vmem:[#allocation3_spill] sm:$0xff] }
 0x50f   :  { %v2894_v46 = vpop.xlane.xlu0 %2893 }
 0x510   :  { %3005 = vperm.xlu0 %9475, %v11815_v48   ;;  %v11838_v48 = vpop.permute.xlu1 %1475 }
 0x513   :  { %v2900_v0 = vpop.xlane.xlu0 %2899 }
 0x514   :  { %3011 = vperm.xlu0 %9475, %v11822_v25   ;;  %v11845_v25 = vadd.f32 %v11680_v19, %v16336_v24  ;;  %v11849_v54 = vpop.permute.xlu1 %1487 }
 0x516   :  { %16376 = vst [vmem:[#allocation179_spill] sm:$0xff] %v11845_v25 }
 0x517   :  { %v11831_v12 = vpop.xlane.xlu0 %4360 }
 0x518   :  { %16373 = vst [vmem:[#allocation176_spill] sm:$0xff] %v11831_v12  ;;  %3023 = vperm.xlu0 %9475, %v11829_v29   ;;  %v11861_v29 = vadd.f32 %v11708_v42, %v16348_v6  ;;  %v11863_v19 = vpop.permute.xlu1 %1493 }
 0x51a   :  { %16380 = vst [vmem:[#allocation183_spill] sm:$0xff] %v11861_v29 }
 0x51b   :  { %v11840_v4 = vpop.xlane.xlu0 %4372 }
 0x51c   :  { %16375 = vst [vmem:[#allocation178_spill] sm:$0xff] %v11840_v4  ;;  %3017 = vperm.xlu0 %9475, %v11836_v2   ;;  %v11873_v63 = vpop.permute.xlu1 %1505  ;;  %v16389_v4 = vlaneseq }
 0x51f   :  { %v11847_v14 = vpop.xlane.xlu0 %4378 }
 0x520   :  { %16377 = vst [vmem:[#allocation180_spill] sm:$0xff] %v11847_v14  ;;  %3029 = vperm.xlu0 %9475, %v11845_v25   ;;  %v11869_v14 = vadd.f32 %v2882_v18, %v16344_v11 }
 0x522   :  { %16382 = vst [vmem:[#allocation185_spill] sm:$0xff] %v11869_v14 }
 0x523   :  { %v11856_v52 = vpop.xlane.xlu0 %5837 }
 0x524   :  { %16379 = vst [vmem:[#allocation182_spill] sm:$0xff] %v11856_v52  ;;  %3035 = vperm.xlu0 %9475, %v11854_v13   ;;  %v11877_v52 = vadd.f32 %v2894_v46, %v16351_v57  ;;  %v11881_v13 = vadd.f32 %v2900_v0, %v16354_v5 }
 0x526   :  { %16384 = vst [vmem:[#allocation187_spill] sm:$0xff] %v11877_v52  ;;  %16385 = vst [vmem:[#allocation188_spill] sm:$0xff] %v11881_v13 }
 0x527   :  { %v11865_v2 = vpop.xlane.xlu0 %5849 }
 0x528   :  { %16381 = vst [vmem:[#allocation184_spill] sm:$0xff] %v11865_v2  ;;  %3047 = vperm.xlu0 %9475, %v11861_v29   ;;  %v11883_v2 = vpop.permute.xlu1 %1499 }
 0x52b   :  { %v11871_v25 = vpop.xlane.xlu0 %5855 }
 0x52c   :  { %16383 = vst [vmem:[#allocation186_spill] sm:$0xff] %v11871_v25  ;;  %3041 = vperm.xlu0 %9475, %v11869_v14   ;;  %v11891_v29 = vpop.permute.xlu1 %1511 }
 0x52f   :  { %v2906_v42 = vpop.xlane.xlu0 %2905 }
 0x530   :  { %3053 = vperm.xlu0 %9475, %v11877_v52   ;;  %v11889_v25 = vadd.f32 %v2906_v42, %v16358_v32  ;;  %v11896_v14 = vpop.permute.xlu1 %1517 }
 0x532   :  { %16387 = vst [vmem:[#allocation190_spill] sm:$0xff] %v11889_v25 }
 0x533   :  { %v11886_v18 = vpop.xlane.xlu0 %4384 }
 0x534   :  { %3059 = vperm.xlu0 %9475, %v11881_v13   ;;  %16386 = vst [vmem:[#allocation189_spill] sm:$0xff] %v11886_v18  ;;  %v11898_v5 = vpop.permute.xlu1 %1523  ;;  %v1553_v13 = vand.u32 127, %v16389_v4 }
 0x536   :  { %v1558_v42 = vadd.s32 4294967288, %v1553_v13  ;;  %v11904_v51 = vsub.s32 %v1553_v13, %v16390_v50 }
 0x537   :  { %v11894_v46 = vpop.xlane.xlu0 %5861 }
 0x538   :  { %3065 = vperm.xlu0 %9475, %v11889_v25   ;;  %16388 = vst [vmem:[#allocation191_spill] sm:$0xff] %v11894_v46  ;;  %v11901_v57 = vpop.permute.xlu1 %1529  ;;  %v11907_v25 = vsub.s32 %v1558_v42, %v16390_v50  ;;  %v1568_v4 = vrot.slane %v11805_v20, %v11904_v51  ;;  %v1577_v13 = vrot.slane %v11817_v58, %v11904_v51 }
 0x53c   :  { %v11909_v46 = vpop.permute.xlu1 %1535 }
 0x53f   :  { %v1458_v52 = vpop.permute.xlu0 %1457 }
 0x540   :  { %v1557_v43 = vrot.slane %v1458_v52, %v11904_v51  ;;  %v11924_v42 = vpop.permute.xlu1 %1541 }
 0x543   :  { %v1467_v0 = vpop.permute.xlu0 %1466 }
 0x544   :  { %v1572_v36 = vrot.slane %v1467_v0, %v11907_v25  ;;  %v1562_v0 = vrot.slane %v11794_v26, %v11907_v25  ;;  %v1604_v26 = vrot.slane %v11849_v54, %v11904_v51 }
 0x546   :  { %v1573_v20 = vsel %vm1563_vm4, %v1572_v36, %v1568_v4  ;;  %v1564_v11 = vsel %vm1563_vm4, %v1562_v0, %v1557_v43 }
 0x547   :  { %v1473_v53 = vpop.permute.xlu0 %1472  ;;  %v1701_v36 = vsel %vm1700_vm5, %v1573_v20, %v1564_v11 }
 0x548   :  { %v1581_v39 = vrot.slane %v1473_v53, %v11907_v25  ;;  %v1586_v53 = vrot.slane %v11838_v48, %v11904_v51 }
 0x54a   :  { %v1582_v58 = vsel %vm1563_vm4, %v1581_v39, %v1577_v13  ;;  %v1622_v13 = vrot.slane %v11883_v2, %v11904_v51 }
 0x54b   :  { %v1479_v18 = vpop.permute.xlu0 %1478  ;;  %v1703_v39 = vsel %vm1702_vm6, %v1582_v58, %v1701_v36 }
 0x54c   :  { %v1590_v12 = vrot.slane %v1479_v18, %v11907_v25  ;;  %v1595_v18 = vrot.slane %v11824_v35, %v11904_v51 }
 0x54e   :  { %v1591_v48 = vsel %vm1563_vm4, %v1590_v12, %v1586_v53 }
 0x54f   :  { %v1485_v32 = vpop.permute.xlu0 %1484  ;;  %v1705_v54 = vsel %vm1704_vm7, %v1591_v48, %v1703_v39 }
 0x550   :  { %v1599_v50 = vrot.slane %v1485_v32, %v11907_v25 }
 0x552   :  { %v1600_v35 = vsel %vm1563_vm4, %v1599_v50, %v1595_v18 }
 0x553   :  { %v1491_v6 = vpop.permute.xlu0 %1490  ;;  %v1707_v11 = vsel %vm1706_vm8, %v1600_v35, %v1705_v54  ;;  %v11961_v35 = vadd.f32 %v11310_v31, %v16290_v7 }
 0x554   :  { %v1608_v52 = vrot.slane %v1491_v6, %v11907_v25  ;;  %v1613_v6 = vrot.slane %v11863_v19, %v11904_v51  ;;  %v1548_v19 = vpop.permute.xlu1 %1547 }
 0x555   :  { %16391 = vst [vmem:[#allocation3_spill] sm:$0xff] %v11961_v35 }
 0x556   :  { %v1609_v4 = vsel %vm1563_vm4, %v1608_v52, %v1604_v26 }
 0x557   :  { %v1497_v32 = vpop.permute.xlu0 %1496  ;;  %v1709_v50 = vsel %vm1708_vm9, %v1609_v4, %v1707_v11 }
 0x558   :  { %v1617_v33 = vrot.slane %v1497_v32, %v11907_v25  ;;  %v11953_v2 = vpop.permute.xlu1 %2972 }
 0x55a   :  { %v1618_v43 = vsel %vm1563_vm4, %v1617_v33, %v1613_v6 }
 0x55b   :  { %v1503_v12 = vpop.permute.xlu0 %1502  ;;  %v1711_v20 = vsel %vm1710_vm10, %v1618_v43, %v1709_v50  ;;  %v11968_v43 = vadd.f32 %v11448_v44, %v16240_v60  ;;  %v1658_v44 = vrot.slane %v11898_v5, %v11904_v51 }
 0x55c   :  { %v1626_v0 = vrot.slane %v1503_v12, %v11907_v25  ;;  %v11955_v26 = vpop.permute.xlu1 %2978  ;;  %v1640_v12 = vrot.slane %v11891_v29, %v11904_v51 }
 0x55d   :  { %16392 = vst [vmem:[#allocation192_spill] sm:$0xff] %v11968_v43 }
 0x55e   :  { %v1627_v53 = vsel %vm1563_vm4, %v1626_v0, %v1622_v13  ;;  %v1649_v0 = vrot.slane %v11896_v14, %v11904_v51  ;;  %v1667_v14 = vrot.slane %v11901_v57, %v11904_v51 }
 0x55f   :  { %v1509_v52 = vpop.permute.xlu0 %1508  ;;  %v1713_v33 = vsel %vm1712_vm11, %v1627_v53, %v1711_v20  ;;  %v1631_v53 = vrot.slane %v11873_v63, %v11904_v51  ;;  %v1676_v63 = vrot.slane %v11909_v46, %v11904_v51 }
 0x560   :  { %v1724_v18 = vsel %vm1723_vm12, %v1713_v33, -inf  ;;  %v11957_v6 = vpop.permute.xlu1 %2981  ;;  %v1635_v11 = vrot.slane %v1509_v52, %v11907_v25  ;;  %v11988_v52 = vadd.f32 %v11459_v59, %v16298_v37 }
 0x561   :  { %1725 = vmax.xlane.f32.xlu1 %v1724_v18 }
 0x562   :  { %16393 = vst [vmem:[#allocation193_spill] sm:$0xff] %v11988_v52  ;;  %v1636_v5 = vsel %vm1563_vm4, %v1635_v11, %v1631_v53  ;;  %v1694_v11 = vrot.slane %v1548_v19, %v11904_v51 }
 0x563   :  { %v1515_v58 = vpop.permute.xlu0 %1514 }
 0x564   :  { %v1644_v39 = vrot.slane %v1515_v58, %v11907_v25  ;;  %v11972_v13 = vpop.permute.xlu1 %2984 }
 0x566   :  { %v1645_v20 = vsel %vm1563_vm4, %v1644_v39, %v1640_v12 }
 0x567   :  { %v1521_v32 = vpop.permute.xlu0 %1520  ;;  %v1714_v59 = vsel %vm1700_vm5, %v1645_v20, %v1636_v5 }
 0x568   :  { %v1653_v4 = vrot.slane %v1521_v32, %v11907_v25  ;;  %v12002_v57 = vpop.permute.xlu1 %2996 }
 0x56a   :  { %v1654_v33 = vsel %vm1563_vm4, %v1653_v4, %v1649_v0 }
 0x56b   :  { %v1527_v48 = vpop.permute.xlu0 %1526  ;;  %v1715_v39 = vsel %vm1702_vm6, %v1654_v33, %v1714_v59  ;;  %v16399_v59 = vld [vmem:[#allocation97_spill] sm:$0xff] }
 0x56c   :  { %v1662_v31 = vrot.slane %v1527_v48, %v11907_v25  ;;  %v1685_v48 = vrot.slane %v11924_v42, %v11904_v51  ;;  %v12011_v42 = vadd.f32 %v11340_v61, %v16243_v8  ;;  %v12023_v61 = vadd.f32 %v11406_v55, %v16264_v23  ;;  %v2991_v19 = vpop.permute.xlu1 %2990 }
 0x56e   :  { %v1663_v58 = vsel %vm1563_vm4, %v1662_v31, %v1658_v44  ;;  %16394 = vst [vmem:[#allocation194_spill] sm:$0xff] %v12011_v42  ;;  %16395 = vst [vmem:[#allocation195_spill] sm:$0xff] %v12023_v61 }
 0x56f   :  { %v1533_v36 = vpop.permute.xlu0 %1532  ;;  %v1716_v46 = vsel %vm1704_vm7, %v1663_v58, %v1715_v39  ;;  %v12034_v58 = vadd.f32 %v11417_v27, %v16251_v34 }
 0x570   :  { %v1671_v50 = vrot.slane %v1533_v36, %v11907_v25 }
 0x571   :  { %16397 = vst [vmem:[#allocation197_spill] sm:$0xff] %v12034_v58 }
 0x572   :  { %4451 = vperm.xlu1 %9474, %v11961_v35   ;;  %v1672_v36 = vsel %vm1563_vm4, %v1671_v50, %v1667_v14 }
 0x573   :  { %v1539_v54 = vpop.permute.xlu0 %1538  ;;  %v1717_v31 = vsel %vm1706_vm8, %v1672_v36, %v1716_v46  ;;  %v12044_v36 = vadd.f32 %v16399_v59, %v16247_v38 }
 0x574   :  { %v1680_v29 = vrot.slane %v1539_v54, %v11907_v25 }
 0x575   :  { %16400 = vst [vmem:[#allocation97_spill] sm:$0xff] %v12044_v36 }
 0x576   :  { %4457 = vperm.xlu1 %9474, %v11968_v43   ;;  %v1681_v4 = vsel %vm1563_vm4, %v1680_v29, %v1676_v63  ;;  %v3003_v63 = vpop.permute.xlu1 %3002 }
 0x577   :  { %v1545_v18 = vpop.permute.xlu0 %1544  ;;  %v1718_v50 = vsel %vm1708_vm9, %v1681_v4, %v1717_v31  ;;  %v16401_v4 = vld [vmem:[#allocation101_spill] sm:$0xff] }
 0x578   :  { %v1689_v32 = vrot.slane %v1545_v18, %v11907_v25  ;;  %v12029_v18 = vadd.f32 %v11536_v1, %v16271_v17  ;;  %v12051_v46 = vadd.f32 %v16401_v4, %v16237_v28 }
 0x57a   :  { %4460 = vperm.xlu1 %9474, %v11988_v52   ;;  %v1690_v54 = vsel %vm1563_vm4, %v1689_v32, %v1685_v48  ;;  %16396 = vst [vmem:[#allocation196_spill] sm:$0xff] %v12029_v18  ;;  %v12039_v32 = vadd.f32 %v11545_v47, %v16274_v22  ;;  %v3009_v48 = vpop.permute.xlu1 %3008  ;;  %16402 = vst [vmem:[#allocation101_spill] sm:$0xff] %v12051_v46  ;;  %v16520_v22 = vld [vmem:[#allocation178_spill] sm:$0xff] }
 0x57b   :  { %v1551_v12 = vpop.permute.xlu0 %1550  ;;  %v1719_v44 = vsel %vm1710_vm10, %v1690_v54, %v1718_v50 }
 0x57c   :  { %v1698_v0 = vrot.slane %v1551_v12, %v11907_v25  ;;  %16398 = vst [vmem:[#allocation198_spill] sm:$0xff] %v12039_v32  ;;  %v16403_v12 = vld [vmem:[#allocation107_spill] sm:$0xff] }
 0x57e   :  { %4463 = vperm.xlu1 %9474, %v12011_v42   ;;  %v1699_v53 = vsel %vm1563_vm4, %v1698_v0, %v1694_v11  ;;  %v12046_v39 = vpop.permute.xlu1 %3020  ;;  %v12058_v11 = vadd.f32 %v16403_v12, %v16304_v41  ;;  %v16405_v0 = vld [vmem:[#allocation123_spill] sm:$0xff] }
 0x57f   :  { %v2976_v20 = vpop.permute.xlu0 %2975  ;;  %v1720_v29 = vsel %vm1712_vm11, %v1699_v53, %v1719_v44  ;;  %v12063_v50 = vadd.f32 %v16405_v0, %v16333_v45  ;;  %v16408_v0 = vld [vmem:[#allocation126_spill] sm:$0xff] }
 0x580   :  { %v1727_v14 = vsel %vm1723_vm12, %v1720_v29, -inf  ;;  %16404 = vst [vmem:[#allocation107_spill] sm:$0xff] %v12058_v11  ;;  %v12070_v29 = vadd.f32 %v11722_v3, %v16336_v24 }
 0x581   :  { %1728 = vmax.xlane.f32.xlu0 %v1727_v14  ;;  %16406 = vst [vmem:[#allocation123_spill] sm:$0xff] %v12063_v50  ;;  %v3074_v14 = vrot.slane %v2976_v20, %v11907_v25  ;;  %v3088_v20 = vrot.slane %v11972_v13, %v11904_v51 }
 0x582   :  { %4499 = vperm.xlu1 %9474, %v12023_v61   ;;  %v3015_v54 = vpop.permute.xlu1 %3014  ;;  %16407 = vst [vmem:[#allocation199_spill] sm:$0xff] %v12070_v29 }
 0x583   :  { %v2988_v33 = vpop.permute.xlu0 %2987 }
 0x584   :  { %v3092_v12 = vrot.slane %v2988_v33, %v11907_v25  ;;  %v3097_v33 = vrot.slane %v2991_v19, %v11904_v51 }
 0x586   :  { %4505 = vperm.xlu1 %9474, %v12029_v18   ;;  %v12065_v53 = vpop.permute.xlu1 %3026 }
 0x587   :  { %v3000_v5 = vpop.permute.xlu0 %2999 }
 0x58a   :  { %4469 = vperm.xlu1 %9474, %v12034_v58   ;;  %v3033_v4 = vpop.permute.xlu1 %3032  ;;  %v3083_v58 = vrot.slane %v11957_v6, %v11907_v25  ;;  %v12096_v6 = vadd.f32 %v11736_v56, %v16340_v21 }
 0x58b   :  { %v2994_v55 = vpop.permute.xlu0 %2993 }
 0x58c   :  { %v3101_v3 = vrot.slane %v2994_v55, %v11907_v25  ;;  %16410 = vst [vmem:[#allocation200_spill] sm:$0xff] %v12096_v6 }
 0x58e   :  { %4511 = vperm.xlu1 %9474, %v12039_v32   ;;  %v3070_v32 = vrot.slane %v11953_v2, %v11904_v51  ;;  %v3102_v13 = vsel %vm1563_vm4, %v3101_v3, %v3097_v33 }
 0x58f   :  { %v3006_v1 = vpop.permute.xlu0 %3005 }
 0x590   :  { %v3075_v18 = vsel %vm1563_vm4, %v3074_v14, %v3070_v32  ;;  %v3110_v32 = vrot.slane %v3000_v5, %v11907_v25 }
 0x592   :  { %4475 = vperm.xlu1 %9474, %v12044_v36   ;;  %v12077_v36 = vadd.f32 %v16408_v0, %v16310_v62  ;;  %v3093_v0 = vsel %vm1563_vm4, %v3092_v12, %v3088_v20  ;;  %v3115_v12 = vrot.slane %v3003_v63, %v11904_v51 }
 0x593   :  { %v3012_v27 = vpop.permute.xlu0 %3011 }
 0x594   :  { %16409 = vst [vmem:[#allocation126_spill] sm:$0xff] %v12077_v36  ;;  %v3128_v14 = vrot.slane %v3012_v27, %v11907_v25  ;;  %v3133_v27 = vrot.slane %v3015_v54, %v11904_v51 }
 0x597   :  { %4454 = vperm.xlu0 %9475, %v12051_v46   ;;  %v12054_v47 = vpop.permute.xlu0 %3023  ;;  %v16450_v46 = vld [vmem:[#allocation117_spill] sm:$0xff] }
 0x59b   :  { %4466 = vperm.xlu0 %9475, %v12058_v11   ;;  %v3018_v31 = vpop.permute.xlu0 %3017 }
 0x59c   :  { %v3137_v56 = vrot.slane %v3018_v31, %v11907_v25 }
 0x59f   :  { %4502 = vperm.xlu0 %9475, %v12063_v50   ;;  %v3030_v44 = vpop.permute.xlu0 %3029  ;;  %v3045_v50 = vpop.permute.xlu1 %3044 }
 0x5a3   :  { %4508 = vperm.xlu0 %9475, %v12070_v29   ;;  %v3036_v59 = vpop.permute.xlu0 %3035  ;;  %v3079_v29 = vrot.slane %v11955_v26, %v11904_v51  ;;  %v3119_v26 = vrot.slane %v3006_v1, %v11907_v25  ;;  %v3124_v1 = vrot.slane %v3009_v48, %v11904_v51 }
 0x5a5   :  { %v3084_v55 = vsel %vm1563_vm4, %v3083_v58, %v3079_v29  ;;  %v3106_v58 = vrot.slane %v12002_v57, %v11904_v51  ;;  %v3120_v63 = vsel %vm1563_vm4, %v3119_v26, %v3115_v12  ;;  %v3129_v31 = vsel %vm1563_vm4, %v3128_v14, %v3124_v1 }
 0x5a6   :  { %v3211_v19 = vsel %vm1700_vm5, %v3084_v55, %v3075_v18  ;;  %v16411_v18 = vld [vmem:[#allocation109_spill] sm:$0xff]  ;;  %v3138_v57 = vsel %vm1563_vm4, %v3137_v56, %v3133_v27  ;;  %v3155_v12 = vrot.slane %v3030_v44, %v11907_v25  ;;  %v3164_v56 = vrot.slane %v3036_v59, %v11907_v25 }
 0x5a7   :  { %4472 = vperm.xlu0 %9475, %v12077_v36   ;;  %v12092_v2 = vpop.permute.xlu0 %3047  ;;  %v3212_v20 = vsel %vm1702_vm6, %v3093_v0, %v3211_v19  ;;  %v12114_v5 = vadd.f32 %v16411_v18, %v16316_v40  ;;  %v3111_v3 = vsel %vm1563_vm4, %v3110_v32, %v3106_v58  ;;  %v3039_v0 = vpop.permute.xlu1 %3038  ;;  %v3151_v58 = vrot.slane %v12065_v53, %v11904_v51  ;;  %v16446_v36 = vld [vmem:[#allocation115_spill] sm:$0xff] }
 0x5a8   :  { %v3213_v29 = vsel %vm1704_vm7, %v3102_v13, %v3212_v20  ;;  %v3146_v1 = vrot.slane %v12054_v47, %v11907_v25  ;;  %v3160_v18 = vrot.slane %v3033_v4, %v11904_v51  ;;  %v3142_v27 = vrot.slane %v12046_v39, %v11904_v51 }
 0x5a9   :  { %16412 = vst [vmem:[#allocation109_spill] sm:$0xff] %v12114_v5  ;;  %v3214_v48 = vsel %vm1706_vm8, %v3111_v3, %v3213_v29  ;;  %v3156_v44 = vsel %vm1563_vm4, %v3155_v12, %v3151_v58  ;;  %v3182_v4 = vrot.slane %v12092_v2, %v11907_v25 }
 0x5aa   :  { %v3215_v55 = vsel %vm1708_vm9, %v3120_v63, %v3214_v48  ;;  %v3169_v63 = vrot.slane %v3039_v0, %v11904_v51  ;;  %v3165_v3 = vsel %vm1563_vm4, %v3164_v56, %v3160_v18  ;;  %v16413_v18 = vld [vmem:[#allocation4_spill] sm:$0xff] }
 0x5ab   :  { %4514 = vperm.xlu0 %9475, %v12096_v6   ;;  %v3042_v33 = vpop.permute.xlu0 %3041  ;;  %v3216_v13 = vsel %vm1710_vm10, %v3129_v31, %v3215_v55  ;;  %v3051_v32 = vpop.permute.xlu1 %3050  ;;  %v3147_v31 = vsel %vm1563_vm4, %v3146_v1, %v3142_v27 }
 0x5ac   :  { %v3217_v54 = vsel %vm1712_vm11, %v3138_v57, %v3216_v13  ;;  %v3173_v29 = vrot.slane %v3042_v33, %v11907_v25  ;;  %v3218_v33 = vsel %vm1700_vm5, %v3156_v44, %v3147_v31  ;;  %v3187_v48 = vrot.slane %v3051_v32, %v11904_v51  ;;  %v16416_v31 = vld [vmem:[#allocation81_spill] sm:$0xff] }
 0x5ad   :  { %v3227_v26 = vsel %vm1723_vm12, %v3217_v54, -inf  ;;  %v3219_v0 = vsel %vm1702_vm6, %v3165_v3, %v3218_v33  ;;  %v3178_v13 = vrot.slane %v3045_v50, %v11904_v51  ;;  %v16415_v3 = vld [vmem:[#allocation80_spill] sm:$0xff]  ;;  %v16418_v33 = vld [vmem:[#allocation83_spill] sm:$0xff] }
 0x5ae   :  { %v3174_v53 = vsel %vm1563_vm4, %v3173_v29, %v3169_v63  ;;  %v16414_v63 = vld [vmem:[#allocation5_spill] sm:$0xff] }
 0x5af   :  { %4478 = vperm.xlu0 %9475, %v12114_v5   ;;  %v3054_v19 = vpop.permute.xlu0 %3053  ;;  %v3057_v20 = vpop.permute.xlu1 %3056  ;;  %v3183_v2 = vsel %vm1563_vm4, %v3182_v4, %v3178_v13  ;;  %v16420_v13 = vld [vmem:[#allocation7_spill] sm:$0xff] }
 0x5b0   :  { %v3191_v47 = vrot.slane %v3054_v19, %v11907_v25  ;;  %v3196_v54 = vrot.slane %v3057_v20, %v11904_v51  ;;  %v3220_v19 = vsel %vm1704_vm7, %v3174_v53, %v3219_v0 }
 0x5b1   :  { %v3221_v56 = vsel %vm1706_vm8, %v3183_v2, %v3220_v19  ;;  %v16421_v19 = vld [vmem:[#allocation84_spill] sm:$0xff]  ;;  %v16422_v2 = vld [vmem:[#allocation86_spill] sm:$0xff] }
 0x5b2   :  { %v3192_v12 = vsel %vm1563_vm4, %v3191_v47, %v3187_v48  ;;  %v16417_v47 = vld [vmem:[#allocation6_spill] sm:$0xff] }
 0x5b3   :  { %v3060_v14 = vpop.permute.xlu0 %3059  ;;  %v3063_v57 = vpop.permute.xlu1 %3062  ;;  %v3222_v58 = vsel %vm1708_vm9, %v3192_v12, %v3221_v56  ;;  %v16423_v56 = vld [vmem:[#allocation8_spill] sm:$0xff] }
 0x5b4   :  { %v3200_v39 = vrot.slane %v3060_v14, %v11907_v25 }
 0x5b6   :  { %3228 = vmax.xlane.f32.xlu1 %v3227_v26  ;;  %v3205_v26 = vrot.slane %v3063_v57, %v11904_v51  ;;  %v3201_v14 = vsel %vm1563_vm4, %v3200_v39, %v3196_v54  ;;  %v16419_v39 = vld [vmem:[#allocation82_spill] sm:$0xff] }
 0x5b7   :  { %v3066_v59 = vpop.permute.xlu0 %3065  ;;  %v3223_v50 = vsel %vm1710_vm10, %v3201_v14, %v3222_v58 }
 0x5b8   :  { %v3209_v55 = vrot.slane %v3066_v59, %v11907_v25 }
 0x5ba   :  { %v3210_v32 = vsel %vm1563_vm4, %v3209_v55, %v3205_v26 }
 0x5bb   :  { %v3224_v20 = vsel %vm1712_vm11, %v3210_v32, %v3223_v50  ;;  %v16424_v50 = vld [vmem:[#allocation88_spill] sm:$0xff] }
 0x5bc   :  { %v3230_v1 = vsel %vm1723_vm12, %v3224_v20, -inf }
 0x5ce   :  { %3231 = vmax.xlane.f32.xlu0 %v3230_v1 }
 0x5ee   :  { %v1726_v29 = vpop.xlane.xlu1 %1725 }
 0x5ef   :  { %v1735_v27 = vrot.slane %v1726_v29, %v16413_v18  ;;  %v1739_v44 = vrot.slane %v1726_v29, %v16414_v63  ;;  %v1743_v57 = vrot.slane %v1726_v29, %v16417_v47  ;;  %v1747_v54 = vrot.slane %v1726_v29, %v16420_v13 }
 0x5f0   :  { %v1751_v58 = vrot.slane %v1726_v29, %v16423_v56 }
 0x5f1   :  { %v1812_v59 = vsub.f32 %v16415_v3, %v1735_v27  ;;  %v1813_v53 = vsub.f32 %v16416_v31, %v1735_v27  ;;  %v1815_v4 = vsub.f32 %v16418_v33, %v1739_v44  ;;  %v1814_v48 = vsub.f32 %v16419_v39, %v1739_v44  ;;  %v16425_v27 = vld [vmem:[#allocation92_spill] sm:$0xff]  ;;  %v16428_v39 = vld [vmem:[#allocation87_spill] sm:$0xff] }
 0x5f2   :  { %v1817_v26 = vsub.f32 %v16421_v19, %v1743_v57  ;;  %v1816_v14 = vsub.f32 %v16422_v2, %v1743_v57  ;;  %v1819_v20 = vsub.f32 %v16424_v50, %v1747_v54  ;;  %v1818_v44 = vsub.f32 %v16425_v27, %v1747_v54  ;;  %v16430_v19 = vld [vmem:[#allocation10_spill] sm:$0xff]  ;;  %v16431_v2 = vld [vmem:[#allocation93_spill] sm:$0xff] }
 0x5f3   :  { %v1844_v0 = vmul.f32 1.442695, %v1812_v59  ;;  %v1846_v55 = vmul.f32 1.442695, %v1813_v53  ;;  %v1850_v12 = vmul.f32 1.442695, %v1815_v4  ;;  %v1820_v57 = vsub.f32 %v16428_v39, %v1751_v58 }
 0x5f4   :  { %v1848_v32 = vmul.f32 1.442695, %v1814_v48  ;;  %v1854_v1 = vmul.f32 1.442695, %v1817_v26  ;;  %v1852_v3 = vmul.f32 1.442695, %v1816_v14  ;;  %v1759_v54 = vrot.slane %v1726_v29, %v16430_v19 }
 0x5f5   :  { %9492 = vpow2.f32 %v1844_v0  ;;  %v16426_v59 = vld [vmem:[#allocation9_spill] sm:$0xff]  ;;  %v1858_v4 = vmul.f32 1.442695, %v1819_v20  ;;  %v1856_v48 = vmul.f32 1.442695, %v1818_v44  ;;  %v16433_v20 = vld [vmem:[#allocation11_spill] sm:$0xff] }
 0x5f6   :  { %9494 = vpow2.f32 %v1846_v55  ;;  %v1755_v31 = vrot.slane %v1726_v29, %v16426_v59  ;;  %v16427_v53 = vld [vmem:[#allocation85_spill] sm:$0xff]  ;;  %v1825_v27 = vsub.f32 %v11652_v9, %v1759_v54  ;;  %v16434_v44 = vld [vmem:[#allocation94_spill] sm:$0xff]  ;;  %v16437_v9 = vld [vmem:[#allocation111_spill] sm:$0xff] }
 0x5f7   :  { %9496 = vpow2.f32 %v1850_v12  ;;  %v1821_v33 = vsub.f32 %v16427_v53, %v1751_v58 }
 0x5f8   :  { %9498 = vpow2.f32 %v1848_v32  ;;  %v1823_v26 = vsub.f32 %v11640_v30, %v1755_v31  ;;  %v1822_v14 = vsub.f32 %v16431_v2, %v1755_v31  ;;  %v1860_v32 = vmul.f32 1.442695, %v1820_v57 }
 0x5f9   :  { %9500 = vpow2.f32 %v1854_v1  ;;  %v1862_v12 = vmul.f32 1.442695, %v1821_v33  ;;  %v1763_v1 = vrot.slane %v1726_v29, %v16433_v20  ;;  %v1870_v29 = vmul.f32 1.442695, %v1825_v27 }
 0x5fa   :  { %9502 = vpow2.f32 %v1852_v3  ;;  %v1866_v30 = vmul.f32 1.442695, %v1823_v26  ;;  %v1824_v3 = vsub.f32 %v16434_v44, %v1759_v54  ;;  %v1864_v31 = vmul.f32 1.442695, %v1822_v14  ;;  %v16440_v44 = vld [vmem:[#allocation95_spill] sm:$0xff] }
 0x5fb   :  { %9504 = vpow2.f32 %v1858_v4  ;;  %v16436_v4 = vld [vmem:[#allocation142_spill] sm:$0xff]  ;;  %v1826_v57 = vsub.f32 %v16437_v9, %v1763_v1 }
 0x5fc   :  { %9506 = vpow2.f32 %v1856_v48  ;;  %v1827_v39 = vsub.f32 %v16436_v4, %v1763_v1  ;;  %v1868_v48 = vmul.f32 1.442695, %v1824_v3 }
 0x5fd   :  { %9508 = vpow2.f32 %v1862_v12  ;;  %v1872_v1 = vmul.f32 1.442695, %v1826_v57  ;;  %v16443_v57 = vld [vmem:[#allocation146_spill] sm:$0xff] }
 0x5fe   :  { %9510 = vpow2.f32 %v1860_v32  ;;  %v1874_v2 = vmul.f32 1.442695, %v1827_v39 }
 0x5ff   :  { %v12179_v0 = vpop.eup %9492  ;;  %9512 = vpow2.f32 %v1866_v30  ;;  %v12219_v30 = vpop.permute.xlu1 %4451 }
 0x600   :  { %v12181_v55 = vpop.eup %9494  ;;  %1941 = vperm.xlu0 %9475, %v12179_v0   ;;  %9514 = vpow2.f32 %v1864_v31 }
 0x601   :  { %16429 = vst [vmem:[#allocation80_spill] sm:$0xff] %v12181_v55  ;;  %1944 = vperm.xlu1 %9474, %v12181_v55   ;;  %v12188_v58 = vpop.eup %9496  ;;  %9516 = vpow2.f32 %v1870_v29  ;;  %v16442_v29 = vld [vmem:[#allocation113_spill] sm:$0xff] }
 0x602   :  { %v12190_v50 = vpop.eup %9498  ;;  %9518 = vpow2.f32 %v1868_v48 }
 0x603   :  { %16432 = vst [vmem:[#allocation81_spill] sm:$0xff] %v12190_v50  ;;  %v12197_v53 = vpop.eup %9500  ;;  %9520 = vpow2.f32 %v1874_v2 }
 0x604   :  { %1950 = vperm.xlu0 %9475, %v12188_v58   ;;  %v12199_v33 = vpop.eup %9502  ;;  %9522 = vpow2.f32 %v1872_v1 }
 0x605   :  { %1947 = vperm.xlu1 %9474, %v12190_v50   ;;  %16435 = vst [vmem:[#allocation83_spill] sm:$0xff] %v12199_v33  ;;  %v12205_v26 = vpop.eup %9504  ;;  %v16491_v50 = vld [vmem:[#allocation157_spill] sm:$0xff] }
 0x606   :  { %v12207_v54 = vpop.eup %9506 }
 0x607   :  { %16438 = vst [vmem:[#allocation82_spill] sm:$0xff] %v12207_v54  ;;  %v12217_v27 = vpop.eup %9508 }
 0x608   :  { %1956 = vperm.xlu0 %9475, %v12197_v53   ;;  %16439 = vst [vmem:[#allocation84_spill] sm:$0xff] %v12217_v27  ;;  %v12223_v4 = vpop.eup %9510 }
 0x609   :  { %1953 = vperm.xlu1 %9474, %v12199_v33   ;;  %16441 = vst [vmem:[#allocation86_spill] sm:$0xff] %v12223_v4  ;;  %v12231_v5 = vpop.eup %9512  ;;  %v16490_v33 = vld [vmem:[#allocation65_spill] sm:$0xff] }
 0x60a   :  { %16444 = vst [vmem:[#allocation88_spill] sm:$0xff] %v12231_v5 }
 0x60c   :  { %1962 = vperm.xlu0 %9475, %v12205_v26  }
 0x60d   :  { %1959 = vperm.xlu1 %9474, %v12207_v54  }
 0x60e   :  { %v12210_v12 = vpop.xlane.xlu0 %1728 }
 0x60f   :  { %v1767_v14 = vrot.slane %v12210_v12, %v16413_v18  ;;  %v1771_v32 = vrot.slane %v12210_v12, %v16414_v63  ;;  %v1775_v39 = vrot.slane %v12210_v12, %v16417_v47  ;;  %v1779_v2 = vrot.slane %v12210_v12, %v16420_v13 }
 0x610   :  { %1968 = vperm.xlu0 %9475, %v12217_v27   ;;  %v1783_v11 = vrot.slane %v12210_v12, %v16423_v56  ;;  %v1787_v52 = vrot.slane %v12210_v12, %v16426_v59  ;;  %v1791_v35 = vrot.slane %v12210_v12, %v16430_v19 }
 0x611   :  { %v1828_v3 = vsub.f32 %v16440_v44, %v1767_v14  ;;  %v1829_v31 = vsub.f32 %v11678_v49, %v1767_v14  ;;  %v1830_v9 = vsub.f32 %v16442_v29, %v1771_v32  ;;  %1965 = vperm.xlu1 %9474, %v12223_v4   ;;  %v1831_v48 = vsub.f32 %v16443_v57, %v1771_v32  ;;  %v12233_v49 = vpop.eup %9514  ;;  %v12236_v14 = vpop.permute.xlu1 %4457  ;;  %v16447_v32 = vld [vmem:[#allocation149_spill] sm:$0xff]  ;;  %v16488_v4 = vld [vmem:[#allocation103_spill] sm:$0xff] }
 0x612   :  { %16445 = vst [vmem:[#allocation92_spill] sm:$0xff] %v12233_v49  ;;  %v1832_v29 = vsub.f32 %v16446_v36, %v1775_v39  ;;  %v1833_v1 = vsub.f32 %v16447_v32, %v1775_v39  ;;  %v1834_v42 = vsub.f32 %v16450_v46, %v1779_v2  ;;  %v16454_v46 = vld [vmem:[#allocation118_spill] sm:$0xff] }
 0x613   :  { %v1876_v44 = vmul.f32 1.442695, %v1828_v3  ;;  %v1878_v6 = vmul.f32 1.442695, %v1829_v31  ;;  %v1880_v61 = vmul.f32 1.442695, %v1830_v9  ;;  %v12243_v31 = vpop.eup %9516 }
 0x614   :  { %1974 = vperm.xlu0 %9475, %v12231_v5   ;;  %v1882_v3 = vmul.f32 1.442695, %v1831_v48  ;;  %16448 = vst [vmem:[#allocation85_spill] sm:$0xff] %v12243_v31  ;;  %v12245_v57 = vpop.eup %9518  ;;  %v1884_v36 = vmul.f32 1.442695, %v1832_v29  ;;  %v16451_v9 = vld [vmem:[#allocation152_spill] sm:$0xff] }
 0x615   :  { %9524 = vpow2.f32 %v1876_v44  ;;  %1971 = vperm.xlu1 %9474, %v12233_v49   ;;  %16449 = vst [vmem:[#allocation87_spill] sm:$0xff] %v12245_v57  ;;  %v1835_v44 = vsub.f32 %v16451_v9, %v1779_v2  ;;  %v12253_v39 = vpop.eup %9520  ;;  %v12255_v48 = vpop.permute.xlu1 %4460  ;;  %v1888_v29 = vmul.f32 1.442695, %v1834_v42  ;;  %v1837_v2 = vsub.f32 %v11734_v15, %v1783_v11 }
 0x616   :  { %9526 = vpow2.f32 %v1878_v6  ;;  %v1886_v6 = vmul.f32 1.442695, %v1833_v1  ;;  %16452 = vst [vmem:[#allocation93_spill] sm:$0xff] %v12253_v39  ;;  %v12257_v32 = vpop.eup %9522  ;;  %v1839_v15 = vsub.f32 %v11747_v10, %v1787_v52 }
 0x617   :  { %9528 = vpow2.f32 %v1880_v61  ;;  %16453 = vst [vmem:[#allocation94_spill] sm:$0xff] %v12257_v32  ;;  %v1836_v61 = vsub.f32 %v16454_v46, %v1783_v11  ;;  %v1890_v1 = vmul.f32 1.442695, %v1835_v44  ;;  %v1894_v42 = vmul.f32 1.442695, %v1837_v2 }
 0x618   :  { %1980 = vperm.xlu0 %9475, %v12243_v31   ;;  %9530 = vpow2.f32 %v1882_v3  ;;  %v1898_v10 = vmul.f32 1.442695, %v1839_v15 }
 0x619   :  { %1977 = vperm.xlu1 %9474, %v12245_v57   ;;  %9532 = vpow2.f32 %v1884_v36  ;;  %v12269_v43 = vpop.permute.xlu1 %4463  ;;  %v16457_v57 = vld [vmem:[#allocation119_spill] sm:$0xff]  ;;  %v1892_v36 = vmul.f32 1.442695, %v1836_v61  ;;  %v1841_v61 = vsub.f32 %v11758_v16, %v1791_v35 }
 0x61a   :  { %9534 = vpow2.f32 %v1886_v6  ;;  %v1838_v49 = vsub.f32 %v16457_v57, %v1787_v52  ;;  %v16460_v6 = vld [vmem:[#allocation120_spill] sm:$0xff]  ;;  %v1795_v57 = vrot.slane %v12210_v12, %v16433_v20 }
 0x61b   :  { %9536 = vpow2.f32 %v1888_v29  ;;  %v1840_v46 = vsub.f32 %v16460_v6, %v1791_v35  ;;  %v1902_v12 = vmul.f32 1.442695, %v1841_v61 }
 0x61c   :  { %1986 = vperm.xlu0 %9475, %v12253_v39   ;;  %9538 = vpow2.f32 %v1890_v1 }
 0x61d   :  { %1983 = vperm.xlu1 %9474, %v12257_v32   ;;  %9540 = vpow2.f32 %v1892_v36  ;;  %v1896_v32 = vmul.f32 1.442695, %v1838_v49  ;;  %v12289_v29 = vpop.permute.xlu1 %4499  ;;  %v1900_v1 = vmul.f32 1.442695, %v1840_v46  ;;  %v16464_v49 = vld [vmem:[#allocation122_spill] sm:$0xff] }
 0x61e   :  { %9542 = vpow2.f32 %v1894_v42  ;;  %16462 = vst [vmem:[#allocation115_spill] sm:$0xff] %v12289_v29  ;;  %v1842_v36 = vsub.f32 %v16464_v49, %v1795_v57  ;;  %v12331_v29 = vpop.permute.xlu0 %4454 }
 0x61f   :  { %v12265_v3 = vpop.eup %9524  ;;  %9544 = vpow2.f32 %v1896_v32  ;;  %v16468_v32 = vld [vmem:[#allocation162_spill] sm:$0xff] }
 0x620   :  { %16455 = vst [vmem:[#allocation142_spill] sm:$0xff] %v12265_v3  ;;  %v12267_v9 = vpop.eup %9526  ;;  %9546 = vpow2.f32 %v1898_v10  ;;  %v1843_v15 = vsub.f32 %v16468_v32, %v1795_v57  ;;  %v1904_v42 = vmul.f32 1.442695, %v1842_v36  ;;  %v16476_v32 = vld [vmem:[#allocation63_spill] sm:$0xff] }
 0x621   :  { %16456 = vst [vmem:[#allocation111_spill] sm:$0xff] %v12267_v9  ;;  %1992 = vperm.xlu0 %9475, %v12267_v9   ;;  %1989 = vperm.xlu1 %9474, %v12265_v3   ;;  %v12277_v11 = vpop.eup %9528  ;;  %v12300_v35 = vpop.permute.xlu1 %4505  ;;  %9548 = vpow2.f32 %v1900_v1 }
 0x622   :  { %16458 = vst [vmem:[#allocation95_spill] sm:$0xff] %v12277_v11  ;;  %v12279_v44 = vpop.eup %9530  ;;  %16467 = vst [vmem:[#allocation118_spill] sm:$0xff] %v12300_v35  ;;  %9550 = vpow2.f32 %v1902_v12  ;;  %v1906_v61 = vmul.f32 1.442695, %v1843_v15  ;;  %v16477_v15 = vld [vmem:[#allocation176_spill] sm:$0xff] }
 0x623   :  { %16459 = vst [vmem:[#allocation113_spill] sm:$0xff] %v12279_v44  ;;  %v12287_v52 = vpop.eup %9532  ;;  %9552 = vpow2.f32 %v1904_v42  ;;  %v12329_v42 = vadd.f32 %v16477_v15, %v16476_v32  ;;  %v16484_v15 = vld [vmem:[#allocation54_spill] sm:$0xff] }
 0x624   :  { %16461 = vst [vmem:[#allocation146_spill] sm:$0xff] %v12287_v52  ;;  %v12291_v2 = vpop.eup %9534  ;;  %9554 = vpow2.f32 %v1906_v61  ;;  %v16480_v61 = vld [vmem:[#allocation75_spill] sm:$0xff] }
 0x625   :  { %1998 = vperm.xlu0 %9475, %v12279_v44   ;;  %1995 = vperm.xlu1 %9474, %v12277_v11   ;;  %16463 = vst [vmem:[#allocation149_spill] sm:$0xff] %v12291_v2  ;;  %v12296_v6 = vpop.eup %9536  ;;  %v12313_v1 = vpop.permute.xlu1 %4469  ;;  %16478 = vst [vmem:[#allocation176_spill] sm:$0xff] %v12329_v42  ;;  %v16485_v11 = vld [vmem:[#allocation129_spill] sm:$0xff] }
 0x626   :  { %16465 = vst [vmem:[#allocation117_spill] sm:$0xff] %v12296_v6  ;;  %v12298_v16 = vpop.eup %9538  ;;  %v12351_v3 = vadd.f32 %v16485_v11, %v16484_v15  ;;  %v16494_v11 = vld [vmem:[#allocation76_spill] sm:$0xff] }
 0x627   :  { %16466 = vst [vmem:[#allocation152_spill] sm:$0xff] %v12298_v16  ;;  %v12305_v46 = vpop.eup %9540 }
 0x628   :  { %16469 = vst [vmem:[#allocation119_spill] sm:$0xff] %v12305_v46  ;;  %v12307_v49 = vpop.eup %9542  ;;  %16486 = vst [vmem:[#allocation129_spill] sm:$0xff] %v12351_v3 }
 0x629   :  { %2004 = vperm.xlu0 %9475, %v12291_v2   ;;  %2001 = vperm.xlu1 %9474, %v12287_v52   ;;  %16470 = vst [vmem:[#allocation120_spill] sm:$0xff] %v12307_v49  ;;  %v12311_v10 = vpop.eup %9544  ;;  %v12323_v12 = vpop.permute.xlu1 %4511 }
 0x62a   :  { %16471 = vst [vmem:[#allocation122_spill] sm:$0xff] %v12311_v10  ;;  %v12315_v35 = vpop.eup %9546  ;;  %16475 = vst [vmem:[#allocation203_spill] sm:$0xff] %v12323_v12 }
 0x62b   :  { %16472 = vst [vmem:[#allocation162_spill] sm:$0xff] %v12315_v35  ;;  %v12319_v57 = vpop.eup %9548 }
 0x62c   :  { %16473 = vst [vmem:[#allocation201_spill] sm:$0xff] %v12319_v57  ;;  %v12321_v36 = vpop.eup %9550 }
 0x62d   :  { %2010 = vperm.xlu0 %9475, %v12298_v16   ;;  %2007 = vperm.xlu1 %9474, %v12296_v6   ;;  %16474 = vst [vmem:[#allocation202_spill] sm:$0xff] %v12321_v36  ;;  %v12341_v12 = vpop.permute.xlu1 %4475 }
 0x631   :  { %2016 = vperm.xlu0 %9475, %v12307_v49   ;;  %2013 = vperm.xlu1 %9474, %v12305_v46   ;;  %v12333_v46 = vpop.eup %9552 }
 0x632   :  { %16479 = vst [vmem:[#allocation204_spill] sm:$0xff] %v12333_v46  ;;  %v12343_v52 = vpop.eup %9554 }
 0x633   :  { %16483 = vst [vmem:[#allocation205_spill] sm:$0xff] %v12343_v52 }
 0x635   :  { %2022 = vperm.xlu0 %9475, %v12315_v35   ;;  %2019 = vperm.xlu1 %9474, %v12311_v10   ;;  %v16481_v10 = vld [vmem:[#allocation143_spill] sm:$0xff] }
 0x636   :  { %v12339_v6 = vadd.f32 %v16481_v10, %v16480_v61 }
 0x638   :  { %16482 = vst [vmem:[#allocation143_spill] sm:$0xff] %v12339_v6 }
 0x639   :  { %2028 = vperm.xlu0 %9475, %v12321_v36   ;;  %2025 = vperm.xlu1 %9474, %v12319_v57   ;;  %v12345_v57 = vpop.permute.xlu0 %4466 }
 0x63d   :  { %4520 = vperm.xlu0 %9475, %v12329_v42   ;;  %2031 = vperm.xlu1 %9474, %v12333_v46   ;;  %v16487_v46 = vld [vmem:[#allocation66_spill] sm:$0xff]  ;;  %v12367_v55 = vpop.permute.xlu0 %4502 }
 0x63e   :  { %v12357_v10 = vadd.f32 %v16488_v4, %v16487_v46  ;;  %16493 = vst [vmem:[#allocation206_spill] sm:$0xff] %v12367_v55  ;;  %v16501_v55 = vld [vmem:[#allocation96_spill] sm:$0xff] }
 0x63f   :  { %v12385_v38 = vadd.f32 %v16501_v55, %v16290_v7  ;;  %v16508_v7 = vld [vmem:[#allocation98_spill] sm:$0xff] }
 0x640   :  { %16489 = vst [vmem:[#allocation103_spill] sm:$0xff] %v12357_v10 }
 0x641   :  { %2034 = vperm.xlu0 %9475, %v12343_v52   ;;  %4517 = vperm.xlu1 %9474, %v12339_v6   ;;  %v12365_v6 = vadd.f32 %v16491_v50, %v16490_v33  ;;  %v16495_v52 = vld [vmem:[#allocation121_spill] sm:$0xff]  ;;  %v16500_v50 = vld [vmem:[#allocation166_spill] sm:$0xff] }
 0x642   :  { %v12371_v36 = vadd.f32 %v16495_v52, %v16494_v11  ;;  %v12387_v52 = vpop.permute.xlu0 %4508 }
 0x643   :  { %v12353_v42 = vpop.xlane.xlu1 %3228  ;;  %16492 = vst [vmem:[#allocation157_spill] sm:$0xff] %v12365_v6  ;;  %16503 = vst [vmem:[#allocation166_spill] sm:$0xff] %v12387_v52  ;;  %v12401_v52 = vadd.f32 %v16508_v7, %v16240_v60  ;;  %v16515_v60 = vld [vmem:[#allocation68_spill] sm:$0xff] }
 0x644   :  { %v3238_v54 = vrot.slane %v12353_v42, %v16413_v18  ;;  %16496 = vst [vmem:[#allocation121_spill] sm:$0xff] %v12371_v36  ;;  %v3242_v4 = vrot.slane %v12353_v42, %v16414_v63 }
 0x645   :  { %4484 = vperm.xlu0 %9475, %v12351_v3   ;;  %4481 = vperm.xlu1 %9474, %v12357_v10   ;;  %v16497_v3 = vld [vmem:[#allocation125_spill] sm:$0xff]  ;;  %v16498_v10 = vld [vmem:[#allocation102_spill] sm:$0xff] }
 0x646   :  { %v3315_v46 = vsub.f32 %v16497_v3, %v3238_v54  ;;  %v12380_v61 = vadd.f32 %v16498_v10, %v16237_v28  ;;  %v3316_v35 = vsub.f32 %v16500_v50, %v3238_v54  ;;  %16502 = vst [vmem:[#allocation102_spill] sm:$0xff] %v12385_v38  ;;  %v16504_v3 = vld [vmem:[#allocation131_spill] sm:$0xff]  ;;  %v16505_v10 = vld [vmem:[#allocation112_spill] sm:$0xff] }
 0x647   :  { %v3318_v11 = vsub.f32 %v16504_v3, %v3242_v4  ;;  %v12396_v28 = vadd.f32 %v16505_v10, %v16298_v37  ;;  %v16507_v54 = vld [vmem:[#allocation128_spill] sm:$0xff]  ;;  %16509 = vst [vmem:[#allocation131_spill] sm:$0xff] %v12401_v52  ;;  %v16511_v10 = vld [vmem:[#allocation55_spill] sm:$0xff] }
 0x648   :  { %16499 = vst [vmem:[#allocation125_spill] sm:$0xff] %v12380_v61  ;;  %v3317_v50 = vsub.f32 %v16507_v54, %v3242_v4  ;;  %v3349_v55 = vmul.f32 1.442695, %v3316_v35  ;;  %v16510_v3 = vld [vmem:[#allocation168_spill] sm:$0xff]  ;;  %v12412_v35 = vpop.permute.xlu0 %4472  ;;  %v16514_v4 = vld [vmem:[#allocation134_spill] sm:$0xff] }
 0x649   :  { %4526 = vperm.xlu0 %9475, %v12365_v6   ;;  %4523 = vperm.xlu1 %9474, %v12371_v36   ;;  %v3246_v6 = vrot.slane %v12353_v42, %v16417_v47  ;;  %v3347_v36 = vmul.f32 1.442695, %v3315_v46  ;;  %16506 = vst [vmem:[#allocation96_spill] sm:$0xff] %v12396_v28  ;;  %v16512_v37 = vld [vmem:[#allocation132_spill] sm:$0xff] }
 0x64a   :  { %v12410_v49 = vadd.f32 %v16512_v37, %v16511_v10  ;;  %v3351_v54 = vmul.f32 1.442695, %v3317_v50  ;;  %v16522_v50 = vld [vmem:[#allocation139_spill] sm:$0xff] }
 0x64b   :  { %v3320_v46 = vsub.f32 %v16510_v3, %v3246_v6  ;;  %9556 = vpow2.f32 %v3347_v36  ;;  %v3319_v7 = vsub.f32 %v16514_v4, %v3246_v6  ;;  %v3254_v36 = vrot.slane %v12353_v42, %v16423_v56  ;;  %v16523_v4 = vld [vmem:[#allocation77_spill] sm:$0xff] }
 0x64c   :  { %16513 = vst [vmem:[#allocation112_spill] sm:$0xff] %v12410_v49  ;;  %9558 = vpow2.f32 %v3349_v55  ;;  %v12433_v2 = vpop.permute.xlu0 %4514 }
 0x64d   :  { %5931 = vperm.xlu0 %9475, %v12380_v61   ;;  %5928 = vperm.xlu1 %9474, %v12385_v38   ;;  %v3250_v61 = vrot.slane %v12353_v42, %v16420_v13  ;;  %v3353_v38 = vmul.f32 1.442695, %v3318_v11  ;;  %v16518_v11 = vld [vmem:[#allocation172_spill] sm:$0xff]  ;;  %v3357_v37 = vmul.f32 1.442695, %v3320_v46  ;;  %16526 = vst [vmem:[#allocation132_spill] sm:$0xff] %v12433_v2 }
 0x64e   :  { %v16527_v46 = vld [vmem:[#allocation170_spill] sm:$0xff] }
 0x64f   :  { %v3322_v3 = vsub.f32 %v16518_v11, %v3250_v61  ;;  %9560 = vpow2.f32 %v3353_v38  ;;  %v3321_v55 = vsub.f32 %v16522_v50, %v3250_v61  ;;  %v3258_v38 = vrot.slane %v12353_v42, %v16426_v59  ;;  %v16528_v61 = vld [vmem:[#allocation137_spill] sm:$0xff] }
 0x650   :  { %9562 = vpow2.f32 %v3351_v54  ;;  %v3324_v11 = vsub.f32 %v16527_v46, %v3254_v36  ;;  %v3323_v54 = vsub.f32 %v16528_v61, %v3254_v36  ;;  %v16532_v36 = vld [vmem:[#allocation140_spill] sm:$0xff] }
 0x651   :  { %5937 = vperm.xlu0 %9475, %v12396_v28   ;;  %5934 = vperm.xlu1 %9474, %v12401_v52   ;;  %v16516_v28 = vld [vmem:[#allocation104_spill] sm:$0xff]  ;;  %v16519_v52 = vld [vmem:[#allocation67_spill] sm:$0xff]  ;;  %9564 = vpow2.f32 %v3357_v37 }
 0x652   :  { %v12417_v16 = vadd.f32 %v16516_v28, %v16515_v60  ;;  %v12426_v6 = vadd.f32 %v16520_v22, %v16519_v52  ;;  %v3355_v28 = vmul.f32 1.442695, %v3319_v7  ;;  %v16524_v60 = vld [vmem:[#allocation91_spill] sm:$0xff]  ;;  %v3361_v22 = vmul.f32 1.442695, %v3322_v3  ;;  %v12450_v3 = vpop.permute.xlu0 %4478 }
 0x653   :  { %v3359_v7 = vmul.f32 1.442695, %v3321_v55  ;;  %v3365_v37 = vmul.f32 1.442695, %v3324_v11  ;;  %v3363_v55 = vmul.f32 1.442695, %v3323_v54 }
 0x654   :  { %16517 = vst [vmem:[#allocation128_spill] sm:$0xff] %v12417_v16  ;;  %16521 = vst [vmem:[#allocation98_spill] sm:$0xff] %v12426_v6  ;;  %9566 = vpow2.f32 %v3355_v28  ;;  %v3325_v28 = vsub.f32 %v16532_v36, %v3258_v38 }
 0x655   :  { %4490 = vperm.xlu0 %9475, %v12410_v49   ;;  %4487 = vperm.xlu1 %9474, %v12417_v16   ;;  %v12431_v49 = vadd.f32 %v16524_v60, %v16523_v4  ;;  %v12441_v50 = vpop.eup %9556  ;;  %v16531_v16 = vld [vmem:[#allocation173_spill] sm:$0xff]  ;;  %9568 = vpow2.f32 %v3361_v22 }
 0x656   :  { %16529 = vst [vmem:[#allocation134_spill] sm:$0xff] %v12441_v50  ;;  %v12443_v60 = vpop.eup %9558  ;;  %v3326_v2 = vsub.f32 %v16531_v16, %v3258_v38  ;;  %9570 = vpow2.f32 %v3359_v7  ;;  %v16535_v16 = vld [vmem:[#allocation174_spill] sm:$0xff]  ;;  %v3367_v38 = vmul.f32 1.442695, %v3325_v28 }
 0x657   :  { %16525 = vst [vmem:[#allocation168_spill] sm:$0xff] %v12431_v49  ;;  %16530 = vst [vmem:[#allocation104_spill] sm:$0xff] %v12443_v60  ;;  %9572 = vpow2.f32 %v3365_v37 }
 0x658   :  { %v3369_v11 = vmul.f32 1.442695, %v3326_v2  ;;  %9574 = vpow2.f32 %v3363_v55 }
 0x659   :  { %4532 = vperm.xlu0 %9475, %v12426_v6   ;;  %4529 = vperm.xlu1 %9474, %v12431_v49   ;;  %v3262_v6 = vrot.slane %v12353_v42, %v16430_v19  ;;  %v12453_v46 = vpop.eup %9560 }
 0x65a   :  { %16533 = vst [vmem:[#allocation172_spill] sm:$0xff] %v12453_v46  ;;  %v12455_v61 = vpop.eup %9562  ;;  %9576 = vpow2.f32 %v3369_v11 }
 0x65b   :  { %16534 = vst [vmem:[#allocation178_spill] sm:$0xff] %v12455_v61  ;;  %v3328_v22 = vsub.f32 %v16535_v16, %v3262_v6  ;;  %v12463_v54 = vpop.xlane.xlu0 %3231  ;;  %v12465_v7 = vpop.eup %9564  ;;  %9578 = vpow2.f32 %v3367_v38 }
 0x65c   :  { %16537 = vst [vmem:[#allocation139_spill] sm:$0xff] %v12463_v54  ;;  %16538 = vst [vmem:[#allocation91_spill] sm:$0xff] %v12465_v7  ;;  %v3270_v2 = vrot.slane %v12463_v54, %v16413_v18 }
 0x65d   :  { %3444 = vperm.xlu0 %9475, %v12441_v50   ;;  %3447 = vperm.xlu1 %9474, %v12443_v60   ;;  %v3266_v50 = vrot.slane %v12353_v42, %v16433_v20  ;;  %v16536_v60 = vld [vmem:[#allocation141_spill] sm:$0xff]  ;;  %v3373_v16 = vmul.f32 1.442695, %v3328_v22  ;;  %v16544_v22 = vld [vmem:[#allocation175_spill] sm:$0xff] }
 0x65e   :  { %v3327_v49 = vsub.f32 %v16536_v60, %v3262_v6  ;;  %v12467_v36 = vpop.eup %9566  ;;  %v16541_v6 = vld [vmem:[#allocation145_spill] sm:$0xff]  ;;  %v3332_v11 = vsub.f32 %v16544_v22, %v3270_v2 }
 0x65f   :  { %16539 = vst [vmem:[#allocation170_spill] sm:$0xff] %v12467_v36  ;;  %v3329_v60 = vsub.f32 %v16541_v6, %v3266_v50  ;;  %v12475_v28 = vpop.eup %9568  ;;  %9580 = vpow2.f32 %v3373_v16  ;;  %v16548_v16 = vld [vmem:[#allocation179_spill] sm:$0xff] }
 0x660   :  { %v3371_v37 = vmul.f32 1.442695, %v3327_v49  ;;  %16542 = vst [vmem:[#allocation137_spill] sm:$0xff] %v12475_v28  ;;  %v12477_v55 = vpop.eup %9570 }
 0x661   :  { %3453 = vperm.xlu0 %9475, %v12453_v46   ;;  %3450 = vperm.xlu1 %9474, %v12455_v61   ;;  %v16540_v46 = vld [vmem:[#allocation177_spill] sm:$0xff]  ;;  %16543 = vst [vmem:[#allocation173_spill] sm:$0xff] %v12477_v55  ;;  %v12485_v49 = vpop.eup %9572  ;;  %v3381_v61 = vmul.f32 1.442695, %v3332_v11  ;;  %v16553_v11 = vld [vmem:[#allocation151_spill] sm:$0xff] }
 0x662   :  { %v3330_v42 = vsub.f32 %v16540_v46, %v3266_v50  ;;  %v3274_v46 = vrot.slane %v12463_v54, %v16414_v63  ;;  %9582 = vpow2.f32 %v3371_v37  ;;  %v16545_v50 = vld [vmem:[#allocation144_spill] sm:$0xff]  ;;  %16546 = vst [vmem:[#allocation140_spill] sm:$0xff] %v12485_v49  ;;  %v12487_v6 = vpop.eup %9574 }
 0x663   :  { %v3331_v38 = vsub.f32 %v16545_v50, %v3270_v2  ;;  %16547 = vst [vmem:[#allocation174_spill] sm:$0xff] %v12487_v6  ;;  %v16549_v37 = vld [vmem:[#allocation148_spill] sm:$0xff] }
 0x664   :  { %v12495_v2 = vpop.eup %9576 }
 0x665   :  { %3459 = vperm.xlu0 %9475, %v12465_v7   ;;  %3456 = vperm.xlu1 %9474, %v12467_v36   ;;  %v3377_v7 = vmul.f32 1.442695, %v3330_v42  ;;  %v3375_v36 = vmul.f32 1.442695, %v3329_v60  ;;  %v3278_v42 = vrot.slane %v12463_v54, %v16417_v47  ;;  %v3333_v60 = vsub.f32 %v16549_v37, %v3274_v46  ;;  %16550 = vst [vmem:[#allocation141_spill] sm:$0xff] %v12495_v2  ;;  %v12497_v50 = vpop.eup %9578 }
 0x666   :  { %v3379_v22 = vmul.f32 1.442695, %v3331_v38  ;;  %16551 = vst [vmem:[#allocation177_spill] sm:$0xff] %v12497_v50 }
 0x667   :  { %9584 = vpow2.f32 %v3377_v7  ;;  %v3282_v7 = vrot.slane %v12463_v54, %v16420_v13 }
 0x668   :  { %9586 = vpow2.f32 %v3375_v36  ;;  %v3335_v36 = vsub.f32 %v16553_v11, %v3278_v42  ;;  %v3290_v11 = vrot.slane %v12463_v54, %v16426_v59 }
 0x669   :  { %3465 = vperm.xlu0 %9475, %v12475_v28   ;;  %3462 = vperm.xlu1 %9474, %v12477_v55   ;;  %v3334_v28 = vsub.f32 %v16548_v16, %v3274_v46  ;;  %9588 = vpow2.f32 %v3381_v61  ;;  %v3383_v46 = vmul.f32 1.442695, %v3333_v60  ;;  %v12505_v38 = vpop.eup %9580 }
 0x66a   :  { %9590 = vpow2.f32 %v3379_v22  ;;  %16554 = vst [vmem:[#allocation145_spill] sm:$0xff] %v12505_v38 }
 0x66b   :  { %v3385_v16 = vmul.f32 1.442695, %v3334_v28  ;;  %v16557_v28 = vld [vmem:[#allocation156_spill] sm:$0xff] }
 0x66c   :  { %v12507_v37 = vpop.eup %9582 }
 0x66d   :  { %3471 = vperm.xlu0 %9475, %v12485_v49   ;;  %3468 = vperm.xlu1 %9474, %v12487_v6   ;;  %v16552_v49 = vld [vmem:[#allocation181_spill] sm:$0xff]  ;;  %16555 = vst [vmem:[#allocation175_spill] sm:$0xff] %v12507_v37  ;;  %9592 = vpow2.f32 %v3385_v16 }
 0x66e   :  { %v3336_v55 = vsub.f32 %v16552_v49, %v3278_v42  ;;  %v16556_v6 = vld [vmem:[#allocation185_spill] sm:$0xff]  ;;  %v3337_v49 = vsub.f32 %v16557_v28, %v3282_v7  ;;  %9594 = vpow2.f32 %v3383_v46  ;;  %v3387_v42 = vmul.f32 1.442695, %v3335_v36  ;;  %v16564_v28 = vld [vmem:[#allocation187_spill] sm:$0xff] }
 0x66f   :  { %v3338_v4 = vsub.f32 %v16556_v6, %v3282_v7 }
 0x670   :  { %v3389_v61 = vmul.f32 1.442695, %v3336_v55  ;;  %v16561_v55 = vld [vmem:[#allocation154_spill] sm:$0xff]  ;;  %v3391_v7 = vmul.f32 1.442695, %v3337_v49 }
 0x671   :  { %3477 = vperm.xlu0 %9475, %v12495_v2   ;;  %3474 = vperm.xlu1 %9474, %v12497_v50   ;;  %v3286_v2 = vrot.slane %v12463_v54, %v16423_v56  ;;  %v12515_v60 = vpop.eup %9584  ;;  %v3393_v6 = vmul.f32 1.442695, %v3338_v4 }
 0x672   :  { %16558 = vst [vmem:[#allocation144_spill] sm:$0xff] %v12515_v60  ;;  %v12517_v22 = vpop.eup %9586  ;;  %9596 = vpow2.f32 %v3389_v61 }
 0x673   :  { %16559 = vst [vmem:[#allocation179_spill] sm:$0xff] %v12517_v22  ;;  %v3339_v16 = vsub.f32 %v16561_v55, %v3286_v2  ;;  %9598 = vpow2.f32 %v3387_v42  ;;  %v12525_v36 = vpop.eup %9588 }
 0x674   :  { %16562 = vst [vmem:[#allocation148_spill] sm:$0xff] %v12525_v36  ;;  %v12527_v46 = vpop.eup %9590  ;;  %9600 = vpow2.f32 %v3393_v6 }
 0x675   :  { %3483 = vperm.xlu0 %9475, %v12505_v38   ;;  %3480 = vperm.xlu1 %9474, %v12507_v37   ;;  %v16560_v38 = vld [vmem:[#allocation183_spill] sm:$0xff]  ;;  %16563 = vst [vmem:[#allocation181_spill] sm:$0xff] %v12527_v46  ;;  %9602 = vpow2.f32 %v3391_v7  ;;  %v3395_v61 = vmul.f32 1.442695, %v3339_v16 }
 0x676   :  { %v3340_v50 = vsub.f32 %v16560_v38, %v3286_v2  ;;  %v16565_v38 = vld [vmem:[#allocation158_spill] sm:$0xff] }
 0x677   :  { %v3341_v4 = vsub.f32 %v16565_v38, %v3290_v11  ;;  %v12535_v2 = vpop.eup %9592 }
 0x678   :  { %v3397_v37 = vmul.f32 1.442695, %v3340_v50  ;;  %16566 = vst [vmem:[#allocation151_spill] sm:$0xff] %v12535_v2  ;;  %v12539_v42 = vpop.eup %9594 }
 0x679   :  { %3489 = vperm.xlu0 %9475, %v12515_v60   ;;  %3486 = vperm.xlu1 %9474, %v12517_v22   ;;  %v3342_v60 = vsub.f32 %v16564_v28, %v3290_v11  ;;  %16567 = vst [vmem:[#allocation185_spill] sm:$0xff] %v12539_v42  ;;  %v3399_v50 = vmul.f32 1.442695, %v3341_v4 }
 0x67a   :  { %9604 = vpow2.f32 %v3397_v37 }
 0x67b   :  { %v3401_v55 = vmul.f32 1.442695, %v3342_v60  ;;  %9606 = vpow2.f32 %v3395_v61 }
 0x67c   :  { %v12543_v11 = vpop.eup %9596 }
 0x67d   :  { %3495 = vperm.xlu0 %9475, %v12525_v36   ;;  %3492 = vperm.xlu1 %9474, %v12527_v46   ;;  %16568 = vst [vmem:[#allocation156_spill] sm:$0xff] %v12543_v11  ;;  %v12545_v7 = vpop.eup %9598  ;;  %9608 = vpow2.f32 %v3401_v55 }
 0x67e   :  { %16569 = vst [vmem:[#allocation183_spill] sm:$0xff] %v12545_v7  ;;  %9610 = vpow2.f32 %v3399_v50  ;;  %v12549_v38 = vpop.eup %9600 }
 0x67f   :  { %v12533_v22 = vpop.permute.xlu0 %1941  ;;  %16570 = vst [vmem:[#allocation154_spill] sm:$0xff] %v12549_v38  ;;  %v12551_v60 = vpop.eup %9602 }
 0x680   :  { %v12537_v49 = vpop.permute.xlu1 %1944  ;;  %16571 = vst [vmem:[#allocation187_spill] sm:$0xff] %v12551_v60 }
 0x681   :  { %3501 = vperm.xlu0 %9475, %v12535_v2   ;;  %3498 = vperm.xlu1 %9474, %v12539_v42  }
 0x683   :  { %v1951_v6 = vpop.permute.xlu0 %1950 }
 0x684   :  { %v1948_v16 = vpop.permute.xlu1 %1947  ;;  %v12555_v61 = vpop.eup %9604 }
 0x685   :  { %3507 = vperm.xlu0 %9475, %v12543_v11   ;;  %3504 = vperm.xlu1 %9474, %v12545_v7   ;;  %16572 = vst [vmem:[#allocation158_spill] sm:$0xff] %v12555_v61  ;;  %v12557_v36 = vpop.eup %9606  ;;  %v2048_v39 = vrot.slane %v1948_v16, %v11904_v51 }
 0x686   :  { %16573 = vst [vmem:[#allocation207_spill] sm:$0xff] %v12557_v36 }
 0x687   :  { %v1957_v28 = vpop.permute.xlu0 %1956  ;;  %v12561_v50 = vpop.eup %9608 }
 0x688   :  { %v1954_v37 = vpop.permute.xlu1 %1953  ;;  %16574 = vst [vmem:[#allocation208_spill] sm:$0xff] %v12561_v50  ;;  %v12563_v7 = vpop.eup %9610 }
 0x689   :  { %3513 = vperm.xlu0 %9475, %v12549_v38   ;;  %3510 = vperm.xlu1 %9474, %v12551_v60   ;;  %16575 = vst [vmem:[#allocation209_spill] sm:$0xff] %v12563_v7  ;;  %v16576_v38 = vld [vmem:[#allocation114_spill] sm:$0xff]  ;;  %v2057_v20 = vrot.slane %v1954_v37, %v11904_v51 }
 0x68a   :  { %v12569_v60 = vadd.f32 %v16576_v38, %v16304_v41 }
 0x68b   :  { %v1963_v4 = vpop.permute.xlu0 %1962 }
 0x68c   :  { %v1960_v2 = vpop.permute.xlu1 %1959  ;;  %16577 = vst [vmem:[#allocation114_spill] sm:$0xff] %v12569_v60  ;;  %v2070_v19 = vrot.slane %v1963_v4, %v11907_v25 }
 0x68d   :  { %3519 = vperm.xlu0 %9475, %v12555_v61   ;;  %3516 = vperm.xlu1 %9474, %v12557_v36   ;;  %v16578_v61 = vld [vmem:[#allocation135_spill] sm:$0xff]  ;;  %v2066_v31 = vrot.slane %v1960_v2, %v11904_v51 }
 0x68e   :  { %v12574_v36 = vadd.f32 %v16578_v61, %v16333_v45  ;;  %v2061_v61 = vrot.slane %v1957_v28, %v11907_v25  ;;  %v2043_v45 = vrot.slane %v12537_v49, %v11907_v25 }
 0x68f   :  { %v1969_v55 = vpop.permute.xlu0 %1968 }
 0x690   :  { %v1966_v11 = vpop.permute.xlu1 %1965  ;;  %16579 = vst [vmem:[#allocation135_spill] sm:$0xff] %v12574_v36  ;;  %v2079_v16 = vrot.slane %v1969_v55, %v11907_v25  ;;  %v2062_v49 = vsel %vm1563_vm4, %v2061_v61, %v2057_v20 }
 0x691   :  { %3525 = vperm.xlu0 %9475, %v12561_v50   ;;  %3522 = vperm.xlu1 %9474, %v12563_v7   ;;  %v2075_v5 = vrot.slane %v1966_v11, %v11904_v51  ;;  %v2071_v11 = vsel %vm1563_vm4, %v2070_v19, %v2066_v31 }
 0x693   :  { %v1975_v42 = vpop.permute.xlu0 %1974 }
 0x694   :  { %v1972_v46 = vpop.permute.xlu1 %1971  ;;  %v2088_v27 = vrot.slane %v1975_v42, %v11907_v25 }
 0x695   :  { %5943 = vperm.xlu0 %9475, %v12569_v60   ;;  %v2052_v60 = vrot.slane %v1951_v6, %v11907_v25  ;;  %v2084_v28 = vrot.slane %v1972_v46, %v11904_v51  ;;  %v2080_v46 = vsel %vm1563_vm4, %v2079_v16, %v2075_v5 }
 0x697   :  { %v1981_v54 = vpop.permute.xlu0 %1980  ;;  %v2053_v37 = vsel %vm1563_vm4, %v2052_v60, %v2048_v39 }
 0x698   :  { %v1978_v34 = vpop.permute.xlu1 %1977  ;;  %v2097_v2 = vrot.slane %v1981_v54, %v11907_v25 }
 0x699   :  { %5979 = vperm.xlu0 %9475, %v12574_v36   ;;  %v2039_v36 = vrot.slane %v12533_v22, %v11904_v51  ;;  %v2093_v22 = vrot.slane %v1978_v34, %v11904_v51  ;;  %v2089_v34 = vsel %vm1563_vm4, %v2088_v27, %v2084_v28 }
 0x69b   :  { %v1987_v44 = vpop.permute.xlu0 %1986  ;;  %v2044_v4 = vsel %vm1563_vm4, %v2043_v45, %v2039_v36  ;;  %v2098_v45 = vsel %vm1563_vm4, %v2097_v2, %v2093_v22 }
 0x69c   :  { %v1984_v50 = vpop.permute.xlu1 %1983  ;;  %v2106_v56 = vrot.slane %v1987_v44, %v11907_v25  ;;  %v2180_v39 = vsel %vm1700_vm5, %v2053_v37, %v2044_v4 }
 0x69d   :  { %v2102_v55 = vrot.slane %v1984_v50, %v11904_v51  ;;  %v2181_v20 = vsel %vm1702_vm6, %v2062_v49, %v2180_v39 }
 0x69e   :  { %v2182_v54 = vsel %vm1704_vm7, %v2071_v11, %v2181_v20 }
 0x69f   :  { %v2183_v19 = vsel %vm1706_vm8, %v2080_v46, %v2182_v54  ;;  %v2107_v31 = vsel %vm1563_vm4, %v2106_v56, %v2102_v55 }
 0x6a0   :  { %v12577_v9 = vpop.permute.xlu1 %1989  ;;  %v12579_v7 = vpop.permute.xlu0 %1992  ;;  %v2184_v50 = vsel %vm1708_vm9, %v2089_v34, %v2183_v19 }
 0x6a1   :  { %v2185_v5 = vsel %vm1710_vm10, %v2098_v45, %v2184_v50  ;;  %v2111_v11 = vrot.slane %v12577_v9, %v11904_v51  ;;  %v2115_v55 = vrot.slane %v12579_v7, %v11907_v25 }
 0x6a2   :  { %v2186_v61 = vsel %vm1712_vm11, %v2107_v31, %v2185_v5 }
 0x6a3   :  { %v2196_v27 = vsel %vm1723_vm12, %v2186_v61, 0.0 }
 0x6a4   :  { %v1996_v38 = vpop.permute.xlu1 %1995  ;;  %v1999_v41 = vpop.permute.xlu0 %1998 }
 0x6a5   :  { %v2120_v28 = vrot.slane %v1996_v38, %v11904_v51  ;;  %v2124_v49 = vrot.slane %v1999_v41, %v11907_v25 }
 0x6a8   :  { %v2002_v59 = vpop.permute.xlu1 %2001  ;;  %v2005_v6 = vpop.permute.xlu0 %2004 }
 0x6a9   :  { %v2129_v22 = vrot.slane %v2002_v59, %v11904_v51  ;;  %v2133_v56 = vrot.slane %v2005_v6, %v11907_v25  ;;  %v2125_v59 = vsel %vm1563_vm4, %v2124_v49, %v2120_v28 }
 0x6ab   :  { %v2134_v34 = vsel %vm1563_vm4, %v2133_v56, %v2129_v22 }
 0x6ac   :  { %v2008_v60 = vpop.permute.xlu1 %2007  ;;  %v2011_v42 = vpop.permute.xlu0 %2010 }
 0x6ad   :  { %v2138_v39 = vrot.slane %v2008_v60, %v11904_v51  ;;  %v2142_v46 = vrot.slane %v2011_v42, %v11907_v25  ;;  %v2116_v60 = vsel %vm1563_vm4, %v2115_v55, %v2111_v11 }
 0x6ae   :  { %v2187_v45 = vsel %vm1700_vm5, %v2125_v59, %v2116_v60 }
 0x6af   :  { %v2143_v42 = vsel %vm1563_vm4, %v2142_v46, %v2138_v39  ;;  %v16582_v39 = vld [vmem:[#allocation105_spill] sm:$0xff] }
 0x6b0   :  { %v2014_v36 = vpop.permute.xlu1 %2013  ;;  %v2017_v44 = vpop.permute.xlu0 %2016  ;;  %v12660_v46 = vadd.f32 %v16582_v39, %v16264_v23 }
 0x6b1   :  { %v2147_v38 = vrot.slane %v2014_v36, %v11904_v51  ;;  %v2151_v41 = vrot.slane %v2017_v44, %v11907_v25  ;;  %v2188_v36 = vsel %vm1702_vm6, %v2134_v34, %v2187_v45 }
 0x6b2   :  { %v2189_v50 = vsel %vm1704_vm7, %v2143_v42, %v2188_v36  ;;  %16583 = vst [vmem:[#allocation105_spill] sm:$0xff] %v12660_v46  ;;  %v16589_v42 = vld [vmem:[#allocation159_spill] sm:$0xff] }
 0x6b3   :  { %v2152_v19 = vsel %vm1563_vm4, %v2151_v41, %v2147_v38  ;;  %v16584_v38 = vld [vmem:[#allocation124_spill] sm:$0xff]  ;;  %v12683_v45 = vadd.f32 %v16589_v42, %v16336_v24  ;;  %v16592_v36 = vld [vmem:[#allocation163_spill] sm:$0xff] }
 0x6b4   :  { %v2020_v16 = vpop.permute.xlu1 %2019  ;;  %v2023_v37 = vpop.permute.xlu0 %2022  ;;  %v12665_v41 = vadd.f32 %v16584_v38, %v16271_v17  ;;  %v16601_v38 = vld [vmem:[#allocation71_spill] sm:$0xff]  ;;  %v16611_v17 = vld [vmem:[#allocation89_spill] sm:$0xff] }
 0x6b5   :  { %2197 = vadd.xlane.f32.xlu1 %v2196_v27  ;;  %v2156_v6 = vrot.slane %v2020_v16, %v11904_v51  ;;  %v2160_v20 = vrot.slane %v2023_v37, %v11907_v25  ;;  %v2190_v16 = vsel %vm1706_vm8, %v2152_v19, %v2189_v50  ;;  %16590 = vst [vmem:[#allocation159_spill] sm:$0xff] %v12683_v45 }
 0x6b6   :  { %16585 = vst [vmem:[#allocation124_spill] sm:$0xff] %v12665_v41  ;;  %v12745_v24 = vadd.f32 %v16611_v17, %v16484_v15  ;;  %v16621_v15 = vld [vmem:[#allocation184_spill] sm:$0xff] }
 0x6b7   :  { %v2161_v44 = vsel %vm1563_vm4, %v2160_v20, %v2156_v6  ;;  %v16586_v6 = vld [vmem:[#allocation70_spill] sm:$0xff]  ;;  %v16587_v20 = vld [vmem:[#allocation127_spill] sm:$0xff] }
 0x6b8   :  { %v2026_v2 = vpop.permute.xlu1 %2025  ;;  %v2029_v4 = vpop.permute.xlu0 %2028  ;;  %v2191_v28 = vsel %vm1708_vm9, %v2161_v44, %v2190_v16  ;;  %v12672_v34 = vadd.f32 %v16587_v20, %v16586_v6  ;;  %v16595_v16 = vld [vmem:[#allocation180_spill] sm:$0xff]  ;;  %v16602_v20 = vld [vmem:[#allocation189_spill] sm:$0xff]  ;;  %16612 = vst [vmem:[#allocation89_spill] sm:$0xff] %v12745_v24 }
 0x6b9   :  { %v2165_v9 = vrot.slane %v2026_v2, %v11904_v51  ;;  %v2169_v7 = vrot.slane %v2029_v4, %v11907_v25  ;;  %v16580_v2 = vld [vmem:[#allocation99_spill] sm:$0xff]  ;;  %v12722_v42 = vadd.f32 %v16602_v20, %v16601_v38 }
 0x6ba   :  { %v12652_v4 = vadd.f32 %v16580_v2, %v16243_v8  ;;  %16588 = vst [vmem:[#allocation127_spill] sm:$0xff] %v12672_v34 }
 0x6bb   :  { %v2170_v5 = vsel %vm1563_vm4, %v2169_v7, %v2165_v9  ;;  %16603 = vst [vmem:[#allocation189_spill] sm:$0xff] %v12722_v42 }
 0x6bc   :  { %v12633_v54 = vpop.permute.xlu0 %4520  ;;  %v2032_v31 = vpop.permute.xlu1 %2031  ;;  %v2192_v22 = vsel %vm1710_vm10, %v2170_v5, %v2191_v28  ;;  %16581 = vst [vmem:[#allocation99_spill] sm:$0xff] %v12652_v4  ;;  %v16597_v28 = vld [vmem:[#allocation138_spill] sm:$0xff] }
 0x6bd   :  { %v2174_v37 = vrot.slane %v2032_v31, %v11904_v51  ;;  %v16591_v31 = vld [vmem:[#allocation56_spill] sm:$0xff] }
 0x6be   :  { %v12690_v44 = vadd.f32 %v16592_v36, %v16591_v31 }
 0x6c0   :  { %v2035_v61 = vpop.permute.xlu0 %2034  ;;  %v12655_v55 = vpop.permute.xlu1 %4517  ;;  %16593 = vst [vmem:[#allocation163_spill] sm:$0xff] %v12690_v44 }
 0x6c1   :  { %v2178_v27 = vrot.slane %v2035_v61, %v11907_v25  ;;  %v16594_v61 = vld [vmem:[#allocation69_spill] sm:$0xff] }
 0x6c3   :  { %v2179_v49 = vsel %vm1563_vm4, %v2178_v27, %v2174_v37  ;;  %v12699_v37 = vadd.f32 %v16595_v16, %v16594_v61  ;;  %v16605_v16 = vld [vmem:[#allocation116_spill] sm:$0xff] }
 0x6c4   :  { %v2193_v56 = vsel %vm1712_vm11, %v2179_v49, %v2192_v22  ;;  %v12667_v59 = vpop.permute.xlu1 %4481  ;;  %v12677_v7 = vpop.permute.xlu0 %4484  ;;  %v12706_v49 = vadd.f32 %v16597_v28, %v16310_v62  ;;  %v12729_v28 = vadd.f32 %v16605_v16, %v16316_v40  ;;  %v16607_v62 = vld [vmem:[#allocation182_spill] sm:$0xff]  ;;  %v16614_v40 = vld [vmem:[#allocation169_spill] sm:$0xff] }
 0x6c5   :  { %v2199_v11 = vsel %vm1723_vm12, %v2193_v56, 0.0  ;;  %16596 = vst [vmem:[#allocation180_spill] sm:$0xff] %v12699_v37  ;;  %v16599_v56 = vld [vmem:[#allocation167_spill] sm:$0xff]  ;;  %v12736_v8 = vadd.f32 %v16607_v62, %v16476_v32  ;;  %v12752_v23 = vadd.f32 %v16614_v40, %v16490_v33  ;;  %v16617_v32 = vld [vmem:[#allocation90_spill] sm:$0xff] }
 0x6c6   :  { %2200 = vadd.xlane.f32.xlu0 %v2199_v11  ;;  %5940 = vperm.xlu1 %9474, %v12652_v4   ;;  %16598 = vst [vmem:[#allocation138_spill] sm:$0xff] %v12706_v49  ;;  %v12713_v2 = vadd.f32 %v16599_v56, %v16340_v21  ;;  %16606 = vst [vmem:[#allocation116_spill] sm:$0xff] %v12729_v28  ;;  %v16624_v33 = vld [vmem:[#allocation171_spill] sm:$0xff] }
 0x6c7   :  { %16608 = vst [vmem:[#allocation182_spill] sm:$0xff] %v12736_v8  ;;  %16615 = vst [vmem:[#allocation169_spill] sm:$0xff] %v12752_v23 }
 0x6c8   :  { %v12674_v9 = vpop.permute.xlu1 %4523  ;;  %v12685_v19 = vpop.permute.xlu0 %4526  ;;  %16600 = vst [vmem:[#allocation167_spill] sm:$0xff] %v12713_v2 }
 0x6ca   :  { %5976 = vperm.xlu1 %9474, %v12660_v46  }
 0x6cc   :  { %v12679_v60 = vpop.permute.xlu1 %5928  ;;  %v12695_v5 = vpop.permute.xlu0 %5931 }
 0x6ce   :  { %5982 = vperm.xlu1 %9474, %v12665_v41  }
 0x6d0   :  { %v12692_v50 = vpop.permute.xlu1 %5934  ;;  %v12708_v22 = vpop.permute.xlu0 %5937 }
 0x6d2   :  { %4493 = vperm.xlu1 %9474, %v12672_v34  }
 0x6d4   :  { %v12702_v27 = vpop.permute.xlu1 %4487  ;;  %v12718_v39 = vpop.permute.xlu0 %4490 }
 0x6d8   :  { %v12715_v11 = vpop.permute.xlu1 %4529  ;;  %v12731_v56 = vpop.permute.xlu0 %4532 }
 0x6d9   :  { %v4670_v41 = vrot.slane %v12731_v56, %v11907_v25 }
 0x6dc   :  { %5985 = vperm.xlu0 %9475, %v12683_v45   ;;  %v12725_v36 = vpop.permute.xlu1 %3447  ;;  %v12741_v20 = vpop.permute.xlu0 %3444 }
 0x6dd   :  { %16604 = vst [vmem:[#allocation210_spill] sm:$0xff] %v12725_v36  ;;  %16610 = vst [vmem:[#allocation212_spill] sm:$0xff] %v12741_v20  ;;  %v12759_v36 = vadd.f32 %v16617_v32, %v16511_v10  ;;  %v16627_v10 = vld [vmem:[#allocation186_spill] sm:$0xff] }
 0x6df   :  { %16618 = vst [vmem:[#allocation90_spill] sm:$0xff] %v12759_v36 }
 0x6e0   :  { %4496 = vperm.xlu0 %9475, %v12690_v44   ;;  %v12738_v21 = vpop.permute.xlu1 %3450  ;;  %v12754_v62 = vpop.permute.xlu0 %3453 }
 0x6e1   :  { %16609 = vst [vmem:[#allocation211_spill] sm:$0xff] %v12738_v21  ;;  %16616 = vst [vmem:[#allocation214_spill] sm:$0xff] %v12754_v62  ;;  %v12775_v62 = vadd.f32 %v16624_v33, %v16591_v31 }
 0x6e3   :  { %16625 = vst [vmem:[#allocation171_spill] sm:$0xff] %v12775_v62 }
 0x6e4   :  { %4538 = vperm.xlu0 %9475, %v12699_v37   ;;  %v12748_v16 = vpop.permute.xlu1 %3456  ;;  %v12764_v17 = vpop.permute.xlu0 %3459 }
 0x6e5   :  { %16613 = vst [vmem:[#allocation213_spill] sm:$0xff] %v12748_v16  ;;  %16620 = vst [vmem:[#allocation216_spill] sm:$0xff] %v12764_v17  ;;  %v12768_v16 = vadd.f32 %v16621_v15, %v16519_v52  ;;  %v16631_v52 = vld [vmem:[#allocation191_spill] sm:$0xff] }
 0x6e7   :  { %16622 = vst [vmem:[#allocation184_spill] sm:$0xff] %v12768_v16 }
 0x6e8   :  { %5949 = vperm.xlu0 %9475, %v12706_v49   ;;  %v12761_v20 = vpop.permute.xlu1 %3462  ;;  %v12777_v32 = vpop.permute.xlu0 %3465 }
 0x6e9   :  { %16619 = vst [vmem:[#allocation215_spill] sm:$0xff] %v12761_v20  ;;  %16626 = vst [vmem:[#allocation218_spill] sm:$0xff] %v12777_v32  ;;  %v12782_v20 = vadd.f32 %v16627_v10, %v16594_v61 }
 0x6eb   :  { %16628 = vst [vmem:[#allocation186_spill] sm:$0xff] %v12782_v20 }
 0x6ec   :  { %5991 = vperm.xlu0 %9475, %v12713_v2   ;;  %v12771_v40 = vpop.permute.xlu1 %3468  ;;  %v12787_v15 = vpop.permute.xlu0 %3471 }
 0x6ed   :  { %16623 = vst [vmem:[#allocation217_spill] sm:$0xff] %v12771_v40  ;;  %16630 = vst [vmem:[#allocation220_spill] sm:$0xff] %v12787_v15  ;;  %v12791_v40 = vadd.f32 %v16631_v52, %v16601_v38 }
 0x6ef   :  { %16632 = vst [vmem:[#allocation191_spill] sm:$0xff] %v12791_v40 }
 0x6f0   :  { %4544 = vperm.xlu0 %9475, %v12722_v42   ;;  %v12784_v17 = vpop.permute.xlu1 %3474  ;;  %v12796_v31 = vpop.permute.xlu0 %3477 }
 0x6f1   :  { %16629 = vst [vmem:[#allocation219_spill] sm:$0xff] %v12784_v17  ;;  %16634 = vst [vmem:[#allocation222_spill] sm:$0xff] %v12796_v31 }
 0x6f4   :  { %5955 = vperm.xlu0 %9475, %v12729_v28   ;;  %v12794_v33 = vpop.permute.xlu1 %3480  ;;  %v12800_v10 = vpop.permute.xlu0 %3483 }
 0x6f5   :  { %16633 = vst [vmem:[#allocation221_spill] sm:$0xff] %v12794_v33  ;;  %16636 = vst [vmem:[#allocation224_spill] sm:$0xff] %v12800_v10 }
 0x6f8   :  { %5997 = vperm.xlu0 %9475, %v12736_v8   ;;  %v12798_v32 = vpop.permute.xlu1 %3486  ;;  %v12804_v17 = vpop.permute.xlu0 %3489 }
 0x6f9   :  { %16635 = vst [vmem:[#allocation223_spill] sm:$0xff] %v12798_v32  ;;  %16638 = vst [vmem:[#allocation226_spill] sm:$0xff] %v12804_v17 }
 0x6fc   :  { %5961 = vperm.xlu0 %9475, %v12745_v24   ;;  %v12802_v61 = vpop.permute.xlu1 %3492  ;;  %v12808_v15 = vpop.permute.xlu0 %3495  ;;  %v4607_v24 = vrot.slane %v12718_v39, %v11907_v25 }
 0x6fd   :  { %16637 = vst [vmem:[#allocation225_spill] sm:$0xff] %v12802_v61  ;;  %16640 = vst [vmem:[#allocation228_spill] sm:$0xff] %v12808_v15 }
 0x700   :  { %6003 = vperm.xlu0 %9475, %v12752_v23   ;;  %v12806_v21 = vpop.permute.xlu1 %3498  ;;  %v12812_v38 = vpop.permute.xlu0 %3501 }
 0x701   :  { %16639 = vst [vmem:[#allocation227_spill] sm:$0xff] %v12806_v21  ;;  %16642 = vst [vmem:[#allocation230_spill] sm:$0xff] %v12812_v38 }
 0x704   :  { %5967 = vperm.xlu0 %9475, %v12759_v36   ;;  %v12810_v52 = vpop.permute.xlu1 %3504  ;;  %v12816_v33 = vpop.permute.xlu0 %3507  ;;  %v4580_v36 = vrot.slane %v12412_v35, %v11907_v25  ;;  %v4594_v35 = vrot.slane %v12667_v59, %v11904_v51 }
 0x705   :  { %16641 = vst [vmem:[#allocation229_spill] sm:$0xff] %v12810_v52  ;;  %16644 = vst [vmem:[#allocation232_spill] sm:$0xff] %v12816_v33 }
 0x708   :  { %6009 = vperm.xlu0 %9475, %v12768_v16   ;;  %v12820_v32 = vpop.permute.xlu0 %3513  ;;  %v4549_v16 = vrot.slane %v12219_v30, %v11904_v51 }
 0x709   :  { %16646 = vst [vmem:[#allocation234_spill] sm:$0xff] %v12820_v32  ;;  %v4553_v32 = vrot.slane %v12331_v29, %v11907_v25  ;;  %v4567_v29 = vrot.slane %v12269_v43, %v11904_v51  ;;  %v4598_v43 = vrot.slane %v12677_v7, %v11907_v25 }
 0x70c   :  { %5973 = vperm.xlu0 %9475, %v12775_v62   ;;  %v12824_v61 = vpop.permute.xlu0 %3519 }
 0x70d   :  { %16648 = vst [vmem:[#allocation236_spill] sm:$0xff] %v12824_v61 }
 0x710   :  { %6015 = vperm.xlu0 %9475, %v12782_v20   ;;  %v12826_v21 = vpop.permute.xlu0 %3525  ;;  %v4571_v20 = vrot.slane %v12345_v57, %v11907_v25  ;;  %v4589_v57 = vrot.slane %v12450_v3, %v11907_v25  ;;  %v4585_v3 = vrot.slane %v12341_v12, %v11904_v51 }
 0x711   :  { %16649 = vst [vmem:[#allocation237_spill] sm:$0xff] %v12826_v21 }
 0x712   :  { %v4572_v23 = vsel %vm1563_vm4, %v4571_v20, %v4567_v29  ;;  %v16650_v29 = vld [vmem:[#allocation8_spill] sm:$0xff] }
 0x714   :  { %6021 = vperm.xlu0 %9475, %v12791_v40   ;;  %v12814_v40 = vpop.permute.xlu1 %3510  ;;  %v12830_v52 = vpop.permute.xlu0 %5943 }
 0x715   :  { %16643 = vst [vmem:[#allocation231_spill] sm:$0xff] %v12814_v40 }
 0x718   :  { %v12818_v31 = vpop.permute.xlu1 %3516  ;;  %v12842_v61 = vpop.permute.xlu0 %5979 }
 0x719   :  { %16645 = vst [vmem:[#allocation233_spill] sm:$0xff] %v12818_v31 }
 0x71c   :  { %v12822_v10 = vpop.permute.xlu1 %3522 }
 0x71d   :  { %16647 = vst [vmem:[#allocation235_spill] sm:$0xff] %v12822_v10 }
 0x742   :  { %v2198_v17 = vpop.xlane.xlu1 %2197 }
 0x743   :  { %9612 = vrcp.f32 %v2198_v17 }
 0x746   :  { %v12828_v15 = vpop.permute.xlu1 %5940 }
 0x74a   :  { %v12835_v33 = vpop.permute.xlu1 %5976 }
 0x74d   :  { %v9613_v38 = vpop.eup %9612 }
 0x74e   :  { %v12833_v40 = vrot.slane %v9613_v38, %v16413_v18  ;;  %v12840_v10 = vrot.slane %v9613_v38, %v16414_v63  ;;  %v12847_v21 = vrot.slane %v9613_v38, %v16417_v47  ;;  %v12853_v62 = vpop.permute.xlu1 %5982  ;;  %v12870_v30 = vrot.slane %v9613_v38, %v16420_v13 }
 0x750   :  { %v2286_v31 = vmul.f32 %v12179_v0, %v12833_v40  ;;  %v2289_v17 = vmul.f32 %v12188_v58, %v12840_v10  ;;  %v4562_v58 = vrot.slane %v12255_v48, %v11907_v25  ;;  %v4554_v48 = vsel %vm1563_vm4, %v4553_v32, %v4549_v16 }
 0x751   :  { %v4590_v32 = vsel %vm1563_vm4, %v4589_v57, %v4585_v3  ;;  %v2293_v20 = vmul.f32 %v12205_v26, %v12870_v30  ;;  %v16652_v3 = vld [vmem:[#allocation9_spill] sm:$0xff] }
 0x752   :  { %2351 = vperm.xlu0 %9475, %v2286_v31   ;;  %v4558_v31 = vrot.slane %v12236_v14, %v11904_v51  ;;  %v4576_v14 = vrot.slane %v12313_v1, %v11904_v51  ;;  %v4494_v12 = vpop.permute.xlu1 %4493 }
 0x753   :  { %v2201_v0 = vpop.xlane.xlu0 %2200  ;;  %v4612_v57 = vrot.slane %v4494_v12, %v11904_v51 }
 0x754   :  { %v4563_v16 = vsel %vm1563_vm4, %v4562_v58, %v4558_v31  ;;  %v4581_v59 = vsel %vm1563_vm4, %v4580_v36, %v4576_v14  ;;  %9614 = vrcp.f32 %v2201_v0  ;;  %v16651_v14 = vld [vmem:[#allocation84_spill] sm:$0xff] }
 0x755   :  { %v4690_v7 = vsel %vm1700_vm5, %v4563_v16, %v4554_v48  ;;  %v16653_v0 = vld [vmem:[#allocation88_spill] sm:$0xff] }
 0x756   :  { %2360 = vperm.xlu0 %9475, %v2289_v17   ;;  %v2291_v17 = vmul.f32 %v12197_v53, %v12847_v21  ;;  %v4603_v53 = vrot.slane %v12702_v27, %v11904_v51  ;;  %v12895_v27 = vrot.slane %v9613_v38, %v16650_v29  ;;  %v4691_v39 = vsel %vm1702_vm6, %v4572_v23, %v4690_v7 }
 0x757   :  { %v4692_v8 = vsel %vm1704_vm7, %v4581_v59, %v4691_v39  ;;  %v16654_v59 = vld [vmem:[#allocation10_spill] sm:$0xff] }
 0x758   :  { %v4608_v31 = vsel %vm1563_vm4, %v4607_v24, %v4603_v53  ;;  %v4693_v58 = vsel %vm1706_vm8, %v4590_v32, %v4692_v8  ;;  %v2295_v48 = vmul.f32 %v16651_v14, %v12895_v27  ;;  %v2233_v7 = vrot.slane %v9613_v38, %v16654_v59  ;;  %v16655_v32 = vld [vmem:[#allocation85_spill] sm:$0xff] }
 0x75a   :  { %2366 = vperm.xlu0 %9475, %v2291_v17   ;;  %v4599_v17 = vsel %vm1563_vm4, %v4598_v43, %v4594_v35  ;;  %v12908_v35 = vrot.slane %v9613_v38, %v16652_v3  ;;  %v2299_v12 = vmul.f32 %v16655_v32, %v2233_v7  ;;  %v16666_v32 = vld [vmem:[#allocation149_spill] sm:$0xff] }
 0x75b   :  { %v12886_v1 = vpop.permute.xlu0 %5985  ;;  %v4694_v23 = vsel %vm1708_vm9, %v4599_v17, %v4693_v58 }
 0x75c   :  { %v4695_v24 = vsel %vm1710_vm10, %v4608_v31, %v4694_v23  ;;  %v2297_v16 = vmul.f32 %v16653_v0, %v12908_v35  ;;  %v16660_v23 = vld [vmem:[#allocation147_spill] sm:$0xff]  ;;  %v16664_v0 = vld [vmem:[#allocation106_spill] sm:$0xff] }
 0x75e   :  { %2372 = vperm.xlu0 %9475, %v2293_v20   ;;  %v16656_v20 = vld [vmem:[#allocation11_spill] sm:$0xff]  ;;  %v9615_v17 = vpop.eup %9614 }
 0x75f   :  { %v4497_v36 = vpop.permute.xlu0 %4496  ;;  %v2237_v39 = vrot.slane %v9613_v38, %v16656_v20  ;;  %v2241_v58 = vrot.slane %v9615_v17, %v16413_v18  ;;  %v2245_v14 = vrot.slane %v9615_v17, %v16414_v63  ;;  %v2249_v38 = vrot.slane %v9615_v17, %v16417_v47 }
 0x760   :  { %v4616_v26 = vrot.slane %v4497_v36, %v11907_v25  ;;  %v16657_v36 = vld [vmem:[#allocation93_spill] sm:$0xff]  ;;  %v2257_v28 = vrot.slane %v9615_v17, %v16650_v29  ;;  %v2261_v2 = vrot.slane %v9615_v17, %v16652_v3 }
 0x761   :  { %v2301_v31 = vmul.f32 %v16657_v36, %v2237_v39  ;;  %v2253_v36 = vrot.slane %v9615_v17, %v16420_v13 }
 0x762   :  { %v4617_v43 = vsel %vm1563_vm4, %v4616_v26, %v4612_v57  ;;  %2378 = vperm.xlu0 %9475, %v2295_v48   ;;  %v16658_v57 = vld [vmem:[#allocation111_spill] sm:$0xff]  ;;  %v16659_v48 = vld [vmem:[#allocation78_spill] sm:$0xff] }
 0x763   :  { %v4696_v8 = vsel %vm1712_vm11, %v4617_v43, %v4695_v24  ;;  %v2303_v26 = vmul.f32 %v16658_v57, %v2241_v58  ;;  %v12925_v43 = vadd.f32 %v16660_v23, %v16659_v48  ;;  %v16662_v24 = vld [vmem:[#allocation113_spill] sm:$0xff]  ;;  %v16668_v57 = vld [vmem:[#allocation130_spill] sm:$0xff]  ;;  %v16670_v23 = vld [vmem:[#allocation152_spill] sm:$0xff] }
 0x764   :  { %v4706_v53 = vsel %vm1723_vm12, %v4696_v8, -inf  ;;  %v2305_v8 = vmul.f32 %v16662_v24, %v2245_v14  ;;  %v2309_v24 = vmul.f32 %v16670_v23, %v2253_v36  ;;  %v16678_v23 = vld [vmem:[#allocation162_spill] sm:$0xff] }
 0x765   :  { %4707 = vmax.xlane.f32.xlu1 %v4706_v53  ;;  %16661 = vst [vmem:[#allocation84_spill] sm:$0xff] %v12925_v43  ;;  %v16663_v53 = vld [vmem:[#allocation62_spill] sm:$0xff]  ;;  %v2313_v49 = vmul.f32 %v16678_v23, %v2261_v2  ;;  %v16686_v23 = vld [vmem:[#allocation205_spill] sm:$0xff] }
 0x766   :  { %2384 = vperm.xlu0 %9475, %v2297_v16   ;;  %v12932_v16 = vadd.f32 %v16664_v0, %v16663_v53  ;;  %v16672_v0 = vld [vmem:[#allocation160_spill] sm:$0xff] }
 0x768   :  { %16665 = vst [vmem:[#allocation88_spill] sm:$0xff] %v12932_v16 }
 0x76a   :  { %2390 = vperm.xlu0 %9475, %v2299_v12   ;;  %v2307_v12 = vmul.f32 %v16666_v32, %v2249_v38  ;;  %v16674_v32 = vld [vmem:[#allocation120_spill] sm:$0xff] }
 0x76b   :  { %v2311_v42 = vmul.f32 %v16674_v32, %v2257_v28  ;;  %v16682_v32 = vld [vmem:[#allocation202_spill] sm:$0xff] }
 0x76e   :  { %2396 = vperm.xlu0 %9475, %v2301_v31   ;;  %v16667_v31 = vld [vmem:[#allocation74_spill] sm:$0xff] }
 0x772   :  { %2402 = vperm.xlu0 %9475, %v2303_v26   ;;  %v12939_v26 = vadd.f32 %v16668_v57, %v16667_v31  ;;  %v16676_v57 = vld [vmem:[#allocation100_spill] sm:$0xff] }
 0x774   :  { %16669 = vst [vmem:[#allocation85_spill] sm:$0xff] %v12939_v26 }
 0x776   :  { %4535 = vperm.xlu1 %9474, %v12925_v43   ;;  %2408 = vperm.xlu0 %9475, %v2305_v8   ;;  %v16671_v8 = vld [vmem:[#allocation79_spill] sm:$0xff] }
 0x777   :  { %v12946_v53 = vadd.f32 %v16672_v0, %v16671_v8  ;;  %v16680_v0 = vld [vmem:[#allocation150_spill] sm:$0xff] }
 0x779   :  { %16673 = vst [vmem:[#allocation93_spill] sm:$0xff] %v12946_v53 }
 0x77a   :  { %5946 = vperm.xlu1 %9474, %v12932_v16   ;;  %2414 = vperm.xlu0 %9475, %v2307_v12   ;;  %v16675_v12 = vld [vmem:[#allocation64_spill] sm:$0xff] }
 0x77b   :  { %v12953_v31 = vadd.f32 %v16676_v57, %v16675_v12  ;;  %v16684_v57 = vld [vmem:[#allocation108_spill] sm:$0xff] }
 0x77d   :  { %16677 = vst [vmem:[#allocation111_spill] sm:$0xff] %v12953_v31 }
 0x77e   :  { %5988 = vperm.xlu1 %9474, %v12939_v26   ;;  %2420 = vperm.xlu0 %9475, %v2309_v24   ;;  %v2265_v26 = vrot.slane %v9615_v17, %v16654_v59  ;;  %v16679_v24 = vld [vmem:[#allocation75_spill] sm:$0xff] }
 0x77f   :  { %v12960_v16 = vadd.f32 %v16680_v0, %v16679_v24 }
 0x780   :  { %v2315_v37 = vmul.f32 %v16682_v32, %v2265_v26 }
 0x781   :  { %16681 = vst [vmem:[#allocation147_spill] sm:$0xff] %v12960_v16 }
 0x782   :  { %4541 = vperm.xlu1 %9474, %v12946_v53   ;;  %2426 = vperm.xlu0 %9475, %v2311_v42   ;;  %v2269_v53 = vrot.slane %v9615_v17, %v16656_v20  ;;  %v16683_v42 = vld [vmem:[#allocation66_spill] sm:$0xff]  ;;  %v16690_v17 = vld [vmem:[#allocation80_spill] sm:$0xff] }
 0x783   :  { %v12967_v12 = vadd.f32 %v16684_v57, %v16683_v42  ;;  %v2287_v32 = vmul.f32 %v16690_v17, %v12833_v40  ;;  %v16692_v57 = vld [vmem:[#allocation83_spill] sm:$0xff]  ;;  %v12988_v17 = vpop.permute.xlu0 %4538 }
 0x784   :  { %v2317_v43 = vmul.f32 %v16686_v23, %v2269_v53  ;;  %v2290_v23 = vmul.f32 %v16692_v57, %v12847_v21  ;;  %v16697_v21 = vld [vmem:[#allocation94_spill] sm:$0xff]  ;;  %v4679_v56 = vrot.slane %v12988_v17, %v11907_v25 }
 0x785   :  { %16685 = vst [vmem:[#allocation113_spill] sm:$0xff] %v12967_v12 }
 0x786   :  { %5952 = vperm.xlu1 %9474, %v12953_v31   ;;  %2432 = vperm.xlu0 %9475, %v2313_v49   ;;  %v16687_v49 = vld [vmem:[#allocation76_spill] sm:$0xff]  ;;  %v16688_v31 = vld [vmem:[#allocation133_spill] sm:$0xff] }
 0x787   :  { %v12973_v0 = vadd.f32 %v16688_v31, %v16687_v49  ;;  %v16694_v31 = vld [vmem:[#allocation86_spill] sm:$0xff] }
 0x788   :  { %v2294_v49 = vmul.f32 %v16694_v31, %v12895_v27  ;;  %v16699_v27 = vld [vmem:[#allocation95_spill] sm:$0xff] }
 0x789   :  { %16689 = vst [vmem:[#allocation106_spill] sm:$0xff] %v12973_v0 }
 0x78a   :  { %5994 = vperm.xlu1 %9474, %v12960_v16   ;;  %2438 = vperm.xlu0 %9475, %v2315_v37   ;;  %v16691_v37 = vld [vmem:[#allocation81_spill] sm:$0xff]  ;;  %v16725_v16 = vld [vmem:[#allocation132_spill] sm:$0xff] }
 0x78b   :  { %v2288_v24 = vmul.f32 %v16691_v37, %v12840_v10  ;;  %v16696_v10 = vld [vmem:[#allocation87_spill] sm:$0xff]  ;;  %v2300_v37 = vmul.f32 %v16697_v21, %v2237_v39 }
 0x78c   :  { %v16702_v39 = vld [vmem:[#allocation119_spill] sm:$0xff] }
 0x78e   :  { %5958 = vperm.xlu1 %9474, %v12967_v12   ;;  %2444 = vperm.xlu0 %9475, %v2317_v43   ;;  %v16693_v43 = vld [vmem:[#allocation82_spill] sm:$0xff] }
 0x78f   :  { %v2292_v42 = vmul.f32 %v16693_v43, %v12870_v30  ;;  %v16698_v30 = vld [vmem:[#allocation142_spill] sm:$0xff] }
 0x790   :  { %v16724_v12 = vld [vmem:[#allocation206_spill] sm:$0xff] }
 0x792   :  { %6000 = vperm.xlu1 %9474, %v12973_v0   ;;  %v16695_v0 = vld [vmem:[#allocation92_spill] sm:$0xff] }
 0x793   :  { %v2296_v40 = vmul.f32 %v16695_v0, %v12908_v35  ;;  %v16700_v0 = vld [vmem:[#allocation146_spill] sm:$0xff] }
 0x796   :  { %2354 = vperm.xlu1 %9474, %v2287_v32   ;;  %v12991_v32 = vpop.permute.xlu0 %5949 }
 0x79a   :  { %2357 = vperm.xlu1 %9474, %v2288_v24   ;;  %v2298_v24 = vmul.f32 %v16696_v10, %v2233_v7  ;;  %v12995_v57 = vpop.permute.xlu0 %5991  ;;  %v16701_v7 = vld [vmem:[#allocation117_spill] sm:$0xff]  ;;  %v16703_v10 = vld [vmem:[#allocation122_spill] sm:$0xff] }
 0x79b   :  { %v2308_v43 = vmul.f32 %v16701_v7, %v2253_v36  ;;  %v16706_v36 = vld [vmem:[#allocation68_spill] sm:$0xff]  ;;  %v16714_v7 = vld [vmem:[#allocation155_spill] sm:$0xff] }
 0x79e   :  { %2363 = vperm.xlu1 %9474, %v2290_v23   ;;  %v12998_v35 = vpop.permute.xlu0 %4544  ;;  %v2306_v23 = vmul.f32 %v16700_v0, %v2249_v38  ;;  %v16705_v38 = vld [vmem:[#allocation204_spill] sm:$0xff]  ;;  %v16710_v0 = vld [vmem:[#allocation153_spill] sm:$0xff] }
 0x7a2   :  { %2369 = vperm.xlu1 %9474, %v2292_v42   ;;  %v2302_v42 = vmul.f32 %v16698_v30, %v2241_v58  ;;  %v13002_v31 = vpop.permute.xlu0 %5955  ;;  %v2316_v30 = vmul.f32 %v16705_v38, %v2269_v53 }
 0x7a6   :  { %2375 = vperm.xlu1 %9474, %v2294_v49   ;;  %v2304_v49 = vmul.f32 %v16699_v27, %v2245_v14  ;;  %v13005_v58 = vpop.permute.xlu0 %5997  ;;  %v16704_v14 = vld [vmem:[#allocation201_spill] sm:$0xff] }
 0x7a7   :  { %v2314_v21 = vmul.f32 %v16704_v14, %v2265_v26  ;;  %v16712_v26 = vld [vmem:[#allocation136_spill] sm:$0xff] }
 0x7a8   :  { %v13028_v53 = vadd.f32 %v16712_v26, %v16586_v6 }
 0x7aa   :  { %2381 = vperm.xlu1 %9474, %v2296_v40   ;;  %v2310_v40 = vmul.f32 %v16702_v39, %v2257_v28  ;;  %v16709_v28 = vld [vmem:[#allocation77_spill] sm:$0xff]  ;;  %16713 = vst [vmem:[#allocation152_spill] sm:$0xff] %v13028_v53 }
 0x7ae   :  { %2387 = vperm.xlu1 %9474, %v2298_v24   ;;  %v2312_v24 = vmul.f32 %v16703_v10, %v2261_v2  ;;  %v13021_v2 = vadd.f32 %v16710_v0, %v16709_v28  ;;  %v16718_v0 = vld [vmem:[#allocation3_spill] sm:$0xff] }
 0x7af   :  { %v16721_v28 = vld [vmem:[#allocation115_spill] sm:$0xff] }
 0x7b0   :  { %16711 = vst [vmem:[#allocation130_spill] sm:$0xff] %v13021_v2 }
 0x7b2   :  { %2393 = vperm.xlu1 %9474, %v2300_v37   ;;  %v13009_v37 = vpop.permute.xlu0 %5961 }
 0x7b6   :  { %2399 = vperm.xlu1 %9474, %v2302_v42   ;;  %v16707_v42 = vld [vmem:[#allocation110_spill] sm:$0xff] }
 0x7b7   :  { %v13014_v27 = vadd.f32 %v16707_v42, %v16706_v36  ;;  %v16720_v36 = vld [vmem:[#allocation192_spill] sm:$0xff] }
 0x7b9   :  { %16708 = vst [vmem:[#allocation149_spill] sm:$0xff] %v13014_v27 }
 0x7ba   :  { %2405 = vperm.xlu1 %9474, %v2304_v49   ;;  %v13016_v49 = vpop.permute.xlu0 %6003 }
 0x7be   :  { %2411 = vperm.xlu1 %9474, %v2306_v23   ;;  %v13023_v23 = vpop.permute.xlu0 %5967 }
 0x7c2   :  { %2417 = vperm.xlu1 %9474, %v2308_v43   ;;  %v13033_v43 = vadd.f32 %v16714_v7, %v16659_v48  ;;  %v13035_v39 = vpop.permute.xlu0 %6009  ;;  %v16719_v7 = vld [vmem:[#allocation166_spill] sm:$0xff] }
 0x7c4   :  { %16715 = vst [vmem:[#allocation160_spill] sm:$0xff] %v13033_v43 }
 0x7c6   :  { %2423 = vperm.xlu1 %9474, %v2310_v40   ;;  %v16716_v40 = vld [vmem:[#allocation164_spill] sm:$0xff] }
 0x7c7   :  { %v13040_v10 = vadd.f32 %v16716_v40, %v16671_v8  ;;  %v4634_v40 = vrot.slane %v16719_v7, %v11907_v25  ;;  %v4643_v7 = vrot.slane %v16725_v16, %v11907_v25 }
 0x7c9   :  { %16717 = vst [vmem:[#allocation120_spill] sm:$0xff] %v13040_v10 }
 0x7ca   :  { %2429 = vperm.xlu1 %9474, %v2312_v24   ;;  %v13042_v24 = vpop.permute.xlu0 %5973 }
 0x7ce   :  { %2435 = vperm.xlu1 %9474, %v2314_v21   ;;  %v13045_v14 = vpop.permute.xlu0 %6015 }
 0x7d2   :  { %2441 = vperm.xlu1 %9474, %v2316_v30   ;;  %v13047_v21 = vpop.permute.xlu0 %6021 }
 0x7d6   :  { %5964 = vperm.xlu1 %9474, %v13014_v27   ;;  %v13061_v8 = vpop.permute.xlu0 %2351 }
 0x7d7   :  { %v2449_v4 = vrot.slane %v13061_v8, %v11904_v51 }
 0x7da   :  { %6006 = vperm.xlu1 %9474, %v13021_v2   ;;  %v16723_v2 = vld [vmem:[#allocation203_spill] sm:$0xff] }
 0x7db   :  { %v4639_v27 = vrot.slane %v16723_v2, %v11904_v51  ;;  %v16726_v2 = vld [vmem:[#allocation193_spill] sm:$0xff] }
 0x7de   :  { %5970 = vperm.xlu1 %9474, %v13028_v53  }
 0x7e2   :  { %6012 = vperm.xlu1 %9474, %v13033_v43   ;;  %v16722_v43 = vld [vmem:[#allocation118_spill] sm:$0xff] }
 0x7e3   :  { %v4630_v53 = vrot.slane %v16722_v43, %v11904_v51  ;;  %v4661_v43 = vrot.slane %v12685_v19, %v11907_v25  ;;  %v4666_v19 = vrot.slane %v12715_v11, %v11904_v51 }
 0x7e5   :  { %v4635_v34 = vsel %vm1563_vm4, %v4634_v40, %v4630_v53  ;;  %v4652_v53 = vrot.slane %v12633_v54, %v11907_v25  ;;  %v4644_v40 = vsel %vm1563_vm4, %v4643_v7, %v4639_v27  ;;  %v4671_v7 = vsel %vm1563_vm4, %v4670_v41, %v4666_v19 }
 0x7e6   :  { %6018 = vperm.xlu1 %9474, %v13040_v10   ;;  %v4621_v10 = vrot.slane %v16721_v28, %v11904_v51  ;;  %v4657_v28 = vrot.slane %v12674_v9, %v11904_v51 }
 0x7e8   :  { %v4662_v54 = vsel %vm1563_vm4, %v4661_v43, %v4657_v28  ;;  %v4688_v43 = vrot.slane %v12998_v35, %v11907_v25 }
 0x7f2   :  { %v13049_v38 = vpop.xlane.xlu1 %4707 }
 0x7f3   :  { %v13053_v30 = vrot.slane %v13049_v38, %v16413_v18  ;;  %v4721_v42 = vrot.slane %v13049_v38, %v16414_v63 }
 0x7f5   :  { %v4794_v26 = vsub.f32 %v16718_v0, %v13053_v30  ;;  %v4796_v48 = vsub.f32 %v16720_v36, %v4721_v42  ;;  %v4625_v0 = vrot.slane %v16724_v12, %v11907_v25  ;;  %v4648_v36 = vrot.slane %v12655_v55, %v11904_v51  ;;  %v13090_v55 = vpop.permute.xlu0 %2360 }
 0x7f6   :  { %v4536_v6 = vpop.permute.xlu1 %4535  ;;  %v13085_v12 = vrot.slane %v13049_v38, %v16417_v47  ;;  %v4797_v16 = vsub.f32 %v16726_v2, %v4721_v42 }
 0x7f7   :  { %v4826_v44 = vmul.f32 1.442695, %v4794_v26  ;;  %v4830_v26 = vmul.f32 1.442695, %v4796_v48  ;;  %v4626_v9 = vsel %vm1563_vm4, %v4625_v0, %v4621_v10  ;;  %v4675_v48 = vrot.slane %v4536_v6, %v11904_v51  ;;  %v16727_v10 = vld [vmem:[#allocation194_spill] sm:$0xff] }
 0x7f8   :  { %v4697_v46 = vsel %vm1700_vm5, %v4635_v34, %v4626_v9  ;;  %v4798_v0 = vsub.f32 %v16727_v10, %v13085_v12  ;;  %v4832_v27 = vmul.f32 1.442695, %v4797_v16 }
 0x7f9   :  { %9616 = vpow2.f32 %v4826_v44  ;;  %v4653_v44 = vsel %vm1563_vm4, %v4652_v53, %v4648_v36  ;;  %v4698_v11 = vsel %vm1702_vm6, %v4644_v40, %v4697_v46  ;;  %v2367_v36 = vpop.permute.xlu0 %2366  ;;  %v4680_v2 = vsel %vm1563_vm4, %v4679_v56, %v4675_v48 }
 0x7fa   :  { %v13081_v45 = vpop.permute.xlu1 %5946  ;;  %9618 = vpow2.f32 %v4830_v26  ;;  %v4699_v34 = vsel %vm1704_vm7, %v4653_v44, %v4698_v11  ;;  %v4834_v16 = vmul.f32 1.442695, %v4798_v0 }
 0x7fb   :  { %v4700_v6 = vsel %vm1706_vm8, %v4662_v54, %v4699_v34  ;;  %9620 = vpow2.f32 %v4832_v27 }
 0x7fc   :  { %v4701_v26 = vsel %vm1708_vm9, %v4671_v7, %v4700_v6  ;;  %9622 = vpow2.f32 %v4834_v16 }
 0x7fd   :  { %v4702_v41 = vsel %vm1710_vm10, %v4680_v2, %v4701_v26  ;;  %v2373_v19 = vpop.permute.xlu0 %2372 }
 0x7fe   :  { %v13101_v42 = vpop.permute.xlu1 %5988 }
 0x801   :  { %v2379_v10 = vpop.permute.xlu0 %2378 }
 0x802   :  { %v4542_v28 = vpop.permute.xlu1 %4541 }
 0x803   :  { %v4684_v46 = vrot.slane %v4542_v28, %v11904_v51  ;;  %v13117_v17 = vpop.eup %9616 }
 0x804   :  { %16728 = vst [vmem:[#allocation100_spill] sm:$0xff] %v13117_v17  ;;  %4923 = vperm.xlu1 %9474, %v13117_v17   ;;  %v13126_v44 = vpop.eup %9618 }
 0x805   :  { %v4689_v53 = vsel %vm1563_vm4, %v4688_v43, %v4684_v46  ;;  %16729 = vst [vmem:[#allocation162_spill] sm:$0xff] %v13126_v44  ;;  %v13131_v54 = vpop.eup %9620  ;;  %v2385_v56 = vpop.permute.xlu0 %2384 }
 0x806   :  { %v13122_v9 = vpop.permute.xlu1 %5952  ;;  %v4703_v40 = vsel %vm1712_vm11, %v4689_v53, %v4702_v41  ;;  %16730 = vst [vmem:[#allocation150_spill] sm:$0xff] %v13131_v54  ;;  %v13136_v27 = vpop.eup %9622 }
 0x807   :  { %v4709_v35 = vsel %vm1723_vm12, %v4703_v40, -inf  ;;  %16731 = vst [vmem:[#allocation202_spill] sm:$0xff] %v13136_v27  ;;  %v2462_v40 = vrot.slane %v13090_v55, %v11907_v25  ;;  %v2489_v55 = vrot.slane %v2379_v10, %v11907_v25 }
 0x808   :  { %4710 = vmax.xlane.f32.xlu0 %v4709_v35  ;;  %4929 = vperm.xlu1 %9474, %v13126_v44  }
 0x809   :  { %v2391_v7 = vpop.permute.xlu0 %2390 }
 0x80a   :  { %v13129_v48 = vpop.permute.xlu1 %5994  ;;  %v2507_v8 = vrot.slane %v2391_v7, %v11907_v25 }
 0x80c   :  { %4932 = vperm.xlu1 %9474, %v13131_v54  }
 0x80d   :  { %v2397_v28 = vpop.permute.xlu0 %2396 }
 0x80e   :  { %v13134_v0 = vpop.permute.xlu1 %5958 }
 0x810   :  { %4935 = vperm.xlu1 %9474, %v13136_v27   ;;  %v2471_v27 = vrot.slane %v2367_v36, %v11907_v25 }
 0x811   :  { %v13141_v16 = vpop.permute.xlu0 %2402 }
 0x812   :  { %v13139_v11 = vpop.permute.xlu1 %6000 }
 0x815   :  { %v2409_v44 = vpop.permute.xlu0 %2408 }
 0x816   :  { %v2355_v34 = vpop.permute.xlu1 %2354 }
 0x817   :  { %v2453_v35 = vrot.slane %v2355_v34, %v11907_v25 }
 0x819   :  { %v2454_v36 = vsel %vm1563_vm4, %v2453_v35, %v2449_v4 }
 0x81a   :  { %v2358_v6 = vpop.permute.xlu1 %2357 }
 0x81b   :  { %v2458_v26 = vrot.slane %v2358_v6, %v11904_v51  ;;  %v2480_v6 = vrot.slane %v2373_v19, %v11907_v25 }
 0x81e   :  { %v2364_v2 = vpop.permute.xlu1 %2363 }
 0x81f   :  { %v2467_v53 = vrot.slane %v2364_v2, %v11904_v51  ;;  %v2463_v2 = vsel %vm1563_vm4, %v2462_v40, %v2458_v26 }
 0x820   :  { %v2590_v19 = vsel %vm1700_vm5, %v2463_v2, %v2454_v36 }
 0x821   :  { %v2472_v34 = vsel %vm1563_vm4, %v2471_v27, %v2467_v53  ;;  %v2415_v27 = vpop.permute.xlu0 %2414 }
 0x822   :  { %v2370_v43 = vpop.permute.xlu1 %2369 }
 0x823   :  { %v2476_v54 = vrot.slane %v2370_v43, %v11904_v51  ;;  %v2498_v43 = vrot.slane %v2385_v56, %v11907_v25 }
 0x825   :  { %v2421_v2 = vpop.permute.xlu0 %2420 }
 0x826   :  { %v2376_v46 = vpop.permute.xlu1 %2375 }
 0x827   :  { %v2485_v17 = vrot.slane %v2376_v46, %v11904_v51  ;;  %v2481_v46 = vsel %vm1563_vm4, %v2480_v6, %v2476_v54  ;;  %v2516_v54 = vrot.slane %v2397_v28, %v11907_v25 }
 0x829   :  { %v2490_v26 = vsel %vm1563_vm4, %v2489_v55, %v2485_v17  ;;  %v2427_v55 = vpop.permute.xlu0 %2426 }
 0x82a   :  { %v2382_v41 = vpop.permute.xlu1 %2381 }
 0x82b   :  { %v2494_v3 = vrot.slane %v2382_v41, %v11904_v51  ;;  %v2591_v41 = vsel %vm1702_vm6, %v2472_v34, %v2590_v19 }
 0x82c   :  { %v2592_v53 = vsel %vm1704_vm7, %v2481_v46, %v2591_v41  ;;  %v2534_v41 = vrot.slane %v2409_v44, %v11907_v25 }
 0x82d   :  { %v2499_v10 = vsel %vm1563_vm4, %v2498_v43, %v2494_v3  ;;  %v2433_v43 = vpop.permute.xlu0 %2432 }
 0x82e   :  { %v2388_v29 = vpop.permute.xlu1 %2387 }
 0x82f   :  { %v2503_v20 = vrot.slane %v2388_v29, %v11904_v51  ;;  %v2593_v29 = vsel %vm1706_vm8, %v2490_v26, %v2592_v53 }
 0x830   :  { %v2594_v40 = vsel %vm1708_vm9, %v2499_v10, %v2593_v29  ;;  %v2552_v29 = vrot.slane %v2421_v2, %v11907_v25 }
 0x831   :  { %v2508_v56 = vsel %vm1563_vm4, %v2507_v8, %v2503_v20  ;;  %v2439_v8 = vpop.permute.xlu0 %2438 }
 0x832   :  { %v2394_v4 = vpop.permute.xlu1 %2393  ;;  %v2595_v35 = vsel %vm1710_vm10, %v2508_v56, %v2594_v40  ;;  %v2543_v56 = vrot.slane %v2415_v27, %v11907_v25 }
 0x833   :  { %v2512_v7 = vrot.slane %v2394_v4, %v11904_v51 }
 0x835   :  { %v2517_v17 = vsel %vm1563_vm4, %v2516_v54, %v2512_v7  ;;  %v2525_v54 = vrot.slane %v13141_v16, %v11907_v25  ;;  %v2579_v16 = vrot.slane %v2439_v8, %v11907_v25  ;;  %v2445_v2 = vpop.permute.xlu0 %2444 }
 0x836   :  { %v2400_v6 = vpop.permute.xlu1 %2399  ;;  %v2596_v3 = vsel %vm1712_vm11, %v2517_v17, %v2595_v35  ;;  %v2561_v17 = vrot.slane %v2427_v55, %v11907_v25 }
 0x837   :  { %9313 = vmatprep.mubr.msk.f32.mxu1 %vm1723_vm12, %v2596_v3  ;;  %v2521_v10 = vrot.slane %v2400_v6, %v11904_v51  ;;  %v2570_v6 = vrot.slane %v2433_v43, %v11907_v25 }
 0x839   :  { %v2526_v27 = vsel %vm1563_vm4, %v2525_v54, %v2521_v10 }
 0x83a   :  { %v2406_v20 = vpop.permute.xlu1 %2405 }
 0x83b   :  { %v2530_v46 = vrot.slane %v2406_v20, %v11904_v51 }
 0x83d   :  { %v2535_v7 = vsel %vm1563_vm4, %v2534_v41, %v2530_v46 }
 0x83e   :  { %v2412_v34 = vpop.permute.xlu1 %2411 }
 0x83f   :  { %v2539_v19 = vrot.slane %v2412_v34, %v11904_v51  ;;  %v2597_v34 = vsel %vm1700_vm5, %v2535_v7, %v2526_v27 }
 0x841   :  { %v2544_v44 = vsel %vm1563_vm4, %v2543_v56, %v2539_v19  ;;  %v6039_v56 = vrot.slane %v12708_v22, %v11907_v25  ;;  %v6048_v22 = vrot.slane %v12830_v52, %v11907_v25 }
 0x842   :  { %v2418_v28 = vpop.permute.xlu1 %2417  ;;  %v2598_v55 = vsel %vm1702_vm6, %v2544_v44, %v2597_v34  ;;  %v6030_v44 = vrot.slane %v12695_v5, %v11907_v25 }
 0x843   :  { %v2548_v53 = vrot.slane %v2418_v28, %v11904_v51 }
 0x845   :  { %v2553_v3 = vsel %vm1563_vm4, %v2552_v29, %v2548_v53  ;;  %v6035_v53 = vrot.slane %v12692_v50, %v11904_v51  ;;  %v6044_v29 = vrot.slane %v12828_v15, %v11904_v51  ;;  %v6053_v50 = vrot.slane %v13081_v45, %v11904_v51 }
 0x846   :  { %v2424_v36 = vpop.permute.xlu1 %2423  ;;  %v2599_v46 = vsel %vm1704_vm7, %v2553_v3, %v2598_v55  ;;  %v6062_v15 = vrot.slane %v13122_v9, %v11904_v51  ;;  %v6066_v45 = vrot.slane %v13002_v31, %v11907_v25  ;;  %v6075_v9 = vrot.slane %v13009_v37, %v11907_v25 }
 0x847   :  { %v2557_v4 = vrot.slane %v2424_v36, %v11904_v51  ;;  %v6049_v5 = vsel %vm1563_vm4, %v6048_v22, %v6044_v29  ;;  %v6098_v37 = vrot.slane %v12835_v33, %v11904_v51  ;;  %v6107_v55 = vrot.slane %v12853_v62, %v11904_v51 }
 0x848   :  { %v6067_v31 = vsel %vm1563_vm4, %v6066_v45, %v6062_v15  ;;  %v6125_v33 = vrot.slane %v13129_v48, %v11904_v51 }
 0x849   :  { %v2562_v28 = vsel %vm1563_vm4, %v2561_v17, %v2557_v4  ;;  %v6026_v17 = vrot.slane %v12679_v60, %v11904_v51  ;;  %v6071_v60 = vrot.slane %v13134_v0, %v11904_v51  ;;  %v6111_v0 = vrot.slane %v12886_v1, %v11907_v25 }
 0x84a   :  { %v2430_v26 = vpop.permute.xlu1 %2429  ;;  %v2600_v41 = vsel %vm1706_vm8, %v2562_v28, %v2599_v46 }
 0x84b   :  { %v2566_v40 = vrot.slane %v2430_v26, %v11904_v51  ;;  %v2588_v26 = vrot.slane %v2445_v2, %v11907_v25  ;;  %v6031_v52 = vsel %vm1563_vm4, %v6030_v44, %v6026_v17  ;;  %v6102_v2 = vrot.slane %v12842_v61, %v11907_v25 }
 0x84c   :  { %v6076_v28 = vsel %vm1563_vm4, %v6075_v9, %v6071_v60  ;;  %v6093_v61 = vrot.slane %v13042_v24, %v11907_v25  ;;  %v6112_v62 = vsel %vm1563_vm4, %v6111_v0, %v6107_v55  ;;  %v6129_v24 = vrot.slane %v13005_v58, %v11907_v25 }
 0x84d   :  { %v2571_v36 = vsel %vm1563_vm4, %v2570_v6, %v2566_v40  ;;  %v6057_v6 = vrot.slane %v12991_v32, %v11907_v25  ;;  %v6156_v17 = vrot.slane %v13045_v14, %v11907_v25 }
 0x84e   :  { %v2436_v35 = vpop.permute.xlu1 %2435  ;;  %v2601_v10 = vsel %vm1708_vm9, %v2571_v36, %v2600_v41  ;;  %v6130_v58 = vsel %vm1563_vm4, %v6129_v24, %v6125_v33  ;;  %v16742_v24 = vld [vmem:[#allocation188_spill] sm:$0xff] }
 0x84f   :  { %v2575_v20 = vrot.slane %v2436_v35, %v11904_v51  ;;  %v6040_v35 = vsel %vm1563_vm4, %v6039_v56, %v6035_v53  ;;  %v6103_v53 = vsel %vm1563_vm4, %v6102_v2, %v6098_v37  ;;  %v6138_v56 = vrot.slane %v13016_v49, %v11907_v25 }
 0x850   :  { %v6167_v32 = vsel %vm1700_vm5, %v6040_v35, %v6031_v52  ;;  %v6165_v35 = vrot.slane %v13047_v21, %v11907_v25  ;;  %v16732_v52 = vld [vmem:[#allocation101_spill] sm:$0xff]  ;;  %v16733_v21 = vld [vmem:[#allocation107_spill] sm:$0xff] }
 0x851   :  { %v2580_v43 = vsel %vm1563_vm4, %v2579_v16, %v2575_v20  ;;  %v6058_v20 = vsel %vm1563_vm4, %v6057_v6, %v6053_v50  ;;  %v6084_v16 = vrot.slane %v13023_v23, %v11907_v25  ;;  %v6168_v34 = vsel %vm1702_vm6, %v6049_v5, %v6167_v32 }
 0x852   :  { %v2442_v19 = vpop.permute.xlu1 %2441  ;;  %v2602_v54 = vsel %vm1710_vm10, %v2580_v43, %v2601_v10  ;;  %v6169_v1 = vsel %vm1704_vm7, %v6058_v20, %v6168_v34  ;;  %v6116_v23 = vrot.slane %v13101_v42, %v11904_v51  ;;  %v6134_v42 = vrot.slane %v13139_v11, %v11904_v51  ;;  %v16736_v34 = vld [vmem:[#allocation195_spill] sm:$0xff] }
 0x853   :  { %v2584_v8 = vrot.slane %v2442_v19, %v11904_v51  ;;  %v6170_v43 = vsel %vm1706_vm8, %v6067_v31, %v6169_v1  ;;  %v4795_v9 = vsub.f32 %v16732_v52, %v13053_v30  ;;  %v4799_v20 = vsub.f32 %v16733_v21, %v13085_v12  ;;  %v16738_v1 = vld [vmem:[#allocation139_spill] sm:$0xff]  ;;  %v16753_v21 = vld [vmem:[#allocation97_spill] sm:$0xff] }
 0x854   :  { %v6171_v41 = vsel %vm1708_vm9, %v6076_v28, %v6170_v43  ;;  %v6139_v49 = vsel %vm1563_vm4, %v6138_v56, %v6134_v42  ;;  %v16737_v28 = vld [vmem:[#allocation123_spill] sm:$0xff]  ;;  %v4729_v42 = vrot.slane %v13049_v38, %v16420_v13 }
 0x855   :  { %v2589_v4 = vsel %vm1563_vm4, %v2588_v26, %v2584_v8  ;;  %v6120_v26 = vrot.slane %v12995_v57, %v11907_v25  ;;  %v4828_v32 = vmul.f32 1.442695, %v4795_v9  ;;  %v4836_v0 = vmul.f32 1.442695, %v4799_v20 }
 0x856   :  { %v5965_v7 = vpop.permute.xlu1 %5964  ;;  %v2603_v40 = vsel %vm1712_vm11, %v2589_v4, %v2602_v54  ;;  %v6147_v54 = vrot.slane %v13035_v39, %v11907_v25 }
 0x857   :  { %9314 = vmatmul.mubr.msk.f32.vlgmr.msra.gmra.mrb[20].mxu1 %vm1723_vm12, %v2603_v40  ;;  %v6080_v27 = vrot.slane %v5965_v7, %v11904_v51  ;;  %v6121_v57 = vsel %vm1563_vm4, %v6120_v26, %v6116_v23  ;;  %v6174_v40 = vsel %vm1700_vm5, %v6112_v62, %v6103_v53  ;;  %9624 = vpow2.f32 %v4828_v32  ;;  %v16741_v62 = vld [vmem:[#allocation161_spill] sm:$0xff] }
 0x858   :  { %v6175_v44 = vsel %vm1702_vm6, %v6121_v57, %v6174_v40  ;;  %9626 = vpow2.f32 %v4836_v0  ;;  %v3294_v23 = vrot.slane %v16738_v1, %v16654_v59  ;;  %v16743_v53 = vld [vmem:[#allocation197_spill] sm:$0xff]  ;;  %v16746_v40 = vld [vmem:[#allocation198_spill] sm:$0xff] }
 0x859   :  { %v6085_v36 = vsel %vm1563_vm4, %v6084_v16, %v6080_v27  ;;  %v6176_v39 = vsel %vm1704_vm7, %v6130_v58, %v6175_v44  ;;  %v4800_v56 = vsub.f32 %v16743_v53, %v4729_v42  ;;  %v16745_v58 = vld [vmem:[#allocation11_spill] sm:$0xff]  ;;  %v16747_v44 = vld [vmem:[#allocation200_spill] sm:$0xff] }
 0x85a   :  { %v6007_v3 = vpop.permute.xlu1 %6006  ;;  %v6172_v48 = vsel %vm1710_vm10, %v6085_v36, %v6171_v41  ;;  %v6177_v6 = vsel %vm1706_vm8, %v6139_v49, %v6176_v39  ;;  %v16739_v36 = vld [vmem:[#allocation196_spill] sm:$0xff]  ;;  %v3343_v26 = vsub.f32 %v16741_v62, %v3294_v23  ;;  %v16760_v62 = vld [vmem:[#allocation103_spill] sm:$0xff] }
 0x85b   :  { %v6143_v8 = vrot.slane %v6007_v3, %v11904_v51 }
 0x85d   :  { %v6148_v50 = vsel %vm1563_vm4, %v6147_v54, %v6143_v8  ;;  %v3344_v8 = vsub.f32 %v16742_v24, %v3294_v23  ;;  %v16757_v23 = vld [vmem:[#allocation143_spill] sm:$0xff]  ;;  %v16761_v24 = vld [vmem:[#allocation129_spill] sm:$0xff] }
 0x85e   :  { %v5971_v46 = vpop.permute.xlu1 %5970  ;;  %v6178_v14 = vsel %vm1708_vm9, %v6148_v50, %v6177_v6  ;;  %v16750_v6 = vld [vmem:[#allocation8_spill] sm:$0xff] }
 0x85f   :  { %v6089_v19 = vrot.slane %v5971_v46, %v11904_v51 }
 0x861   :  { %v6094_v10 = vsel %vm1563_vm4, %v6093_v61, %v6089_v19  ;;  %v13305_v16 = vpop.eup %9624  ;;  %v16740_v61 = vld [vmem:[#allocation199_spill] sm:$0xff] }
 0x862   :  { %v6013_v4 = vpop.permute.xlu1 %6012  ;;  %v6173_v11 = vsel %vm1712_vm11, %v6094_v10, %v6172_v48  ;;  %16734 = vst [vmem:[#allocation108_spill] sm:$0xff] %v13305_v16  ;;  %v13308_v31 = vpop.eup %9626  ;;  %v3403_v48 = vmul.f32 1.442695, %v3343_v26 }
 0x863   :  { %v6152_v29 = vrot.slane %v6013_v4, %v11904_v51  ;;  %v6183_v7 = vsel %vm1723_vm12, %v6173_v11, -inf  ;;  %16735 = vst [vmem:[#allocation205_spill] sm:$0xff] %v13308_v31  ;;  %v3405_v4 = vmul.f32 1.442695, %v3344_v8  ;;  %v16744_v11 = vld [vmem:[#allocation126_spill] sm:$0xff] }
 0x864   :  { %6184 = vmax.xlane.f32.xlu0 %v6183_v7  ;;  %v4801_v54 = vsub.f32 %v16744_v11, %v4729_v42  ;;  %v4838_v7 = vmul.f32 1.442695, %v4800_v56 }
 0x865   :  { %v6157_v22 = vsel %vm1563_vm4, %v6156_v17, %v6152_v29  ;;  %v3298_v29 = vrot.slane %v16738_v1, %v16745_v58 }
 0x866   :  { %v6019_v15 = vpop.permute.xlu1 %6018  ;;  %v6179_v45 = vsel %vm1710_vm10, %v6157_v22, %v6178_v14  ;;  %v4840_v49 = vmul.f32 1.442695, %v4801_v54  ;;  %v16764_v54 = vld [vmem:[#allocation157_spill] sm:$0xff] }
 0x867   :  { %v6161_v60 = vrot.slane %v6019_v15, %v11904_v51  ;;  %v16749_v15 = vld [vmem:[#allocation165_spill] sm:$0xff] }
 0x869   :  { %v6166_v5 = vsel %vm1563_vm4, %v6165_v35, %v6161_v60  ;;  %v3345_v35 = vsub.f32 %v16749_v15, %v3298_v29  ;;  %v4733_v60 = vrot.slane %v13049_v38, %v16750_v6 }
 0x86a   :  { %v6180_v27 = vsel %vm1712_vm11, %v6166_v5, %v6179_v45  ;;  %v16751_v5 = vld [vmem:[#allocation190_spill] sm:$0xff] }
 0x86b   :  { %v6186_v3 = vsel %vm1723_vm12, %v6180_v27, -inf  ;;  %v3346_v45 = vsub.f32 %v16751_v5, %v3298_v29  ;;  %v3407_v9 = vmul.f32 1.442695, %v3345_v35  ;;  %v4802_v20 = vsub.f32 %v16753_v21, %v4733_v60 }
 0x86c   :  { %6187 = vmax.xlane.f32.xlu0 %v6186_v3 }
 0x86d   :  { %v3409_v0 = vmul.f32 1.442695, %v3346_v45  ;;  %v4842_v1 = vmul.f32 1.442695, %v4802_v20  ;;  %v16773_v20 = vld [vmem:[#allocation102_spill] sm:$0xff] }
 0x882   :  { %4926 = vperm.xlu0 %9475, %v13305_v16  }
 0x886   :  { %4938 = vperm.xlu0 %9475, %v13308_v31  }
 0x895   :  { %v13311_v2 = vpop.xlane.xlu0 %4710 }
 0x896   :  { %v4749_v30 = vrot.slane %v13311_v2, %v16413_v18  ;;  %v4753_v12 = vrot.slane %v13311_v2, %v16414_v63  ;;  %v4757_v57 = vrot.slane %v13311_v2, %v16417_v47  ;;  %v4761_v32 = vrot.slane %v13311_v2, %v16420_v13 }
 0x897   :  { %v4765_v42 = vrot.slane %v13311_v2, %v16750_v6 }
 0x898   :  { %v4810_v37 = vsub.f32 %v16736_v34, %v4749_v30  ;;  %v4811_v55 = vsub.f32 %v16737_v28, %v4749_v30  ;;  %v4812_v46 = vsub.f32 %v16739_v36, %v4753_v12  ;;  %v4813_v43 = vsub.f32 %v16740_v61, %v4753_v12  ;;  %v16754_v30 = vld [vmem:[#allocation109_spill] sm:$0xff]  ;;  %v16758_v61 = vld [vmem:[#allocation176_spill] sm:$0xff] }
 0x899   :  { %v4814_v17 = vsub.f32 %v16746_v40, %v4757_v57  ;;  %v4815_v50 = vsub.f32 %v16747_v44, %v4757_v57  ;;  %v4803_v12 = vsub.f32 %v16754_v30, %v4733_v60  ;;  %v16756_v28 = vld [vmem:[#allocation9_spill] sm:$0xff]  ;;  %v4816_v36 = vsub.f32 %v16757_v23, %v4761_v32  ;;  %v16776_v23 = vld [vmem:[#allocation96_spill] sm:$0xff] }
 0x89a   :  { %v4858_v33 = vmul.f32 1.442695, %v4810_v37  ;;  %v4860_v19 = vmul.f32 1.442695, %v4811_v55  ;;  %v4862_v41 = vmul.f32 1.442695, %v4812_v46  ;;  %v4737_v55 = vrot.slane %v13049_v38, %v16756_v28 }
 0x89b   :  { %v4864_v10 = vmul.f32 1.442695, %v4813_v43  ;;  %v4866_v14 = vmul.f32 1.442695, %v4814_v17  ;;  %v4868_v27 = vmul.f32 1.442695, %v4815_v50  ;;  %v4817_v43 = vsub.f32 %v16758_v61, %v4761_v32 }
 0x89c   :  { %9628 = vpow2.f32 %v4858_v33  ;;  %v4844_v46 = vmul.f32 1.442695, %v4803_v12  ;;  %v4804_v26 = vsub.f32 %v16760_v62, %v4737_v55  ;;  %v4805_v8 = vsub.f32 %v16761_v24, %v4737_v55  ;;  %v16763_v57 = vld [vmem:[#allocation121_spill] sm:$0xff]  ;;  %v16775_v55 = vld [vmem:[#allocation131_spill] sm:$0xff] }
 0x89d   :  { %9630 = vpow2.f32 %v4860_v19  ;;  %v4819_v29 = vsub.f32 %v16764_v54, %v4765_v42  ;;  %v4741_v12 = vrot.slane %v13049_v38, %v16654_v59  ;;  %v16780_v54 = vld [vmem:[#allocation98_spill] sm:$0xff] }
 0x89e   :  { %9632 = vpow2.f32 %v4862_v41  ;;  %v4870_v41 = vmul.f32 1.442695, %v4816_v36  ;;  %v4846_v56 = vmul.f32 1.442695, %v4804_v26  ;;  %v4848_v11 = vmul.f32 1.442695, %v4805_v8 }
 0x89f   :  { %9634 = vpow2.f32 %v4864_v10  ;;  %v4872_v10 = vmul.f32 1.442695, %v4817_v43  ;;  %v16777_v43 = vld [vmem:[#allocation128_spill] sm:$0xff]  ;;  %v4769_v26 = vrot.slane %v13311_v2, %v16756_v28 }
 0x8a0   :  { %9636 = vpow2.f32 %v3403_v48  ;;  %v4806_v62 = vsub.f32 %v16777_v43, %v4741_v12  ;;  %v16786_v43 = vld [vmem:[#allocation135_spill] sm:$0xff] }
 0x8a1   :  { %9638 = vpow2.f32 %v3405_v4  ;;  %v4818_v4 = vsub.f32 %v16763_v57, %v4765_v42 }
 0x8a2   :  { %9640 = vpow2.f32 %v4838_v7 }
 0x8a3   :  { %9642 = vpow2.f32 %v4840_v49  ;;  %v4874_v17 = vmul.f32 1.442695, %v4818_v4  ;;  %v4876_v49 = vmul.f32 1.442695, %v4819_v29  ;;  %v4821_v29 = vsub.f32 %v16780_v54, %v4769_v26 }
 0x8a4   :  { %9644 = vpow2.f32 %v4866_v14 }
 0x8a5   :  { %9646 = vpow2.f32 %v4868_v27 }
 0x8a6   :  { %v13335_v39 = vpop.eup %9628  ;;  %9648 = vpow2.f32 %v3407_v9 }
 0x8a7   :  { %v13337_v22 = vpop.eup %9630  ;;  %4971 = vperm.xlu1 %9474, %v13335_v39   ;;  %9650 = vpow2.f32 %v3409_v0  ;;  %v16774_v0 = vld [vmem:[#allocation125_spill] sm:$0xff] }
 0x8a8   :  { %16748 = vst [vmem:[#allocation133_spill] sm:$0xff] %v13337_v22  ;;  %4974 = vperm.xlu0 %9475, %v13337_v22   ;;  %v13345_v3 = vpop.eup %9632  ;;  %9652 = vpow2.f32 %v4842_v1 }
 0x8a9   :  { %v13347_v52 = vpop.eup %9634  ;;  %9654 = vpow2.f32 %v4844_v46 }
 0x8aa   :  { %16752 = vst [vmem:[#allocation80_spill] sm:$0xff] %v13347_v52  ;;  %v13355_v34 = vpop.eup %9636  ;;  %9656 = vpow2.f32 %v4870_v41  ;;  %v16778_v41 = vld [vmem:[#allocation112_spill] sm:$0xff] }
 0x8ab   :  { %4977 = vperm.xlu1 %9474, %v13345_v3   ;;  %v13357_v37 = vpop.eup %9638  ;;  %9658 = vpow2.f32 %v4872_v10  ;;  %v4807_v24 = vsub.f32 %v16778_v41, %v4741_v12  ;;  %v4850_v10 = vmul.f32 1.442695, %v4806_v62  ;;  %v4745_v41 = vrot.slane %v13049_v38, %v16745_v58 }
 0x8ac   :  { %4980 = vperm.xlu0 %9475, %v13347_v52   ;;  %16755 = vst [vmem:[#allocation81_spill] sm:$0xff] %v13357_v37  ;;  %v13365_v33 = vpop.eup %9640  ;;  %9660 = vpow2.f32 %v4846_v56  ;;  %v16779_v56 = vld [vmem:[#allocation168_spill] sm:$0xff]  ;;  %v4773_v38 = vrot.slane %v13311_v2, %v16654_v59 }
 0x8ad   :  { %v13367_v19 = vpop.eup %9642  ;;  %9662 = vpow2.f32 %v4848_v11  ;;  %v4820_v57 = vsub.f32 %v16779_v56, %v4769_v26  ;;  %v4852_v11 = vmul.f32 1.442695, %v4807_v24  ;;  %v16789_v24 = vld [vmem:[#allocation124_spill] sm:$0xff]  ;;  %v16790_v56 = vld [vmem:[#allocation159_spill] sm:$0xff] }
 0x8ae   :  { %16759 = vst [vmem:[#allocation83_spill] sm:$0xff] %v13367_v19  ;;  %v13375_v48 = vpop.eup %9644  ;;  %9664 = vpow2.f32 %v4874_v17 }
 0x8af   :  { %3528 = vperm.xlu1 %9474, %v13355_v34   ;;  %v13377_v53 = vpop.eup %9646  ;;  %9666 = vpow2.f32 %v4876_v49  ;;  %v4878_v49 = vmul.f32 1.442695, %v4820_v57 }
 0x8b0   :  { %3531 = vperm.xlu0 %9475, %v13357_v37   ;;  %16762 = vst [vmem:[#allocation82_spill] sm:$0xff] %v13377_v53  ;;  %v13383_v7 = vpop.eup %9648 }
 0x8b1   :  { %v13385_v40 = vpop.eup %9650 }
 0x8b2   :  { %16765 = vst [vmem:[#allocation86_spill] sm:$0xff] %v13385_v40  ;;  %v13389_v44 = vpop.eup %9652 }
 0x8b3   :  { %4941 = vperm.xlu1 %9474, %v13365_v33   ;;  %v13391_v50 = vpop.eup %9654 }
 0x8b4   :  { %4944 = vperm.xlu0 %9475, %v13367_v19   ;;  %16766 = vst [vmem:[#allocation92_spill] sm:$0xff] %v13391_v50  ;;  %v13395_v15 = vpop.eup %9656 }
 0x8b5   :  { %16767 = vst [vmem:[#allocation87_spill] sm:$0xff] %v13395_v15  ;;  %v13397_v35 = vpop.eup %9658 }
 0x8b6   :  { %16768 = vst [vmem:[#allocation94_spill] sm:$0xff] %v13397_v35  ;;  %v13401_v60 = vpop.eup %9660 }
 0x8b7   :  { %4983 = vperm.xlu1 %9474, %v13375_v48   ;;  %16769 = vst [vmem:[#allocation142_spill] sm:$0xff] %v13401_v60  ;;  %v13403_v14 = vpop.eup %9662 }
 0x8b8   :  { %4986 = vperm.xlu0 %9475, %v13377_v53   ;;  %16770 = vst [vmem:[#allocation95_spill] sm:$0xff] %v13403_v14  ;;  %v13407_v5 = vpop.eup %9664  ;;  %v16864_v53 = vld [vmem:[#allocation220_spill] sm:$0xff] }
 0x8b9   :  { %16771 = vst [vmem:[#allocation146_spill] sm:$0xff] %v13407_v5  ;;  %v13409_v45 = vpop.eup %9666  ;;  %v3582_v19 = vrot.slane %v16864_v53, %v11907_v25  ;;  %v16866_v53 = vld [vmem:[#allocation222_spill] sm:$0xff] }
 0x8ba   :  { %16772 = vst [vmem:[#allocation117_spill] sm:$0xff] %v13409_v45 }
 0x8bb   :  { %3534 = vperm.xlu1 %9474, %v13383_v7  }
 0x8bc   :  { %3537 = vperm.xlu0 %9475, %v13385_v40  }
 0x8bf   :  { %4947 = vperm.xlu1 %9474, %v13389_v44  }
 0x8c0   :  { %4950 = vperm.xlu0 %9475, %v13391_v50   ;;  %v16863_v50 = vld [vmem:[#allocation217_spill] sm:$0xff] }
 0x8c1   :  { %v3578_v40 = vrot.slane %v16863_v50, %v11904_v51  ;;  %v16865_v50 = vld [vmem:[#allocation219_spill] sm:$0xff] }
 0x8c3   :  { %4989 = vperm.xlu1 %9474, %v13395_v15  }
 0x8c4   :  { %4992 = vperm.xlu0 %9475, %v13397_v35  }
 0x8c7   :  { %4953 = vperm.xlu1 %9474, %v13401_v60  }
 0x8c8   :  { %4956 = vperm.xlu0 %9475, %v13403_v14  }
 0x8cb   :  { %4995 = vperm.xlu1 %9474, %v13407_v5  }
 0x8cc   :  { %4998 = vperm.xlu0 %9475, %v13409_v45  }
 0x8f1   :  { %v13413_v27 = vpop.xlane.xlu0 %6184 }
 0x8f2   :  { %v6194_v9 = vrot.slane %v13413_v27, %v16413_v18  ;;  %v6198_v21 = vrot.slane %v13413_v27, %v16414_v63  ;;  %v6202_v4 = vrot.slane %v13413_v27, %v16417_v47 }
 0x8f4   :  { %v6271_v32 = vsub.f32 %v16773_v20, %v6194_v9  ;;  %v6272_v30 = vsub.f32 %v16774_v0, %v6194_v9  ;;  %v6273_v1 = vsub.f32 %v16775_v55, %v6198_v21  ;;  %v6274_v36 = vsub.f32 %v16776_v23, %v6198_v21  ;;  %v16781_v9 = vld [vmem:[#allocation99_spill] sm:$0xff]  ;;  %v16782_v0 = vld [vmem:[#allocation114_spill] sm:$0xff] }
 0x8f5   :  { %v6275_v21 = vsub.f32 %v16781_v9, %v6202_v4 }
 0x8f6   :  { %v6303_v46 = vmul.f32 1.442695, %v6271_v32  ;;  %v6305_v61 = vmul.f32 1.442695, %v6272_v30  ;;  %v6307_v42 = vmul.f32 1.442695, %v6273_v1  ;;  %v6276_v30 = vsub.f32 %v16782_v0, %v6202_v4 }
 0x8f7   :  { %v6309_v8 = vmul.f32 1.442695, %v6274_v36  ;;  %v4880_v32 = vmul.f32 1.442695, %v4821_v29  ;;  %v6311_v1 = vmul.f32 1.442695, %v6275_v21 }
 0x8f8   :  { %9668 = vpow2.f32 %v6303_v46  ;;  %v16785_v36 = vld [vmem:[#allocation105_spill] sm:$0xff]  ;;  %v16793_v29 = vld [vmem:[#allocation127_spill] sm:$0xff] }
 0x8f9   :  { %9670 = vpow2.f32 %v6305_v61  ;;  %v13433_v17 = vpop.xlane.xlu0 %6187  ;;  %v6313_v61 = vmul.f32 1.442695, %v6276_v30  ;;  %v16794_v21 = vld [vmem:[#allocation163_spill] sm:$0xff] }
 0x8fa   :  { %9672 = vpow2.f32 %v6307_v42  ;;  %v6226_v20 = vrot.slane %v13433_v17, %v16413_v18  ;;  %v6230_v23 = vrot.slane %v13433_v17, %v16414_v63 }
 0x8fb   :  { %9674 = vpow2.f32 %v6309_v8 }
 0x8fc   :  { %9676 = vpow2.f32 %v4850_v10  ;;  %v6287_v46 = vsub.f32 %v16785_v36, %v6226_v20  ;;  %v6288_v62 = vsub.f32 %v16786_v43, %v6226_v20  ;;  %v6289_v8 = vsub.f32 %v16789_v24, %v6230_v23  ;;  %v16798_v43 = vld [vmem:[#allocation180_spill] sm:$0xff] }
 0x8fd   :  { %9678 = vpow2.f32 %v4852_v11  ;;  %v6290_v57 = vsub.f32 %v16790_v56, %v6230_v23  ;;  %v4809_v20 = vsub.f32 %v16794_v21, %v4745_v41  ;;  %v16797_v23 = vld [vmem:[#allocation84_spill] sm:$0xff]  ;;  %v4777_v21 = vrot.slane %v13311_v2, %v16745_v58 }
 0x8fe   :  { %9680 = vpow2.f32 %v4878_v49  ;;  %v6335_v10 = vmul.f32 1.442695, %v6287_v46  ;;  %v6337_v4 = vmul.f32 1.442695, %v6288_v62  ;;  %v4808_v49 = vsub.f32 %v16793_v29, %v4745_v41  ;;  %v16802_v29 = vld [vmem:[#allocation138_spill] sm:$0xff] }
 0x8ff   :  { %9682 = vpow2.f32 %v4880_v32  ;;  %v6339_v9 = vmul.f32 1.442695, %v6289_v8  ;;  %v6341_v32 = vmul.f32 1.442695, %v6290_v57  ;;  %v4822_v36 = vsub.f32 %v16797_v23, %v4773_v38 }
 0x900   :  { %9684 = vpow2.f32 %v6311_v1  ;;  %v4854_v1 = vmul.f32 1.442695, %v4808_v49  ;;  %v6206_v46 = vrot.slane %v13413_v27, %v16420_v13  ;;  %v4823_v62 = vsub.f32 %v16798_v43, %v4773_v38 }
 0x901   :  { %9686 = vpow2.f32 %v6313_v61  ;;  %v4856_v61 = vmul.f32 1.442695, %v4809_v20  ;;  %v4882_v8 = vmul.f32 1.442695, %v4822_v36  ;;  %v6234_v57 = vrot.slane %v13433_v17, %v16417_v47  ;;  %v16806_v36 = vld [vmem:[#allocation167_spill] sm:$0xff] }
 0x902   :  { %v13439_v12 = vpop.eup %9668  ;;  %9688 = vpow2.f32 %v6335_v10  ;;  %v16801_v10 = vld [vmem:[#allocation88_spill] sm:$0xff]  ;;  %v6278_v49 = vsub.f32 %v16802_v29, %v6206_v46  ;;  %v6210_v2 = vrot.slane %v13413_v27, %v16750_v6 }
 0x903   :  { %16783 = vst [vmem:[#allocation119_spill] sm:$0xff] %v13439_v12  ;;  %v13441_v55 = vpop.eup %9670  ;;  %6400 = vperm.xlu1 %9474, %v13439_v12   ;;  %9690 = vpow2.f32 %v6337_v4  ;;  %v6277_v56 = vsub.f32 %v16801_v10, %v6206_v46  ;;  %v4884_v4 = vmul.f32 1.442695, %v4823_v62  ;;  %v16809_v62 = vld [vmem:[#allocation93_spill] sm:$0xff] }
 0x904   :  { %16784 = vst [vmem:[#allocation122_spill] sm:$0xff] %v13441_v55  ;;  %6403 = vperm.xlu0 %9475, %v13441_v55   ;;  %v13449_v26 = vpop.eup %9672  ;;  %9692 = vpow2.f32 %v6339_v9  ;;  %v6317_v23 = vmul.f32 1.442695, %v6278_v49  ;;  %v4824_v10 = vsub.f32 %v16809_v62, %v4777_v21 }
 0x905   :  { %16787 = vst [vmem:[#allocation201_spill] sm:$0xff] %v13449_v26  ;;  %v13451_v42 = vpop.eup %9674  ;;  %9694 = vpow2.f32 %v6341_v32  ;;  %v6315_v20 = vmul.f32 1.442695, %v6277_v56  ;;  %v16805_v32 = vld [vmem:[#allocation85_spill] sm:$0xff] }
 0x906   :  { %16788 = vst [vmem:[#allocation204_spill] sm:$0xff] %v13451_v42  ;;  %v13459_v11 = vpop.eup %9676  ;;  %9696 = vpow2.f32 %v4854_v1  ;;  %v6291_v1 = vsub.f32 %v16805_v32, %v6234_v57  ;;  %v16810_v56 = vld [vmem:[#allocation189_spill] sm:$0xff]  ;;  %v4886_v32 = vmul.f32 1.442695, %v4824_v10  ;;  %v6214_v10 = vrot.slane %v13413_v27, %v16756_v28 }
 0x907   :  { %6406 = vperm.xlu1 %9474, %v13449_v26   ;;  %16791 = vst [vmem:[#allocation110_spill] sm:$0xff] %v13459_v11  ;;  %v13461_v54 = vpop.eup %9678  ;;  %9698 = vpow2.f32 %v4856_v61  ;;  %v6292_v61 = vsub.f32 %v16806_v36, %v6234_v57  ;;  %v16813_v36 = vld [vmem:[#allocation111_spill] sm:$0xff] }
 0x908   :  { %6409 = vperm.xlu0 %9475, %v13451_v42   ;;  %16792 = vst [vmem:[#allocation153_spill] sm:$0xff] %v13461_v54  ;;  %v13469_v0 = vpop.eup %9680  ;;  %9700 = vpow2.f32 %v4882_v8  ;;  %v6343_v8 = vmul.f32 1.442695, %v6291_v1  ;;  %v6279_v62 = vsub.f32 %v16813_v36, %v6210_v2  ;;  %v16814_v1 = vld [vmem:[#allocation116_spill] sm:$0xff]  ;;  %v16817_v36 = vld [vmem:[#allocation147_spill] sm:$0xff]  ;;  %v16859_v42 = vld [vmem:[#allocation210_spill] sm:$0xff] }
 0x909   :  { %16795 = vst [vmem:[#allocation136_spill] sm:$0xff] %v13469_v0  ;;  %v13471_v30 = vpop.eup %9682  ;;  %9702 = vpow2.f32 %v4884_v4  ;;  %v4825_v4 = vsub.f32 %v16810_v56, %v4777_v21  ;;  %v6345_v29 = vmul.f32 1.442695, %v6292_v61  ;;  %v6280_v21 = vsub.f32 %v16814_v1, %v6210_v2 }
 0x90a   :  { %16796 = vst [vmem:[#allocation155_spill] sm:$0xff] %v13471_v30  ;;  %v13479_v41 = vpop.eup %9684  ;;  %9704 = vpow2.f32 %v6315_v20  ;;  %v6319_v56 = vmul.f32 1.442695, %v6279_v62  ;;  %v6242_v62 = vrot.slane %v13433_v17, %v16750_v6  ;;  %v3546_v55 = vrot.slane %v16859_v42, %v11907_v25 }
 0x90b   :  { %4959 = vperm.xlu1 %9474, %v13459_v11   ;;  %16799 = vst [vmem:[#allocation164_spill] sm:$0xff] %v13479_v41  ;;  %v13481_v24 = vpop.eup %9686  ;;  %9706 = vpow2.f32 %v6317_v23  ;;  %v4888_v20 = vmul.f32 1.442695, %v4825_v4  ;;  %v16818_v4 = vld [vmem:[#allocation182_spill] sm:$0xff] }
 0x90c   :  { %4962 = vperm.xlu0 %9475, %v13461_v54   ;;  %16800 = vst [vmem:[#allocation3_spill] sm:$0xff] %v13481_v24  ;;  %v13489_v38 = vpop.eup %9688  ;;  %9708 = vpow2.f32 %v6343_v8  ;;  %v6321_v8 = vmul.f32 1.442695, %v6280_v21 }
 0x90d   :  { %16803 = vst [vmem:[#allocation166_spill] sm:$0xff] %v13489_v38  ;;  %v13491_v9 = vpop.eup %9690  ;;  %9710 = vpow2.f32 %v6345_v29 }
 0x90e   :  { %16804 = vst [vmem:[#allocation192_spill] sm:$0xff] %v13491_v9  ;;  %v13499_v46 = vpop.eup %9692  ;;  %9712 = vpow2.f32 %v4886_v32 }
 0x90f   :  { %5001 = vperm.xlu1 %9474, %v13469_v0   ;;  %16807 = vst [vmem:[#allocation115_spill] sm:$0xff] %v13499_v46  ;;  %v13501_v43 = vpop.eup %9694  ;;  %9714 = vpow2.f32 %v4888_v20  ;;  %v16823_v20 = vld [vmem:[#allocation89_spill] sm:$0xff] }
 0x910   :  { %5004 = vperm.xlu0 %9475, %v13471_v30   ;;  %16808 = vst [vmem:[#allocation118_spill] sm:$0xff] %v13501_v43  ;;  %v13509_v57 = vpop.eup %9696  ;;  %9716 = vpow2.f32 %v6319_v56  ;;  %v6282_v21 = vsub.f32 %v16823_v20, %v6214_v10  ;;  %v16827_v56 = vld [vmem:[#allocation106_spill] sm:$0xff] }
 0x911   :  { %16811 = vst [vmem:[#allocation203_spill] sm:$0xff] %v13509_v57  ;;  %v13511_v49 = vpop.eup %9698  ;;  %9718 = vpow2.f32 %v6321_v8  ;;  %v16828_v8 = vld [vmem:[#allocation169_spill] sm:$0xff] }
 0x912   :  { %16812 = vst [vmem:[#allocation206_spill] sm:$0xff] %v13511_v49  ;;  %v13519_v23 = vpop.eup %9700 }
 0x913   :  { %6412 = vperm.xlu1 %9474, %v13479_v41   ;;  %16815 = vst [vmem:[#allocation132_spill] sm:$0xff] %v13519_v23  ;;  %v13521_v61 = vpop.eup %9702 }
 0x914   :  { %6415 = vperm.xlu0 %9475, %v13481_v24   ;;  %16816 = vst [vmem:[#allocation193_spill] sm:$0xff] %v13521_v61  ;;  %v13529_v29 = vpop.eup %9704  ;;  %v16858_v24 = vld [vmem:[#allocation216_spill] sm:$0xff] }
 0x915   :  { %16819 = vst [vmem:[#allocation194_spill] sm:$0xff] %v13529_v29  ;;  %v13531_v1 = vpop.eup %9706 }
 0x916   :  { %16820 = vst [vmem:[#allocation101_spill] sm:$0xff] %v13531_v1 }
 0x917   :  { %6448 = vperm.xlu1 %9474, %v13489_v38   ;;  %v16857_v38 = vld [vmem:[#allocation213_spill] sm:$0xff] }
 0x918   :  { %6451 = vperm.xlu0 %9475, %v13491_v9   ;;  %v3560_v9 = vrot.slane %v16857_v38, %v11904_v51 }
 0x91b   :  { %6454 = vperm.xlu1 %9474, %v13499_v46   ;;  %v6238_v46 = vrot.slane %v13433_v17, %v16420_v13 }
 0x91c   :  { %6457 = vperm.xlu0 %9475, %v13501_v43   ;;  %v16836_v43 = vld [vmem:[#allocation184_spill] sm:$0xff] }
 0x91d   :  { %v6294_v2 = vsub.f32 %v16818_v4, %v6238_v46 }
 0x91f   :  { %4965 = vperm.xlu1 %9474, %v13509_v57   ;;  %v6293_v57 = vsub.f32 %v16817_v36, %v6238_v46  ;;  %v6349_v46 = vmul.f32 1.442695, %v6294_v2  ;;  %v6296_v2 = vsub.f32 %v16828_v8, %v6242_v62 }
 0x920   :  { %4968 = vperm.xlu0 %9475, %v13511_v49  }
 0x921   :  { %v6347_v49 = vmul.f32 1.442695, %v6293_v57 }
 0x923   :  { %5007 = vperm.xlu1 %9474, %v13519_v23   ;;  %v16821_v23 = vld [vmem:[#allocation113_spill] sm:$0xff]  ;;  %9720 = vpow2.f32 %v6347_v49  ;;  %v13562_v49 = vpop.permute.xlu1 %4923 }
 0x924   :  { %5010 = vperm.xlu0 %9475, %v13521_v61   ;;  %v6281_v32 = vsub.f32 %v16821_v23, %v6214_v10  ;;  %v13543_v61 = vpop.eup %9708  ;;  %v6218_v23 = vrot.slane %v13413_v27, %v16654_v59  ;;  %v6325_v10 = vmul.f32 1.442695, %v6282_v21  ;;  %9722 = vpow2.f32 %v6349_v46  ;;  %v16832_v21 = vld [vmem:[#allocation90_spill] sm:$0xff] }
 0x925   :  { %16825 = vst [vmem:[#allocation123_spill] sm:$0xff] %v13543_v61  ;;  %v6353_v46 = vmul.f32 1.442695, %v6296_v2 }
 0x926   :  { %v6323_v57 = vmul.f32 1.442695, %v6281_v32  ;;  %v6246_v32 = vrot.slane %v13433_v17, %v16756_v28 }
 0x927   :  { %6418 = vperm.xlu1 %9474, %v13529_v29   ;;  %v13545_v29 = vpop.eup %9710 }
 0x928   :  { %6421 = vperm.xlu0 %9475, %v13531_v1   ;;  %16826 = vst [vmem:[#allocation139_spill] sm:$0xff] %v13545_v29  ;;  %v6295_v1 = vsub.f32 %v16827_v56, %v6242_v62  ;;  %v13553_v20 = vpop.eup %9712  ;;  %9724 = vpow2.f32 %v6323_v57  ;;  %v6284_v62 = vsub.f32 %v16832_v21, %v6218_v23  ;;  %v13579_v21 = vpop.permute.xlu1 %4929 }
 0x929   :  { %16829 = vst [vmem:[#allocation196_spill] sm:$0xff] %v13553_v20  ;;  %9726 = vpow2.f32 %v6325_v10 }
 0x92a   :  { %v13538_v36 = vpop.f32.mrb[20].mxu1  ;;  %v6351_v56 = vmul.f32 1.442695, %v6295_v1 }
 0x92b   :  { %16822 = vst [vmem:[#allocation107_spill] sm:$0xff] %v13538_v36  ;;  %v13541_v4 = vpop.f32.mrb[21].mxu1  ;;  %6460 = vperm.xlu1 %9474, %v13543_v61   ;;  %v16831_v36 = vld [vmem:[#allocation149_spill] sm:$0xff] }
 0x92c   :  { %16824 = vst [vmem:[#allocation195_spill] sm:$0xff] %v13541_v4  ;;  %6463 = vperm.xlu0 %9475, %v13545_v29   ;;  %v13555_v4 = vpop.eup %9714  ;;  %v6283_v61 = vsub.f32 %v16831_v36, %v6218_v23  ;;  %v6222_v36 = vrot.slane %v13413_v27, %v16745_v58  ;;  %9728 = vpow2.f32 %v6351_v56  ;;  %v6298_v23 = vsub.f32 %v16836_v43, %v6246_v32 }
 0x92d   :  { %16830 = vst [vmem:[#allocation199_spill] sm:$0xff] %v13555_v4  ;;  %v13565_v8 = vpop.eup %9716  ;;  %9730 = vpow2.f32 %v6353_v46  ;;  %v13587_v43 = vrot.slane %v13433_v17, %v16654_v59 }
 0x92e   :  { %16833 = vst [vmem:[#allocation161_spill] sm:$0xff] %v13565_v8  ;;  %v13567_v29 = vpop.eup %9718  ;;  %v6327_v57 = vmul.f32 1.442695, %v6283_v61 }
 0x92f   :  { %5013 = vperm.xlu1 %9474, %v13553_v20   ;;  %16834 = vst [vmem:[#allocation188_spill] sm:$0xff] %v13567_v29  ;;  %v16835_v20 = vld [vmem:[#allocation130_spill] sm:$0xff]  ;;  %v13575_v10 = vpop.eup %9720 }
 0x930   :  { %5016 = vperm.xlu0 %9475, %v13555_v4   ;;  %v6297_v1 = vsub.f32 %v16835_v20, %v6246_v32  ;;  %v6329_v4 = vmul.f32 1.442695, %v6284_v62  ;;  %16837 = vst [vmem:[#allocation197_spill] sm:$0xff] %v13575_v10  ;;  %v13577_v2 = vpop.eup %9722  ;;  %9732 = vpow2.f32 %v6327_v57  ;;  %v16840_v20 = vld [vmem:[#allocation171_spill] sm:$0xff]  ;;  %v6357_v32 = vmul.f32 1.442695, %v6298_v23  ;;  %v13603_v23 = vpop.permute.xlu0 %4926 }
 0x931   :  { %16838 = vst [vmem:[#allocation126_spill] sm:$0xff] %v13577_v2  ;;  %v6286_v56 = vsub.f32 %v16840_v20, %v6222_v36 }
 0x932   :  { %v6355_v61 = vmul.f32 1.442695, %v6297_v1  ;;  %9734 = vpow2.f32 %v6329_v4  ;;  %v13589_v62 = vpop.eup %9724  ;;  %v13599_v4 = vrot.slane %v13433_v17, %v16745_v58 }
 0x933   :  { %6424 = vperm.xlu1 %9474, %v13565_v8   ;;  %v16839_v8 = vld [vmem:[#allocation152_spill] sm:$0xff]  ;;  %16841 = vst [vmem:[#allocation198_spill] sm:$0xff] %v13589_v62  ;;  %v13591_v46 = vpop.eup %9726  ;;  %v6333_v57 = vmul.f32 1.442695, %v6286_v56 }
 0x934   :  { %6427 = vperm.xlu0 %9475, %v13567_v29   ;;  %v6285_v27 = vsub.f32 %v16839_v8, %v6222_v36  ;;  %16842 = vst [vmem:[#allocation200_spill] sm:$0xff] %v13591_v46  ;;  %9736 = vpow2.f32 %v6355_v61  ;;  %v13595_v8 = vpop.permute.xlu1 %4932  ;;  %v16843_v36 = vld [vmem:[#allocation186_spill] sm:$0xff] }
 0x935   :  { %v6300_v1 = vsub.f32 %v16843_v36, %v13587_v43  ;;  %9738 = vpow2.f32 %v6357_v32 }
 0x936   :  { %v13605_v20 = vpop.eup %9728 }
 0x937   :  { %6466 = vperm.xlu1 %9474, %v13575_v10   ;;  %v6331_v10 = vmul.f32 1.442695, %v6285_v27  ;;  %16844 = vst [vmem:[#allocation165_spill] sm:$0xff] %v13605_v20  ;;  %v16846_v27 = vld [vmem:[#allocation191_spill] sm:$0xff]  ;;  %v6361_v61 = vmul.f32 1.442695, %v6300_v1 }
 0x938   :  { %6469 = vperm.xlu0 %9475, %v13577_v2   ;;  %v6302_v17 = vsub.f32 %v16846_v27, %v13599_v4  ;;  %v13617_v32 = vpop.permute.xlu1 %4935 }
 0x939   :  { %9740 = vpow2.f32 %v6331_v10 }
 0x93a   :  { %9742 = vpow2.f32 %v6333_v57  ;;  %v6365_v10 = vmul.f32 1.442695, %v6302_v17 }
 0x93b   :  { %6430 = vperm.xlu1 %9474, %v13589_v62   ;;  %v13607_v62 = vpop.eup %9730  ;;  %9744 = vpow2.f32 %v6361_v61 }
 0x93c   :  { %6433 = vperm.xlu0 %9475, %v13591_v46   ;;  %16845 = vst [vmem:[#allocation190_spill] sm:$0xff] %v13607_v62  ;;  %v13613_v56 = vpop.eup %9732  ;;  %v13619_v46 = vpop.permute.xlu0 %4938  ;;  %9746 = vpow2.f32 %v6365_v10 }
 0x93d   :  { %16847 = vst [vmem:[#allocation97_spill] sm:$0xff] %v13613_v56  ;;  %v13615_v36 = vpop.eup %9734  ;;  %v13627_v27 = vpop.permute.xlu1 %4971 }
 0x93e   :  { %16848 = vst [vmem:[#allocation109_spill] sm:$0xff] %v13615_v36 }
 0x93f   :  { %6472 = vperm.xlu1 %9474, %v13605_v20  }
 0x940   :  { %6475 = vperm.xlu0 %9475, %v13607_v62   ;;  %v13623_v62 = vpop.eup %9736  ;;  %v13629_v1 = vpop.permute.xlu0 %4974 }
 0x941   :  { %16849 = vst [vmem:[#allocation143_spill] sm:$0xff] %v13623_v62  ;;  %v13625_v57 = vpop.eup %9738  ;;  %v13639_v17 = vpop.permute.xlu1 %4977 }
 0x942   :  { %16850 = vst [vmem:[#allocation176_spill] sm:$0xff] %v13625_v57 }
 0x943   :  { %6436 = vperm.xlu1 %9474, %v13613_v56   ;;  %v13633_v20 = vpop.eup %9740 }
 0x944   :  { %6439 = vperm.xlu0 %9475, %v13615_v36   ;;  %16851 = vst [vmem:[#allocation103_spill] sm:$0xff] %v13633_v20  ;;  %v13635_v56 = vpop.eup %9742  ;;  %v13641_v61 = vpop.permute.xlu0 %4980 }
 0x945   :  { %16852 = vst [vmem:[#allocation129_spill] sm:$0xff] %v13635_v56  ;;  %v13643_v36 = vpop.eup %9744 }
 0x946   :  { %16853 = vst [vmem:[#allocation121_spill] sm:$0xff] %v13643_v36 }
 0x947   :  { %6478 = vperm.xlu1 %9474, %v13623_v62   ;;  %v13646_v62 = vpop.eup %9746 }
 0x948   :  { %6481 = vperm.xlu0 %9475, %v13625_v57   ;;  %16854 = vst [vmem:[#allocation157_spill] sm:$0xff] %v13646_v62  ;;  %v13648_v57 = vpop.permute.xlu1 %3528  ;;  %v13650_v10 = vpop.permute.xlu0 %3531 }
 0x94b   :  { %6442 = vperm.xlu1 %9474, %v13633_v20   ;;  %v16855_v20 = vld [vmem:[#allocation211_spill] sm:$0xff] }
 0x94c   :  { %6445 = vperm.xlu0 %9475, %v13635_v56   ;;  %v3551_v2 = vrot.slane %v16855_v20, %v11904_v51  ;;  %v16856_v56 = vld [vmem:[#allocation214_spill] sm:$0xff]  ;;  %v13661_v30 = vpop.permute.xlu1 %4941  ;;  %v13663_v54 = vpop.permute.xlu0 %4944  ;;  %v16861_v20 = vld [vmem:[#allocation215_spill] sm:$0xff] }
 0x94d   :  { %v3555_v29 = vrot.slane %v16856_v56, %v11907_v25  ;;  %v3569_v14 = vrot.slane %v16861_v20, %v11904_v51  ;;  %v16862_v56 = vld [vmem:[#allocation218_spill] sm:$0xff] }
 0x94e   :  { %v3573_v35 = vrot.slane %v16862_v56, %v11907_v25 }
 0x94f   :  { %v3556_v38 = vsel %vm1563_vm4, %v3555_v29, %v3551_v2  ;;  %v3583_v2 = vsel %vm1563_vm4, %v3582_v19, %v3578_v40  ;;  %v16871_v19 = vld [vmem:[#allocation223_spill] sm:$0xff] }
 0x950   :  { %6487 = vperm.xlu0 %9475, %v13643_v36   ;;  %v3564_v36 = vrot.slane %v16858_v24, %v11907_v25  ;;  %v13682_v20 = vpop.permute.xlu1 %4983  ;;  %v13684_v52 = vpop.permute.xlu0 %4986  ;;  %v3605_v40 = vrot.slane %v16871_v19, %v11904_v51  ;;  %v16878_v19 = vld [vmem:[#allocation234_spill] sm:$0xff] }
 0x951   :  { %v3645_v0 = vrot.slane %v16878_v19, %v11907_v25  ;;  %v16882_v19 = vld [vmem:[#allocation237_spill] sm:$0xff] }
 0x952   :  { %v3565_v24 = vsel %vm1563_vm4, %v3564_v36, %v3560_v9  ;;  %v3587_v36 = vrot.slane %v16865_v50, %v11904_v51  ;;  %v16873_v50 = vld [vmem:[#allocation229_spill] sm:$0xff] }
 0x954   :  { %6493 = vperm.xlu0 %9475, %v13646_v62   ;;  %v16860_v62 = vld [vmem:[#allocation212_spill] sm:$0xff]  ;;  %v3538_v5 = vpop.permute.xlu0 %3537 }
 0x955   :  { %v3542_v45 = vrot.slane %v16860_v62, %v11904_v51  ;;  %v3574_v62 = vsel %vm1563_vm4, %v3573_v35, %v3569_v14  ;;  %v16867_v35 = vld [vmem:[#allocation221_spill] sm:$0xff] }
 0x956   :  { %v3596_v14 = vrot.slane %v16867_v35, %v11904_v51  ;;  %v16874_v35 = vld [vmem:[#allocation232_spill] sm:$0xff] }
 0x957   :  { %v3547_v42 = vsel %vm1563_vm4, %v3546_v55, %v3542_v45  ;;  %v3591_v45 = vrot.slane %v16866_v53, %v11907_v25  ;;  %v16868_v55 = vld [vmem:[#allocation224_spill] sm:$0xff]  ;;  %v3632_v53 = vrot.slane %v16873_v50, %v11904_v51  ;;  %v3636_v22 = vrot.slane %v16874_v35, %v11907_v25  ;;  %v16879_v50 = vld [vmem:[#allocation233_spill] sm:$0xff] }
 0x958   :  { %v3683_v37 = vsel %vm1700_vm5, %v3556_v38, %v3547_v42  ;;  %v3600_v56 = vrot.slane %v16868_v55, %v11907_v25  ;;  %v16869_v38 = vld [vmem:[#allocation227_spill] sm:$0xff]  ;;  %v16875_v55 = vld [vmem:[#allocation225_spill] sm:$0xff]  ;;  %v3650_v26 = vrot.slane %v16879_v50, %v11904_v51  ;;  %v16880_v35 = vld [vmem:[#allocation236_spill] sm:$0xff] }
 0x959   :  { %v3684_v29 = vsel %vm1702_vm6, %v3565_v24, %v3683_v37  ;;  %v3623_v42 = vrot.slane %v16869_v38, %v11904_v51  ;;  %v16870_v37 = vld [vmem:[#allocation230_spill] sm:$0xff]  ;;  %v3614_v31 = vrot.slane %v16875_v55, %v11904_v51  ;;  %v16876_v38 = vld [vmem:[#allocation228_spill] sm:$0xff]  ;;  %v3592_v11 = vsel %vm1563_vm4, %v3591_v45, %v3587_v36  ;;  %v3535_v55 = vpop.permute.xlu1 %3534 }
 0x95a   :  { %v3685_v9 = vsel %vm1704_vm7, %v3574_v62, %v3684_v29  ;;  %v3627_v24 = vrot.slane %v16870_v37, %v11907_v25  ;;  %v16872_v62 = vld [vmem:[#allocation226_spill] sm:$0xff]  ;;  %v3618_v16 = vrot.slane %v16876_v38, %v11907_v25  ;;  %v16877_v37 = vld [vmem:[#allocation231_spill] sm:$0xff]  ;;  %v3654_v12 = vrot.slane %v16880_v35, %v11907_v25 }
 0x95b   :  { %v3609_v29 = vrot.slane %v16872_v62, %v11907_v25  ;;  %v3641_v41 = vrot.slane %v16877_v37, %v11904_v51  ;;  %v3686_v62 = vsel %vm1706_vm8, %v3583_v2, %v3685_v9  ;;  %v3601_v38 = vsel %vm1563_vm4, %v3600_v56, %v3596_v14  ;;  %v16881_v37 = vld [vmem:[#allocation235_spill] sm:$0xff] }
 0x95c   :  { %v3628_v60 = vsel %vm1563_vm4, %v3627_v24, %v3623_v42  ;;  %v3659_v15 = vrot.slane %v16881_v37, %v11904_v51  ;;  %v3663_v9 = vrot.slane %v16882_v19, %v11907_v25  ;;  %v3637_v2 = vsel %vm1563_vm4, %v3636_v22, %v3632_v53 }
 0x95d   :  { %v3668_v36 = vrot.slane %v13648_v57, %v11904_v51  ;;  %v3672_v45 = vrot.slane %v13650_v10, %v11907_v25  ;;  %v3610_v50 = vsel %vm1563_vm4, %v3609_v29, %v3605_v40  ;;  %v3619_v14 = vsel %vm1563_vm4, %v3618_v16, %v3614_v31 }
 0x95e   :  { %v3646_v56 = vsel %vm1563_vm4, %v3645_v0, %v3641_v41  ;;  %v3677_v42 = vrot.slane %v3535_v55, %v11904_v51  ;;  %v3681_v24 = vrot.slane %v3538_v5, %v11907_v25  ;;  %v3690_v35 = vsel %vm1700_vm5, %v3628_v60, %v3619_v14  ;;  %v4948_v41 = vpop.permute.xlu1 %4947 }
 0x95f   :  { %v3655_v22 = vsel %vm1563_vm4, %v3654_v12, %v3650_v26  ;;  %v3687_v53 = vsel %vm1708_vm9, %v3592_v11, %v3686_v62  ;;  %v3691_v57 = vsel %vm1702_vm6, %v3637_v2, %v3690_v35  ;;  %v3664_v10 = vsel %vm1563_vm4, %v3663_v9, %v3659_v15  ;;  %v4951_v12 = vpop.permute.xlu0 %4950 }
 0x960   :  { %v3688_v40 = vsel %vm1710_vm10, %v3601_v38, %v3687_v53  ;;  %v3692_v16 = vsel %vm1704_vm7, %v3646_v56, %v3691_v57  ;;  %v3673_v31 = vsel %vm1563_vm4, %v3672_v45, %v3668_v36  ;;  %v3682_v60 = vsel %vm1563_vm4, %v3681_v24, %v3677_v42 }
 0x961   :  { %v3689_v0 = vsel %vm1712_vm11, %v3610_v50, %v3688_v40  ;;  %v3693_v5 = vsel %vm1706_vm8, %v3655_v22, %v3692_v16  ;;  %v5025_v57 = vrot.slane %v13603_v23, %v11907_v25  ;;  %v5043_v40 = vrot.slane %v13619_v46, %v11907_v25 }
 0x962   :  { %v3694_v26 = vsel %vm1708_vm9, %v3664_v10, %v3693_v5  ;;  %v3699_v11 = vsel %vm1723_vm12, %v3689_v0, 0.0  ;;  %v13754_v62 = vpop.permute.xlu1 %4989  ;;  %v5034_v0 = vrot.slane %v13595_v8, %v11907_v25  ;;  %v5048_v5 = vrot.slane %v13661_v30, %v11904_v51 }
 0x963   :  { %v3695_v15 = vsel %vm1710_vm10, %v3673_v31, %v3694_v26  ;;  %v13757_v38 = vpop.permute.xlu0 %4992  ;;  %v5021_v31 = vrot.slane %v13562_v49, %v11904_v51  ;;  %v5039_v23 = vrot.slane %v13617_v32, %v11904_v51  ;;  %v5057_v26 = vrot.slane %v4948_v41, %v11904_v51 }
 0x964   :  { %v3696_v29 = vsel %vm1712_vm11, %v3682_v60, %v3695_v15  ;;  %v5052_v60 = vrot.slane %v13663_v54, %v11907_v25  ;;  %v5061_v46 = vrot.slane %v4951_v12, %v11907_v25 }
 0x965   :  { %v3702_v55 = vsel %vm1723_vm12, %v3696_v29, 0.0  ;;  %v5026_v49 = vsel %vm1563_vm4, %v5025_v57, %v5021_v31  ;;  %v5044_v54 = vsel %vm1563_vm4, %v5043_v40, %v5039_v23 }
 0x966   :  { %v4954_v37 = vpop.permute.xlu1 %4953 }
 0x967   :  { %v4957_v19 = vpop.permute.xlu0 %4956  ;;  %v5066_v8 = vrot.slane %v4954_v37, %v11904_v51  ;;  %v5062_v37 = vsel %vm1563_vm4, %v5061_v46, %v5057_v26 }
 0x968   :  { %v5070_v15 = vrot.slane %v4957_v19, %v11907_v25 }
 0x96a   :  { %v13759_v9 = vpop.permute.xlu1 %4995  ;;  %v5071_v57 = vsel %vm1563_vm4, %v5070_v15, %v5066_v8 }
 0x96b   :  { %v13761_v2 = vpop.permute.xlu0 %4998 }
 0x96f   :  { %3700 = vadd.xlane.f32.xlu1 %v3699_v11  ;;  %v5030_v11 = vrot.slane %v13579_v21, %v11904_v51  ;;  %v5053_v21 = vsel %vm1563_vm4, %v5052_v60, %v5048_v5 }
 0x971   :  { %v5035_v12 = vsel %vm1563_vm4, %v5034_v0, %v5030_v11 }
 0x973   :  { %3703 = vadd.xlane.f32.xlu0 %v3702_v55  ;;  %v5162_v55 = vsel %vm1700_vm5, %v5035_v12, %v5026_v49  ;;  %v5111_v12 = vrot.slane %v13682_v20, %v11904_v51  ;;  %v5129_v20 = vrot.slane %v13759_v9, %v11904_v51 }
 0x974   :  { %v5163_v19 = vsel %vm1702_vm6, %v5044_v54, %v5162_v55  ;;  %v5102_v54 = vrot.slane %v13639_v17, %v11904_v51  ;;  %v5120_v17 = vrot.slane %v13754_v62, %v11904_v51 }
 0x975   :  { %v5164_v40 = vsel %vm1704_vm7, %v5053_v21, %v5163_v19  ;;  %v5115_v21 = vrot.slane %v13684_v52, %v11907_v25  ;;  %v5097_v19 = vrot.slane %v13629_v1, %v11907_v25  ;;  %v5133_v52 = vrot.slane %v13761_v2, %v11907_v25 }
 0x976   :  { %v5165_v0 = vsel %vm1706_vm8, %v5062_v37, %v5164_v40  ;;  %v5093_v37 = vrot.slane %v13627_v27, %v11904_v51 }
 0x977   :  { %v5166_v60 = vsel %vm1708_vm9, %v5071_v57, %v5165_v0  ;;  %v5116_v62 = vsel %vm1563_vm4, %v5115_v21, %v5111_v12 }
 0x978   :  { %v5098_v2 = vsel %vm1563_vm4, %v5097_v19, %v5093_v37 }
 0x982   :  { %v13763_v36 = vpop.permute.xlu1 %6400 }
 0x983   :  { %v13765_v45 = vpop.permute.xlu0 %6403 }
 0x986   :  { %v13767_v50 = vpop.permute.xlu1 %6406 }
 0x987   :  { %v13769_v14 = vpop.permute.xlu0 %6409 }
 0x98a   :  { %v4960_v56 = vpop.permute.xlu1 %4959 }
 0x98b   :  { %v4963_v42 = vpop.permute.xlu0 %4962  ;;  %v5075_v29 = vrot.slane %v4960_v56, %v11904_v51 }
 0x98c   :  { %v5079_v32 = vrot.slane %v4963_v42, %v11907_v25 }
 0x98e   :  { %v13771_v24 = vpop.permute.xlu1 %5001  ;;  %v5080_v56 = vsel %vm1563_vm4, %v5079_v32, %v5075_v29  ;;  %v5106_v29 = vrot.slane %v13641_v61, %v11907_v25  ;;  %v5124_v61 = vrot.slane %v13757_v38, %v11907_v25 }
 0x98f   :  { %v13773_v35 = vpop.permute.xlu0 %5004  ;;  %v5167_v46 = vsel %vm1710_vm10, %v5080_v56, %v5166_v60  ;;  %v5138_v27 = vrot.slane %v13771_v24, %v11904_v51  ;;  %v5134_v24 = vsel %vm1563_vm4, %v5133_v52, %v5129_v20 }
 0x990   :  { %v5107_v57 = vsel %vm1563_vm4, %v5106_v29, %v5102_v54  ;;  %v5142_v1 = vrot.slane %v13773_v35, %v11907_v25  ;;  %v5125_v56 = vsel %vm1563_vm4, %v5124_v61, %v5120_v17 }
 0x992   :  { %v13775_v22 = vpop.permute.xlu1 %6412 }
 0x993   :  { %v13777_v53 = vpop.permute.xlu0 %6415 }
 0x996   :  { %v13781_v10 = vpop.permute.xlu1 %6448 }
 0x997   :  { %v13785_v16 = vpop.permute.xlu0 %6451 }
 0x99a   :  { %v13804_v30 = vpop.permute.xlu1 %6454 }
 0x99b   :  { %v13809_v41 = vpop.permute.xlu0 %6457 }
 0x99e   :  { %v4966_v31 = vpop.permute.xlu1 %4965 }
 0x99f   :  { %v5084_v42 = vrot.slane %v4966_v31, %v11904_v51  ;;  %v4969_v23 = vpop.permute.xlu0 %4968 }
 0x9a0   :  { %v5088_v5 = vrot.slane %v4969_v23, %v11907_v25  ;;  %v5143_v23 = vsel %vm1563_vm4, %v5142_v1, %v5138_v27  ;;  %v6507_v27 = vrot.slane %v13767_v50, %v11904_v51  ;;  %v6511_v1 = vrot.slane %v13769_v14, %v11907_v25 }
 0x9a2   :  { %v5008_v11 = vpop.permute.xlu1 %5007  ;;  %v5089_v26 = vsel %vm1563_vm4, %v5088_v5, %v5084_v42  ;;  %v5169_v42 = vsel %vm1700_vm5, %v5107_v57, %v5098_v2 }
 0x9a3   :  { %v5011_v49 = vpop.permute.xlu0 %5010  ;;  %v5168_v8 = vsel %vm1712_vm11, %v5089_v26, %v5167_v46  ;;  %v5147_v38 = vrot.slane %v5008_v11, %v11904_v51  ;;  %v5170_v35 = vsel %vm1702_vm6, %v5116_v62, %v5169_v42  ;;  %v6502_v42 = vrot.slane %v13765_v45, %v11907_v25 }
 0x9a4   :  { %v5178_v15 = vsel %vm1723_vm12, %v5168_v8, 0.0  ;;  %v5151_v40 = vrot.slane %v5011_v49, %v11907_v25  ;;  %v5171_v5 = vsel %vm1704_vm7, %v5125_v56, %v5170_v35  ;;  %v6498_v56 = vrot.slane %v13763_v36, %v11904_v51 }
 0x9a5   :  { %5179 = vadd.xlane.f32.xlu0 %v5178_v15  ;;  %v5172_v46 = vsel %vm1706_vm8, %v5134_v24, %v5171_v5  ;;  %v6512_v35 = vsel %vm1563_vm4, %v6511_v1, %v6507_v27  ;;  %v16883_v1 = vld [vmem:[#allocation160_spill] sm:$0xff] }
 0x9a6   :  { %v13831_v32 = vpop.permute.xlu1 %6418  ;;  %v5152_v60 = vsel %vm1563_vm4, %v5151_v40, %v5147_v38  ;;  %v5173_v8 = vsel %vm1708_vm9, %v5143_v23, %v5172_v46  ;;  %v6516_v38 = vrot.slane %v13775_v22, %v11904_v51  ;;  %v6520_v40 = vrot.slane %v13777_v53, %v11907_v25 }
 0x9a7   :  { %v13837_v55 = vpop.permute.xlu0 %6421  ;;  %v5174_v29 = vsel %vm1710_vm10, %v5152_v60, %v5173_v8  ;;  %v6525_v50 = vrot.slane %v13831_v32, %v11904_v51 }
 0x9a8   :  { %v6529_v14 = vrot.slane %v13837_v55, %v11907_v25  ;;  %v6521_v45 = vsel %vm1563_vm4, %v6520_v40, %v6516_v38  ;;  %v6503_v55 = vsel %vm1563_vm4, %v6502_v42, %v6498_v56 }
 0x9aa   :  { %v13856_v31 = vpop.permute.xlu1 %6460  ;;  %v6530_v60 = vsel %vm1563_vm4, %v6529_v14, %v6525_v50 }
 0x9ab   :  { %v13861_v9 = vpop.permute.xlu0 %6463 }
 0x9ae   :  { %v5014_v0 = vpop.permute.xlu1 %5013 }
 0x9af   :  { %v5156_v11 = vrot.slane %v5014_v0, %v11904_v51  ;;  %v5017_v26 = vpop.permute.xlu0 %5016 }
 0x9b0   :  { %v5160_v49 = vrot.slane %v5017_v26, %v11907_v25 }
 0x9b2   :  { %v6425_v15 = vpop.permute.xlu1 %6424  ;;  %v5161_v54 = vsel %vm1563_vm4, %v5160_v49, %v5156_v11  ;;  %v6639_v11 = vsel %vm1700_vm5, %v6512_v35, %v6503_v55  ;;  %v16886_v55 = vld [vmem:[#allocation178_spill] sm:$0xff] }
 0x9b3   :  { %v6428_v12 = vpop.permute.xlu0 %6427  ;;  %v5175_v21 = vsel %vm1712_vm11, %v5161_v54, %v5174_v29  ;;  %v6534_v24 = vrot.slane %v6425_v15, %v11904_v51  ;;  %v6640_v46 = vsel %vm1702_vm6, %v6521_v45, %v6639_v11  ;;  %v16885_v45 = vld [vmem:[#allocation134_spill] sm:$0xff]  ;;  %v16887_v11 = vld [vmem:[#allocation172_spill] sm:$0xff] }
 0x9b4   :  { %v5181_v37 = vsel %vm1723_vm12, %v5175_v21, 0.0  ;;  %v6538_v22 = vrot.slane %v6428_v12, %v11907_v25  ;;  %v6641_v15 = vsel %vm1704_vm7, %v6530_v60, %v6640_v46 }
 0x9b5   :  { %5182 = vadd.xlane.f32.xlu0 %v5181_v37 }
 0x9b6   :  { %v13879_v19 = vpop.permute.xlu1 %6466  ;;  %v6539_v26 = vsel %vm1563_vm4, %v6538_v22, %v6534_v24 }
 0x9b7   :  { %v13881_v17 = vpop.permute.xlu0 %6469  ;;  %v6642_v21 = vsel %vm1706_vm8, %v6539_v26, %v6641_v15 }
 0x9ba   :  { %v6431_v61 = vpop.permute.xlu1 %6430 }
 0x9bb   :  { %v6434_v20 = vpop.permute.xlu0 %6433  ;;  %v6543_v53 = vrot.slane %v6431_v61, %v11904_v51 }
 0x9bc   :  { %v6547_v23 = vrot.slane %v6434_v20, %v11907_v25 }
 0x9be   :  { %v13883_v52 = vpop.permute.xlu1 %6472  ;;  %v6548_v49 = vsel %vm1563_vm4, %v6547_v23, %v6543_v53 }
 0x9bf   :  { %v13885_v57 = vpop.permute.xlu0 %6475  ;;  %v6643_v61 = vsel %vm1708_vm9, %v6548_v49, %v6642_v21 }
 0x9c2   :  { %v6437_v62 = vpop.permute.xlu1 %6436 }
 0x9c3   :  { %v6440_v2 = vpop.permute.xlu0 %6439  ;;  %v6552_v0 = vrot.slane %v6437_v62, %v11904_v51  ;;  %v6299_v62 = vsub.f32 %v16883_v1, %v13587_v43 }
 0x9c4   :  { %v6556_v32 = vrot.slane %v6440_v2, %v11907_v25  ;;  %v16884_v2 = vld [vmem:[#allocation120_spill] sm:$0xff] }
 0x9c5   :  { %v6301_v56 = vsub.f32 %v16884_v2, %v13599_v4  ;;  %v6359_v42 = vmul.f32 1.442695, %v6299_v62 }
 0x9c6   :  { %v13908_v36 = vpop.permute.xlu1 %6478  ;;  %v6557_v54 = vsel %vm1563_vm4, %v6556_v32, %v6552_v0 }
 0x9c7   :  { %v13913_v5 = vpop.permute.xlu0 %6481  ;;  %v6644_v27 = vsel %vm1710_vm10, %v6557_v54, %v6643_v61  ;;  %9748 = vpow2.f32 %v6359_v42  ;;  %v6363_v50 = vmul.f32 1.442695, %v6301_v56  ;;  %v16893_v56 = vld [vmem:[#allocation174_spill] sm:$0xff] }
 0x9c9   :  { %9750 = vpow2.f32 %v6363_v50 }
 0x9ca   :  { %v6443_v8 = vpop.permute.xlu1 %6442 }
 0x9cb   :  { %v6561_v29 = vrot.slane %v6443_v8, %v11904_v51  ;;  %v6446_v12 = vpop.permute.xlu0 %6445  ;;  %v16888_v8 = vld [vmem:[#allocation170_spill] sm:$0xff] }
 0x9cc   :  { %v6565_v37 = vrot.slane %v6446_v12, %v11907_v25 }
 0x9ce   :  { %v6566_v20 = vsel %vm1563_vm4, %v6565_v37, %v6561_v29  ;;  %v16889_v29 = vld [vmem:[#allocation181_spill] sm:$0xff] }
 0x9cf   :  { %v6645_v38 = vsel %vm1712_vm11, %v6566_v20, %v6644_v27  ;;  %v13941_v43 = vpop.permute.xlu0 %6487  ;;  %v16890_v37 = vld [vmem:[#allocation185_spill] sm:$0xff] }
 0x9d0   :  { %v6655_v40 = vsel %vm1723_vm12, %v6645_v38, 0.0  ;;  %v16891_v27 = vld [vmem:[#allocation173_spill] sm:$0xff]  ;;  %v16892_v38 = vld [vmem:[#allocation183_spill] sm:$0xff] }
 0x9d1   :  { %6656 = vadd.xlane.f32.xlu1 %v6655_v40  ;;  %v13935_v14 = vpop.eup %9748 }
 0x9d3   :  { %v13938_v24 = vpop.eup %9750  ;;  %v13943_v35 = vpop.permute.xlu0 %6493 }
 0x9e2   :  { %6484 = vperm.xlu1 %9474, %v13935_v14  }
 0x9e6   :  { %6490 = vperm.xlu1 %9474, %v13938_v24  }
 0x9fc   :  { %v3701_v22 = vpop.xlane.xlu1 %3700 }
 0x9fd   :  { %9752 = vrcp.f32 %v3701_v22  ;;  %v16894_v22 = vld [vmem:[#allocation187_spill] sm:$0xff] }
 0xa00   :  { %v3704_v53 = vpop.xlane.xlu0 %3703 }
 0xa01   :  { %9754 = vrcp.f32 %v3704_v53 }
 0xa07   :  { %v13945_v4 = vpop.eup %9752 }
 0xa08   :  { %v13949_v23 = vrot.slane %v13945_v4, %v16413_v18  ;;  %v3716_v32 = vrot.slane %v13945_v4, %v16414_v63  ;;  %v13959_v46 = vrot.slane %v13945_v4, %v16417_v47  ;;  %v13979_v20 = vrot.slane %v13945_v4, %v16420_v13 }
 0xa09   :  { %v13991_v2 = vrot.slane %v13945_v4, %v16750_v6 }
 0xa0a   :  { %v3789_v0 = vmul.f32 %v16885_v45, %v13949_v23  ;;  %v3791_v60 = vmul.f32 %v16886_v55, %v3716_v32  ;;  %v3792_v26 = vmul.f32 %v16887_v11, %v3716_v32  ;;  %v3793_v15 = vmul.f32 %v16888_v8, %v13959_v46  ;;  %v16895_v32 = vld [vmem:[#allocation177_spill] sm:$0xff]  ;;  %v16896_v11 = vld [vmem:[#allocation207_spill] sm:$0xff] }
 0xa0b   :  { %v13961_v49 = vpop.eup %9754  ;;  %v3795_v1 = vmul.f32 %v16891_v27, %v13979_v20  ;;  %v3797_v42 = vmul.f32 %v16893_v56, %v13991_v2  ;;  %v14003_v45 = vrot.slane %v13945_v4, %v16756_v28  ;;  %v16898_v27 = vld [vmem:[#allocation162_spill] sm:$0xff] }
 0xa0c   :  { %3854 = vperm.xlu1 %9474, %v3789_v0   ;;  %v13967_v54 = vrot.slane %v13961_v49, %v16413_v18  ;;  %v13973_v21 = vrot.slane %v13961_v49, %v16414_v63  ;;  %v13985_v62 = vrot.slane %v13961_v49, %v16417_v47  ;;  %v13997_v50 = vrot.slane %v13961_v49, %v16420_v13 }
 0xa0d   :  { %v3799_v55 = vmul.f32 %v16895_v32, %v14003_v45 }
 0xa0e   :  { %v3805_v12 = vmul.f32 %v16889_v29, %v13967_v54  ;;  %v3807_v61 = vmul.f32 %v16890_v37, %v13973_v21  ;;  %v3809_v40 = vmul.f32 %v16892_v38, %v13985_v62  ;;  %v3811_v53 = vmul.f32 %v16894_v22, %v13997_v50  ;;  %v16897_v29 = vld [vmem:[#allocation100_spill] sm:$0xff]  ;;  %v16900_v22 = vld [vmem:[#allocation209_spill] sm:$0xff] }
 0xa0f   :  { %v14029_v38 = vrot.slane %v13945_v4, %v16654_v59 }
 0xa10   :  { %3860 = vperm.xlu1 %9474, %v3791_v60   ;;  %v14009_v60 = vrot.slane %v13961_v49, %v16750_v6 }
 0xa14   :  { %3863 = vperm.xlu1 %9474, %v3792_v26   ;;  %v3813_v26 = vmul.f32 %v16896_v11, %v14009_v60 }
 0xa18   :  { %3866 = vperm.xlu1 %9474, %v3793_v15  }
 0xa1c   :  { %3902 = vperm.xlu1 %9474, %v3805_v12  }
 0xa20   :  { %3908 = vperm.xlu1 %9474, %v3807_v61  }
 0xa24   :  { %3872 = vperm.xlu1 %9474, %v3795_v1  }
 0xa28   :  { %3914 = vperm.xlu1 %9474, %v3809_v40   ;;  %v16899_v40 = vld [vmem:[#allocation175_spill] sm:$0xff] }
 0xa29   :  { %v3801_v56 = vmul.f32 %v16899_v40, %v14029_v38  ;;  %v6583_v40 = vrot.slane %v13809_v41, %v11907_v25 }
 0xa2c   :  { %3878 = vperm.xlu1 %9474, %v3797_v42   ;;  %v14035_v42 = vrot.slane %v13961_v49, %v16756_v28 }
 0xa30   :  { %3920 = vperm.xlu1 %9474, %v3811_v53   ;;  %v3815_v53 = vmul.f32 %v16900_v22, %v14035_v42  ;;  %v14071_v22 = vrot.slane %v13961_v49, %v16654_v59 }
 0xa32   :  { %v5180_v0 = vpop.xlane.xlu0 %5179 }
 0xa33   :  { %9756 = vrcp.f32 %v5180_v0 }
 0xa34   :  { %3884 = vperm.xlu1 %9474, %v3799_v55   ;;  %v16901_v55 = vld [vmem:[#allocation202_spill] sm:$0xff] }
 0xa38   :  { %3926 = vperm.xlu1 %9474, %v3813_v26  }
 0xa3d   :  { %v14013_v8 = vpop.eup %9756 }
 0xa3e   :  { %v14017_v15 = vrot.slane %v14013_v8, %v16413_v18  ;;  %v14023_v37 = vrot.slane %v14013_v8, %v16414_v63  ;;  %v14041_v0 = vrot.slane %v14013_v8, %v16417_v47 }
 0xa40   :  { %v5268_v12 = vmul.f32 %v16897_v29, %v14017_v15  ;;  %v5270_v1 = vmul.f32 %v16898_v27, %v14023_v37  ;;  %v5272_v11 = vmul.f32 %v16901_v55, %v14041_v0  ;;  %v14061_v27 = vrot.slane %v13945_v4, %v16745_v58 }
 0xa41   :  { %v6574_v4 = vrot.slane %v13785_v16, %v11907_v25  ;;  %v6610_v16 = vrot.slane %v13885_v57, %v11907_v25 }
 0xa42   :  { %5333 = vperm.xlu1 %9474, %v5268_v12   ;;  %v5183_v61 = vpop.xlane.xlu0 %5182 }
 0xa43   :  { %9758 = vrcp.f32 %v5183_v61 }
 0xa46   :  { %5339 = vperm.xlu1 %9474, %v5270_v1   ;;  %v6579_v1 = vrot.slane %v13804_v30, %v11904_v51  ;;  %v6592_v30 = vrot.slane %v13861_v9, %v11907_v25  ;;  %v14094_v9 = vrot.slane %v14013_v8, %v16420_v13 }
 0xa48   :  { %v6584_v55 = vsel %vm1563_vm4, %v6583_v40, %v6579_v1 }
 0xa4a   :  { %3890 = vperm.xlu1 %9474, %v3801_v56  }
 0xa4d   :  { %v14043_v32 = vpop.eup %9758 }
 0xa4e   :  { %3932 = vperm.xlu1 %9474, %v3815_v53   ;;  %v14049_v26 = vrot.slane %v14043_v32, %v16413_v18  ;;  %v14055_v12 = vrot.slane %v14043_v32, %v16414_v63  ;;  %v6588_v53 = vrot.slane %v13856_v31, %v11904_v51  ;;  %v3817_v31 = vmul.f32 %v13355_v34, %v14071_v22 }
 0xa50   :  { %v5284_v29 = vmul.f32 %v13335_v39, %v14049_v26  ;;  %v5286_v61 = vmul.f32 %v13345_v3, %v14055_v12  ;;  %v16902_v39 = vld [vmem:[#allocation179_spill] sm:$0xff]  ;;  %v6570_v3 = vrot.slane %v13781_v10, %v11904_v51  ;;  %v6606_v10 = vrot.slane %v13883_v52, %v11904_v51 }
 0xa51   :  { %v3803_v56 = vmul.f32 %v16902_v39, %v14061_v27  ;;  %v6593_v52 = vsel %vm1563_vm4, %v6592_v30, %v6588_v53 }
 0xa52   :  { %5345 = vperm.xlu1 %9474, %v5272_v11   ;;  %v6597_v11 = vrot.slane %v13879_v19, %v11904_v51  ;;  %v6619_v19 = vrot.slane %v13913_v5, %v11907_v25  ;;  %v6611_v39 = vsel %vm1563_vm4, %v6610_v16, %v6606_v10  ;;  %v5274_v5 = vmul.f32 %v13365_v33, %v14094_v9 }
 0xa53   :  { %v14127_v16 = vrot.slane %v13961_v49, %v16745_v58 }
 0xa56   :  { %5381 = vperm.xlu1 %9474, %v5284_v29   ;;  %v6601_v29 = vrot.slane %v13881_v17, %v11907_v25  ;;  %v6575_v17 = vsel %vm1563_vm4, %v6574_v4, %v6570_v3 }
 0xa57   :  { %v6646_v57 = vsel %vm1700_vm5, %v6584_v55, %v6575_v17  ;;  %v3819_v17 = vmul.f32 %v13383_v7, %v14127_v16  ;;  %v14149_v7 = vrot.slane %v14013_v8, %v16756_v28 }
 0xa58   :  { %v6602_v34 = vsel %vm1563_vm4, %v6601_v29, %v6597_v11  ;;  %v6647_v3 = vsel %vm1702_vm6, %v6593_v52, %v6646_v57  ;;  %v14143_v52 = vrot.slane %v14043_v32, %v16420_v13 }
 0xa59   :  { %v6648_v53 = vsel %vm1704_vm7, %v6602_v34, %v6647_v3  ;;  %v16904_v34 = vld [vmem:[#allocation142_spill] sm:$0xff]  ;;  %v16906_v3 = vld [vmem:[#allocation104_spill] sm:$0xff] }
 0xa5a   :  { %5387 = vperm.xlu1 %9474, %v5286_v61   ;;  %v6615_v61 = vrot.slane %v13908_v36, %v11904_v51  ;;  %v6628_v36 = vrot.slane %v13941_v43, %v11907_v25  ;;  %v6649_v11 = vsel %vm1706_vm8, %v6611_v39, %v6648_v53  ;;  %v6637_v43 = vrot.slane %v13943_v35, %v11907_v25  ;;  %v16905_v39 = vld [vmem:[#allocation146_spill] sm:$0xff]  ;;  %v16907_v53 = vld [vmem:[#allocation119_spill] sm:$0xff] }
 0xa5c   :  { %v6620_v4 = vsel %vm1563_vm4, %v6619_v19, %v6615_v61 }
 0xa5d   :  { %v6650_v10 = vsel %vm1708_vm9, %v6620_v4, %v6649_v11  ;;  %v3790_v4 = vmul.f32 %v16906_v3, %v13949_v23  ;;  %v16908_v11 = vld [vmem:[#allocation91_spill] sm:$0xff]  ;;  %v16910_v23 = vld [vmem:[#allocation148_spill] sm:$0xff] }
 0xa5e   :  { %v6657_v41 = vpop.xlane.xlu1 %6656  ;;  %3896 = vperm.xlu1 %9474, %v3803_v56   ;;  %v14112_v56 = vrot.slane %v14043_v32, %v16417_v47  ;;  %v16917_v3 = vld [vmem:[#allocation140_spill] sm:$0xff] }
 0xa5f   :  { %9760 = vrcp.f32 %v6657_v41  ;;  %v14155_v41 = vrot.slane %v14043_v32, %v16750_v6 }
 0xa60   :  { %v5288_v29 = vmul.f32 %v13375_v48, %v14112_v56  ;;  %v14137_v48 = vrot.slane %v14013_v8, %v16750_v6 }
 0xa62   :  { %v6485_v1 = vpop.permute.xlu1 %6484  ;;  %3938 = vperm.xlu1 %9474, %v3817_v31   ;;  %v5276_v49 = vmul.f32 %v13389_v44, %v14137_v48 }
 0xa63   :  { %v6624_v40 = vrot.slane %v6485_v1, %v11904_v51  ;;  %v16903_v1 = vld [vmem:[#allocation87_spill] sm:$0xff] }
 0xa64   :  { %v5290_v57 = vmul.f32 %v16903_v1, %v14143_v52 }
 0xa65   :  { %v6629_v30 = vsel %vm1563_vm4, %v6628_v36, %v6624_v40  ;;  %v5278_v40 = vmul.f32 %v16904_v34, %v14149_v7  ;;  %v5292_v36 = vmul.f32 %v16905_v39, %v14155_v41 }
 0xa66   :  { %v6491_v55 = vpop.permute.xlu1 %6490  ;;  %5351 = vperm.xlu1 %9474, %v5274_v5   ;;  %v6651_v61 = vsel %vm1710_vm10, %v6629_v30, %v6650_v10  ;;  %v14179_v10 = vrot.slane %v14013_v8, %v16654_v59 }
 0xa67   :  { %v6633_v33 = vrot.slane %v6491_v55, %v11904_v51 }
 0xa69   :  { %v6638_v31 = vsel %vm1563_vm4, %v6637_v43, %v6633_v33  ;;  %v14157_v44 = vpop.eup %9760  ;;  %v3794_v43 = vmul.f32 %v16908_v11, %v13959_v46  ;;  %v16909_v33 = vld [vmem:[#allocation201_spill] sm:$0xff]  ;;  %v16912_v46 = vld [vmem:[#allocation151_spill] sm:$0xff] }
 0xa6a   :  { %5393 = vperm.xlu1 %9474, %v5288_v29   ;;  %v6652_v19 = vsel %vm1712_vm11, %v6638_v31, %v6651_v61  ;;  %v14163_v5 = vrot.slane %v14157_v44, %v16413_v18  ;;  %v14171_v55 = vrot.slane %v14157_v44, %v16414_v63  ;;  %v3806_v31 = vmul.f32 %v16910_v23, %v13967_v54  ;;  %v16911_v61 = vld [vmem:[#allocation110_spill] sm:$0xff]  ;;  %v16914_v54 = vld [vmem:[#allocation137_spill] sm:$0xff] }
 0xa6b   :  { %v6658_v35 = vsel %vm1723_vm12, %v6652_v19, 0.0  ;;  %v5280_v19 = vmul.f32 %v16911_v61, %v14179_v10  ;;  %v3796_v34 = vmul.f32 %v16914_v54, %v13979_v20  ;;  %v16919_v11 = vld [vmem:[#allocation141_spill] sm:$0xff]  ;;  %v16922_v23 = vld [vmem:[#allocation150_spill] sm:$0xff]  ;;  %v16924_v61 = vld [vmem:[#allocation208_spill] sm:$0xff] }
 0xa6c   :  { %6659 = vadd.xlane.f32.xlu0 %v6658_v35  ;;  %v6745_v30 = vmul.f32 %v16907_v53, %v14163_v5  ;;  %v6747_v29 = vmul.f32 %v16909_v33, %v14171_v55  ;;  %v14187_v35 = vrot.slane %v14043_v32, %v16756_v28  ;;  %v16918_v53 = vld [vmem:[#allocation154_spill] sm:$0xff]  ;;  %v3800_v20 = vmul.f32 %v16919_v11, %v14003_v45 }
 0xa6d   :  { %v3816_v45 = vmul.f32 %v16924_v61, %v14035_v42  ;;  %v16929_v42 = vld [vmem:[#allocation81_spill] sm:$0xff] }
 0xa6e   :  { %3944 = vperm.xlu1 %9474, %v3819_v17   ;;  %v3808_v17 = vmul.f32 %v16912_v46, %v13973_v21  ;;  %v16926_v46 = vld [vmem:[#allocation133_spill] sm:$0xff]  ;;  %v3818_v54 = vmul.f32 %v16929_v42, %v14071_v22  ;;  %v16933_v22 = vld [vmem:[#allocation92_spill] sm:$0xff]  ;;  %v16944_v42 = vld [vmem:[#allocation118_spill] sm:$0xff] }
 0xa72   :  { %5357 = vperm.xlu1 %9474, %v5276_v49   ;;  %v16913_v49 = vld [vmem:[#allocation136_spill] sm:$0xff] }
 0xa73   :  { %v5294_v1 = vmul.f32 %v16913_v49, %v14187_v35  ;;  %v16928_v49 = vld [vmem:[#allocation144_spill] sm:$0xff] }
 0xa76   :  { %5399 = vperm.xlu1 %9474, %v5290_v57   ;;  %v14195_v57 = vrot.slane %v14157_v44, %v16417_v47 }
 0xa7a   :  { %5363 = vperm.xlu1 %9474, %v5278_v40   ;;  %v16915_v40 = vld [vmem:[#allocation164_spill] sm:$0xff] }
 0xa7b   :  { %v6749_v39 = vmul.f32 %v16915_v40, %v14195_v57  ;;  %v16931_v40 = vld [vmem:[#allocation82_spill] sm:$0xff] }
 0xa7e   :  { %5405 = vperm.xlu1 %9474, %v5292_v36   ;;  %v16916_v36 = vld [vmem:[#allocation156_spill] sm:$0xff] }
 0xa7f   :  { %v3810_v21 = vmul.f32 %v16916_v36, %v13985_v62 }
 0xa82   :  { %3857 = vperm.xlu0 %9475, %v3790_v4   ;;  %6810 = vperm.xlu1 %9474, %v6745_v30   ;;  %v3798_v4 = vmul.f32 %v16917_v3, %v13991_v2  ;;  %v3812_v30 = vmul.f32 %v16918_v53, %v13997_v50  ;;  %v5271_v2 = vmul.f32 %v16922_v23, %v14023_v37 }
 0xa83   :  { %v5277_v3 = vmul.f32 %v16933_v22, %v14137_v48 }
 0xa86   :  { %3869 = vperm.xlu0 %9475, %v3794_v43   ;;  %6816 = vperm.xlu1 %9474, %v6747_v29   ;;  %v16920_v43 = vld [vmem:[#allocation158_spill] sm:$0xff]  ;;  %v16921_v29 = vld [vmem:[#allocation108_spill] sm:$0xff] }
 0xa87   :  { %v3814_v33 = vmul.f32 %v16920_v43, %v14009_v60  ;;  %v5269_v62 = vmul.f32 %v16921_v29, %v14017_v15  ;;  %v5285_v15 = vmul.f32 %v16926_v46, %v14049_v26  ;;  %v16937_v43 = vld [vmem:[#allocation122_spill] sm:$0xff]  ;;  %v16942_v46 = vld [vmem:[#allocation192_spill] sm:$0xff] }
 0xa88   :  { %v6746_v48 = vmul.f32 %v16937_v43, %v14163_v5  ;;  %v16941_v5 = vld [vmem:[#allocation3_spill] sm:$0xff] }
 0xa8a   :  { %3905 = vperm.xlu0 %9475, %v3806_v31   ;;  %5369 = vperm.xlu1 %9474, %v5280_v19   ;;  %v16923_v31 = vld [vmem:[#allocation145_spill] sm:$0xff] }
 0xa8b   :  { %v3802_v50 = vmul.f32 %v16923_v31, %v14029_v38  ;;  %v16925_v19 = vld [vmem:[#allocation205_spill] sm:$0xff]  ;;  %v3804_v38 = vmul.f32 %v16928_v49, %v14061_v27  ;;  %v16932_v27 = vld [vmem:[#allocation86_spill] sm:$0xff] }
 0xa8c   :  { %v5273_v60 = vmul.f32 %v16925_v19, %v14041_v0  ;;  %v3820_v36 = vmul.f32 %v16932_v27, %v14127_v16  ;;  %v16936_v16 = vld [vmem:[#allocation117_spill] sm:$0xff] }
 0xa8e   :  { %3911 = vperm.xlu0 %9475, %v3808_v17   ;;  %5411 = vperm.xlu1 %9474, %v5294_v1   ;;  %v16927_v17 = vld [vmem:[#allocation80_spill] sm:$0xff]  ;;  %v14227_v1 = vpop.permute.xlu1 %3854 }
 0xa8f   :  { %v5287_v37 = vmul.f32 %v16927_v17, %v14055_v12  ;;  %v5289_v12 = vmul.f32 %v16931_v40, %v14112_v56  ;;  %v16935_v56 = vld [vmem:[#allocation95_spill] sm:$0xff]  ;;  %v16943_v17 = vld [vmem:[#allocation166_spill] sm:$0xff]  ;;  %v5219_v40 = vrot.slane %v14013_v8, %v16745_v58  ;;  %v16948_v8 = vld [vmem:[#allocation193_spill] sm:$0xff] }
 0xa92   :  { %3875 = vperm.xlu0 %9475, %v3796_v34   ;;  %6822 = vperm.xlu1 %9474, %v6749_v39   ;;  %v14231_v0 = vpop.permute.xlu1 %3860  ;;  %v16930_v34 = vld [vmem:[#allocation83_spill] sm:$0xff] }
 0xa93   :  { %v5275_v26 = vmul.f32 %v16930_v34, %v14094_v9  ;;  %v16945_v34 = vld [vmem:[#allocation115_spill] sm:$0xff] }
 0xa96   :  { %3917 = vperm.xlu0 %9475, %v3810_v21   ;;  %v14237_v39 = vpop.permute.xlu1 %3863 }
 0xa9a   :  { %3881 = vperm.xlu0 %9475, %v3798_v4   ;;  %v14241_v21 = vpop.permute.xlu1 %3866  ;;  %v16934_v4 = vld [vmem:[#allocation94_spill] sm:$0xff] }
 0xa9b   :  { %v5291_v9 = vmul.f32 %v16934_v4, %v14143_v52  ;;  %v16938_v52 = vld [vmem:[#allocation204_spill] sm:$0xff] }
 0xa9c   :  { %v6748_v29 = vmul.f32 %v16938_v52, %v14171_v55 }
 0xa9e   :  { %3923 = vperm.xlu0 %9475, %v3812_v30   ;;  %v14247_v53 = vpop.permute.xlu1 %3902  ;;  %v5279_v30 = vmul.f32 %v16935_v56, %v14149_v7  ;;  %v16939_v7 = vld [vmem:[#allocation153_spill] sm:$0xff] }
 0xa9f   :  { %v5281_v23 = vmul.f32 %v16939_v7, %v14179_v10 }
 0xaa2   :  { %3887 = vperm.xlu0 %9475, %v3800_v20   ;;  %v14251_v11 = vpop.permute.xlu1 %3908  ;;  %v5293_v20 = vmul.f32 %v16936_v16, %v14155_v41 }
 0xaa6   :  { %3929 = vperm.xlu0 %9475, %v3814_v33   ;;  %v14257_v33 = vpop.permute.xlu1 %3872 }
 0xaaa   :  { %5336 = vperm.xlu0 %9475, %v5269_v62   ;;  %v14261_v62 = vpop.permute.xlu1 %3914 }
 0xaae   :  { %5342 = vperm.xlu0 %9475, %v5271_v2   ;;  %v16940_v2 = vld [vmem:[#allocation155_spill] sm:$0xff]  ;;  %v14267_v31 = vpop.permute.xlu1 %3878 }
 0xaaf   :  { %v5295_v41 = vmul.f32 %v16940_v2, %v14187_v35 }
 0xab2   :  { %3893 = vperm.xlu0 %9475, %v3802_v50   ;;  %v6750_v50 = vmul.f32 %v16941_v5, %v14195_v57  ;;  %v14271_v55 = vpop.permute.xlu1 %3920 }
 0xab6   :  { %3935 = vperm.xlu0 %9475, %v3816_v45   ;;  %v14275_v19 = vpop.permute.xlu1 %3884 }
 0xaba   :  { %5348 = vperm.xlu0 %9475, %v5273_v60   ;;  %v14287_v49 = vpop.permute.xlu1 %3926 }
 0xabe   :  { %5384 = vperm.xlu0 %9475, %v5285_v15  }
 0xac2   :  { %5390 = vperm.xlu0 %9475, %v5287_v37  }
 0xac6   :  { %3899 = vperm.xlu0 %9475, %v3804_v38  }
 0xaca   :  { %3941 = vperm.xlu0 %9475, %v3818_v54  }
 0xace   :  { %5354 = vperm.xlu0 %9475, %v5275_v26  }
 0xad2   :  { %5396 = vperm.xlu0 %9475, %v5289_v12   ;;  %v14295_v12 = vpop.permute.xlu1 %5333 }
 0xad6   :  { %3947 = vperm.xlu0 %9475, %v3820_v36   ;;  %v16946_v36 = vld [vmem:[#allocation206_spill] sm:$0xff] }
 0xad7   :  { %v5283_v22 = vmul.f32 %v16946_v36, %v5219_v40 }
 0xada   :  { %5360 = vperm.xlu0 %9475, %v5277_v3   ;;  %v16947_v3 = vld [vmem:[#allocation203_spill] sm:$0xff] }
 0xadb   :  { %v5282_v4 = vmul.f32 %v16947_v3, %v5219_v40  ;;  %v6684_v40 = vrot.slane %v14157_v44, %v16750_v6 }
 0xade   :  { %5402 = vperm.xlu0 %9475, %v5291_v9   ;;  %v5247_v9 = vrot.slane %v14043_v32, %v16654_v59 }
 0xae0   :  { %v5297_v16 = vmul.f32 %v16948_v8, %v5247_v9 }
 0xae2   :  { %5366 = vperm.xlu0 %9475, %v5279_v30   ;;  %v14305_v30 = vpop.permute.xlu1 %5339 }
 0xae6   :  { %5408 = vperm.xlu0 %9475, %v5293_v20   ;;  %v16949_v20 = vld [vmem:[#allocation132_spill] sm:$0xff]  ;;  %v14317_v5 = vpop.permute.xlu1 %3890 }
 0xae7   :  { %v5296_v43 = vmul.f32 %v16949_v20, %v5247_v9  ;;  %v16958_v20 = vld [vmem:[#allocation126_spill] sm:$0xff] }
 0xaea   :  { %6813 = vperm.xlu0 %9475, %v6746_v48   ;;  %v6680_v48 = vrot.slane %v14157_v44, %v16420_v13 }
 0xaee   :  { %6819 = vperm.xlu0 %9475, %v6748_v29   ;;  %v16950_v29 = vld [vmem:[#allocation101_spill] sm:$0xff] }
 0xaef   :  { %v6752_v7 = vmul.f32 %v16950_v29, %v6680_v48 }
 0xaf2   :  { %5372 = vperm.xlu0 %9475, %v5281_v23   ;;  %v16951_v23 = vld [vmem:[#allocation194_spill] sm:$0xff] }
 0xaf3   :  { %v6751_v2 = vmul.f32 %v16951_v23, %v6680_v48  ;;  %v16959_v48 = vld [vmem:[#allocation197_spill] sm:$0xff] }
 0xaf6   :  { %5414 = vperm.xlu0 %9475, %v5295_v41  }
 0xaf9   :  { %v6660_v61 = vpop.xlane.xlu0 %6659 }
 0xafa   :  { %9762 = vrcp.f32 %v6660_v61  ;;  %6825 = vperm.xlu0 %9475, %v6750_v50   ;;  %v16952_v61 = vld [vmem:[#allocation139_spill] sm:$0xff] }
 0xb01   :  { %v14273_v45 = vpop.permute.xlu0 %3857 }
 0xb04   :  { %v14277_v10 = vpop.eup %9762 }
 0xb05   :  { %v14279_v60 = vpop.permute.xlu0 %3869  ;;  %v6700_v35 = vrot.slane %v14277_v10, %v16413_v18  ;;  %v6704_v37 = vrot.slane %v14277_v10, %v16414_v63  ;;  %v6708_v41 = vrot.slane %v14277_v10, %v16417_v47  ;;  %v6712_v9 = vrot.slane %v14277_v10, %v16420_v13 }
 0xb07   :  { %v6762_v15 = vmul.f32 %v16942_v46, %v6700_v35  ;;  %v6761_v57 = vmul.f32 %v16943_v17, %v6700_v35  ;;  %v6764_v54 = vmul.f32 %v16944_v42, %v6704_v37  ;;  %v6763_v26 = vmul.f32 %v16945_v34, %v6704_v37  ;;  %v16953_v46 = vld [vmem:[#allocation123_spill] sm:$0xff]  ;;  %v14327_v37 = vpop.permute.xlu1 %3932  ;;  %v16955_v34 = vld [vmem:[#allocation196_spill] sm:$0xff] }
 0xb08   :  { %v6766_v35 = vmul.f32 %v16952_v61, %v6708_v41  ;;  %v5251_v17 = vrot.slane %v14043_v32, %v16745_v58  ;;  %v16954_v42 = vld [vmem:[#allocation199_spill] sm:$0xff]  ;;  %v16957_v32 = vld [vmem:[#allocation161_spill] sm:$0xff]  ;;  %v6767_v29 = vmul.f32 %v16959_v48, %v6712_v9 }
 0xb09   :  { %6861 = vperm.xlu0 %9475, %v6762_v15   ;;  %6858 = vperm.xlu1 %9474, %v6761_v57   ;;  %v14289_v38 = vpop.permute.xlu0 %3905  ;;  %v6765_v15 = vmul.f32 %v16953_v46, %v6708_v41  ;;  %v16960_v41 = vld [vmem:[#allocation198_spill] sm:$0xff] }
 0xb0a   :  { %v16961_v46 = vld [vmem:[#allocation46_spill] sm:$0xff] }
 0xb0b   :  { %v14339_v8 = vpop.permute.xlu1 %5345 }
 0xb0d   :  { %6867 = vperm.xlu0 %9475, %v6764_v54   ;;  %6864 = vperm.xlu1 %9474, %v6763_v26   ;;  %v14297_v27 = vpop.permute.xlu0 %3911  ;;  %v5299_v54 = vmul.f32 %v16954_v42, %v5251_v17  ;;  %v5298_v26 = vmul.f32 %v16955_v34, %v5251_v17  ;;  %v16962_v17 = vld [vmem:[#allocation165_spill] sm:$0xff] }
 0xb11   :  { %5378 = vperm.xlu0 %9475, %v5283_v22   ;;  %5375 = vperm.xlu1 %9474, %v5282_v4   ;;  %v14303_v56 = vpop.permute.xlu0 %3875  ;;  %v16956_v22 = vld [vmem:[#allocation188_spill] sm:$0xff]  ;;  %v6753_v4 = vmul.f32 %v16957_v32, %v6684_v40 }
 0xb12   :  { %v6754_v3 = vmul.f32 %v16956_v22, %v6684_v40 }
 0xb15   :  { %5420 = vperm.xlu0 %9475, %v5297_v16   ;;  %5417 = vperm.xlu1 %9474, %v5296_v43   ;;  %v14311_v52 = vpop.permute.xlu0 %3917  ;;  %v6768_v43 = vmul.f32 %v16958_v20, %v6712_v9  ;;  %v6720_v20 = vrot.slane %v14277_v10, %v16756_v28 }
 0xb19   :  { %6831 = vperm.xlu0 %9475, %v6752_v7   ;;  %6828 = vperm.xlu1 %9474, %v6751_v2   ;;  %v14319_v50 = vpop.permute.xlu0 %3881  ;;  %v6688_v7 = vrot.slane %v14157_v44, %v16756_v28  ;;  %v14349_v2 = vpop.permute.xlu1 %5381 }
 0xb1b   :  { %v6755_v61 = vmul.f32 %v16960_v41, %v6688_v7  ;;  %v16967_v41 = vld [vmem:[#allocation109_spill] sm:$0xff] }
 0xb1d   :  { %6873 = vperm.xlu0 %9475, %v6766_v35   ;;  %6870 = vperm.xlu1 %9474, %v6765_v15   ;;  %v14325_v57 = vpop.permute.xlu0 %3923  ;;  %v6716_v35 = vrot.slane %v14277_v10, %v16750_v6  ;;  %v14362_v40 = vpop.permute.xlu1 %5387 }
 0xb1f   :  { %v6769_v42 = vmul.f32 %v16962_v17, %v6716_v35  ;;  %v6696_v17 = vrot.slane %v14157_v44, %v16745_v58 }
 0xb21   :  { %5426 = vperm.xlu0 %9475, %v5299_v54   ;;  %5423 = vperm.xlu1 %9474, %v5298_v26   ;;  %v14333_v36 = vpop.permute.xlu0 %3887  ;;  %v16963_v54 = vld [vmem:[#allocation200_spill] sm:$0xff]  ;;  %v6692_v26 = vrot.slane %v14157_v44, %v16654_v59  ;;  %v3897_v48 = vpop.permute.xlu1 %3896 }
 0xb22   :  { %v6756_v34 = vmul.f32 %v16963_v54, %v6688_v7 }
 0xb25   :  { %6837 = vperm.xlu0 %9475, %v6754_v3   ;;  %6834 = vperm.xlu1 %9474, %v6753_v4   ;;  %v14341_v16 = vpop.permute.xlu0 %3929  ;;  %v16964_v3 = vld [vmem:[#allocation97_spill] sm:$0xff]  ;;  %v16965_v4 = vld [vmem:[#allocation190_spill] sm:$0xff] }
 0xb26   :  { %v6757_v32 = vmul.f32 %v16964_v3, %v6692_v26  ;;  %v6770_v9 = vmul.f32 %v16965_v4, %v6716_v35  ;;  %v16968_v35 = vld [vmem:[#allocation103_spill] sm:$0xff]  ;;  %v14380_v4 = vpop.permute.xlu1 %3938 }
 0xb27   :  { %v6759_v54 = vmul.f32 %v16968_v35, %v6696_v17 }
 0xb29   :  { %6879 = vperm.xlu0 %9475, %v6768_v43   ;;  %6876 = vperm.xlu1 %9474, %v6767_v29   ;;  %v14347_v23 = vpop.permute.xlu0 %5336  ;;  %v16966_v29 = vld [vmem:[#allocation143_spill] sm:$0xff] }
 0xb2a   :  { %v6771_v7 = vmul.f32 %v16966_v29, %v6720_v20  ;;  %v3952_v29 = vrot.slane %v14227_v1, %v11904_v51  ;;  %v3961_v1 = vrot.slane %v14231_v0, %v11904_v51 }
 0xb2d   :  { %6840 = vperm.xlu0 %9475, %v6755_v61   ;;  %9477 = vrot.lane.b32.xlu1 %v16961_v46, %s9835_s8  ;;  %v14356_v15 = vpop.permute.xlu0 %5342  ;;  %v6758_v61 = vmul.f32 %v16967_v41, %v6692_v26  ;;  %v3974_v26 = vrot.slane %v14279_v60, %v11907_v25  ;;  %v16970_v41 = vld [vmem:[#allocation129_spill] sm:$0xff]  ;;  %v3992_v60 = vrot.slane %v14319_v50, %v11907_v25 }
 0xb31   :  { %6882 = vperm.xlu0 %9475, %v6769_v42   ;;  %6843 = vperm.xlu1 %9474, %v6756_v34   ;;  %v3894_v22 = vpop.permute.xlu0 %3893  ;;  %v16969_v34 = vld [vmem:[#allocation176_spill] sm:$0xff] }
 0xb32   :  { %v6772_v3 = vmul.f32 %v16969_v34, %v6720_v20  ;;  %v3965_v20 = vrot.slane %v14237_v39, %v11907_v25  ;;  %v3979_v39 = vrot.slane %v14257_v33, %v11904_v51  ;;  %v3997_v33 = vrot.slane %v14275_v19, %v11904_v51 }
 0xb33   :  { %v4006_v34 = vrot.slane %v14317_v5, %v11904_v51 }
 0xb34   :  { %v3966_v0 = vsel %vm1563_vm4, %v3965_v20, %v3961_v1 }
 0xb35   :  { %6846 = vperm.xlu0 %9475, %v6757_v32   ;;  %6885 = vperm.xlu1 %9474, %v6770_v9   ;;  %v14368_v43 = vpop.permute.xlu0 %3935  ;;  %v6724_v32 = vrot.slane %v14277_v10, %v16654_v59  ;;  %v3956_v9 = vrot.slane %v14273_v45, %v11907_v25  ;;  %v3970_v45 = vrot.slane %v14241_v21, %v11904_v51 }
 0xb36   :  { %v3988_v21 = vrot.slane %v14267_v31, %v11904_v51 }
 0xb37   :  { %v6773_v35 = vmul.f32 %v13935_v14, %v6724_v32  ;;  %v3975_v50 = vsel %vm1563_vm4, %v3974_v26, %v3970_v45  ;;  %v4010_v14 = vrot.slane %v3894_v22, %v11907_v25  ;;  %v16971_v26 = vld [vmem:[#allocation121_spill] sm:$0xff] }
 0xb38   :  { %v3993_v22 = vsel %vm1563_vm4, %v3992_v60, %v3988_v21 }
 0xb39   :  { %6888 = vperm.xlu0 %9475, %v6771_v7   ;;  %6849 = vperm.xlu1 %9474, %v6758_v61   ;;  %v14374_v42 = vpop.permute.xlu0 %5348  ;;  %v3983_v7 = vrot.slane %v14303_v56, %v11907_v25  ;;  %v6760_v61 = vmul.f32 %v16970_v41, %v6696_v17  ;;  %v3957_v56 = vsel %vm1563_vm4, %v3956_v9, %v3952_v29 }
 0xb3a   :  { %v4001_v17 = vrot.slane %v14333_v36, %v11907_v25  ;;  %v14420_v36 = vpop.permute.xlu1 %5351  ;;  %v6774_v29 = vmul.f32 %v16971_v26, %v6724_v32  ;;  %v4011_v5 = vsel %vm1563_vm4, %v4010_v14, %v4006_v34 }
 0xb3b   :  { %v3984_v31 = vsel %vm1563_vm4, %v3983_v7, %v3979_v39  ;;  %v4015_v7 = vrot.slane %v3897_v48, %v11904_v51 }
 0xb3c   :  { %v4002_v41 = vsel %vm1563_vm4, %v4001_v17, %v3997_v33 }
 0xb3d   :  { %6852 = vperm.xlu0 %9475, %v6759_v54   ;;  %6891 = vperm.xlu1 %9474, %v6772_v3   ;;  %v14386_v44 = vpop.permute.xlu0 %5384  ;;  %v6728_v54 = vrot.slane %v14277_v10, %v16745_v58  ;;  %v4093_v3 = vsel %vm1700_vm5, %v3966_v0, %v3957_v56 }
 0xb3e   :  { %v4094_v20 = vsel %vm1702_vm6, %v3975_v50, %v4093_v3  ;;  %v14436_v1 = vpop.permute.xlu1 %5393 }
 0xb3f   :  { %v6775_v9 = vmul.f32 %v13938_v24, %v6728_v54  ;;  %v4095_v19 = vsel %vm1704_vm7, %v3984_v31, %v4094_v20  ;;  %v16972_v24 = vld [vmem:[#allocation157_spill] sm:$0xff] }
 0xb40   :  { %v4096_v45 = vsel %vm1706_vm8, %v3993_v22, %v4095_v19 }
 0xb41   :  { %6894 = vperm.xlu0 %9475, %v6773_v35   ;;  %6855 = vperm.xlu1 %9474, %v6760_v61   ;;  %v14413_v10 = vpop.permute.xlu0 %5390  ;;  %v6776_v35 = vmul.f32 %v16972_v24, %v6728_v54  ;;  %v4097_v32 = vsel %vm1708_vm9, %v4002_v41, %v4096_v45 }
 0xb42   :  { %v4098_v56 = vsel %vm1710_vm10, %v4011_v5, %v4097_v32  ;;  %v14450_v21 = vpop.permute.xlu1 %3944 }
 0xb45   :  { %6900 = vperm.xlu0 %9475, %v6775_v9   ;;  %6897 = vperm.xlu1 %9474, %v6774_v29   ;;  %v3900_v61 = vpop.permute.xlu0 %3899 }
 0xb46   :  { %v4019_v60 = vrot.slane %v3900_v61, %v11907_v25  ;;  %v14454_v14 = vpop.permute.xlu1 %5357 }
 0xb48   :  { %v4020_v39 = vsel %vm1563_vm4, %v4019_v60, %v4015_v7 }
 0xb49   :  { %9482 = vrot.lane.b32.xlu0 %v16961_v46, %s9836_s28  ;;  %6903 = vperm.xlu1 %9474, %v6776_v35   ;;  %v14442_v17 = vpop.permute.xlu0 %3941  ;;  %v4099_v48 = vsel %vm1712_vm11, %v4020_v39, %v4098_v56 }
 0xb4a   :  { %9320 = vmatprep.mubr.msk.f32.mxu1 %vm1723_vm12, %v4099_v48  ;;  %v14460_v34 = vpop.permute.xlu1 %5399 }
 0xb4d   :  { %9487 = vrot.lane.b32.xlu1 %v16961_v46, %s9837_s29  ;;  %v14448_v54 = vpop.permute.xlu0 %5354 }
 0xb4e   :  { %v14464_v3 = vpop.permute.xlu1 %5363 }
 0xb51   :  { %v14452_v50 = vpop.permute.xlu0 %5396 }
 0xb52   :  { %v14468_v46 = vpop.permute.xlu1 %5405 }
 0xb55   :  { %v14456_v0 = vpop.permute.xlu0 %3947 }
 0xb56   :  { %v14472_v26 = vpop.permute.xlu1 %6810 }
 0xb59   :  { %v14458_v33 = vpop.permute.xlu0 %5360 }
 0xb5a   :  { %v14476_v20 = vpop.permute.xlu1 %6816 }
 0xb5d   :  { %v14462_v31 = vpop.permute.xlu0 %5402 }
 0xb5e   :  { %v14480_v19 = vpop.permute.xlu1 %5369 }
 0xb61   :  { %v14466_v22 = vpop.permute.xlu0 %5366 }
 0xb62   :  { %v14484_v61 = vpop.permute.xlu1 %5411 }
 0xb65   :  { %v14470_v9 = vpop.permute.xlu0 %5408 }
 0xb66   :  { %v14488_v45 = vpop.permute.xlu1 %6822 }
 0xb69   :  { %v14474_v29 = vpop.permute.xlu0 %6813 }
 0xb6d   :  { %v14478_v41 = vpop.permute.xlu0 %6819 }
 0xb71   :  { %v14482_v5 = vpop.permute.xlu0 %5372 }
 0xb75   :  { %v14486_v7 = vpop.permute.xlu0 %5414 }
 0xb79   :  { %v14490_v60 = vpop.permute.xlu0 %6825 }
 0xb88   :  { %v14492_v24 = vpop.permute.xlu1 %6858  ;;  %v14494_v35 = vpop.permute.xlu0 %6861 }
 0xb89   :  { %16973 = vst [vmem:[#allocation102_spill] sm:$0xff] %v14492_v24  ;;  %16974 = vst [vmem:[#allocation125_spill] sm:$0xff] %v14494_v35  ;;  %v4037_v35 = vrot.slane %v14297_v27, %v11907_v25  ;;  %v4046_v24 = vrot.slane %v14311_v52, %v11907_v25  ;;  %v4051_v27 = vrot.slane %v14271_v55, %v11904_v51 }
 0xb8a   :  { %v4060_v52 = vrot.slane %v14287_v49, %v11904_v51  ;;  %v4078_v55 = vrot.slane %v14380_v4, %v11904_v51  ;;  %v4055_v49 = vrot.slane %v14325_v57, %v11907_v25  ;;  %v4087_v57 = vrot.slane %v14450_v21, %v11904_v51 }
 0xb8c   :  { %v14496_v32 = vpop.permute.xlu1 %6864  ;;  %v14498_v39 = vpop.permute.xlu0 %6867  ;;  %v4056_v21 = vsel %vm1563_vm4, %v4055_v49, %v4051_v27 }
 0xb90   :  { %v14500_v56 = vpop.permute.xlu1 %5375  ;;  %v14502_v48 = vpop.permute.xlu0 %5378 }
 0xb94   :  { %v14504_v58 = vpop.permute.xlu1 %5417  ;;  %v14506_v59 = vpop.permute.xlu0 %5420 }
 0xb95   :  { %16975 = vst [vmem:[#allocation131_spill] sm:$0xff] %v14506_v59  ;;  %v4024_v59 = vrot.slane %v14247_v53, %v11904_v51  ;;  %v5431_v53 = vrot.slane %v14295_v12, %v11904_v51  ;;  %v4064_v12 = vrot.slane %v14341_v16, %v11907_v25  ;;  %v5467_v16 = vrot.slane %v14454_v14, %v11904_v51 }
 0xb97   :  { %v4065_v14 = vsel %vm1563_vm4, %v4064_v12, %v4060_v52  ;;  %v4091_v52 = vrot.slane %v14456_v0, %v11907_v25 }
 0xb98   :  { %v14508_v28 = vpop.permute.xlu1 %6828  ;;  %v14510_v6 = vpop.permute.xlu0 %6831 }
 0xb99   :  { %16976 = vst [vmem:[#allocation96_spill] sm:$0xff] %v14510_v6  ;;  %v4033_v6 = vrot.slane %v14251_v11, %v11904_v51  ;;  %v5440_v11 = vrot.slane %v14305_v30, %v11904_v51  ;;  %v5458_v30 = vrot.slane %v14420_v36, %v11904_v51  ;;  %v5476_v36 = vrot.slane %v14464_v3, %v11904_v51 }
 0xb9a   :  { %v4073_v3 = vrot.slane %v14368_v43, %v11907_v25  ;;  %v5489_v43 = vrot.slane %v14482_v5, %v11907_v25 }
 0xb9c   :  { %v14512_v13 = vpop.permute.xlu1 %6870  ;;  %v14514_v63 = vpop.permute.xlu0 %6873 }
 0xb9d   :  { %16977 = vst [vmem:[#allocation128_spill] sm:$0xff] %v14512_v13  ;;  %16978 = vst [vmem:[#allocation112_spill] sm:$0xff] %v14514_v63  ;;  %v4028_v13 = vrot.slane %v14289_v38, %v11907_v25  ;;  %v4069_v38 = vrot.slane %v14327_v37, %v11904_v51 }
 0xb9f   :  { %v4029_v37 = vsel %vm1563_vm4, %v4028_v13, %v4024_v59  ;;  %v5485_v59 = vrot.slane %v14480_v19, %v11904_v51 }
 0xba0   :  { %v14516_v18 = vpop.permute.xlu1 %5423  ;;  %v14518_v47 = vpop.permute.xlu0 %5426 }
 0xba1   :  { %16979 = vst [vmem:[#allocation168_spill] sm:$0xff] %v14516_v18  ;;  %16980 = vst [vmem:[#allocation98_spill] sm:$0xff] %v14518_v47  ;;  %v4042_v47 = vrot.slane %v14261_v62, %v11904_v51  ;;  %v4038_v62 = vsel %vm1563_vm4, %v4037_v35, %v4033_v6  ;;  %v5453_v6 = vrot.slane %v14374_v42, %v11907_v25 }
 0xba2   :  { %v4100_v13 = vsel %vm1700_vm5, %v4038_v62, %v4029_v37  ;;  %v5435_v42 = vrot.slane %v14347_v23, %v11907_v25  ;;  %v5471_v35 = vrot.slane %v14458_v33, %v11907_v25  ;;  %v4082_v23 = vrot.slane %v14442_v17, %v11907_v25 }
 0xba3   :  { %v5494_v17 = vrot.slane %v14500_v56, %v11904_v51  ;;  %v4074_v37 = vsel %vm1563_vm4, %v4073_v3, %v4069_v38  ;;  %v4092_v38 = vsel %vm1563_vm4, %v4091_v52, %v4087_v57 }
 0xba4   :  { %v14530_v63 = vpop.permute.xlu1 %6834  ;;  %v14532_v18 = vpop.permute.xlu0 %6837  ;;  %v5472_v0 = vsel %vm1563_vm4, %v5471_v35, %v5467_v16  ;;  %v5490_v16 = vsel %vm1563_vm4, %v5489_v43, %v5485_v59  ;;  %v5521_v43 = vrot.slane %v14436_v1, %v11904_v51  ;;  %v5539_v1 = vrot.slane %v14468_v46, %v11904_v51 }
 0xba5   :  { %16981 = vst [vmem:[#allocation99_spill] sm:$0xff] %v14530_v63  ;;  %16982 = vst [vmem:[#allocation114_spill] sm:$0xff] %v14532_v18  ;;  %v5449_v18 = vrot.slane %v14339_v8, %v11904_v51  ;;  %v4047_v63 = vsel %vm1563_vm4, %v4046_v24, %v4042_v47  ;;  %v5444_v8 = vrot.slane %v14356_v15, %v11907_v25 }
 0xba6   :  { %v4101_v15 = vsel %vm1702_vm6, %v4047_v63, %v4100_v13  ;;  %v5462_v24 = vrot.slane %v14448_v54, %v11907_v25  ;;  %v5480_v54 = vrot.slane %v14466_v22, %v11907_v25  ;;  %v5498_v22 = vrot.slane %v14502_v48, %v11907_v25 }
 0xba7   :  { %v5445_v19 = vsel %vm1563_vm4, %v5444_v8, %v5440_v11  ;;  %v5454_v63 = vsel %vm1563_vm4, %v5453_v6, %v5449_v18  ;;  %v5436_v11 = vsel %vm1563_vm4, %v5435_v42, %v5431_v53  ;;  %v4102_v5 = vsel %vm1704_vm7, %v4056_v21, %v4101_v15 }
 0xba8   :  { %v14563_v4 = vpop.permute.xlu1 %6876  ;;  %v14565_v47 = vpop.permute.xlu0 %6879  ;;  %v5463_v18 = vsel %vm1563_vm4, %v5462_v24, %v5458_v30  ;;  %v5572_v12 = vsel %vm1700_vm5, %v5445_v19, %v5436_v11  ;;  %v4083_v53 = vsel %vm1563_vm4, %v4082_v23, %v4078_v55  ;;  %v5481_v30 = vsel %vm1563_vm4, %v5480_v54, %v5476_v36 }
 0xba9   :  { %v5573_v6 = vsel %vm1702_vm6, %v5454_v63, %v5572_v12  ;;  %v4103_v48 = vsel %vm1706_vm8, %v4065_v14, %v4102_v5  ;;  %v5499_v55 = vsel %vm1563_vm4, %v5498_v22, %v5494_v17  ;;  %v5516_v19 = vrot.slane %v14413_v10, %v11907_v25 }
 0xbaa   :  { %v5574_v42 = vsel %vm1704_vm7, %v5463_v18, %v5573_v6  ;;  %v4104_v15 = vsel %vm1708_vm9, %v4074_v37, %v4103_v48  ;;  %v5525_v63 = vrot.slane %v14452_v50, %v11907_v25  ;;  %v5512_v23 = vrot.slane %v14362_v40, %v11904_v51 }
 0xbab   :  { %v5575_v24 = vsel %vm1706_vm8, %v5472_v0, %v5574_v42  ;;  %v4105_v36 = vsel %vm1710_vm10, %v4083_v53, %v4104_v15  ;;  %v5507_v54 = vrot.slane %v14386_v44, %v11907_v25  ;;  %v5503_v10 = vrot.slane %v14349_v2, %v11904_v51  ;;  %v16987_v15 = vld [vmem:[#allocation102_spill] sm:$0xff] }
 0xbac   :  { %v9478_v62 = vpop.permute.xlu1 %9477  ;;  %v14593_v27 = vpop.permute.xlu0 %6840  ;;  %v5576_v21 = vsel %vm1708_vm9, %v5481_v30, %v5575_v24  ;;  %v4106_v57 = vsel %vm1712_vm11, %v4092_v38, %v4105_v36  ;;  %v5534_v50 = vrot.slane %v14462_v31, %v11907_v25  ;;  %v5526_v40 = vsel %vm1563_vm4, %v5525_v63, %v5521_v43  ;;  %v16989_v63 = vld [vmem:[#allocation168_spill] sm:$0xff] }
 0xbad   :  { %v9480_v33 = vunpack.i.h.bf16 %v9478_v62  ;;  %v9479_v49 = vunpack.i.l.bf16 %v9478_v62  ;;  %v5577_v59 = vsel %vm1710_vm10, %v5490_v16, %v5576_v21  ;;  %v5543_v44 = vrot.slane %v14470_v9, %v11907_v25 }
 0xbae   :  { %v5578_v35 = vsel %vm1712_vm11, %v5499_v55, %v5577_v59  ;;  %v5530_v11 = vrot.slane %v14460_v34, %v11904_v51  ;;  %v5508_v2 = vsel %vm1563_vm4, %v5507_v54, %v5503_v10  ;;  %v6908_v31 = vrot.slane %v14472_v26, %v11904_v51  ;;  %v16988_v55 = vld [vmem:[#allocation125_spill] sm:$0xff]  ;;  %v16990_v54 = vld [vmem:[#allocation98_spill] sm:$0xff] }
 0xbaf   :  { %v9410_v8 = vpack.c.bf16 %v9480_v33, %v9479_v49  ;;  %v5517_v33 = vsel %vm1563_vm4, %v5516_v19, %v5512_v23  ;;  %v6921_v49 = vrot.slane %v14478_v41, %v11907_v25  ;;  %v6917_v9 = vrot.slane %v14476_v20, %v11904_v51 }
 0xbb0   :  { %v14612_v13 = vpop.permute.xlu1 %6843  ;;  %v14614_v56 = vpop.permute.xlu0 %6882  ;;  %v5548_v41 = vrot.slane %v14484_v61, %v11904_v51  ;;  %v5579_v34 = vsel %vm1700_vm5, %v5517_v33, %v5508_v2  ;;  %v6926_v46 = vrot.slane %v14488_v45, %v11904_v51  ;;  %v5535_v12 = vsel %vm1563_vm4, %v5534_v50, %v5530_v11  ;;  %v16992_v11 = vld [vmem:[#allocation114_spill] sm:$0xff] }
 0xbb1   :  { %9411 = vmatprep.subr.bf16.mxu1 %v9410_v8  ;;  %v5580_v22 = vsel %vm1702_vm6, %v5526_v40, %v5579_v34  ;;  %v6912_v37 = vrot.slane %v14474_v29, %v11907_v25  ;;  %v5544_v26 = vsel %vm1563_vm4, %v5543_v44, %v5539_v1  ;;  %v6922_v0 = vsel %vm1563_vm4, %v6921_v49, %v6917_v9  ;;  %v16983_v29 = vld [vmem:[#allocation131_spill] sm:$0xff] }
 0xbb2   :  { %9413 = vmatpush3.bf16.msra.mxu1 %v9410_v8  ;;  %v5552_v20 = vrot.slane %v14486_v7, %v11907_v25  ;;  %v6930_v61 = vrot.slane %v14490_v60, %v11907_v25  ;;  %v6989_v45 = vrot.slane %v14496_v32, %v11904_v51  ;;  %v6993_v8 = vrot.slane %v14498_v39, %v11907_v25  ;;  %v16984_v60 = vld [vmem:[#allocation96_spill] sm:$0xff]  ;;  %v16991_v44 = vld [vmem:[#allocation99_spill] sm:$0xff] }
 0xbb3   :  { %v5557_v5 = vrot.slane %v14504_v58, %v11904_v51  ;;  %v5561_v6 = vrot.slane %v16983_v29, %v11907_v25  ;;  %v6935_v7 = vrot.slane %v14508_v28, %v11904_v51  ;;  %v6939_v48 = vrot.slane %v16984_v60, %v11907_v25  ;;  %v16985_v32 = vld [vmem:[#allocation128_spill] sm:$0xff] }
 0xbb4   :  { %v14625_v3 = vpop.permute.xlu1 %6885  ;;  %v14627_v14 = vpop.permute.xlu0 %6846  ;;  %v6998_v42 = vrot.slane %v16985_v32, %v11904_v51  ;;  %v16986_v39 = vld [vmem:[#allocation112_spill] sm:$0xff]  ;;  %v5581_v58 = vsel %vm1704_vm7, %v5535_v12, %v5580_v22  ;;  %v6913_v16 = vsel %vm1563_vm4, %v6912_v37, %v6908_v31  ;;  %v6980_v24 = vrot.slane %v16987_v15, %v11904_v51 }
 0xbb5   :  { %9321 = vmatmul.mubr.msk.f32.vlgmr.msra.gmra.mrb[22].mxu1 %vm1723_vm12, %v4106_v57  ;;  %v7002_v38 = vrot.slane %v16986_v39, %v11907_v25  ;;  %v6984_v36 = vrot.slane %v16988_v55, %v11907_v25  ;;  %v5582_v28 = vsel %vm1706_vm8, %v5544_v26, %v5581_v58  ;;  %v7049_v21 = vsel %vm1700_vm5, %v6922_v0, %v6913_v16 }
 0xbb6   :  { %9327 = vmatprep.mubr.msk.f32.mxu1 %vm1723_vm12, %v5578_v35  ;;  %v5553_v57 = vsel %vm1563_vm4, %v5552_v20, %v5548_v41  ;;  %v6931_v59 = vsel %vm1563_vm4, %v6930_v61, %v6926_v46  ;;  %v6994_v35 = vsel %vm1563_vm4, %v6993_v8, %v6989_v45  ;;  %v5562_v19 = vsel %vm1563_vm4, %v5561_v6, %v5557_v5 }
 0xbb7   :  { %v5566_v23 = vrot.slane %v16989_v63, %v11904_v51  ;;  %v5570_v43 = vrot.slane %v16990_v54, %v11907_v25  ;;  %v6940_v50 = vsel %vm1563_vm4, %v6939_v48, %v6935_v7  ;;  %v7003_v40 = vsel %vm1563_vm4, %v7002_v38, %v6998_v42  ;;  %v7202_v54 = vld [vmem:[%s15736_s11] sm:$0xff] }
 0xbb8   :  { %v14642_v62 = vpop.permute.xlu1 %6849  ;;  %v14644_v52 = vpop.permute.xlu0 %6888  ;;  %v6944_v49 = vrot.slane %v16991_v44, %v11904_v51  ;;  %v6948_v1 = vrot.slane %v16992_v11, %v11907_v25  ;;  %v5583_v2 = vsel %vm1708_vm9, %v5553_v57, %v5582_v28  ;;  %v6985_v31 = vsel %vm1563_vm4, %v6984_v36, %v6980_v24  ;;  %v7206_v44 = vld [vmem:[%s15736_s11 + $0x20] sm:$0xff] }
 0xbb9   :  { %v7007_v9 = vrot.slane %v14563_v4, %v11904_v51  ;;  %v7011_v41 = vrot.slane %v14565_v47, %v11907_v25  ;;  %v7050_v34 = vsel %vm1702_vm6, %v6931_v59, %v7049_v21  ;;  %v7056_v46 = vsel %vm1700_vm5, %v6994_v35, %v6985_v31 }
 0xbba   :  { %v5584_v22 = vsel %vm1710_vm10, %v5562_v19, %v5583_v2  ;;  %v7051_v12 = vsel %vm1704_vm7, %v6940_v50, %v7050_v34  ;;  %v7057_v37 = vsel %vm1702_vm6, %v7003_v40, %v7056_v46  ;;  %v5571_v26 = vsel %vm1563_vm4, %v5570_v43, %v5566_v23  ;;  %v7203_v43 = vld [vmem:[%s15736_s11 + $0x8] sm:$0xff]  ;;  %v7205_v50 = vld [vmem:[%s15736_s11 + $0x18] sm:$0xff] }
 0xbbb   :  { %v6957_v0 = vrot.slane %v14612_v13, %v11907_v25  ;;  %v6949_v61 = vsel %vm1563_vm4, %v6948_v1, %v6944_v49  ;;  %v6966_v47 = vrot.slane %v14642_v62, %v11907_v25  ;;  %v7012_v5 = vsel %vm1563_vm4, %v7011_v41, %v7007_v9  ;;  %v7207_v49 = vld [vmem:[%s15736_s11 + $0x28] sm:$0xff]  ;;  %v7208_v1 = vld [vmem:[%s15736_s11 + $0x30] sm:$0xff]  ;;  %v7209_v2 = vld [vmem:[%s15736_s11 + $0x38] sm:$0xff] }
 0xbbc   :  { %v14663_v18 = vpop.permute.xlu1 %6891  ;;  %v14665_v17 = vpop.permute.xlu0 %6852  ;;  %v6953_v29 = vrot.slane %v14593_v27, %v11904_v51  ;;  %v7020_v6 = vrot.slane %v14625_v3, %v11907_v25  ;;  %v7016_v7 = vrot.slane %v14614_v56, %v11904_v51  ;;  %v6962_v60 = vrot.slane %v14627_v14, %v11904_v51  ;;  %v7210_v41 = vld [vmem:[%s15736_s11 + $0x40] sm:$0xff]  ;;  %v7211_v34 = vld [vmem:[%s15736_s11 + $0x48] sm:$0xff] }
 0xbbd   :  { %v7029_v62 = vrot.slane %v14663_v18, %v11907_v25  ;;  %v7025_v27 = vrot.slane %v14644_v52, %v11904_v51  ;;  %v6971_v3 = vrot.slane %v14665_v17, %v11904_v51  ;;  %v7052_v18 = vsel %vm1706_vm8, %v6949_v61, %v7051_v12  ;;  %v7212_v12 = vld [vmem:[%s15736_s11 + $0x50] sm:$0xff] }
 0xbbe   :  { %v6958_v32 = vsel %vm1563_vm4, %v6957_v0, %v6953_v29  ;;  %v6967_v56 = vsel %vm1563_vm4, %v6966_v47, %v6962_v60  ;;  %v7021_v58 = vsel %vm1563_vm4, %v7020_v6, %v7016_v7  ;;  %v7058_v36 = vsel %vm1704_vm7, %v7012_v5, %v7057_v37  ;;  %v7213_v37 = vld [vmem:[%s15736_s11 + $0x58] sm:$0xff]  ;;  %v7214_v0 = vld [vmem:[%s15736_s11 + $0x60] sm:$0xff] }
 0xbbf   :  { %v7030_v16 = vsel %vm1563_vm4, %v7029_v62, %v7025_v27  ;;  %v7053_v55 = vsel %vm1708_vm9, %v6958_v32, %v7052_v18  ;;  %v5585_v21 = vsel %vm1712_vm11, %v5571_v26, %v5584_v22  ;;  %v9430_v11 = vpack.c.bf16 %v7207_v49, %v7206_v44  ;;  %v7217_v47 = vld [vmem:[%s15736_s11 + $0x78] sm:$0xff]  ;;  %v9832_v60 = vld [vmem:[%s15734_s7] sm:$0x7] }
 0xbc0   :  { %v14694_v53 = vpop.permute.xlu1 %6855  ;;  %v14696_v30 = vpop.permute.xlu0 %6894  ;;  %v7054_v57 = vsel %vm1710_vm10, %v6967_v56, %v7053_v55  ;;  %v9434_v31 = vpack.c.bf16 %v7209_v2, %v7208_v1  ;;  %v9438_v22 = vpack.c.bf16 %v7211_v34, %v7210_v41  ;;  %v9442_v26 = vpack.c.bf16 %v7213_v37, %v7212_v12  ;;  %v16993_v62 = vld [vmem:[#allocation6_spill] sm:$0xff]  ;;  %v17001_v41 = vld [vmem:[#allocation4_spill] sm:$0xff] }
 0xbc1   :  { %v6975_v13 = vrot.slane %v14694_v53, %v11907_v25  ;;  %v7034_v52 = vrot.slane %v14696_v30, %v11904_v51  ;;  %v7059_v30 = vsel %vm1706_vm8, %v7021_v58, %v7058_v36  ;;  %v16997_v58 = vld [vmem:[#allocation45_spill] sm:$0xff] }
 0xbc2   :  { %v7060_v19 = vsel %vm1708_vm9, %v7030_v16, %v7059_v30  ;;  %v9229_v16 = vld [vmem:[%s15737_s9] ss:$0 sm:$0xff] }
 0xbc3   :  { %v6976_v17 = vsel %vm1563_vm4, %v6975_v13, %v6971_v3  ;;  %v16994_v3 = vld [vmem:[#allocation107_spill] sm:$0xff] }
 0xbc4   :  { %v6898_v10 = vpop.permute.xlu1 %6897  ;;  %v6901_v33 = vpop.permute.xlu0 %6900  ;;  %v7055_v35 = vsel %vm1712_vm11, %v6976_v17, %v7054_v57 }
 0xbc5   :  { %v7038_v53 = vrot.slane %v6898_v10, %v11907_v25  ;;  %v7043_v15 = vrot.slane %v6901_v33, %v11904_v51  ;;  %v7204_v10 = vld [vmem:[%s15736_s11 + $0x10] sm:$0xff]  ;;  %v9422_v33 = vpack.c.bf16 %v7203_v43, %v7202_v54 }
 0xbc6   :  { %v9426_v40 = vpack.c.bf16 %v7205_v50, %v7204_v10  ;;  %v17000_v50 = vld [vmem:[#allocation43_spill] sm:$0xff] }
 0xbc7   :  { %v7039_v28 = vsel %vm1563_vm4, %v7038_v53, %v7034_v52 }
 0xbc8   :  { %v6904_v20 = vpop.permute.xlu1 %6903  ;;  %v9483_v4 = vpop.permute.xlu0 %9482  ;;  %v7061_v63 = vsel %vm1710_vm10, %v7039_v28, %v7060_v19 }
 0xbc9   :  { %v9485_v45 = vunpack.i.h.bf16 %v9483_v4  ;;  %v9484_v8 = vunpack.i.l.bf16 %v9483_v4  ;;  %v7047_v39 = vrot.slane %v6904_v20, %v11907_v25  ;;  %v7215_v20 = vld [vmem:[%s15736_s11 + $0x68] sm:$0xff]  ;;  %v7216_v4 = vld [vmem:[%s15736_s11 + $0x70] sm:$0xff] }
 0xbca   :  { %v9446_v61 = vpack.c.bf16 %v7215_v20, %v7214_v0 }
 0xbcb   :  { %v9414_v48 = vpack.c.bf16 %v9485_v45, %v9484_v8  ;;  %v7048_v59 = vsel %vm1563_vm4, %v7047_v39, %v7043_v15  ;;  %v9450_v45 = vpack.c.bf16 %v7217_v47, %v7216_v4  ;;  %v16996_v39 = vld [vmem:[#allocation195_spill] sm:$0xff] }
 0xbcc   :  { %v9488_v42 = vpop.permute.xlu1 %9487  ;;  %v7062_v23 = vsel %vm1712_vm11, %v7048_v59, %v7061_v63 }
 0xbcd   :  { %v9490_v14 = vunpack.i.h.bf16 %v9488_v42  ;;  %v9489_v38 = vunpack.i.l.bf16 %v9488_v42  ;;  %9415 = vmatprep.subr.bf16.mxu1 %v9414_v48  ;;  %v16995_v42 = vld [vmem:[#allocation44_spill] sm:$0xff] }
 0xbce   :  { %9417 = vmatpush3.bf16.msra.mxu1 %v9414_v48  ;;  %v576_v48 = vrot.slane %v9832_v60, %v16993_v62 }
 0xbcf   :  { %v9418_v24 = vpack.c.bf16 %v9490_v14, %v9489_v38 }
 0xbd0   :  { %v736_v56 = vadd.f32 %v16995_v42, %v576_v48  ;;  %v731_v52 = vadd.f32 %v16997_v58, %v576_v48 }
 0xbd1   :  { %9328 = vmatmul.mubr.msk.f32.vlgmr.msra.gmra.mrb[24].mxu1 %vm1723_vm12, %v5585_v21  ;;  %9419 = vmatprep.subr.bf16.mxu1 %v9418_v24  ;;  %v9230_v21 = vld [vmem:[%s15738_s10] ss:$0 sm:$0xff] }
 0xbd2   :  { %9421 = vmatpush3.bf16.msra.mxu1 %v9418_v24  ;;  %9334 = vmatprep.mubr.msk.f32.mxu1 %vm1723_vm12, %v7055_v35 }
 0xbd3   :  { %9423 = vmatprep.subr.bf16.mxu1 %v9422_v33 }
 0xbd5   :  { %9335 = vmatmul.mubr.msk.f32.vlgmr.msra.gmra.mrb[26].mxu1 %vm1723_vm12, %v7062_v23  ;;  %v9231_v23 = vld [vmem:[%s15739_s12] ss:$0 sm:$0xff] }
 0xbd6   :  { %9425 = vmatpush3.bf16.msra.mxu1 %v9422_v33 }
 0xbd7   :  { %9427 = vmatprep.subr.bf16.mxu1 %v9426_v40 }
 0xbda   :  { %9429 = vmatpush3.bf16.msra.mxu1 %v9426_v40 }
 0xbdb   :  { %9431 = vmatprep.subr.bf16.mxu1 %v9430_v11 }
 0xbde   :  { %9433 = vmatpush3.bf16.msra.mxu1 %v9430_v11 }
 0xbdf   :  { %9435 = vmatprep.subr.bf16.mxu1 %v9434_v31 }
 0xbe2   :  { %9437 = vmatpush3.bf16.msra.mxu1 %v9434_v31 }
 0xbe3   :  { %9439 = vmatprep.subr.bf16.mxu1 %v9438_v22 }
 0xbe6   :  { %9441 = vmatpush3.bf16.msra.mxu1 %v9438_v22 }
 0xbe7   :  { %9443 = vmatprep.subr.bf16.mxu1 %v9442_v26 }
 0xbea   :  { %9445 = vmatpush3.bf16.msra.mxu1 %v9442_v26 }
 0xbeb   :  { %9447 = vmatprep.subr.bf16.mxu1 %v9446_v61 }
 0xbee   :  { %9449 = vmatpush3.bf16.msra.mxu1 %v9446_v61 }
 0xbef   :  { %9451 = vmatprep.subr.bf16.mxu1 %v9450_v45 }
 0xbf2   :  { %9453 = vmatpush3.bf16.msra.mxu1 %v9450_v45 }
 0xc88   :  { %v9322_v9 = vpop.f32.mrb[22].mxu1 }
 0xc89   :  { %7152 = vrot.lane.b32.xlu1 %v9322_v9, %s9837_s29  ;;  %v4185_v46 = vpop.f32.mrb[23].mxu1 }
 0xc8a   :  { %7150 = vrot.lane.b32.xlu0 %v4185_v46, %s9837_s29 }
 0xca4   :  { %v9329_v8 = vpop.f32.mrb[24].mxu1 }
 0xca5   :  { %7160 = vrot.lane.b32.xlu1 %v9329_v8, %s9836_s28  ;;  %v5662_v5 = vpop.f32.mrb[25].mxu1 }
 0xca6   :  { %7158 = vrot.lane.b32.xlu0 %v5662_v5, %s9836_s28 }
 0xca8   :  { %v9336_v29 = vpop.f32.mrb[26].mxu1 }
 0xca9   :  { %7168 = vrot.lane.b32.xlu1 %v9336_v29, %s9835_s8  ;;  %v7139_v6 = vpop.f32.mrb[27].mxu1 }
 0xcaa   :  { %7166 = vrot.lane.b32.xlu0 %v7139_v6, %s9835_s8 }
 0xcfb   :  { %v7153_v13 = vpop.permute.xlu1 %7152 }
 0xcfc   :  { %v7151_v7 = vpop.permute.xlu0 %7150  ;;  %v7173_v53 = vsel %vm580_vm3, %v16994_v3, %v7153_v13 }
 0xcfd   :  { %v7172_v14 = vsel %vm580_vm3, %v16996_v39, %v7151_v7 }
 0xd17   :  { %v7161_v32 = vpop.permute.xlu1 %7160 }
 0xd18   :  { %v7159_v27 = vpop.permute.xlu0 %7158  ;;  %v7176_v38 = vsel %vm7174_vm13, %v7173_v53, %v7161_v32 }
 0xd19   :  { %v7175_v17 = vsel %vm7174_vm13, %v7172_v14, %v7159_v27 }
 0xd1b   :  { %v7169_v18 = vpop.permute.xlu1 %7168 }
 0xd1c   :  { %v7179_v15 = vsel %vm7177_vm14, %v7176_v38, %v7169_v18  ;;  %v7167_v24 = vpop.permute.xlu0 %7166 }
 0xd1d   :  { %v7181_v55 = vadd.f32 %v7179_v15, %v736_v56  ;;  %v7178_v36 = vsel %vm7177_vm14, %v7175_v17, %v7167_v24  ;;  %v17002_v24 = vld [vmem:[#allocation34_spill] sm:$0xff] }
 0xd1e   :  { %v7180_v28 = vadd.f32 %v7178_v36, %v731_v52  ;;  %v17003_v36 = vld [vmem:[#allocation35_spill] sm:$0xff] }
 0xd1f   :  { %v7190_v57 = vmul.f32 %v9229_v16, %v7181_v55 }
 0xd20   :  { %v7189_v30 = vmul.f32 %v9229_v16, %v7180_v28 }
 0xd21   :  { %v7199_v59 = vadd.f32 %v9230_v21, %v7190_v57  ;;  %v17004_v57 = vld [vmem:[#allocation15_spill] sm:$0xff] }
 0xd22   :  { %v7198_v35 = vadd.f32 %v9230_v21, %v7189_v30 }
 0xd23   :  { %v7201_v63 = vmax.f32 %v7199_v59, 0.0  ;;  %v17005_v59 = vld [vmem:[#allocation13_spill] sm:$0xff] }
 0xd24   :  { %v7200_v19 = vmax.f32 %v7198_v35, 0.0 }
 0xd26   :  { %9369 = vmatprep.mubr.f32.mxu1 %v7200_v19 }
 0xd27   :  { %9370 = vmatmul.mubr.f32.vlgmr.msra.gmra.mrb[28].mxu1 %v7201_v63 }
 0xdfa   :  { %v9371_v54 = vpop.f32.mrb[28].mxu1 }
 0xdfb   :  { %v14860_v43 = vadd.f32 %v9371_v54, %v9231_v23  ;;  %v7291_v10 = vpop.f32.mrb[29].mxu1 }
 0xdfc   :  { %v14862_v33 = vadd.f32 %v9231_v23, %v7291_v10 }
 0xdfd   :  { %16998 = vst [vmem:[#allocation105_spill] sm:$0xff] %v14860_v43  ;;  %v7391_v40 = vrot.slane %v14860_v43, %v17000_v50  ;;  %v7384_v26 = vcombine.high %v14860_v43, %v14860_v43  ;;  %v7318_v28 = vadd.f32 %v14860_v43, %v17003_v36  ;;  %v7302_v30 = vadd.f32 %v14860_v43, %v17004_v57 }
 0xdfe   :  { %16999 = vst [vmem:[#allocation135_spill] sm:$0xff] %v14862_v33  ;;  %v9454_v44 = vpack.c.bf16 %v14860_v43, %v14862_v33  ;;  %v7342_v49 = vrot.slane %v14862_v33, %v17000_v50  ;;  %v7335_v11 = vcombine.high %v14862_v33, %v14862_v33  ;;  %v7317_v55 = vadd.f32 %v14862_v33, %v17002_v24  ;;  %v17013_v24 = vld [vmem:[#allocation19_spill] sm:$0xff] }
 0xdff   :  { %v7407_v1 = vrot.slane %v7391_v40, %v17000_v50  ;;  %v7399_v2 = vcombine.high %v7391_v40, %v7391_v40  ;;  %v7398_v47 = vrot.slane %v7384_v26, %v17000_v50  ;;  %v7301_v35 = vadd.f32 %v14862_v33, %v17005_v59 }
 0xe00   :  { %9455 = vmatprep.subr.bf16.mxu1 %v9454_v44  ;;  %v7358_v31 = vrot.slane %v7342_v49, %v17000_v50  ;;  %v7350_v9 = vcombine.high %v7342_v49, %v7342_v49  ;;  %v7349_v46 = vrot.slane %v7335_v11, %v17000_v50 }
 0xe01   :  { %9457 = vmatpush3.bf16.msra.mxu1 %v9454_v44  ;;  %v7468_v34 = vrot.slane %v7407_v1, %v17001_v41  ;;  %v7421_v37 = vrot.slane %v7399_v2, %v17000_v50  ;;  %v7429_v61 = vcombine.high %v7407_v1, %v7407_v1  ;;  %v7414_v6 = vrot.slane %v7398_v47, %v17000_v50  ;;  %v17006_v1 = vld [vmem:[#allocation37_spill] sm:$0xff] }
 0xe02   :  { %v7436_v22 = vrot.slane %v7358_v31, %v17001_v41  ;;  %v7372_v12 = vrot.slane %v7350_v9, %v17000_v50  ;;  %v7365_v20 = vrot.slane %v7349_v46, %v17000_v50  ;;  %v7351_v5 = vcombine.high %v7349_v46, %v7349_v46 }
 0xe03   :  { %7513 = vrot.lane.b32.xlu1 %v7468_v34, %s9835_s8  ;;  %v7472_v4 = vrot.slane %v7421_v37, %v17001_v41  ;;  %v7476_v29 = vrot.slane %v7429_v61, %v17001_v41  ;;  %v7400_v60 = vcombine.high %v7398_v47, %v7398_v47  ;;  %v7484_v48 = vrot.slane %v7414_v6, %v17001_v41  ;;  %v14931_v34 = vld [vmem:[%s15740_s13] ss:$0 sm:$0xff] }
 0xe04   :  { %7497 = vrot.lane.b32.xlu0 %v7436_v22, %s9835_s8  ;;  %v7440_v0 = vrot.slane %v7372_v12, %v17001_v41  ;;  %v7452_v45 = vrot.slane %v7365_v20, %v17001_v41  ;;  %v7382_v8 = vcombine.high %v7372_v12, %v7372_v12  ;;  %v7379_v7 = vrot.slane %v7351_v5, %v17000_v50  ;;  %v17008_v5 = vld [vmem:[#allocation39_spill] sm:$0xff] }
 0xe05   :  { %v7380_v32 = vcombine.high %v7358_v31, %v7358_v31  ;;  %v7381_v3 = vcombine.high %v7365_v20, %v7365_v20  ;;  %v7428_v53 = vrot.slane %v7400_v60, %v17000_v50  ;;  %v7431_v56 = vcombine.high %v7421_v37, %v7421_v37  ;;  %v17007_v31 = vld [vmem:[#allocation36_spill] sm:$0xff] }
 0xe06   :  { %v7448_v13 = vrot.slane %v7382_v8, %v17001_v41  ;;  %v7456_v27 = vrot.slane %v7379_v7, %v17001_v41  ;;  %v7383_v58 = vcombine.high %v7379_v7, %v7379_v7  ;;  %v7430_v17 = vcombine.high %v7414_v6, %v7414_v6  ;;  %v17009_v6 = vld [vmem:[#allocation38_spill] sm:$0xff]  ;;  %v17010_v7 = vld [vmem:[#allocation17_spill] sm:$0xff] }
 0xe07   :  { %7499 = vrot.lane.b32.xlu1 %v7440_v0, %s9835_s8  ;;  %v7444_v42 = vrot.slane %v7380_v32, %v17001_v41  ;;  %v7460_v39 = vrot.slane %v7381_v3, %v17001_v41  ;;  %v7432_v14 = vcombine.high %v7428_v53, %v7428_v53  ;;  %v7480_v38 = vrot.slane %v7431_v56, %v17001_v41 }
 0xe08   :  { %7515 = vrot.lane.b32.xlu0 %v7472_v4, %s9835_s8  ;;  %v7488_v52 = vrot.slane %v7428_v53, %v17001_v41  ;;  %v7464_v16 = vrot.slane %v7383_v58, %v17001_v41  ;;  %v7492_v15 = vrot.slane %v7430_v17, %v17001_v41  ;;  %v7320_v2 = vadd.f32 %v14860_v43, %v17006_v1 }
 0xe09   :  { %v7496_v18 = vrot.slane %v7432_v14, %v17001_v41  ;;  %v7319_v9 = vadd.f32 %v14862_v33, %v17007_v31  ;;  %v7303_v60 = vadd.f32 %v14862_v33, %v17010_v7 }
 0xe0b   :  { %7505 = vrot.lane.b32.xlu1 %v7452_v45, %s9835_s8 }
 0xe0c   :  { %7517 = vrot.lane.b32.xlu0 %v7476_v29, %s9835_s8  ;;  %v7322_v29 = vadd.f32 %v14860_v43, %v17008_v5  ;;  %v17017_v5 = vld [vmem:[#allocation41_spill] sm:$0xff] }
 0xe0f   :  { %7503 = vrot.lane.b32.xlu1 %v7448_v13, %s9835_s8  ;;  %v7321_v13 = vadd.f32 %v14862_v33, %v17009_v6 }
 0xe10   :  { %7521 = vrot.lane.b32.xlu0 %v7484_v48, %s9835_s8 }
 0xe13   :  { %7507 = vrot.lane.b32.xlu1 %v7456_v27, %s9835_s8 }
 0xe14   :  { %7501 = vrot.lane.b32.xlu0 %v7444_v42, %s9835_s8 }
 0xe17   :  { %7509 = vrot.lane.b32.xlu1 %v7460_v39, %s9835_s8 }
 0xe18   :  { %7519 = vrot.lane.b32.xlu0 %v7480_v38, %s9835_s8 }
 0xe1b   :  { %7527 = vrot.lane.b32.xlu1 %v7496_v18, %s9835_s8 }
 0xe1c   :  { %7523 = vrot.lane.b32.xlu0 %v7488_v52, %s9835_s8  ;;  %v17011_v52 = vld [vmem:[#allocation48_spill] sm:$0xff] }
 0xe1d   :  { %v7326_v17 = vadd.f32 %v14860_v43, %v17011_v52 }
 0xe1f   :  { %7511 = vrot.lane.b32.xlu1 %v7464_v16, %s9835_s8  ;;  %v17012_v16 = vld [vmem:[#allocation42_spill] sm:$0xff] }
 0xe20   :  { %7525 = vrot.lane.b32.xlu0 %v7492_v15, %s9835_s8  ;;  %v7325_v15 = vadd.f32 %v14862_v33, %v17012_v16 }
 0xe75   :  { %v7514_v21 = vpop.permute.xlu1 %7513 }
 0xe76   :  { %v7561_v19 = vadd.f32 %v7514_v21, %v7317_v55  ;;  %v7562_v63 = vadd.f32 %v7514_v21, %v7318_v28  ;;  %v7498_v23 = vpop.permute.xlu0 %7497  ;;  %v7304_v55 = vadd.f32 %v14860_v43, %v17013_v24 }
 0xe77   :  { %v7545_v54 = vadd.f32 %v7498_v23, %v7301_v35  ;;  %v7546_v10 = vadd.f32 %v7498_v23, %v7302_v30 }
 0xe78   :  { %v7593_v50 = vmul.f32 0.2, %v7561_v19  ;;  %v7594_v40 = vmul.f32 0.2, %v7562_v63 }
 0xe79   :  { %v7577_v44 = vmul.f32 0.2, %v7545_v54  ;;  %v7578_v49 = vmul.f32 0.2, %v7546_v10  ;;  %v7500_v11 = vpop.permute.xlu1 %7499 }
 0xe7a   :  { %v7625_v46 = vmax.f32 %v7561_v19, %v7593_v50  ;;  %v7626_v22 = vmax.f32 %v7562_v63, %v7594_v40  ;;  %v7516_v12 = vpop.permute.xlu0 %7515  ;;  %v7547_v36 = vadd.f32 %v7500_v11, %v7303_v60 }
 0xe7b   :  { %v7609_v37 = vmax.f32 %v7545_v54, %v7577_v44  ;;  %v7610_v26 = vmax.f32 %v7546_v10, %v7578_v49  ;;  %v7563_v0 = vadd.f32 %v7516_v12, %v7319_v9  ;;  %v7564_v20 = vadd.f32 %v7516_v12, %v7320_v2  ;;  %v17014_v54 = vld [vmem:[#allocation27_spill] sm:$0xff] }
 0xe7c   :  { %v7664_v4 = vmul.f32 %v14931_v34, %v7626_v22  ;;  %v7663_v61 = vmul.f32 %v14931_v34, %v7625_v46  ;;  %v7310_v10 = vadd.f32 %v14860_v43, %v17014_v54  ;;  %v17015_v49 = vld [vmem:[#allocation23_spill] sm:$0xff]  ;;  %v14965_v2 = vadd.f32 %v7500_v11, %v7304_v55  ;;  %v17016_v46 = vld [vmem:[#allocation21_spill] sm:$0xff]  ;;  %v17022_v54 = vld [vmem:[#allocation18_spill] sm:$0xff] }
 0xe7d   :  { %v7595_v47 = vmul.f32 0.2, %v7563_v0  ;;  %v7596_v45 = vmul.f32 0.2, %v7564_v20  ;;  %v14935_v8 = vpop.permute.xlu1 %7505  ;;  %v7648_v3 = vmul.f32 %v14931_v34, %v7610_v26  ;;  %v7647_v53 = vmul.f32 %v14931_v34, %v7609_v37 }
 0xe7e   :  { %v7518_v48 = vpop.permute.xlu0 %7517  ;;  %v7730_v39 = vsel %vm580_vm3, %v7664_v4, 0.0  ;;  %v7727_v14 = vsel %vm580_vm3, %v7663_v61, 0.0  ;;  %v7306_v1 = vadd.f32 %v14860_v43, %v17015_v49  ;;  %v7579_v31 = vmul.f32 0.2, %v7547_v36 }
 0xe7f   :  { %v7565_v32 = vadd.f32 %v7518_v48, %v7321_v13  ;;  %v7566_v27 = vadd.f32 %v7518_v48, %v7322_v29  ;;  %v7627_v42 = vmax.f32 %v7563_v0, %v7595_v47  ;;  %v7628_v56 = vmax.f32 %v7564_v20, %v7596_v45  ;;  %7731 = vadd.xlane.f32.xlu1 %v7730_v39  ;;  %v17018_v13 = vld [vmem:[#allocation26_spill] sm:$0xff] }
 0xe80   :  { %7728 = vadd.xlane.f32.xlu0 %v7727_v14  ;;  %v7682_v35 = vsel %vm580_vm3, %v7648_v3, 0.0  ;;  %v7679_v19 = vsel %vm580_vm3, %v7647_v53, 0.0  ;;  %v7305_v22 = vadd.f32 %v14862_v33, %v17016_v46  ;;  %v7554_v12 = vadd.f32 %v14935_v8, %v7310_v10 }
 0xe81   :  { %v7597_v38 = vmul.f32 0.2, %v7565_v32  ;;  %v7598_v18 = vmul.f32 0.2, %v7566_v27  ;;  %v14947_v58 = vpop.permute.xlu1 %7503  ;;  %v7666_v63 = vmul.f32 %v14931_v34, %v7628_v56  ;;  %v7665_v23 = vmul.f32 %v14931_v34, %v7627_v42 }
 0xe82   :  { %v7522_v28 = vpop.permute.xlu0 %7521  ;;  %v7324_v29 = vadd.f32 %v14860_v43, %v17017_v5  ;;  %v7580_v6 = vmul.f32 0.2, %v14965_v2  ;;  %v7309_v7 = vadd.f32 %v14862_v33, %v17018_v13  ;;  %v7330_v10 = vadd.f32 %v14860_v43, %v17022_v54  ;;  %v17025_v5 = vld [vmem:[#allocation29_spill] sm:$0xff] }
 0xe83   :  { %v7629_v21 = vmax.f32 %v7565_v32, %v7597_v38  ;;  %v7630_v57 = vmax.f32 %v7566_v27, %v7598_v18  ;;  %v7569_v30 = vadd.f32 %v7522_v28, %v7325_v15  ;;  %v7570_v59 = vadd.f32 %v7522_v28, %v7326_v17  ;;  %7683 = vadd.xlane.f32.xlu1 %v7682_v35  ;;  %v17019_v18 = vld [vmem:[#allocation14_spill] sm:$0xff]  ;;  %v17020_v15 = vld [vmem:[#allocation40_spill] sm:$0xff] }
 0xe84   :  { %7680 = vadd.xlane.f32.xlu0 %v7679_v19  ;;  %v7736_v61 = vsel %vm580_vm3, %v7666_v63, 0.0  ;;  %v7733_v47 = vsel %vm580_vm3, %v7665_v23, 0.0  ;;  %v7611_v32 = vmax.f32 %v7547_v36, %v7579_v31  ;;  %v7586_v27 = vmul.f32 0.2, %v7554_v12  ;;  %v17021_v63 = vld [vmem:[#allocation32_spill] sm:$0xff] }
 0xe85   :  { %v7601_v50 = vmul.f32 0.2, %v7569_v30  ;;  %v7602_v40 = vmul.f32 0.2, %v7570_v59  ;;  %v14961_v44 = vpop.permute.xlu1 %7507  ;;  %v7668_v26 = vmul.f32 %v14931_v34, %v7630_v57  ;;  %v7667_v0 = vmul.f32 %v14931_v34, %v7629_v21 }
 0xe86   :  { %v7502_v9 = vpop.permute.xlu0 %7501  ;;  %v7328_v52 = vadd.f32 %v14860_v43, %v17019_v18  ;;  %v7553_v17 = vadd.f32 %v14935_v8, %v7309_v7  ;;  %v7323_v24 = vadd.f32 %v14862_v33, %v17020_v15  ;;  %v7612_v36 = vmax.f32 %v14965_v2, %v7580_v6 }
 0xe87   :  { %v7550_v37 = vadd.f32 %v7502_v9, %v7306_v1  ;;  %v7633_v20 = vmax.f32 %v7569_v30, %v7601_v50  ;;  %v7634_v4 = vmax.f32 %v7570_v59, %v7602_v40  ;;  %7737 = vadd.xlane.f32.xlu1 %v7736_v61  ;;  %v7549_v60 = vadd.f32 %v7502_v9, %v7305_v22  ;;  %v17023_v40 = vld [vmem:[#allocation25_spill] sm:$0xff] }
 0xe88   :  { %7734 = vadd.xlane.f32.xlu0 %v7733_v47  ;;  %v7742_v53 = vsel %vm580_vm3, %v7668_v26, 0.0  ;;  %v7739_v56 = vsel %vm580_vm3, %v7667_v0, 0.0  ;;  %v7618_v28 = vmax.f32 %v7554_v12, %v7586_v27  ;;  %v7649_v19 = vmul.f32 %v14931_v34, %v7611_v32 }
 0xe89   :  { %v7582_v11 = vmul.f32 0.2, %v7550_v37  ;;  %v14974_v45 = vpop.permute.xlu1 %7509  ;;  %v7672_v39 = vmul.f32 %v14931_v34, %v7634_v4  ;;  %v7671_v14 = vmul.f32 %v14931_v34, %v7633_v20  ;;  %v7581_v16 = vmul.f32 0.2, %v7549_v60  ;;  %v17024_v4 = vld [vmem:[#allocation12_spill] sm:$0xff] }
 0xe8a   :  { %v7520_v48 = vpop.permute.xlu0 %7519  ;;  %v7315_v23 = vadd.f32 %v14862_v33, %v17021_v63  ;;  %v7585_v50 = vmul.f32 0.2, %v7553_v17  ;;  %v7308_v49 = vadd.f32 %v14860_v43, %v17023_v40  ;;  %v7685_v26 = vsel %vm580_vm3, %v7649_v19, 0.0  ;;  %v17029_v63 = vld [vmem:[#allocation28_spill] sm:$0xff] }
 0xe8b   :  { %v7568_v3 = vadd.f32 %v7520_v48, %v7324_v29  ;;  %v7614_v42 = vmax.f32 %v7550_v37, %v7582_v11  ;;  %7743 = vadd.xlane.f32.xlu1 %v7742_v53  ;;  %v7754_v30 = vsel %vm580_vm3, %v7672_v39, 0.0  ;;  %v7751_v59 = vsel %vm580_vm3, %v7671_v14, 0.0  ;;  %v17027_v39 = vld [vmem:[#allocation24_spill] sm:$0xff] }
 0xe8c   :  { %7740 = vadd.xlane.f32.xlu0 %v7739_v56  ;;  %v7613_v1 = vmax.f32 %v7549_v60, %v7581_v16  ;;  %v7567_v2 = vadd.f32 %v7520_v48, %v7323_v24  ;;  %v7656_v0 = vmul.f32 %v14931_v34, %v7618_v28  ;;  %v7650_v20 = vmul.f32 %v14931_v34, %v7612_v36 }
 0xe8d   :  { %v14985_v38 = vpop.permute.xlu1 %7527  ;;  %v7600_v21 = vmul.f32 0.2, %v7568_v3  ;;  %v7652_v35 = vmul.f32 %v14931_v34, %v7614_v42  ;;  %v7327_v61 = vadd.f32 %v14862_v33, %v17024_v4  ;;  %v7617_v47 = vmax.f32 %v7553_v17, %v7585_v50  ;;  %v17026_v42 = vld [vmem:[#allocation16_spill] sm:$0xff] }
 0xe8e   :  { %v7524_v55 = vpop.permute.xlu0 %7523  ;;  %v7552_v11 = vadd.f32 %v14947_v58, %v7308_v49  ;;  %v7312_v29 = vadd.f32 %v14860_v43, %v17025_v5  ;;  %v7599_v6 = vmul.f32 0.2, %v7567_v2  ;;  %v7706_v32 = vsel %vm580_vm3, %v7656_v0, 0.0  ;;  %v17031_v5 = vld [vmem:[#allocation30_spill] sm:$0xff] }
 0xe8f   :  { %v7572_v57 = vadd.f32 %v7524_v55, %v7328_v52  ;;  %7755 = vadd.xlane.f32.xlu1 %v7754_v30  ;;  %v7632_v9 = vmax.f32 %v7568_v3, %v7600_v21  ;;  %v7694_v37 = vsel %vm580_vm3, %v7652_v35, 0.0  ;;  %v7571_v13 = vadd.f32 %v7524_v55, %v7327_v61  ;;  %v17028_v30 = vld [vmem:[#allocation31_spill] sm:$0xff] }
 0xe90   :  { %7752 = vadd.xlane.f32.xlu0 %v7751_v59  ;;  %v7688_v27 = vsel %vm580_vm3, %v7650_v20, 0.0  ;;  %v7651_v53 = vmul.f32 %v14931_v34, %v7613_v1  ;;  %v7329_v56 = vadd.f32 %v14862_v33, %v17026_v42  ;;  %v7307_v14 = vadd.f32 %v14862_v33, %v17027_v39  ;;  %v17033_v39 = vld [vmem:[#allocation20_spill] sm:$0xff] }
 0xe91   :  { %v14997_v8 = vpop.permute.xlu1 %7511  ;;  %v7604_v46 = vmul.f32 0.2, %v7572_v57  ;;  %v7670_v3 = vmul.f32 %v14931_v34, %v7632_v9  ;;  %v7584_v18 = vmul.f32 0.2, %v7552_v11  ;;  %v7556_v52 = vadd.f32 %v14961_v44, %v7312_v29  ;;  %v17030_v9 = vld [vmem:[#allocation22_spill] sm:$0xff] }
 0xe92   :  { %v7526_v31 = vpop.permute.xlu0 %7525  ;;  %v7559_v22 = vadd.f32 %v14997_v8, %v7315_v23  ;;  %v7631_v17 = vmax.f32 %v7567_v2, %v7599_v6  ;;  %v7603_v16 = vmul.f32 0.2, %v7571_v13  ;;  %v7691_v28 = vsel %vm580_vm3, %v7651_v53, 0.0  ;;  %v17032_v6 = vld [vmem:[#allocation33_spill] sm:$0xff] }
 0xe93   :  { %v7574_v12 = vadd.f32 %v7526_v31, %v7330_v10  ;;  %7695 = vadd.xlane.f32.xlu1 %v7694_v37  ;;  %v7636_v7 = vmax.f32 %v7572_v57, %v7604_v46  ;;  %v7573_v24 = vadd.f32 %v7526_v31, %v7329_v56  ;;  %v7748_v36 = vsel %vm580_vm3, %v7670_v3, 0.0 }
 0xe94   :  { %7686 = vadd.xlane.f32.xlu0 %v7685_v26  ;;  %v7591_v60 = vmul.f32 0.2, %v7559_v22  ;;  %v7655_v57 = vmul.f32 %v14931_v34, %v7617_v47  ;;  %v7314_v59 = vadd.f32 %v14860_v43, %v17028_v30  ;;  %v7551_v35 = vadd.f32 %v14947_v58, %v7307_v14 }
 0xe95   :  { %v7606_v48 = vmul.f32 0.2, %v7574_v12  ;;  %v7674_v21 = vmul.f32 %v14931_v34, %v7636_v7  ;;  %v7616_v19 = vmax.f32 %v7552_v11, %v7584_v18  ;;  %v7311_v23 = vadd.f32 %v14862_v33, %v17029_v63 }
 0xe96   :  { %v7623_v15 = vmax.f32 %v7559_v22, %v7591_v60  ;;  %v7588_v54 = vmul.f32 0.2, %v7556_v52  ;;  %v7558_v10 = vadd.f32 %v14974_v45, %v7314_v59  ;;  %v7635_v50 = vmax.f32 %v7571_v13, %v7603_v16 }
 0xe97   :  { %7707 = vadd.xlane.f32.xlu1 %v7706_v32  ;;  %v7638_v55 = vmax.f32 %v7574_v12, %v7606_v48  ;;  %v7605_v40 = vmul.f32 0.2, %v7573_v24  ;;  %v7760_v1 = vsel %vm580_vm3, %v7674_v21, 0.0  ;;  %v7703_v2 = vsel %vm580_vm3, %v7655_v57, 0.0 }
 0xe98   :  { %7689 = vadd.xlane.f32.xlu0 %v7688_v27  ;;  %v15035_v49 = vmul.f32 %v14931_v34, %v7623_v15  ;;  %v7669_v58 = vmul.f32 %v14931_v34, %v7631_v17  ;;  %v7332_v46 = vadd.f32 %v14860_v43, %v17030_v9  ;;  %v7583_v22 = vmul.f32 0.2, %v7551_v35  ;;  %v17034_v9 = vld [vmem:[#allocation57_spill] sm:$0xff] }
 0xe99   :  { %v7676_v31 = vmul.f32 %v14931_v34, %v7638_v55  ;;  %v7555_v12 = vadd.f32 %v14961_v44, %v7311_v23  ;;  %v7620_v37 = vmax.f32 %v7556_v52, %v7588_v54  ;;  %v7590_v26 = vmul.f32 0.2, %v7558_v10 }
 0xe9a   :  { %v7576_v0 = vadd.f32 %v14985_v38, %v7332_v46  ;;  %v7637_v20 = vmax.f32 %v7573_v24, %v7605_v40  ;;  %v7745_v61 = vsel %vm580_vm3, %v7669_v58, 0.0  ;;  %v7654_v47 = vmul.f32 %v14931_v34, %v7616_v19 }
 0xe9b   :  { %7749 = vadd.xlane.f32.xlu1 %v7748_v36  ;;  %v7766_v4 = vsel %vm580_vm3, %v7676_v31, 0.0  ;;  %v7673_v11 = vmul.f32 %v14931_v34, %v7635_v50  ;;  %v7313_v29 = vadd.f32 %v14862_v33, %v17031_v5  ;;  %v7316_v13 = vadd.f32 %v14860_v43, %v17032_v6  ;;  %v17039_v5 = vld [vmem:[#allocation73_spill] sm:$0xff] }
 0xe9c   :  { %7692 = vadd.xlane.f32.xlu0 %v7691_v28  ;;  %v7615_v44 = vmax.f32 %v7551_v35, %v7583_v22  ;;  %v7587_v7 = vmul.f32 0.2, %v7555_v12  ;;  %v7622_v48 = vmax.f32 %v7558_v10, %v7590_v26  ;;  %v7608_v32 = vmul.f32 0.2, %v7576_v0  ;;  %v17035_v22 = vld [vmem:[#allocation72_spill] sm:$0xff]  ;;  %v17036_v26 = vld [vmem:[#allocation47_spill] sm:$0xff] }
 0xe9d   :  { %v7557_v60 = vadd.f32 %v14974_v45, %v7313_v29  ;;  %v7560_v27 = vadd.f32 %v14997_v8, %v7316_v13  ;;  %v7700_v3 = vsel %vm580_vm3, %v7654_v47, 0.0  ;;  %v7757_v53 = vsel %vm580_vm3, %v7673_v11, 0.0  ;;  %v17038_v47 = vld [vmem:[#allocation59_spill] sm:$0xff] }
 0xe9e   :  { %v7658_v42 = vmul.f32 %v14931_v34, %v7620_v37  ;;  %v7675_v56 = vmul.f32 %v14931_v34, %v7637_v20  ;;  %v7331_v14 = vadd.f32 %v14862_v33, %v17033_v39  ;;  %v7619_v18 = vmax.f32 %v7555_v12, %v7587_v7  ;;  %v17037_v20 = vld [vmem:[#allocation58_spill] sm:$0xff] }
 0xe9f   :  { %7761 = vadd.xlane.f32.xlu1 %v7760_v1  ;;  %v7589_v52 = vmul.f32 0.2, %v7557_v60  ;;  %v7640_v17 = vmax.f32 %v7576_v0, %v7608_v32  ;;  %v7592_v16 = vmul.f32 0.2, %v7560_v27  ;;  %v7660_v24 = vmul.f32 %v14931_v34, %v7622_v48 }
 0xea0   :  { %7704 = vadd.xlane.f32.xlu0 %v7703_v2  ;;  %v7575_v45 = vadd.f32 %v14985_v38, %v7331_v14  ;;  %v7712_v8 = vsel %vm580_vm3, %v7658_v42, 0.0  ;;  %v7763_v15 = vsel %vm580_vm3, %v7675_v56, 0.0  ;;  %v7653_v55 = vmul.f32 %v14931_v34, %v7615_v44  ;;  %v17040_v44 = vld [vmem:[#allocation61_spill] sm:$0xff]  ;;  %v17043_v42 = vld [vmem:[#allocation76_spill] sm:$0xff] }
 0xea1   :  { %v7621_v36 = vmax.f32 %v7557_v60, %v7589_v52  ;;  %v7624_v21 = vmax.f32 %v7560_v27, %v7592_v16  ;;  %v7718_v57 = vsel %vm580_vm3, %v7660_v24, 0.0  ;;  %v7678_v38 = vmul.f32 %v14931_v34, %v7640_v17  ;;  %v17041_v60 = vld [vmem:[#allocation74_spill] sm:$0xff] }
 0xea2   :  { %v7607_v28 = vmul.f32 0.2, %v7575_v45  ;;  %v7697_v30 = vsel %vm580_vm3, %v7653_v55, 0.0  ;;  %v7657_v59 = vmul.f32 %v14931_v34, %v7619_v18  ;;  %v7721_v2 = vsel %vm580_vm3, %v15035_v49, 0.0  ;;  %v17044_v18 = vld [vmem:[#allocation49_spill] sm:$0xff]  ;;  %v17045_v16 = vld [vmem:[#allocation50_spill] sm:$0xff] }
 0xea3   :  { %7767 = vadd.xlane.f32.xlu1 %v7766_v4  ;;  %v7772_v19 = vsel %vm580_vm3, %v7678_v38, 0.0  ;;  %v7662_v23 = vmul.f32 %v14931_v34, %v7624_v21  ;;  %v7659_v54 = vmul.f32 %v14931_v34, %v7621_v36  ;;  %v17046_v55 = vld [vmem:[#allocation51_spill] sm:$0xff]  ;;  %v17048_v38 = vld [vmem:[#allocation53_spill] sm:$0xff] }
 0xea4   :  { %7746 = vadd.xlane.f32.xlu0 %v7745_v61  ;;  %v7639_v35 = vmax.f32 %v7575_v45, %v7607_v28  ;;  %v7709_v63 = vsel %vm580_vm3, %v7657_v59, 0.0  ;;  %v17047_v28 = vld [vmem:[#allocation60_spill] sm:$0xff] }
 0xea5   :  { %v7724_v10 = vsel %vm580_vm3, %v7662_v23, 0.0  ;;  %v7715_v50 = vsel %vm580_vm3, %v7659_v54, 0.0  ;;  %v17051_v54 = vld [vmem:[#allocation63_spill] sm:$0xff] }
 0xea6   :  { %v7677_v40 = vmul.f32 %v14931_v34, %v7639_v35  ;;  %v17050_v35 = vld [vmem:[#allocation64_spill] sm:$0xff] }
 0xea7   :  { %7701 = vadd.xlane.f32.xlu1 %v7700_v3  ;;  %v17042_v3 = vld [vmem:[#allocation65_spill] sm:$0xff] }
 0xea8   :  { %7758 = vadd.xlane.f32.xlu0 %v7757_v53  ;;  %v7769_v1 = vsel %vm580_vm3, %v7677_v40, 0.0 }
 0xeab   :  { %7713 = vadd.xlane.f32.xlu1 %v7712_v8 }
 0xeac   :  { %7764 = vadd.xlane.f32.xlu0 %v7763_v15 }
 0xeaf   :  { %7719 = vadd.xlane.f32.xlu1 %v7718_v57 }
 0xeb0   :  { %7698 = vadd.xlane.f32.xlu0 %v7697_v30 }
 0xeb3   :  { %7773 = vadd.xlane.f32.xlu1 %v7772_v19 }
 0xeb4   :  { %7710 = vadd.xlane.f32.xlu0 %v7709_v63 }
 0xeb7   :  { %7725 = vadd.xlane.f32.xlu1 %v7724_v10 }
 0xeb8   :  { %7716 = vadd.xlane.f32.xlu0 %v7715_v50  ;;  %v17052_v50 = vld [vmem:[#allocation75_spill] sm:$0xff] }
 0xebc   :  { %7770 = vadd.xlane.f32.xlu0 %v7769_v1 }
 0xec0   :  { %7722 = vadd.xlane.f32.xlu0 %v7721_v2 }
 0xf0c   :  { %v7732_v31 = vpop.xlane.xlu1 %7731 }
 0xf0d   :  { %v7729_v58 = vpop.xlane.xlu0 %7728  ;;  %v15081_v46 = vadd.f32 %v7732_v31, %v17034_v9  ;;  %v17053_v31 = vld [vmem:[#allocation67_spill] sm:$0xff]  ;;  %v17054_v9 = vld [vmem:[#allocation77_spill] sm:$0xff] }
 0xf0e   :  { %v15084_v12 = vadd.f32 %v7729_v58, %v17035_v22 }
 0xf0f   :  { %7891 = vperm.xlu1 %9474, %v15081_v46  }
 0xf10   :  { %7888 = vperm.xlu0 %9475, %v15084_v12   ;;  %v7684_v34 = vpop.xlane.xlu1 %7683 }
 0xf11   :  { %v7681_v37 = vpop.xlane.xlu0 %7680  ;;  %v15089_v0 = vadd.f32 %v7684_v34, %v17036_v26  ;;  %v17055_v26 = vld [vmem:[#allocation69_spill] sm:$0xff] }
 0xf12   :  { %v15092_v49 = vadd.f32 %v7681_v37, %v17037_v20 }
 0xf13   :  { %7843 = vperm.xlu1 %9474, %v15089_v0  }
 0xf14   :  { %7840 = vperm.xlu0 %9475, %v15092_v49   ;;  %v7738_v4 = vpop.xlane.xlu1 %7737 }
 0xf15   :  { %v7735_v61 = vpop.xlane.xlu0 %7734  ;;  %v15097_v11 = vadd.f32 %v7738_v4, %v17038_v47  ;;  %v17056_v4 = vld [vmem:[#allocation78_spill] sm:$0xff] }
 0xf16   :  { %v15100_v29 = vadd.f32 %v7735_v61, %v17039_v5 }
 0xf17   :  { %7897 = vperm.xlu1 %9474, %v15097_v11  }
 0xf18   :  { %7894 = vperm.xlu0 %9475, %v15100_v29   ;;  %v7744_v6 = vpop.xlane.xlu1 %7743 }
 0xf19   :  { %v7741_v13 = vpop.xlane.xlu0 %7740  ;;  %v15105_v7 = vadd.f32 %v7744_v6, %v17040_v44  ;;  %v17057_v6 = vld [vmem:[#allocation52_spill] sm:$0xff]  ;;  %v17058_v44 = vld [vmem:[#allocation62_spill] sm:$0xff] }
 0xf1a   :  { %v15108_v48 = vadd.f32 %v7741_v13, %v17041_v60 }
 0xf1b   :  { %7903 = vperm.xlu1 %9474, %v15105_v7  }
 0xf1c   :  { %7900 = vperm.xlu0 %9475, %v15108_v48   ;;  %v7756_v32 = vpop.xlane.xlu1 %7755 }
 0xf1d   :  { %v7753_v27 = vpop.xlane.xlu0 %7752  ;;  %v15113_v53 = vadd.f32 %v7756_v32, %v17042_v3  ;;  %v17059_v3 = vld [vmem:[#allocation54_spill] sm:$0xff] }
 0xf1e   :  { %v15116_v56 = vadd.f32 %v7753_v27, %v17043_v42 }
 0xf1f   :  { %7915 = vperm.xlu1 %9474, %v15113_v53  }
 0xf20   :  { %7912 = vperm.xlu0 %9475, %v15116_v56   ;;  %v7696_v39 = vpop.xlane.xlu1 %7695 }
 0xf21   :  { %v7687_v14 = vpop.xlane.xlu0 %7686  ;;  %v15129_v36 = vadd.f32 %v7696_v39, %v17046_v55  ;;  %v17061_v39 = vld [vmem:[#allocation66_spill] sm:$0xff] }
 0xf22   :  { %v15121_v52 = vadd.f32 %v7687_v14, %v17044_v18 }
 0xf24   :  { %7846 = vperm.xlu1 %9474, %v15121_v52   ;;  %v7708_v45 = vpop.xlane.xlu1 %7707 }
 0xf25   :  { %v7690_v17 = vpop.xlane.xlu0 %7689  ;;  %v15137_v59 = vadd.f32 %v7708_v45, %v17048_v38  ;;  %v17063_v45 = vld [vmem:[#allocation55_spill] sm:$0xff] }
 0xf26   :  { %v15125_v8 = vadd.f32 %v7690_v17, %v17045_v16  ;;  %v17065_v16 = vld [vmem:[#allocation68_spill] sm:$0xff]  ;;  %v17069_v38 = vld [vmem:[#allocation71_spill] sm:$0xff] }
 0xf27   :  { %17049 = vst [vmem:[#allocation124_spill] sm:$0xff] %v15137_v59 }
 0xf28   :  { %7849 = vperm.xlu1 %9474, %v15125_v8   ;;  %v7750_v15 = vpop.xlane.xlu1 %7749 }
 0xf29   :  { %v7693_v24 = vpop.xlane.xlu0 %7692  ;;  %v15145_v10 = vadd.f32 %v7750_v15, %v17051_v54  ;;  %v17073_v54 = vld [vmem:[#allocation79_spill] sm:$0xff] }
 0xf2a   :  { %v15132_v21 = vadd.f32 %v7693_v24, %v17047_v28  ;;  %v17067_v28 = vld [vmem:[#allocation56_spill] sm:$0xff] }
 0xf2c   :  { %7855 = vperm.xlu1 %9474, %v15129_v36   ;;  %7852 = vperm.xlu0 %9475, %v15132_v21   ;;  %v7762_v57 = vpop.xlane.xlu1 %7761 }
 0xf2d   :  { %v7705_v30 = vpop.xlane.xlu0 %7704  ;;  %v15153_v58 = vadd.f32 %v7762_v57, %v17053_v31 }
 0xf2e   :  { %v15140_v19 = vadd.f32 %v7705_v30, %v17050_v35 }
 0xf30   :  { %7867 = vperm.xlu1 %9474, %v15137_v59   ;;  %7864 = vperm.xlu0 %9475, %v15140_v19   ;;  %v7768_v63 = vpop.xlane.xlu1 %7767 }
 0xf31   :  { %v7747_v23 = vpop.xlane.xlu0 %7746  ;;  %v15161_v20 = vadd.f32 %v7768_v63, %v17055_v26  ;;  %v17071_v63 = vld [vmem:[#allocation70_spill] sm:$0xff] }
 0xf32   :  { %v15148_v40 = vadd.f32 %v7747_v23, %v17052_v50 }
 0xf34   :  { %7909 = vperm.xlu1 %9474, %v15145_v10   ;;  %7906 = vperm.xlu0 %9475, %v15148_v40   ;;  %v7702_v1 = vpop.xlane.xlu1 %7701 }
 0xf35   :  { %v7759_v2 = vpop.xlane.xlu0 %7758  ;;  %v15169_v13 = vadd.f32 %v7702_v1, %v17057_v6 }
 0xf36   :  { %v15156_v22 = vadd.f32 %v7759_v2, %v17054_v9 }
 0xf38   :  { %7921 = vperm.xlu1 %9474, %v15153_v58   ;;  %7918 = vperm.xlu0 %9475, %v15156_v22   ;;  %v7714_v34 = vpop.xlane.xlu1 %7713 }
 0xf39   :  { %v7765_v37 = vpop.xlane.xlu0 %7764  ;;  %v15177_v42 = vadd.f32 %v7714_v34, %v17059_v3 }
 0xf3a   :  { %v15164_v61 = vadd.f32 %v7765_v37, %v17056_v4 }
 0xf3b   :  { %17060 = vst [vmem:[#allocation159_spill] sm:$0xff] %v15177_v42 }
 0xf3c   :  { %7927 = vperm.xlu1 %9474, %v15161_v20   ;;  %7924 = vperm.xlu0 %9475, %v15164_v61   ;;  %v7720_v47 = vpop.xlane.xlu1 %7719 }
 0xf3d   :  { %v7699_v5 = vpop.xlane.xlu0 %7698  ;;  %v15185_v17 = vadd.f32 %v7720_v47, %v17063_v45 }
 0xf3e   :  { %v15172_v60 = vadd.f32 %v7699_v5, %v17058_v44 }
 0xf3f   :  { %17064 = vst [vmem:[#allocation163_spill] sm:$0xff] %v15185_v17 }
 0xf40   :  { %7861 = vperm.xlu1 %9474, %v15169_v13   ;;  %7858 = vperm.xlu0 %9475, %v15172_v60   ;;  %v7774_v32 = vpop.xlane.xlu1 %7773 }
 0xf41   :  { %v7711_v27 = vpop.xlane.xlu0 %7710  ;;  %v15197_v35 = vadd.f32 %v7774_v32, %v17069_v38 }
 0xf42   :  { %v15180_v14 = vadd.f32 %v7711_v27, %v17061_v39 }
 0xf43   :  { %17070 = vst [vmem:[#allocation88_spill] sm:$0xff] %v15197_v35 }
 0xf44   :  { %17062 = vst [vmem:[#allocation127_spill] sm:$0xff] %v15180_v14  ;;  %7873 = vperm.xlu1 %9474, %v15177_v42   ;;  %7870 = vperm.xlu0 %9475, %v15180_v14   ;;  %v7726_v24 = vpop.xlane.xlu1 %7725 }
 0xf45   :  { %v7717_v18 = vpop.xlane.xlu0 %7716  ;;  %v15193_v57 = vadd.f32 %v7726_v24, %v17067_v28 }
 0xf46   :  { %v15188_v15 = vadd.f32 %v7717_v18, %v17065_v16 }
 0xf47   :  { %17068 = vst [vmem:[#allocation180_spill] sm:$0xff] %v15193_v57 }
 0xf48   :  { %17066 = vst [vmem:[#allocation84_spill] sm:$0xff] %v15188_v15  ;;  %7879 = vperm.xlu1 %9474, %v15185_v17   ;;  %7876 = vperm.xlu0 %9475, %v15188_v15  }
 0xf49   :  { %v7771_v55 = vpop.xlane.xlu0 %7770 }
 0xf4a   :  { %v15205_v50 = vadd.f32 %v7771_v55, %v17073_v54 }
 0xf4c   :  { %7885 = vperm.xlu1 %9474, %v15193_v57   ;;  %17074 = vst [vmem:[#allocation85_spill] sm:$0xff] %v15205_v50 }
 0xf4d   :  { %v7723_v30 = vpop.xlane.xlu0 %7722 }
 0xf4e   :  { %v15200_v23 = vadd.f32 %v7723_v30, %v17071_v63 }
 0xf50   :  { %17072 = vst [vmem:[#allocation138_spill] sm:$0xff] %v15200_v23  ;;  %7933 = vperm.xlu1 %9474, %v15197_v35   ;;  %7882 = vperm.xlu0 %9475, %v15200_v23  }
 0xf54   :  { %7930 = vperm.xlu0 %9475, %v15205_v50  }
 0xf8e   :  { %v7892_v1 = vpop.permute.xlu1 %7891 }
 0xf8f   :  { %v7889_v2 = vpop.permute.xlu0 %7888  ;;  %v8014_v54 = vrot.slane %v7892_v1, %v11907_v25 }
 0xf90   :  { %v8010_v33 = vrot.slane %v7889_v2, %v11904_v51 }
 0xf92   :  { %v7844_v31 = vpop.permute.xlu1 %7843  ;;  %v8015_v59 = vsel %vm1563_vm4, %v8014_v54, %v8010_v33 }
 0xf93   :  { %v7841_v9 = vpop.permute.xlu0 %7840  ;;  %v7942_v43 = vrot.slane %v7844_v31, %v11907_v25 }
 0xf94   :  { %v7938_v57 = vrot.slane %v7841_v9, %v11904_v51 }
 0xf96   :  { %v7898_v34 = vpop.permute.xlu1 %7897  ;;  %v7943_v9 = vsel %vm1563_vm4, %v7942_v43, %v7938_v57 }
 0xf97   :  { %v7895_v37 = vpop.permute.xlu0 %7894  ;;  %v8023_v23 = vrot.slane %v7898_v34, %v11907_v25 }
 0xf98   :  { %v8019_v17 = vrot.slane %v7895_v37, %v11904_v51 }
 0xf9a   :  { %v7904_v26 = vpop.permute.xlu1 %7903  ;;  %v8024_v34 = vsel %vm1563_vm4, %v8023_v23, %v8019_v17 }
 0xf9b   :  { %v7901_v47 = vpop.permute.xlu0 %7900  ;;  %v8032_v37 = vrot.slane %v7904_v26, %v11907_v25 }
 0xf9e   :  { %v15208_v4 = vpop.permute.xlu1 %7915 }
 0xf9f   :  { %v15210_v6 = vpop.permute.xlu0 %7912 }
 0xfa3   :  { %v7847_v5 = vpop.permute.xlu1 %7846 }
 0xfa4   :  { %v7947_v15 = vrot.slane %v7847_v5, %v11904_v51 }
 0xfa7   :  { %v7850_v44 = vpop.permute.xlu1 %7849 }
 0xfa8   :  { %v7951_v63 = vrot.slane %v7850_v44, %v11907_v25 }
 0xfaa   :  { %v7952_v1 = vsel %vm1563_vm4, %v7951_v63, %v7947_v15 }
 0xfab   :  { %v7856_v32 = vpop.permute.xlu1 %7855  ;;  %v7853_v27 = vpop.permute.xlu0 %7852 }
 0xfac   :  { %v7960_v42 = vrot.slane %v7856_v32, %v11907_v25  ;;  %v7956_v44 = vrot.slane %v7853_v27, %v11904_v51  ;;  %v8028_v32 = vrot.slane %v7901_v47, %v11904_v51  ;;  %v8079_v27 = vsel %vm1700_vm5, %v7952_v1, %v7943_v9 }
 0xfae   :  { %v7961_v15 = vsel %vm1563_vm4, %v7960_v42, %v7956_v44  ;;  %v8086_v42 = vsel %vm1700_vm5, %v8024_v34, %v8015_v59 }
 0xfaf   :  { %v7868_v3 = vpop.permute.xlu1 %7867  ;;  %v7865_v39 = vpop.permute.xlu0 %7864 }
 0xfb0   :  { %v7978_v17 = vrot.slane %v7868_v3, %v11907_v25  ;;  %v7974_v57 = vrot.slane %v7865_v39, %v11904_v51 }
 0xfb2   :  { %v7979_v44 = vsel %vm1563_vm4, %v7978_v17, %v7974_v57 }
 0xfb3   :  { %v7910_v18 = vpop.permute.xlu1 %7909  ;;  %v7907_v45 = vpop.permute.xlu0 %7906 }
 0xfb7   :  { %v15212_v16 = vpop.permute.xlu1 %7921  ;;  %v15214_v24 = vpop.permute.xlu0 %7918 }
 0xfb8   :  { %v8055_v59 = vrot.slane %v15214_v24, %v11904_v51 }
 0xfbb   :  { %v15216_v55 = vpop.permute.xlu1 %7927  ;;  %v15218_v28 = vpop.permute.xlu0 %7924 }
 0xfbf   :  { %v7862_v30 = vpop.permute.xlu1 %7861  ;;  %v7859_v38 = vpop.permute.xlu0 %7858 }
 0xfc0   :  { %v7969_v2 = vrot.slane %v7862_v30, %v11907_v25  ;;  %v7965_v31 = vrot.slane %v7859_v38, %v11904_v51  ;;  %v8041_v30 = vrot.slane %v7910_v18, %v11907_v25  ;;  %v8037_v38 = vrot.slane %v7907_v45, %v11904_v51 }
 0xfc1   :  { %v8080_v18 = vsel %vm1702_vm6, %v7961_v15, %v8079_v27  ;;  %v8033_v45 = vsel %vm1563_vm4, %v8032_v37, %v8028_v32 }
 0xfc2   :  { %v7970_v63 = vsel %vm1563_vm4, %v7969_v2, %v7965_v31  ;;  %v8042_v39 = vsel %vm1563_vm4, %v8041_v30, %v8037_v38  ;;  %v8087_v31 = vsel %vm1702_vm6, %v8033_v45, %v8086_v42 }
 0xfc3   :  { %v7874_v35 = vpop.permute.xlu1 %7873  ;;  %v7871_v50 = vpop.permute.xlu0 %7870  ;;  %v8081_v3 = vsel %vm1704_vm7, %v7970_v63, %v8080_v18  ;;  %v8088_v34 = vsel %vm1704_vm7, %v8042_v39, %v8087_v31 }
 0xfc4   :  { %v7987_v33 = vrot.slane %v7874_v35, %v11907_v25  ;;  %v7983_v43 = vrot.slane %v7871_v50, %v11904_v51  ;;  %v8050_v35 = vrot.slane %v15208_v4, %v11907_v25  ;;  %v8046_v50 = vrot.slane %v15210_v6, %v11904_v51 }
 0xfc5   :  { %v8068_v4 = vrot.slane %v15216_v55, %v11907_v25  ;;  %v8064_v6 = vrot.slane %v15218_v28, %v11904_v51  ;;  %v8082_v24 = vsel %vm1706_vm8, %v7979_v44, %v8081_v3 }
 0xfc6   :  { %v7988_v54 = vsel %vm1563_vm4, %v7987_v33, %v7983_v43  ;;  %v8051_v27 = vsel %vm1563_vm4, %v8050_v35, %v8046_v50  ;;  %v17075_v35 = vld [vmem:[#allocation5_spill] sm:$0xff] }
 0xfc7   :  { %v7880_v14 = vpop.permute.xlu1 %7879  ;;  %v7877_v5 = vpop.permute.xlu0 %7876  ;;  %v8069_v15 = vsel %vm1563_vm4, %v8068_v4, %v8064_v6  ;;  %v8089_v17 = vsel %vm1706_vm8, %v8051_v27, %v8088_v34  ;;  %v17076_v6 = vld [vmem:[#allocation7_spill] sm:$0xff] }
 0xfc8   :  { %v7996_v23 = vrot.slane %v7880_v14, %v11907_v25  ;;  %v7992_v26 = vrot.slane %v7877_v5, %v11904_v51  ;;  %v8059_v14 = vrot.slane %v15212_v16, %v11907_v25  ;;  %v8083_v5 = vsel %vm1708_vm9, %v7988_v54, %v8082_v24 }
 0xfca   :  { %v7997_v1 = vsel %vm1563_vm4, %v7996_v23, %v7992_v26  ;;  %v8060_v55 = vsel %vm1563_vm4, %v8059_v14, %v8055_v59 }
 0xfcb   :  { %v7886_v47 = vpop.permute.xlu1 %7885  ;;  %v8084_v32 = vsel %vm1710_vm10, %v7997_v1, %v8083_v5  ;;  %v8090_v57 = vsel %vm1708_vm9, %v8060_v55, %v8089_v17 }
 0xfcc   :  { %v8005_v16 = vrot.slane %v7886_v47, %v11907_v25  ;;  %v8091_v26 = vsel %vm1710_vm10, %v8069_v15, %v8090_v57 }
 0xfcf   :  { %v7883_v2 = vpop.permute.xlu0 %7882  ;;  %v7934_v37 = vpop.permute.xlu1 %7933 }
 0xfd0   :  { %v8001_v9 = vrot.slane %v7883_v2, %v11904_v51  ;;  %v8077_v63 = vrot.slane %v7934_v37, %v11907_v25  ;;  %v17078_v37 = vld [vmem:[#allocation9_spill] sm:$0xff] }
 0xfd2   :  { %v8006_v28 = vsel %vm1563_vm4, %v8005_v16, %v8001_v9  ;;  %v17077_v16 = vld [vmem:[#allocation8_spill] sm:$0xff] }
 0xfd3   :  { %v7931_v30 = vpop.permute.xlu0 %7930  ;;  %v8085_v38 = vsel %vm1712_vm11, %v8006_v28, %v8084_v32 }
 0xfd4   :  { %v8073_v33 = vrot.slane %v7931_v30, %v11904_v51  ;;  %v8095_v43 = vsel %vm1723_vm12, %v8085_v38, -inf }
 0xfd5   :  { %8096 = vmax.xlane.f32.xlu0 %v8095_v43 }
 0xfd6   :  { %v8078_v23 = vsel %vm1563_vm4, %v8077_v63, %v8073_v33 }
 0xfd7   :  { %v8092_v47 = vsel %vm1712_vm11, %v8078_v23, %v8091_v26 }
 0xfd8   :  { %v8098_v42 = vsel %vm1723_vm12, %v8092_v47, -inf }
 0xfd9   :  { %8099 = vmax.xlane.f32.xlu1 %v8098_v42 }
0x1066   :  { %v15290_v18 = vpop.xlane.xlu1 %8099 }
0x1067   :  { %v8138_v45 = vrot.slane %v15290_v18, %v17001_v41  ;;  %v8142_v50 = vrot.slane %v15290_v18, %v17075_v35  ;;  %v8146_v14 = vrot.slane %v15290_v18, %v16993_v62  ;;  %v8150_v1 = vrot.slane %v15290_v18, %v17076_v6 }
0x1068   :  { %v8154_v9 = vrot.slane %v15290_v18, %v17077_v16 }
0x1069   :  { %v8199_v3 = vsub.f32 %v15084_v12, %v8138_v45  ;;  %v8200_v39 = vsub.f32 %v15081_v46, %v8138_v45  ;;  %v8201_v59 = vsub.f32 %v15100_v29, %v8142_v50  ;;  %v8202_v44 = vsub.f32 %v15097_v11, %v8142_v50 }
0x106a   :  { %v8203_v2 = vsub.f32 %v15108_v48, %v8146_v14  ;;  %v8204_v12 = vsub.f32 %v15105_v7, %v8146_v14  ;;  %v8205_v29 = vsub.f32 %v15148_v40, %v8150_v1  ;;  %v8206_v11 = vsub.f32 %v15145_v10, %v8150_v1  ;;  %v17079_v10 = vld [vmem:[#allocation10_spill] sm:$0xff] }
0x106b   :  { %v8247_v54 = vmul.f32 1.442695, %v8199_v3  ;;  %v8249_v4 = vmul.f32 1.442695, %v8200_v39  ;;  %v8251_v31 = vmul.f32 1.442695, %v8201_v59  ;;  %v8158_v48 = vrot.slane %v15290_v18, %v17078_v37 }
0x106c   :  { %v8253_v46 = vmul.f32 1.442695, %v8202_v44  ;;  %v8255_v24 = vmul.f32 1.442695, %v8203_v2  ;;  %v8257_v34 = vmul.f32 1.442695, %v8204_v12  ;;  %v8207_v5 = vsub.f32 %v15116_v56, %v8154_v9  ;;  %v15323_v56 = vpop.xlane.xlu0 %8096 }
0x106d   :  { %9764 = vpow2.f32 %v8247_v54  ;;  %v8259_v7 = vmul.f32 1.442695, %v8205_v29  ;;  %v8208_v55 = vsub.f32 %v15113_v53, %v8154_v9  ;;  %v8261_v28 = vmul.f32 1.442695, %v8206_v11 }
0x106e   :  { %9766 = vpow2.f32 %v8249_v4  ;;  %v8162_v27 = vrot.slane %v15290_v18, %v17079_v10  ;;  %v8209_v15 = vsub.f32 %v15156_v22, %v8158_v48  ;;  %v8263_v30 = vmul.f32 1.442695, %v8207_v5  ;;  %v17080_v5 = vld [vmem:[#allocation124_spill] sm:$0xff] }
0x106f   :  { %9768 = vpow2.f32 %v8251_v31  ;;  %v8210_v53 = vsub.f32 %v15153_v58, %v8158_v48  ;;  %v8265_v38 = vmul.f32 1.442695, %v8208_v55  ;;  %v8106_v43 = vrot.slane %v15323_v56, %v17001_v41 }
0x1070   :  { %9770 = vpow2.f32 %v8253_v46  ;;  %v8211_v22 = vsub.f32 %v15164_v61, %v8162_v27  ;;  %v8267_v17 = vmul.f32 1.442695, %v8209_v15  ;;  %v8212_v57 = vsub.f32 %v15161_v20, %v8162_v27  ;;  %v17081_v15 = vld [vmem:[#allocation127_spill] sm:$0xff] }
0x1071   :  { %9772 = vpow2.f32 %v8255_v24  ;;  %v8269_v58 = vmul.f32 1.442695, %v8210_v53  ;;  %v8110_v47 = vrot.slane %v15323_v56, %v17075_v35  ;;  %v8183_v42 = vsub.f32 %v15092_v49, %v8106_v43  ;;  %v17082_v53 = vld [vmem:[#allocation159_spill] sm:$0xff] }
0x1072   :  { %9774 = vpow2.f32 %v8257_v34  ;;  %v8271_v61 = vmul.f32 1.442695, %v8211_v22  ;;  %v8184_v45 = vsub.f32 %v15089_v0, %v8106_v43  ;;  %v8273_v20 = vmul.f32 1.442695, %v8212_v57  ;;  %v17083_v57 = vld [vmem:[#allocation11_spill] sm:$0xff] }
0x1073   :  { %9776 = vpow2.f32 %v8259_v7  ;;  %v8114_v39 = vrot.slane %v15323_v56, %v16993_v62  ;;  %v8185_v14 = vsub.f32 %v15121_v52, %v8110_v47  ;;  %v8215_v49 = vmul.f32 1.442695, %v8183_v42 }
0x1074   :  { %9778 = vpow2.f32 %v8261_v28  ;;  %v8186_v59 = vsub.f32 %v15125_v8, %v8110_v47  ;;  %v8217_v0 = vmul.f32 1.442695, %v8184_v45  ;;  %v8118_v4 = vrot.slane %v15323_v56, %v17076_v6  ;;  %v17084_v47 = vld [vmem:[#allocation84_spill] sm:$0xff]  ;;  %v17085_v45 = vld [vmem:[#allocation163_spill] sm:$0xff] }
0x1075   :  { %9780 = vpow2.f32 %v8263_v30  ;;  %v8187_v1 = vsub.f32 %v15132_v21, %v8114_v39  ;;  %v8219_v52 = vmul.f32 1.442695, %v8185_v14  ;;  %v8188_v2 = vsub.f32 %v15129_v36, %v8114_v39 }
0x1076   :  { %9782 = vpow2.f32 %v8265_v38  ;;  %v8221_v8 = vmul.f32 1.442695, %v8186_v59  ;;  %v8122_v46 = vrot.slane %v15323_v56, %v17077_v16  ;;  %v8189_v9 = vsub.f32 %v15172_v60, %v8118_v4  ;;  %v17087_v59 = vld [vmem:[#allocation138_spill] sm:$0xff] }
0x1077   :  { %v15314_v32 = vpop.eup %9764  ;;  %9784 = vpow2.f32 %v8267_v17  ;;  %v8223_v21 = vmul.f32 1.442695, %v8187_v1  ;;  %v8190_v29 = vsub.f32 %v15169_v13, %v8118_v4  ;;  %v8225_v36 = vmul.f32 1.442695, %v8188_v2  ;;  %v17088_v1 = vld [vmem:[#allocation180_spill] sm:$0xff] }
0x1078   :  { %v15316_v40 = vpop.eup %9766  ;;  %8360 = vperm.xlu0 %9475, %v15314_v32   ;;  %9786 = vpow2.f32 %v8269_v58  ;;  %v8126_v34 = vrot.slane %v15323_v56, %v17078_v37  ;;  %v8191_v48 = vsub.f32 %v15140_v19, %v8122_v46  ;;  %v8227_v60 = vmul.f32 1.442695, %v8189_v9 }
0x1079   :  { %8363 = vperm.xlu1 %9474, %v15316_v40   ;;  %v15326_v63 = vpop.eup %9768  ;;  %9788 = vpow2.f32 %v8271_v61  ;;  %v8192_v7 = vsub.f32 %v17080_v5, %v8122_v46  ;;  %v8229_v13 = vmul.f32 1.442695, %v8190_v29  ;;  %v8130_v27 = vrot.slane %v15323_v56, %v17079_v10 }
0x107a   :  { %v15328_v33 = vpop.eup %9770  ;;  %9790 = vpow2.f32 %v8273_v20  ;;  %v8193_v30 = vsub.f32 %v17081_v15, %v8126_v34  ;;  %v8231_v19 = vmul.f32 1.442695, %v8191_v48  ;;  %v8194_v38 = vsub.f32 %v17082_v53, %v8126_v34 }
0x107b   :  { %v15336_v23 = vpop.eup %9772  ;;  %9792 = vpow2.f32 %v8215_v49  ;;  %v8233_v43 = vmul.f32 1.442695, %v8192_v7  ;;  %v8134_v58 = vrot.slane %v15323_v56, %v17083_v57  ;;  %v8195_v42 = vsub.f32 %v17084_v47, %v8130_v27 }
0x107c   :  { %8366 = vperm.xlu0 %9475, %v15326_v63   ;;  %v15338_v26 = vpop.eup %9774  ;;  %9794 = vpow2.f32 %v8217_v0  ;;  %v8235_v61 = vmul.f32 1.442695, %v8193_v30  ;;  %v8196_v20 = vsub.f32 %v17085_v45, %v8130_v27  ;;  %v8237_v39 = vmul.f32 1.442695, %v8194_v38 }
0x107d   :  { %8369 = vperm.xlu1 %9474, %v15328_v33   ;;  %v15346_v50 = vpop.eup %9776  ;;  %9796 = vpow2.f32 %v8219_v52  ;;  %v8197_v0 = vsub.f32 %v17087_v59, %v8134_v58  ;;  %v8239_v56 = vmul.f32 1.442695, %v8195_v42  ;;  %v8166_v4 = vrot.slane %v15290_v18, %v17083_v57 }
0x107e   :  { %v15348_v3 = vpop.eup %9778  ;;  %9798 = vpow2.f32 %v8221_v8  ;;  %v8198_v52 = vsub.f32 %v17088_v1, %v8134_v58  ;;  %v8241_v2 = vmul.f32 1.442695, %v8196_v20 }
0x107f   :  { %v15356_v54 = vpop.eup %9780  ;;  %9800 = vpow2.f32 %v8223_v21  ;;  %v8243_v9 = vmul.f32 1.442695, %v8197_v0  ;;  %v17091_v21 = vld [vmem:[#allocation85_spill] sm:$0xff] }
0x1080   :  { %8372 = vperm.xlu0 %9475, %v15336_v23   ;;  %v15358_v44 = vpop.eup %9782  ;;  %9802 = vpow2.f32 %v8225_v36  ;;  %v8213_v29 = vsub.f32 %v17091_v21, %v8166_v4  ;;  %v8245_v18 = vmul.f32 1.442695, %v8198_v52  ;;  %v17092_v36 = vld [vmem:[#allocation88_spill] sm:$0xff] }
0x1081   :  { %8375 = vperm.xlu1 %9474, %v15338_v26   ;;  %v15366_v31 = vpop.eup %9784  ;;  %9804 = vpow2.f32 %v8227_v60  ;;  %v8214_v34 = vsub.f32 %v17092_v36, %v8166_v4 }
0x1082   :  { %v15368_v12 = vpop.eup %9786  ;;  %9806 = vpow2.f32 %v8229_v13  ;;  %v8275_v5 = vmul.f32 1.442695, %v8213_v29 }
0x1083   :  { %v15376_v24 = vpop.eup %9788  ;;  %9808 = vpow2.f32 %v8231_v19  ;;  %v8277_v7 = vmul.f32 1.442695, %v8214_v34 }
0x1084   :  { %8378 = vperm.xlu0 %9475, %v15346_v50   ;;  %v15378_v11 = vpop.eup %9790  ;;  %9810 = vpow2.f32 %v8233_v43 }
0x1085   :  { %8381 = vperm.xlu1 %9474, %v15348_v3   ;;  %v15386_v55 = vpop.eup %9792  ;;  %9812 = vpow2.f32 %v8235_v61 }
0x1086   :  { %v15388_v28 = vpop.eup %9794  ;;  %9814 = vpow2.f32 %v8237_v39 }
0x1087   :  { %v15396_v22 = vpop.eup %9796  ;;  %9816 = vpow2.f32 %v8239_v56 }
0x1088   :  { %8384 = vperm.xlu0 %9475, %v15356_v54   ;;  %v15398_v17 = vpop.eup %9798  ;;  %9818 = vpow2.f32 %v8241_v2 }
0x1089   :  { %8387 = vperm.xlu1 %9474, %v15358_v44   ;;  %v15406_v14 = vpop.eup %9800  ;;  %9820 = vpow2.f32 %v8243_v9 }
0x108a   :  { %17086 = vst [vmem:[#allocation167_spill] sm:$0xff] %v15406_v14  ;;  %v15408_v49 = vpop.eup %9802  ;;  %9822 = vpow2.f32 %v8245_v18 }
0x108b   :  { %v15416_v8 = vpop.eup %9804  ;;  %9824 = vpow2.f32 %v8275_v5 }
0x108c   :  { %8390 = vperm.xlu0 %9475, %v15366_v31   ;;  %17089 = vst [vmem:[#allocation93_spill] sm:$0xff] %v15416_v8  ;;  %v15418_v46 = vpop.eup %9806  ;;  %9826 = vpow2.f32 %v8277_v7 }
0x108d   :  { %8393 = vperm.xlu1 %9474, %v15368_v12   ;;  %17090 = vst [vmem:[#allocation189_spill] sm:$0xff] %v15418_v46  ;;  %v15424_v48 = vpop.eup %9808 }
0x108e   :  { %17093 = vst [vmem:[#allocation111_spill] sm:$0xff] %v15424_v48  ;;  %v15426_v60 = vpop.eup %9810 }
0x108f   :  { %17094 = vst [vmem:[#allocation116_spill] sm:$0xff] %v15426_v60  ;;  %v15430_v13 = vpop.eup %9812 }
0x1090   :  { %8396 = vperm.xlu0 %9475, %v15376_v24   ;;  %17095 = vst [vmem:[#allocation147_spill] sm:$0xff] %v15430_v13  ;;  %v15432_v27 = vpop.eup %9814 }
0x1091   :  { %8399 = vperm.xlu1 %9474, %v15378_v11   ;;  %17096 = vst [vmem:[#allocation182_spill] sm:$0xff] %v15432_v27  ;;  %v15436_v15 = vpop.eup %9816 }
0x1092   :  { %17097 = vst [vmem:[#allocation113_spill] sm:$0xff] %v15436_v15  ;;  %v15438_v30 = vpop.eup %9818 }
0x1093   :  { %17098 = vst [vmem:[#allocation89_spill] sm:$0xff] %v15438_v30  ;;  %v15442_v19 = vpop.eup %9820 }
0x1094   :  { %8312 = vperm.xlu0 %9475, %v15386_v55   ;;  %17099 = vst [vmem:[#allocation106_spill] sm:$0xff] %v15442_v19  ;;  %v15444_v53 = vpop.eup %9822 }
0x1095   :  { %8315 = vperm.xlu1 %9474, %v15388_v28   ;;  %17100 = vst [vmem:[#allocation169_spill] sm:$0xff] %v15444_v53  ;;  %v15448_v38 = vpop.eup %9824 }
0x1096   :  { %17101 = vst [vmem:[#allocation149_spill] sm:$0xff] %v15448_v38  ;;  %v15450_v43 = vpop.eup %9826 }
0x1097   :  { %17102 = vst [vmem:[#allocation90_spill] sm:$0xff] %v15450_v43 }
0x1098   :  { %8318 = vperm.xlu0 %9475, %v15396_v22  }
0x1099   :  { %8321 = vperm.xlu1 %9474, %v15398_v17  }
0x109c   :  { %8324 = vperm.xlu0 %9475, %v15406_v14  }
0x109d   :  { %8327 = vperm.xlu1 %9474, %v15408_v49  }
0x10a0   :  { %8330 = vperm.xlu0 %9475, %v15416_v8  }
0x10a1   :  { %8333 = vperm.xlu1 %9474, %v15418_v46  }
0x10a4   :  { %8336 = vperm.xlu0 %9475, %v15424_v48  }
0x10a5   :  { %8339 = vperm.xlu1 %9474, %v15426_v60  }
0x10a8   :  { %8342 = vperm.xlu0 %9475, %v15430_v13  }
0x10a9   :  { %8345 = vperm.xlu1 %9474, %v15432_v27  }
0x10ac   :  { %8348 = vperm.xlu0 %9475, %v15436_v15  }
0x10ad   :  { %8351 = vperm.xlu1 %9474, %v15438_v30  }
0x10b0   :  { %8354 = vperm.xlu0 %9475, %v15442_v19  }
0x10b1   :  { %8357 = vperm.xlu1 %9474, %v15444_v53  }
0x10b4   :  { %8402 = vperm.xlu0 %9475, %v15448_v38  }
0x10b5   :  { %8405 = vperm.xlu1 %9474, %v15450_v43  }
0x10f7   :  { %v15454_v58 = vpop.permute.xlu0 %8360 }
0x10f8   :  { %v15456_v47 = vpop.permute.xlu1 %8363  ;;  %v8482_v48 = vrot.slane %v15454_v58, %v11904_v51 }
0x10fb   :  { %v8367_v42 = vpop.permute.xlu0 %8366 }
0x10fc   :  { %v8370_v61 = vpop.permute.xlu1 %8369  ;;  %v8491_v53 = vrot.slane %v8367_v42, %v11904_v51 }
0x10fd   :  { %v8495_v19 = vrot.slane %v8370_v61, %v11907_v25 }
0x10ff   :  { %v8373_v45 = vpop.permute.xlu0 %8372 }
0x1100   :  { %v8376_v20 = vpop.permute.xlu1 %8375  ;;  %v8500_v15 = vrot.slane %v8373_v45, %v11904_v51 }
0x1101   :  { %v8504_v57 = vrot.slane %v8376_v20, %v11907_v25 }
0x1103   :  { %v15458_v39 = vpop.permute.xlu0 %8378 }
0x1104   :  { %v15460_v59 = vpop.permute.xlu1 %8381 }
0x1107   :  { %v15462_v0 = vpop.permute.xlu0 %8384 }
0x1108   :  { %v15464_v56 = vpop.permute.xlu1 %8387 }
0x110b   :  { %v15466_v4 = vpop.permute.xlu0 %8390 }
0x110c   :  { %v15468_v1 = vpop.permute.xlu1 %8393 }
0x110f   :  { %v15470_v52 = vpop.permute.xlu0 %8396 }
0x1110   :  { %v15472_v2 = vpop.permute.xlu1 %8399 }
0x1113   :  { %v8313_v9 = vpop.permute.xlu0 %8312 }
0x1114   :  { %v8316_v21 = vpop.permute.xlu1 %8315  ;;  %v8410_v42 = vrot.slane %v8313_v9, %v11904_v51 }
0x1115   :  { %v8414_v61 = vrot.slane %v8316_v21, %v11907_v25 }
0x1117   :  { %v8319_v29 = vpop.permute.xlu0 %8318 }
0x1118   :  { %v8322_v18 = vpop.permute.xlu1 %8321  ;;  %v8419_v13 = vrot.slane %v8319_v29, %v11904_v51  ;;  %v8486_v29 = vrot.slane %v15456_v47, %v11907_v25  ;;  %v8509_v47 = vrot.slane %v15458_v39, %v11904_v51  ;;  %v8536_v39 = vrot.slane %v15470_v52, %v11904_v51 }
0x1119   :  { %v8423_v30 = vrot.slane %v8322_v18, %v11907_v25  ;;  %v8496_v18 = vsel %vm1563_vm4, %v8495_v19, %v8491_v53 }
0x111b   :  { %v8325_v36 = vpop.permute.xlu0 %8324  ;;  %v8424_v14 = vsel %vm1563_vm4, %v8423_v30, %v8419_v13  ;;  %v8415_v13 = vsel %vm1563_vm4, %v8414_v61, %v8410_v42  ;;  %v8527_v30 = vrot.slane %v15466_v4, %v11904_v51 }
0x111c   :  { %v8328_v34 = vpop.permute.xlu1 %8327  ;;  %v8428_v8 = vrot.slane %v8325_v36, %v11904_v51  ;;  %v8505_v36 = vsel %vm1563_vm4, %v8504_v57, %v8500_v15  ;;  %v8518_v57 = vrot.slane %v15462_v0, %v11904_v51  ;;  %v8522_v15 = vrot.slane %v15464_v56, %v11907_v25 }
0x111d   :  { %v8432_v60 = vrot.slane %v8328_v34, %v11907_v25  ;;  %v8540_v56 = vrot.slane %v15472_v2, %v11907_v25 }
0x111f   :  { %v8331_v5 = vpop.permute.xlu0 %8330  ;;  %v8433_v19 = vsel %vm1563_vm4, %v8432_v60, %v8428_v8  ;;  %v8551_v8 = vsel %vm1700_vm5, %v8424_v14, %v8415_v13 }
0x1120   :  { %v8334_v7 = vpop.permute.xlu1 %8333  ;;  %v8437_v45 = vrot.slane %v8331_v5, %v11904_v51  ;;  %v8513_v5 = vrot.slane %v15460_v59, %v11907_v25  ;;  %v8552_v59 = vsel %vm1702_vm6, %v8433_v19, %v8551_v8 }
0x1121   :  { %v8441_v20 = vrot.slane %v8334_v7, %v11907_v25 }
0x1123   :  { %v8337_v38 = vpop.permute.xlu0 %8336 }
0x1124   :  { %v8340_v43 = vpop.permute.xlu1 %8339  ;;  %v8446_v34 = vrot.slane %v8337_v38, %v11904_v51 }
0x1125   :  { %v8450_v58 = vrot.slane %v8340_v43, %v11907_v25  ;;  %v8531_v43 = vrot.slane %v15468_v1, %v11907_v25  ;;  %v8487_v1 = vsel %vm1563_vm4, %v8486_v29, %v8482_v48 }
0x1127   :  { %v8343_v27 = vpop.permute.xlu0 %8342  ;;  %v8451_v60 = vsel %vm1563_vm4, %v8450_v58, %v8446_v34  ;;  %v8558_v34 = vsel %vm1700_vm5, %v8496_v18, %v8487_v1 }
0x1128   :  { %v8346_v46 = vpop.permute.xlu1 %8345  ;;  %v8455_v9 = vrot.slane %v8343_v27, %v11904_v51 }
0x1129   :  { %v8459_v21 = vrot.slane %v8346_v46, %v11907_v25  ;;  %v8442_v46 = vsel %vm1563_vm4, %v8441_v20, %v8437_v45  ;;  %v8514_v45 = vsel %vm1563_vm4, %v8513_v5, %v8509_v47  ;;  %v8541_v5 = vsel %vm1563_vm4, %v8540_v56, %v8536_v39 }
0x112a   :  { %v8553_v4 = vsel %vm1704_vm7, %v8442_v46, %v8552_v59 }
0x112b   :  { %v8349_v7 = vpop.permute.xlu0 %8348  ;;  %v8460_v0 = vsel %vm1563_vm4, %v8459_v21, %v8455_v9  ;;  %v8554_v52 = vsel %vm1706_vm8, %v8451_v60, %v8553_v4  ;;  %v8523_v21 = vsel %vm1563_vm4, %v8522_v15, %v8518_v57  ;;  %v8559_v9 = vsel %vm1702_vm6, %v8505_v36, %v8558_v34 }
0x112c   :  { %v8352_v53 = vpop.permute.xlu1 %8351  ;;  %v8464_v38 = vrot.slane %v8349_v7, %v11904_v51  ;;  %v8555_v2 = vsel %vm1708_vm9, %v8460_v0, %v8554_v52  ;;  %v8532_v7 = vsel %vm1563_vm4, %v8531_v43, %v8527_v30  ;;  %v8560_v29 = vsel %vm1704_vm7, %v8514_v45, %v8559_v9 }
0x112d   :  { %v8468_v27 = vrot.slane %v8352_v53, %v11907_v25  ;;  %v8561_v57 = vsel %vm1706_vm8, %v8523_v21, %v8560_v29 }
0x112e   :  { %v8562_v46 = vsel %vm1708_vm9, %v8532_v7, %v8561_v57  ;;  %v17110_v57 = vld [vmem:[#allocation89_spill] sm:$0xff] }
0x112f   :  { %v8355_v61 = vpop.permute.xlu0 %8354  ;;  %v8469_v14 = vsel %vm1563_vm4, %v8468_v27, %v8464_v38  ;;  %v8563_v15 = vsel %vm1710_vm10, %v8541_v5, %v8562_v46  ;;  %v17108_v5 = vld [vmem:[#allocation182_spill] sm:$0xff]  ;;  %v17112_v46 = vld [vmem:[#allocation11_spill] sm:$0xff] }
0x1130   :  { %v8358_v42 = vpop.permute.xlu1 %8357  ;;  %v8473_v20 = vrot.slane %v8355_v61, %v11904_v51  ;;  %v8556_v48 = vsel %vm1710_vm10, %v8469_v14, %v8555_v2 }
0x1131   :  { %v8477_v58 = vrot.slane %v8358_v42, %v11907_v25 }
0x1133   :  { %v8403_v19 = vpop.permute.xlu0 %8402  ;;  %v8478_v53 = vsel %vm1563_vm4, %v8477_v58, %v8473_v20 }
0x1134   :  { %v8406_v47 = vpop.permute.xlu1 %8405  ;;  %v8545_v18 = vrot.slane %v8403_v19, %v11904_v51  ;;  %v8557_v38 = vsel %vm1712_vm11, %v8478_v53, %v8556_v48  ;;  %v17105_v19 = vld [vmem:[#allocation93_spill] sm:$0xff]  ;;  %v17107_v48 = vld [vmem:[#allocation111_spill] sm:$0xff] }
0x1135   :  { %v8549_v36 = vrot.slane %v8406_v47, %v11907_v25  ;;  %v8567_v13 = vsel %vm1723_vm12, %v8557_v38, 0.0  ;;  %v17109_v47 = vld [vmem:[#allocation147_spill] sm:$0xff] }
0x1136   :  { %8568 = vadd.xlane.f32.xlu0 %v8567_v13 }
0x1137   :  { %v8550_v27 = vsel %vm1563_vm4, %v8549_v36, %v8545_v18  ;;  %v17111_v36 = vld [vmem:[#allocation113_spill] sm:$0xff] }
0x1138   :  { %v8564_v30 = vsel %vm1712_vm11, %v8550_v27, %v8563_v15  ;;  %v17113_v15 = vld [vmem:[#allocation169_spill] sm:$0xff] }
0x1139   :  { %v8570_v8 = vsel %vm1723_vm12, %v8564_v30, 0.0  ;;  %v17114_v30 = vld [vmem:[#allocation106_spill] sm:$0xff] }
0x113a   :  { %8571 = vadd.xlane.f32.xlu1 %v8570_v8 }
0x11c3   :  { %v8569_v42 = vpop.xlane.xlu0 %8568 }
0x11c7   :  { %v8572_v60 = vpop.xlane.xlu1 %8571 }
0x11c8   :  { %9828 = vrcp.f32 %v8572_v60 }
0x11c9   :  { %9830 = vrcp.f32 %v8569_v42 }
0x11d2   :  { %v15548_v43 = vpop.eup %9828 }
0x11d3   :  { %v8612_v39 = vrot.slane %v15548_v43, %v17001_v41  ;;  %v8616_v61 = vrot.slane %v15548_v43, %v17075_v35  ;;  %v8620_v14 = vrot.slane %v15548_v43, %v16993_v62  ;;  %v8628_v1 = vrot.slane %v15548_v43, %v17077_v16  ;;  %v9831_v58 = vpop.eup %9830 }
0x11d4   :  { %v8604_v38 = vrot.slane %v9831_v58, %v17079_v10  ;;  %v8608_v27 = vrot.slane %v9831_v58, %v17112_v46  ;;  %v8640_v60 = vrot.slane %v15548_v43, %v17112_v46 }
0x11d5   :  { %v8674_v59 = vmul.f32 %v15316_v40, %v8612_v39  ;;  %v8673_v0 = vmul.f32 %v15314_v32, %v8612_v39  ;;  %v8676_v56 = vmul.f32 %v15328_v33, %v8616_v61  ;;  %v8675_v4 = vmul.f32 %v15326_v63, %v8616_v61  ;;  %v17117_v61 = vld [vmem:[#allocation105_spill] sm:$0xff] }
0x11d6   :  { %v8678_v20 = vmul.f32 %v15338_v26, %v8620_v14  ;;  %v8677_v40 = vmul.f32 %v15336_v23, %v8620_v14  ;;  %v8624_v32 = vrot.slane %v15548_v43, %v17076_v6  ;;  %v8682_v45 = vmul.f32 %v15358_v44, %v8628_v1 }
0x11d7   :  { %8773 = vperm.xlu1 %9474, %v8674_v59   ;;  %8770 = vperm.xlu0 %9475, %v8673_v0   ;;  %v8681_v26 = vmul.f32 %v15356_v54, %v8628_v1  ;;  %v8632_v23 = vrot.slane %v15548_v43, %v17078_v37  ;;  %v8580_v54 = vrot.slane %v9831_v58, %v17001_v41  ;;  %v17116_v59 = vld [vmem:[#allocation149_spill] sm:$0xff] }
0x11d8   :  { %v8680_v33 = vmul.f32 %v15348_v3, %v8624_v32  ;;  %v8679_v63 = vmul.f32 %v15346_v50, %v8624_v32  ;;  %v8636_v50 = vrot.slane %v15548_v43, %v17079_v10  ;;  %v8669_v13 = vmul.f32 %v17111_v36, %v8604_v38  ;;  %v17115_v10 = vld [vmem:[#allocation90_spill] sm:$0xff] }
0x11d9   :  { %v8684_v52 = vmul.f32 %v15368_v12, %v8632_v23  ;;  %v8683_v3 = vmul.f32 %v15366_v31, %v8632_v23  ;;  %v8658_v21 = vmul.f32 %v15388_v28, %v8580_v54  ;;  %v8657_v12 = vmul.f32 %v15386_v55, %v8580_v54  ;;  %v17104_v55 = vld [vmem:[#allocation189_spill] sm:$0xff] }
0x11da   :  { %v8686_v34 = vmul.f32 %v15378_v11, %v8636_v50  ;;  %v8685_v44 = vmul.f32 %v15376_v24, %v8636_v50  ;;  %v8584_v31 = vrot.slane %v9831_v58, %v17075_v35  ;;  %v8588_v11 = vrot.slane %v9831_v58, %v16993_v62  ;;  %v17103_v24 = vld [vmem:[#allocation167_spill] sm:$0xff] }
0x11db   :  { %8779 = vperm.xlu1 %9474, %v8676_v56   ;;  %8776 = vperm.xlu0 %9475, %v8675_v4   ;;  %v8592_v28 = vrot.slane %v9831_v58, %v17076_v6  ;;  %v8671_v8 = vmul.f32 %v17114_v30, %v8608_v27  ;;  %v8688_v39 = vmul.f32 %v17115_v10, %v8640_v60  ;;  %v17118_v56 = vld [vmem:[#allocation135_spill] sm:$0xff] }
0x11dc   :  { %v8660_v2 = vmul.f32 %v15398_v17, %v8584_v31  ;;  %v8659_v9 = vmul.f32 %v15396_v22, %v8584_v31  ;;  %v8662_v41 = vmul.f32 %v15408_v49, %v8588_v11  ;;  %v8661_v7 = vmul.f32 %v17103_v24, %v8588_v11  ;;  %v17106_v22 = vld [vmem:[#allocation116_spill] sm:$0xff] }
0x11dd   :  { %v8664_v35 = vmul.f32 %v17104_v55, %v8592_v28  ;;  %v8663_v53 = vmul.f32 %v17105_v19, %v8592_v28  ;;  %v8596_v17 = vrot.slane %v9831_v58, %v17077_v16  ;;  %v8600_v49 = vrot.slane %v9831_v58, %v17078_v37 }
0x11de   :  { %v8670_v16 = vmul.f32 %v17110_v57, %v8604_v38  ;;  %v8672_v37 = vmul.f32 %v17113_v15, %v8608_v27  ;;  %v8687_v0 = vmul.f32 %v17116_v59, %v8640_v60 }
0x11df   :  { %8785 = vperm.xlu1 %9474, %v8678_v20   ;;  %8782 = vperm.xlu0 %9475, %v8677_v40   ;;  %v8666_v62 = vmul.f32 %v17106_v22, %v8596_v17  ;;  %v8665_v29 = vmul.f32 %v17107_v48, %v8596_v17  ;;  %v8668_v6 = vmul.f32 %v17108_v5, %v8600_v49 }
0x11e0   :  { %v8667_v18 = vmul.f32 %v17109_v47, %v8600_v49 }
0x11e3   :  { %8791 = vperm.xlu1 %9474, %v8680_v33   ;;  %8788 = vperm.xlu0 %9475, %v8679_v63  }
0x11e7   :  { %8797 = vperm.xlu1 %9474, %v8682_v45   ;;  %8794 = vperm.xlu0 %9475, %v8681_v26  }
0x11eb   :  { %8803 = vperm.xlu1 %9474, %v8684_v52   ;;  %8800 = vperm.xlu0 %9475, %v8683_v3  }
0x11ef   :  { %8809 = vperm.xlu1 %9474, %v8686_v34   ;;  %8806 = vperm.xlu0 %9475, %v8685_v44  }
0x11f3   :  { %8725 = vperm.xlu1 %9474, %v8658_v21   ;;  %8722 = vperm.xlu0 %9475, %v8657_v12  }
0x11f7   :  { %8731 = vperm.xlu1 %9474, %v8660_v2   ;;  %8728 = vperm.xlu0 %9475, %v8659_v9  }
0x11fb   :  { %8737 = vperm.xlu1 %9474, %v8662_v41   ;;  %8734 = vperm.xlu0 %9475, %v8661_v7  }
0x11ff   :  { %8743 = vperm.xlu1 %9474, %v8664_v35   ;;  %8740 = vperm.xlu0 %9475, %v8663_v53  }
0x1203   :  { %8749 = vperm.xlu1 %9474, %v8666_v62   ;;  %8746 = vperm.xlu0 %9475, %v8665_v29  }
0x1207   :  { %8755 = vperm.xlu1 %9474, %v8668_v6   ;;  %8752 = vperm.xlu0 %9475, %v8667_v18  }
0x120b   :  { %8761 = vperm.xlu1 %9474, %v8670_v16   ;;  %8758 = vperm.xlu0 %9475, %v8669_v13  }
0x120f   :  { %8767 = vperm.xlu1 %9474, %v8672_v37   ;;  %8764 = vperm.xlu0 %9475, %v8671_v8  }
0x1213   :  { %8815 = vperm.xlu1 %9474, %v8688_v39   ;;  %8812 = vperm.xlu0 %9475, %v8687_v0  }
0x1217   :  { %8977 = vrot.lane.b32.xlu1 %v17117_v61, %s9836_s28  ;;  %8975 = vrot.lane.b32.xlu0 %v17118_v56, %s9836_s28 }
0x1256   :  { %v8774_v4 = vpop.permute.xlu1 %8773  ;;  %v8771_v14 = vpop.permute.xlu0 %8770 }
0x1257   :  { %v8896_v9 = vrot.slane %v8774_v4, %v11907_v25  ;;  %v8892_v11 = vrot.slane %v8771_v14, %v11904_v51 }
0x1259   :  { %v8897_v5 = vsel %vm1563_vm4, %v8896_v9, %v8892_v11 }
0x125a   :  { %v8780_v42 = vpop.permute.xlu1 %8779  ;;  %v8777_v20 = vpop.permute.xlu0 %8776 }
0x125b   :  { %v8905_v41 = vrot.slane %v8780_v42, %v11907_v25  ;;  %v8901_v24 = vrot.slane %v8777_v20, %v11904_v51 }
0x125d   :  { %v8906_v18 = vsel %vm1563_vm4, %v8905_v41, %v8901_v24 }
0x125e   :  { %v8786_v40 = vpop.permute.xlu1 %8785  ;;  %v8783_v43 = vpop.permute.xlu0 %8782 }
0x125f   :  { %v8914_v55 = vrot.slane %v8786_v40, %v11907_v25  ;;  %v8910_v35 = vrot.slane %v8783_v43, %v11904_v51 }
0x1261   :  { %v8915_v36 = vsel %vm1563_vm4, %v8914_v55, %v8910_v35 }
0x1262   :  { %v15610_v32 = vpop.permute.xlu1 %8791  ;;  %v15612_v33 = vpop.permute.xlu0 %8788 }
0x1263   :  { %v8923_v13 = vrot.slane %v15610_v32, %v11907_v25  ;;  %v8919_v46 = vrot.slane %v15612_v33, %v11904_v51 }
0x1266   :  { %v15614_v63 = vpop.permute.xlu1 %8797  ;;  %v15616_v1 = vpop.permute.xlu0 %8794 }
0x1267   :  { %v8932_v39 = vrot.slane %v15614_v63, %v11907_v25  ;;  %v8928_v59 = vrot.slane %v15616_v1, %v11904_v51  ;;  %v8924_v1 = vsel %vm1563_vm4, %v8923_v13, %v8919_v46 }
0x126a   :  { %v15618_v45 = vpop.permute.xlu1 %8803  ;;  %v15620_v26 = vpop.permute.xlu0 %8800 }
0x126b   :  { %v8941_v56 = vrot.slane %v15618_v45, %v11907_v25  ;;  %v8937_v4 = vrot.slane %v15620_v26, %v11904_v51 }
0x126e   :  { %v15622_v23 = vpop.permute.xlu1 %8809  ;;  %v15624_v52 = vpop.permute.xlu0 %8806 }
0x126f   :  { %v8950_v20 = vrot.slane %v15622_v23, %v11907_v25  ;;  %v8946_v40 = vrot.slane %v15624_v52, %v11904_v51  ;;  %v8933_v23 = vsel %vm1563_vm4, %v8932_v39, %v8928_v59 }
0x1272   :  { %v8726_v3 = vpop.permute.xlu1 %8725  ;;  %v8723_v50 = vpop.permute.xlu0 %8722 }
0x1273   :  { %v8824_v62 = vrot.slane %v8726_v3, %v11907_v25  ;;  %v8820_v48 = vrot.slane %v8723_v50, %v11904_v51  ;;  %v8968_v50 = vsel %vm1700_vm5, %v8906_v18, %v8897_v5  ;;  %v9236_v18 = vld [vmem:[%s15744_s15] ss:$0 sm:$0xff] }
0x1275   :  { %v8825_v30 = vsel %vm1563_vm4, %v8824_v62, %v8820_v48  ;;  %v23_v62 = vstv %s15742_s17 }
0x1276   :  { %v8732_v58 = vpop.permute.xlu1 %8731  ;;  %v8729_v34 = vpop.permute.xlu0 %8728  ;;  %24 = vst [vmem:[#allocation2] sm:$0x1] %v23_v62 }
0x1277   :  { %v8833_v7 = vrot.slane %v8732_v58, %v11907_v25  ;;  %v8829_v28 = vrot.slane %v8729_v34, %v11904_v51  ;;  %v8969_v58 = vsel %vm1702_vm6, %v8915_v36, %v8968_v50  ;;  %v8942_v34 = vsel %vm1563_vm4, %v8941_v56, %v8937_v4 }
0x1279   :  { %v8834_v38 = vsel %vm1563_vm4, %v8833_v7, %v8829_v28 }
0x127a   :  { %v8738_v44 = vpop.permute.xlu1 %8737  ;;  %v8735_v54 = vpop.permute.xlu0 %8734  ;;  %v8961_v0 = vsel %vm1700_vm5, %v8834_v38, %v8825_v30 }
0x127b   :  { %v8842_v19 = vrot.slane %v8738_v44, %v11907_v25  ;;  %v8838_v53 = vrot.slane %v8735_v54, %v11904_v51 }
0x127d   :  { %v8843_v27 = vsel %vm1563_vm4, %v8842_v19, %v8838_v53  ;;  %v9080_v19 = vld [vmem:[%s15741_s16] sm:$0xff] }
0x127e   :  { %v8744_v21 = vpop.permute.xlu1 %8743  ;;  %v8741_v12 = vpop.permute.xlu0 %8740  ;;  %v8962_v14 = vsel %vm1702_vm6, %v8843_v27, %v8961_v0 }
0x127f   :  { %v8851_v29 = vrot.slane %v8744_v21, %v11907_v25  ;;  %v8847_v49 = vrot.slane %v8741_v12, %v11904_v51  ;;  %v8970_v21 = vsel %vm1704_vm7, %v8924_v1, %v8969_v58  ;;  %v8951_v12 = vsel %vm1563_vm4, %v8950_v20, %v8946_v40 }
0x1280   :  { %v8971_v11 = vsel %vm1706_vm8, %v8933_v23, %v8970_v21 }
0x1281   :  { %v8852_v8 = vsel %vm1563_vm4, %v8851_v29, %v8847_v49  ;;  %v8972_v7 = vsel %vm1708_vm9, %v8942_v34, %v8971_v11  ;;  %v9235_v49 = vld [vmem:[%s15743_s14] ss:$0 sm:$0xff] }
0x1282   :  { %v8750_v31 = vpop.permute.xlu1 %8749  ;;  %v8747_v2 = vpop.permute.xlu0 %8746  ;;  %v8963_v43 = vsel %vm1704_vm7, %v8852_v8, %v8962_v14  ;;  %v8973_v28 = vsel %vm1710_vm10, %v8951_v12, %v8972_v7 }
0x1283   :  { %v8860_v6 = vrot.slane %v8750_v31, %v11907_v25  ;;  %v8856_v47 = vrot.slane %v8747_v2, %v11904_v51 }
0x1285   :  { %v8861_v61 = vsel %vm1563_vm4, %v8860_v6, %v8856_v47 }
0x1286   :  { %v8756_v17 = vpop.permute.xlu1 %8755  ;;  %v8753_v22 = vpop.permute.xlu0 %8752  ;;  %v8964_v45 = vsel %vm1706_vm8, %v8861_v61, %v8963_v43 }
0x1287   :  { %v8869_v57 = vrot.slane %v8756_v17, %v11907_v25  ;;  %v8865_v16 = vrot.slane %v8753_v22, %v11904_v51  ;;  %v9083_v17 = vld [vmem:[%s15741_s16 + $0x18] sm:$0xff] }
0x1289   :  { %v8870_v42 = vsel %vm1563_vm4, %v8869_v57, %v8865_v16 }
0x128a   :  { %v8762_v15 = vpop.permute.xlu1 %8761  ;;  %v8759_v37 = vpop.permute.xlu0 %8758  ;;  %v8965_v52 = vsel %vm1708_vm9, %v8870_v42, %v8964_v45 }
0x128b   :  { %v8878_v60 = vrot.slane %v8762_v15, %v11907_v25  ;;  %v8874_v10 = vrot.slane %v8759_v37, %v11904_v51  ;;  %v9237_v15 = vld [vmem:[#allocation2] ss:$0 sm:$0xff] }
0x128d   :  { %v8879_v32 = vsel %vm1563_vm4, %v8878_v60, %v8874_v10 }
0x128e   :  { %v8768_v33 = vpop.permute.xlu1 %8767  ;;  %v8765_v63 = vpop.permute.xlu0 %8764  ;;  %v8966_v54 = vsel %vm1710_vm10, %v8879_v32, %v8965_v52 }
0x128f   :  { %v8887_v26 = vrot.slane %v8768_v33, %v11907_v25  ;;  %v8883_v3 = vrot.slane %v8765_v63, %v11904_v51 }
0x1291   :  { %v8888_v44 = vsel %vm1563_vm4, %v8887_v26, %v8883_v3 }
0x1292   :  { %v8816_v31 = vpop.permute.xlu1 %8815  ;;  %v8813_v2 = vpop.permute.xlu0 %8812  ;;  %v8967_v9 = vsel %vm1712_vm11, %v8888_v44, %v8966_v54 }
0x1293   :  { %v8959_v41 = vrot.slane %v8816_v31, %v11907_v25  ;;  %v8955_v24 = vrot.slane %v8813_v2, %v11904_v51  ;;  %9376 = vmatprep.mubr.msk.f32.mxu1 %vm1723_vm12, %v8967_v9  ;;  %v9081_v51 = vld [vmem:[%s15741_s16 + $0x8] sm:$0xff]  ;;  %v9082_v25 = vld [vmem:[%s15741_s16 + $0x10] sm:$0xff] }
0x1294   :  { %v9458_v53 = vpack.c.bf16 %v9081_v51, %v9080_v19  ;;  %v9462_v22 = vpack.c.bf16 %v9083_v17, %v9082_v25 }
0x1295   :  { %v8960_v55 = vsel %vm1563_vm4, %v8959_v41, %v8955_v24 }
0x1296   :  { %v8974_v35 = vsel %vm1712_vm11, %v8960_v55, %v8973_v28  ;;  %9459 = vmatprep.subr.bf16.mxu1 %v9458_v53  ;;  %v8978_v48 = vpop.permute.xlu1 %8977  ;;  %v8976_v5 = vpop.permute.xlu0 %8975 }
0x1297   :  { %9377 = vmatmul.mubr.msk.f32.vlgmr.msra.gmra.mrb[30].mxu1 %vm1723_vm12, %v8974_v35 }
0x1298   :  { %9461 = vmatpush3.bf16.msra.mxu1 %v9458_v53 }
0x1299   :  { %9463 = vmatprep.subr.bf16.mxu1 %v9462_v22 }
0x129c   :  { %9465 = vmatpush3.bf16.msra.mxu1 %v9462_v22 }
0x136a   :  { %v9378_v29 = vpop.f32.mrb[30].mxu1 }
0x136b   :  { %v9057_v6 = vadd.f32 %v9378_v29, %v8978_v48  ;;  %v9051_v47 = vpop.f32.mrb[31].mxu1 }
0x136c   :  { %v9052_v38 = vadd.f32 %v9051_v47, %v8976_v5 }
0x136d   :  { %v9068_v57 = vmul.f32 %v9235_v49, %v9057_v6 }
0x136e   :  { %v9067_v16 = vmul.f32 %v9235_v49, %v9052_v38 }
0x136f   :  { %v9077_v36 = vadd.f32 %v9236_v18, %v9068_v57 }
0x1370   :  { %v9076_v13 = vadd.f32 %v9236_v18, %v9067_v16 }
0x1371   :  { %v9079_v27 = vmax.f32 %v9077_v36, 0.0 }
0x1372   :  { %v9078_v46 = vmax.f32 %v9076_v13, 0.0 }
0x1374   :  { %9387 = vmatprep.mubr.msk.f32.mxu1 %vm580_vm3, %v9078_v46 }
0x1375   :  { %9388 = vmatmul.mubr.msk.f32.vlgmr.msra.gmra.mrb[32].mxu1 %vm580_vm3, %v9079_v27 }
0x1448   :  { %v9389_v37 = vpop.f32.mrb[32].mxu1 }
0x1449   :  { %v9169_v30 = vadd.f32 %v9389_v37, %v9237_v15  ;;  %v9163_v8 = vpop.f32.mrb[33].mxu1 }
0x144a   :  { %v9164_v60 = vadd.f32 %v9237_v15, %v9163_v8 }
0x144b   :  { %9174 = vst.msk [vmem:[%s15745_s18 + $0x8] sm:$0xff] %vm9172_vm15, %v9169_v30 }
0x144c   :  { %9173 = vst.msk [vmem:[%s15745_s18] sm:$0xff] %vm9172_vm15, %v9164_v60 }

</bundles_post_ra>
